<compile_context>
chip_gen: v5e
topology: v5e:2x2
jax: 0.10.0
libtpu: 0.0.40
codegen_flags: <defaults>
</compile_context>

<pallas_src>
import jax
import jax.numpy as jnp
from jax.experimental import pallas as pl
from jax.experimental.pallas import tpu as pltpu


# ---------------------------------------------------------------------------
# helpers
# ---------------------------------------------------------------------------
def _round_up(x, m):
    return (x + m - 1) // m * m


def _elu(v):
    # F.elu with alpha=1.0; exp only evaluated on the clamped negative branch.
    return jnp.where(v > 0, v, jnp.exp(jnp.minimum(v, 0.0)) - 1.0)


# ---------------------------------------------------------------------------
# Pallas kernels
# ---------------------------------------------------------------------------
def _conv_pool_kernel(p_ref, w_ref, b_ref, o_ref):
    # p_ref: (Kp, 4*Qp) bf16 — one image's 4 pooling phases concatenated on lanes
    # w_ref: (Cout, Kp) bf16, b_ref: (Cout, 1) f32, o_ref: (Cout, Qp) bf16
    qp = o_ref.shape[-1]
    acc = jnp.dot(w_ref[...], p_ref[...], preferred_element_type=jnp.float32)
    m = jnp.maximum(jnp.maximum(acc[:, 0:qp], acc[:, qp:2 * qp]),
                    jnp.maximum(acc[:, 2 * qp:3 * qp], acc[:, 3 * qp:4 * qp]))
    # ELU/bias commute with the pooling max (ELU monotone), epilogue in f32.
    o_ref[...] = _elu(m + b_ref[...]).astype(o_ref.dtype)


def _fc_head_math(feat_bf16, w1, b1, w2, b2, ws, bs, w3, b3, wa, ba):
    # bf16 MXU operands, f32 accumulation, f32 epilogue.
    h1 = _elu(jnp.dot(feat_bf16, w1[...], preferred_element_type=jnp.float32) + b1[...])
    h1b = h1.astype(jnp.bfloat16)
    s = _elu(jnp.dot(h1b, w2[...], preferred_element_type=jnp.float32) + b2[...])
    s = jnp.dot(s.astype(jnp.bfloat16), ws[...], preferred_element_type=jnp.float32) + bs[...]
    a = _elu(jnp.dot(h1b, w3[...], preferred_element_type=jnp.float32) + b3[...])
    a = jnp.dot(a.astype(jnp.bfloat16), wa[...], preferred_element_type=jnp.float32) + ba[...]
    # matches the reference; numerically fragile when mean(a) is near zero.
    a = a / jnp.mean(a, axis=-1, keepdims=True)
    return s + a


def _tail_kernel(p4_ref, w4_ref, b4_ref, w1, b1, w2, b2, ws, bs, w3, b3, wa, ba,
                 o_ref):
    # conv4: 4 pooling phases stacked along M (rows are phase-major), one dot,
    # then a sublane max -> pooled 1x1 features -> fused FC head.
    nb = p4_ref.shape[0] // 4
    conv = jnp.dot(p4_ref[...], w4_ref[...], preferred_element_type=jnp.float32)  # (4B, 32)
    m = jnp.maximum(jnp.maximum(conv[0:nb], conv[nb:2 * nb]),
                    jnp.maximum(conv[2 * nb:3 * nb], conv[3 * nb:4 * nb]))
    feat = _elu(m + b4_ref[...])                                                   # (B, 32) f32
    o_ref[...] = _fc_head_math(feat.astype(jnp.bfloat16),
                               w1, b1, w2, b2, ws, bs, w3, b3, wa, ba)


def _head_kernel(x_ref, w1, b1, w2, b2, ws, bs, w3, b3, wa, ba, o_ref):
    # fallback FC head (only used when the final pooled spatial size is not 1x1)
    o_ref[...] = _fc_head_math(x_ref[...], w1, b1, w2, b2, ws, bs, w3, b3, wa, ba)


# ---------------------------------------------------------------------------
# XLA glue: bf16 phase-slab im2col (strided slices + concats only)
# ---------------------------------------------------------------------------
def _build_conv_p(x, kp, qp):
    """x: (B, C, H, W) bf16 -> p: (B, kp, 4*qp) bf16 with
       p[b, (i*5+j)*C + c, q*qp + hp*Wp + wp] = x[b, c, 2hp + a + i, 2wp + b01 + j]
       for phase q = 2*a + b01.  K and lane paddings are zero-filled."""
    B, C, H, W = x.shape
    Hp, Wp = (H - 4) // 2, (W - 4) // 2
    Q = Hp * Wp
    # 36 stride-2 "phase slabs":  slab[u][v][b, c, hp, wp] = x[b, c, 2hp+u, 2wp+v]
    slab = [[x[:, :, u:u + 2 * Hp:2, v:v + 2 * Wp:2].reshape(B, C, Q)
             for v in range(6)] for u in range(6)]
    phases = []
    for a in (0, 1):
        for b01 in (0, 1):
            rows = [slab[a + i][b01 + j] for i in range(5) for j in range(5)]
            pq = jnp.concatenate(rows, axis=1)                       # (B, 25C, Q)
            pq = jnp.pad(pq, ((0, 0), (0, kp - 25 * C), (0, qp - Q)))
            phases.append(pq)
    return jnp.concatenate(phases, axis=2), Hp, Wp                   # (B, kp, 4*qp)


# ---------------------------------------------------------------------------
# Pallas-backed stages
# ---------------------------------------------------------------------------
def conv_pool_stage(x, w_oihw, b):
    """Fused Conv2d(5x5, VALID) + bias + ELU + max_pool2d(2,2).
       x: (B, Cin, H, W) bf16 -> (B, Cout, Hp, Wp) bf16."""
    B, Cin, H, W = x.shape
    Cout = w_oihw.shape[0]
    K = 25 * Cin
    Kp = _round_up(K, 16)                          # bf16 sublane packing
    Hp, Wp = (H - 4) // 2, (W - 4) // 2
    Q = Hp * Wp
    Qp = _round_up(Q, 128)                         # 128-aligned phase chunks & stores
    p, _, _ = _build_conv_p(x, Kp, Qp)             # (B, Kp, 4*Qp) bf16

    wt = jnp.transpose(w_oihw, (0, 2, 3, 1)).reshape(Cout, K)        # (o, (i, j, c))
    wt = jnp.pad(wt, ((0, 0), (0, Kp - K))).astype(jnp.bfloat16)
    bias = b.reshape(Cout, 1).astype(jnp.float32)

    out = pl.pallas_call(
        _conv_pool_kernel,
        out_shape=jax.ShapeDtypeStruct((B, Cout, Qp), jnp.bfloat16),
        grid=(B,),                                  # 2-way parallel split for v7x
        in_specs=[pl.BlockSpec((None, Kp, 4 * Qp), lambda bb: (bb, 0, 0)),
                  pl.BlockSpec((Cout, Kp), lambda bb: (0, 0)),
                  pl.BlockSpec((Cout, 1), lambda bb: (0, 0))],
        out_specs=pl.BlockSpec((None, Cout, Qp), lambda bb: (bb, 0, 0)),
        compiler_params=pltpu.CompilerParams(dimension_semantics=("parallel",)),
    )(p, wt, bias)
    return out[:, :, :Q].reshape(B, Cout, Hp, Wp)   # drop lane padding, back to NCHW


def tail_fused(x3, params):
    """conv4 + bias + ELU + pool (to 1x1) + flatten + FC head, one Pallas call."""
    B, C, H, W = x3.shape                           # expects (H-4)//2 == (W-4)//2 == 1
    K = 25 * C
    # conv4 "im2col": the 4 pooling phases are just the 4 5x5 windows.
    phases = [x3[:, :, a:a + 5, b01:b01 + 5].reshape(B, K)
              for a in (0, 1) for b01 in (0, 1)]
    p4 = jnp.stack(phases, axis=0).reshape(4 * B, K)                  # phase-major rows
    w4 = jnp.transpose(params["conv4_w"], (1, 2, 3, 0)).reshape(K, -1).astype(jnp.bfloat16)
    b4 = params["conv4_b"].reshape(1, -1).astype(jnp.float32)
    A = params["wa"].shape[1]
    bf = lambda t: t.astype(jnp.bfloat16)
    return pl.pallas_call(
        _tail_kernel,
        out_shape=jax.ShapeDtypeStruct((B, A), jnp.float32),
    )(p4, w4, b4,
      bf(params["w1"]), params["b1"], bf(params["w2"]), params["b2"],
      bf(params["ws"]), params["bs"], bf(params["w3"]), params["b3"],
      bf(params["wa"]), params["ba"])


def fc_head(flat, params):
    B = flat.shape[0]
    A = params["wa"].shape[1]
    bf = lambda t: t.astype(jnp.bfloat16)
    return pl.pallas_call(
        _head_kernel,
        out_shape=jax.ShapeDtypeStruct((B, A), jnp.float32),
    )(bf(flat), bf(params["w1"]), params["b1"], bf(params["w2"]), params["b2"],
      bf(params["ws"]), params["bs"], bf(params["w3"]), params["b3"],
      bf(params["wa"]), params["ba"])


# ---------------------------------------------------------------------------
# full forward pass
# ---------------------------------------------------------------------------
def banana_pixels_forward(params, state_nchw):
    # NCHW throughout (matches torch's flatten order); bf16 BEFORE the im2col glue.
    x = state_nchw.astype(jnp.bfloat16)
    for name in ("conv1", "conv2", "conv3"):
        x = conv_pool_stage(x, params[name + "_w"], params[name + "_b"])
    Hp, Wp = (x.shape[2] - 4) // 2, (x.shape[3] - 4) // 2
    if Hp == 1 and Wp == 1:
        # common case: conv4 + pool + flatten + head fused in one kernel
        return tail_fused(x, params)
    # fallback: final spatial > 1x1 -> generic conv stage + head-only kernel
    x = conv_pool_stage(x, params["conv4_w"], params["conv4_b"])
    flat = x.reshape(x.shape[0], -1)                 # torch NCHW flatten order
    return fc_head(flat, params)


# ---------------------------------------------------------------------------
# deterministic parameter init (PyTorch-style fan-in uniform, fixed seed)
# ---------------------------------------------------------------------------
def init_params(key, state_size, action_size):
    h, w, c = state_size

    def uniform(k, shape, fan_in):
        bound = 1.0 / (fan_in ** 0.5)
        return jax.random.uniform(k, shape, jnp.float32, -bound, bound)

    keys = iter(jax.random.split(key, 32))
    p = {}
    for name, cin, cout in (("conv1", c, 16), ("conv2", 16, 32),
                            ("conv3", 32, 32), ("conv4", 32, 32)):
        fan = cin * 5 * 5
        p[name + "_w"] = uniform(next(keys), (cout, cin, 5, 5), fan)   # torch OIHW
        p[name + "_b"] = uniform(next(keys), (cout,), fan)

    # actual flattened feature size after the 4x (conv5 VALID + pool 2x2) stages
    sh, sw = h, w
    for _ in range(4):
        sh = (sh - 4) // 2
        sw = (sw - 4) // 2
    flat_dim = sh * sw * 32
    # TODO(synk): the reference __init__ sizes fc1 with (h//16)**2 * 32, which is
    # inconsistent with its own conv/pool output shape for every valid input; we
    # size fc1 from the actual flattened dimension so the forward is well defined.

    def linear(din, dout):
        wmat = uniform(next(keys), (din, dout), din)   # stored as (in, out) for x @ W
        bvec = uniform(next(keys), (1, dout), din)
        return wmat, bvec

    p["w1"], p["b1"] = linear(flat_dim, 32)
    p["w2"], p["b2"] = linear(32, 32)
    p["w3"], p["b3"] = linear(32, 32)
    p["ws"], p["bs"] = linear(32, 1)
    p["wa"], p["ba"] = linear(32, action_size)
    return p


# ---------------------------------------------------------------------------
if __name__ == "__main__":
    key = jax.random.PRNGKey(0)
    state_size = (76, 76, 3)     # (h, w, c); smallest-ish size surviving 4 conv/pool stages
    action_size = 4
    batch = 2

    pkey, xkey = jax.random.split(key)
    params = init_params(pkey, state_size, action_size)

    h, w, c = state_size
    state = jax.random.normal(xkey, (batch, c, h, w), jnp.float32)    # NCHW, like PyTorch

    fwd = jax.jit(banana_pixels_forward)
    out = fwd(params, state)
    out = jax.block_until_ready(out)
    assert out.shape == (batch, action_size)
    assert out.dtype == jnp.float32
    print("KERNEL_OK")
</pallas_src>

<mosaic_0001>
module attributes {stable_mosaic.version = 11 : i64} {
  func.func @_conv_pool_kernel(%arg0: i32, %arg1: memref<1x80x5632xbf16, #tpu.memory_space<vmem>>, %arg2: memref<16x80xbf16, #tpu.memory_space<vmem>>, %arg3: memref<16x1xf32, #tpu.memory_space<vmem>>, %arg4: memref<1x16x1408xbf16, #tpu.memory_space<vmem>>) attributes {dimension_semantics = [#tpu.dimension_semantics<parallel>], iteration_bounds = array<i64: 2>, scalar_prefetch = 0 : i64, scratch_operands = 0 : i64, tpu.core_type = #tpu.core_type<tc>, window_params = [{transform_indices = @transform_0, window_bounds = array<i64: 1, 80, 5632>}, {pipeline_mode = #tpu.pipeline_mode<synchronous>, transform_indices = @transform_1, window_bounds = array<i64: 16, 80>}, {pipeline_mode = #tpu.pipeline_mode<synchronous>, transform_indices = @transform_2, window_bounds = array<i64: 16, 1>}, {transform_indices = @transform_3, window_bounds = array<i64: 1, 16, 1408>}]} {
    %c0 = arith.constant 0 : index
    %c0_0 = arith.constant 0 : index
    %0 = vector.load %arg2[%c0, %c0_0] : memref<16x80xbf16, #tpu.memory_space<vmem>>, vector<16x80xbf16>
    %c0_1 = arith.constant 0 : index
    %c0_2 = arith.constant 0 : index
    %c0_3 = arith.constant 0 : index
    %1 = vector.load %arg1[%c0_1, %c0_2, %c0_3] : memref<1x80x5632xbf16, #tpu.memory_space<vmem>>, vector<1x80x5632xbf16>
    %2 = vector.shape_cast %1 : vector<1x80x5632xbf16> to vector<80x5632xbf16>
    %cst = arith.constant dense<0.000000e+00> : vector<16x5632xf32>
    %3 = tpu.matmul %0, %2, %cst {dimension_numbers = #tpu.dot_dimension_numbers<[1], [0], [0], [1], [0, 0, 1, 1], [], []>} : vector<16x80xbf16>, vector<80x5632xbf16>, vector<16x5632xf32> -> vector<16x5632xf32>
    %4 = vector.extract_strided_slice %3 {offsets = [0, 0], sizes = [16, 1408], strides = [1, 1]} : vector<16x5632xf32> to vector<16x1408xf32>
    %5 = vector.extract_strided_slice %3 {offsets = [0, 1408], sizes = [16, 1408], strides = [1, 1]} : vector<16x5632xf32> to vector<16x1408xf32>
    %6 = arith.maximumf %4, %5 : vector<16x1408xf32>
    %7 = vector.extract_strided_slice %3 {offsets = [0, 2816], sizes = [16, 1408], strides = [1, 1]} : vector<16x5632xf32> to vector<16x1408xf32>
    %8 = vector.extract_strided_slice %3 {offsets = [0, 4224], sizes = [16, 1408], strides = [1, 1]} : vector<16x5632xf32> to vector<16x1408xf32>
    %9 = arith.maximumf %7, %8 : vector<16x1408xf32>
    %10 = arith.maximumf %6, %9 : vector<16x1408xf32>
    %c0_4 = arith.constant 0 : index
    %c0_5 = arith.constant 0 : index
    %11 = vector.load %arg3[%c0_4, %c0_5] : memref<16x1xf32, #tpu.memory_space<vmem>>, vector<16x1xf32>
    %12 = vector.broadcast %11 : vector<16x1xf32> to vector<16x1408xf32>
    %13 = arith.addf %10, %12 : vector<16x1408xf32>
    %cst_6 = arith.constant 0.000000e+00 : f32
    %14 = vector.broadcast %cst_6 : f32 to vector<16x1408xf32>
    %15 = arith.cmpf ogt, %13, %14 : vector<16x1408xf32>
    %cst_7 = arith.constant 0.000000e+00 : f32
    %16 = vector.broadcast %cst_7 : f32 to vector<16x1408xf32>
    %17 = arith.minimumf %13, %16 : vector<16x1408xf32>
    %18 = math.exp %17 : vector<16x1408xf32>
    %cst_8 = arith.constant 1.000000e+00 : f32
    %19 = vector.broadcast %cst_8 : f32 to vector<16x1408xf32>
    %20 = arith.subf %18, %19 : vector<16x1408xf32>
    %21 = arith.select %15, %13, %20 : vector<16x1408xi1>, vector<16x1408xf32>
    %22 = arith.truncf %21 : vector<16x1408xf32> to vector<16x1408xbf16>
    %c0_9 = arith.constant 0 : index
    %c0_10 = arith.constant 0 : index
    %c0_11 = arith.constant 0 : index
    %23 = vector.load %arg4[%c0_9, %c0_10, %c0_11] : memref<1x16x1408xbf16, #tpu.memory_space<vmem>>, vector<1x16x1408xbf16>
    %24 = vector.shape_cast %23 : vector<1x16x1408xbf16> to vector<16x1408xbf16>
    %25 = vector.shape_cast %22 : vector<16x1408xbf16> to vector<1x16x1408xbf16>
    tpu.vector_store %arg4[%c0_9, %c0_10, %c0_11], %25 {strides = array<i32>} : memref<1x16x1408xbf16, #tpu.memory_space<vmem>>, vector<1x16x1408xbf16>,
    return
  }
  func.func @transform_0(%arg0: i32) -> (i32, i32, i32) {
    %c0_i32 = arith.constant 0 : i32
    %c0_i32_0 = arith.constant 0 : i32
    %c0_i32_1 = arith.constant 0 : i32
    return %arg0, %c0_i32, %c0_i32_0 : i32, i32, i32
  }
  func.func @transform_1(%arg0: i32) -> (i32, i32) {
    %c0_i32 = arith.constant 0 : i32
    %c0_i32_0 = arith.constant 0 : i32
    %c0_i32_1 = arith.constant 0 : i32
    return %c0_i32, %c0_i32_0 : i32, i32
  }
  func.func @transform_2(%arg0: i32) -> (i32, i32) {
    %c0_i32 = arith.constant 0 : i32
    %c0_i32_0 = arith.constant 0 : i32
    %c0_i32_1 = arith.constant 0 : i32
    return %c0_i32, %c0_i32_0 : i32, i32
  }
  func.func @transform_3(%arg0: i32) -> (i32, i32, i32) {
    %c0_i32 = arith.constant 0 : i32
    %c0_i32_0 = arith.constant 0 : i32
    %c0_i32_1 = arith.constant 0 : i32
    return %arg0, %c0_i32, %c0_i32_0 : i32, i32, i32
  }
}

module attributes {stable_mosaic.version = 11 : i64} {
  func.func @_conv_pool_kernel(%arg0: i32, %arg1: memref<1x400x1024xbf16, #tpu.memory_space<vmem>>, %arg2: memref<32x400xbf16, #tpu.memory_space<vmem>>, %arg3: memref<32x1xf32, #tpu.memory_space<vmem>>, %arg4: memref<1x32x256xbf16, #tpu.memory_space<vmem>>) attributes {dimension_semantics = [#tpu.dimension_semantics<parallel>], iteration_bounds = array<i64: 2>, scalar_prefetch = 0 : i64, scratch_operands = 0 : i64, tpu.core_type = #tpu.core_type<tc>, window_params = [{transform_indices = @transform_0, window_bounds = array<i64: 1, 400, 1024>}, {pipeline_mode = #tpu.pipeline_mode<synchronous>, transform_indices = @transform_1, window_bounds = array<i64: 32, 400>}, {pipeline_mode = #tpu.pipeline_mode<synchronous>, transform_indices = @transform_2, window_bounds = array<i64: 32, 1>}, {transform_indices = @transform_3, window_bounds = array<i64: 1, 32, 256>}]} {
    %c0 = arith.constant 0 : index
    %c0_0 = arith.constant 0 : index
    %0 = vector.load %arg2[%c0, %c0_0] : memref<32x400xbf16, #tpu.memory_space<vmem>>, vector<32x400xbf16>
    %c0_1 = arith.constant 0 : index
    %c0_2 = arith.constant 0 : index
    %c0_3 = arith.constant 0 : index
    %1 = vector.load %arg1[%c0_1, %c0_2, %c0_3] : memref<1x400x1024xbf16, #tpu.memory_space<vmem>>, vector<1x400x1024xbf16>
    %2 = vector.shape_cast %1 : vector<1x400x1024xbf16> to vector<400x1024xbf16>
    %cst = arith.constant dense<0.000000e+00> : vector<32x1024xf32>
    %3 = tpu.matmul %0, %2, %cst {dimension_numbers = #tpu.dot_dimension_numbers<[1], [0], [0], [1], [0, 0, 1, 1], [], []>} : vector<32x400xbf16>, vector<400x1024xbf16>, vector<32x1024xf32> -> vector<32x1024xf32>
    %4 = vector.extract_strided_slice %3 {offsets = [0, 0], sizes = [32, 256], strides = [1, 1]} : vector<32x1024xf32> to vector<32x256xf32>
    %5 = vector.extract_strided_slice %3 {offsets = [0, 256], sizes = [32, 256], strides = [1, 1]} : vector<32x1024xf32> to vector<32x256xf32>
    %6 = arith.maximumf %4, %5 : vector<32x256xf32>
    %7 = vector.extract_strided_slice %3 {offsets = [0, 512], sizes = [32, 256], strides = [1, 1]} : vector<32x1024xf32> to vector<32x256xf32>
    %8 = vector.extract_strided_slice %3 {offsets = [0, 768], sizes = [32, 256], strides = [1, 1]} : vector<32x1024xf32> to vector<32x256xf32>
    %9 = arith.maximumf %7, %8 : vector<32x256xf32>
    %10 = arith.maximumf %6, %9 : vector<32x256xf32>
    %c0_4 = arith.constant 0 : index
    %c0_5 = arith.constant 0 : index
    %11 = vector.load %arg3[%c0_4, %c0_5] : memref<32x1xf32, #tpu.memory_space<vmem>>, vector<32x1xf32>
    %12 = vector.broadcast %11 : vector<32x1xf32> to vector<32x256xf32>
    %13 = arith.addf %10, %12 : vector<32x256xf32>
    %cst_6 = arith.constant 0.000000e+00 : f32
    %14 = vector.broadcast %cst_6 : f32 to vector<32x256xf32>
    %15 = arith.cmpf ogt, %13, %14 : vector<32x256xf32>
    %cst_7 = arith.constant 0.000000e+00 : f32
    %16 = vector.broadcast %cst_7 : f32 to vector<32x256xf32>
    %17 = arith.minimumf %13, %16 : vector<32x256xf32>
    %18 = math.exp %17 : vector<32x256xf32>
    %cst_8 = arith.constant 1.000000e+00 : f32
    %19 = vector.broadcast %cst_8 : f32 to vector<32x256xf32>
    %20 = arith.subf %18, %19 : vector<32x256xf32>
    %21 = arith.select %15, %13, %20 : vector<32x256xi1>, vector<32x256xf32>
    %22 = arith.truncf %21 : vector<32x256xf32> to vector<32x256xbf16>
    %c0_9 = arith.constant 0 : index
    %c0_10 = arith.constant 0 : index
    %c0_11 = arith.constant 0 : index
    %23 = vector.load %arg4[%c0_9, %c0_10, %c0_11] : memref<1x32x256xbf16, #tpu.memory_space<vmem>>, vector<1x32x256xbf16>
    %24 = vector.shape_cast %23 : vector<1x32x256xbf16> to vector<32x256xbf16>
    %25 = vector.shape_cast %22 : vector<32x256xbf16> to vector<1x32x256xbf16>
    tpu.vector_store %arg4[%c0_9, %c0_10, %c0_11], %25 {strides = array<i32>} : memref<1x32x256xbf16, #tpu.memory_space<vmem>>, vector<1x32x256xbf16>,
    return
  }
  func.func @transform_0(%arg0: i32) -> (i32, i32, i32) {
    %c0_i32 = arith.constant 0 : i32
    %c0_i32_0 = arith.constant 0 : i32
    %c0_i32_1 = arith.constant 0 : i32
    return %arg0, %c0_i32, %c0_i32_0 : i32, i32, i32
  }
  func.func @transform_1(%arg0: i32) -> (i32, i32) {
    %c0_i32 = arith.constant 0 : i32
    %c0_i32_0 = arith.constant 0 : i32
    %c0_i32_1 = arith.constant 0 : i32
    return %c0_i32, %c0_i32_0 : i32, i32
  }
  func.func @transform_2(%arg0: i32) -> (i32, i32) {
    %c0_i32 = arith.constant 0 : i32
    %c0_i32_0 = arith.constant 0 : i32
    %c0_i32_1 = arith.constant 0 : i32
    return %c0_i32, %c0_i32_0 : i32, i32
  }
  func.func @transform_3(%arg0: i32) -> (i32, i32, i32) {
    %c0_i32 = arith.constant 0 : i32
    %c0_i32_0 = arith.constant 0 : i32
    %c0_i32_1 = arith.constant 0 : i32
    return %arg0, %c0_i32, %c0_i32_0 : i32, i32, i32
  }
}

module attributes {stable_mosaic.version = 11 : i64} {
  func.func @_conv_pool_kernel(%arg0: i32, %arg1: memref<1x800x512xbf16, #tpu.memory_space<vmem>>, %arg2: memref<32x800xbf16, #tpu.memory_space<vmem>>, %arg3: memref<32x1xf32, #tpu.memory_space<vmem>>, %arg4: memref<1x32x128xbf16, #tpu.memory_space<vmem>>) attributes {dimension_semantics = [#tpu.dimension_semantics<parallel>], iteration_bounds = array<i64: 2>, scalar_prefetch = 0 : i64, scratch_operands = 0 : i64, tpu.core_type = #tpu.core_type<tc>, window_params = [{transform_indices = @transform_0, window_bounds = array<i64: 1, 800, 512>}, {pipeline_mode = #tpu.pipeline_mode<synchronous>, transform_indices = @transform_1, window_bounds = array<i64: 32, 800>}, {pipeline_mode = #tpu.pipeline_mode<synchronous>, transform_indices = @transform_2, window_bounds = array<i64: 32, 1>}, {transform_indices = @transform_3, window_bounds = array<i64: 1, 32, 128>}]} {
    %c0 = arith.constant 0 : index
    %c0_0 = arith.constant 0 : index
    %0 = vector.load %arg2[%c0, %c0_0] : memref<32x800xbf16, #tpu.memory_space<vmem>>, vector<32x800xbf16>
    %c0_1 = arith.constant 0 : index
    %c0_2 = arith.constant 0 : index
    %c0_3 = arith.constant 0 : index
    %1 = vector.load %arg1[%c0_1, %c0_2, %c0_3] : memref<1x800x512xbf16, #tpu.memory_space<vmem>>, vector<1x800x512xbf16>
    %2 = vector.shape_cast %1 : vector<1x800x512xbf16> to vector<800x512xbf16>
    %cst = arith.constant dense<0.000000e+00> : vector<32x512xf32>
    %3 = tpu.matmul %0, %2, %cst {dimension_numbers = #tpu.dot_dimension_numbers<[1], [0], [0], [1], [0, 0, 1, 1], [], []>} : vector<32x800xbf16>, vector<800x512xbf16>, vector<32x512xf32> -> vector<32x512xf32>
    %4 = vector.extract_strided_slice %3 {offsets = [0, 0], sizes = [32, 128], strides = [1, 1]} : vector<32x512xf32> to vector<32x128xf32>
    %5 = vector.extract_strided_slice %3 {offsets = [0, 128], sizes = [32, 128], strides = [1, 1]} : vector<32x512xf32> to vector<32x128xf32>
    %6 = arith.maximumf %4, %5 : vector<32x128xf32>
    %7 = vector.extract_strided_slice %3 {offsets = [0, 256], sizes = [32, 128], strides = [1, 1]} : vector<32x512xf32> to vector<32x128xf32>
    %8 = vector.extract_strided_slice %3 {offsets = [0, 384], sizes = [32, 128], strides = [1, 1]} : vector<32x512xf32> to vector<32x128xf32>
    %9 = arith.maximumf %7, %8 : vector<32x128xf32>
    %10 = arith.maximumf %6, %9 : vector<32x128xf32>
    %c0_4 = arith.constant 0 : index
    %c0_5 = arith.constant 0 : index
    %11 = vector.load %arg3[%c0_4, %c0_5] : memref<32x1xf32, #tpu.memory_space<vmem>>, vector<32x1xf32>
    %12 = vector.broadcast %11 : vector<32x1xf32> to vector<32x128xf32>
    %13 = arith.addf %10, %12 : vector<32x128xf32>
    %cst_6 = arith.constant 0.000000e+00 : f32
    %14 = vector.broadcast %cst_6 : f32 to vector<32x128xf32>
    %15 = arith.cmpf ogt, %13, %14 : vector<32x128xf32>
    %cst_7 = arith.constant 0.000000e+00 : f32
    %16 = vector.broadcast %cst_7 : f32 to vector<32x128xf32>
    %17 = arith.minimumf %13, %16 : vector<32x128xf32>
    %18 = math.exp %17 : vector<32x128xf32>
    %cst_8 = arith.constant 1.000000e+00 : f32
    %19 = vector.broadcast %cst_8 : f32 to vector<32x128xf32>
    %20 = arith.subf %18, %19 : vector<32x128xf32>
    %21 = arith.select %15, %13, %20 : vector<32x128xi1>, vector<32x128xf32>
    %22 = arith.truncf %21 : vector<32x128xf32> to vector<32x128xbf16>
    %c0_9 = arith.constant 0 : index
    %c0_10 = arith.constant 0 : index
    %c0_11 = arith.constant 0 : index
    %23 = vector.load %arg4[%c0_9, %c0_10, %c0_11] : memref<1x32x128xbf16, #tpu.memory_space<vmem>>, vector<1x32x128xbf16>
    %24 = vector.shape_cast %23 : vector<1x32x128xbf16> to vector<32x128xbf16>
    %25 = vector.shape_cast %22 : vector<32x128xbf16> to vector<1x32x128xbf16>
    tpu.vector_store %arg4[%c0_9, %c0_10, %c0_11], %25 {strides = array<i32>} : memref<1x32x128xbf16, #tpu.memory_space<vmem>>, vector<1x32x128xbf16>,
    return
  }
  func.func @transform_0(%arg0: i32) -> (i32, i32, i32) {
    %c0_i32 = arith.constant 0 : i32
    %c0_i32_0 = arith.constant 0 : i32
    %c0_i32_1 = arith.constant 0 : i32
    return %arg0, %c0_i32, %c0_i32_0 : i32, i32, i32
  }
  func.func @transform_1(%arg0: i32) -> (i32, i32) {
    %c0_i32 = arith.constant 0 : i32
    %c0_i32_0 = arith.constant 0 : i32
    %c0_i32_1 = arith.constant 0 : i32
    return %c0_i32, %c0_i32_0 : i32, i32
  }
  func.func @transform_2(%arg0: i32) -> (i32, i32) {
    %c0_i32 = arith.constant 0 : i32
    %c0_i32_0 = arith.constant 0 : i32
    %c0_i32_1 = arith.constant 0 : i32
    return %c0_i32, %c0_i32_0 : i32, i32
  }
  func.func @transform_3(%arg0: i32) -> (i32, i32, i32) {
    %c0_i32 = arith.constant 0 : i32
    %c0_i32_0 = arith.constant 0 : i32
    %c0_i32_1 = arith.constant 0 : i32
    return %arg0, %c0_i32, %c0_i32_0 : i32, i32, i32
  }
}

module attributes {stable_mosaic.version = 11 : i64} {
  func.func @_tail_kernel(%arg0: memref<8x800xbf16, #tpu.memory_space<vmem>>, %arg1: memref<800x32xbf16, #tpu.memory_space<vmem>>, %arg2: memref<1x32xf32, #tpu.memory_space<vmem>>, %arg3: memref<32x32xbf16, #tpu.memory_space<vmem>>, %arg4: memref<1x32xf32, #tpu.memory_space<vmem>>, %arg5: memref<32x32xbf16, #tpu.memory_space<vmem>>, %arg6: memref<1x32xf32, #tpu.memory_space<vmem>>, %arg7: memref<32x1xbf16, #tpu.memory_space<vmem>>, %arg8: memref<1x1xf32, #tpu.memory_space<vmem>>, %arg9: memref<32x32xbf16, #tpu.memory_space<vmem>>, %arg10: memref<1x32xf32, #tpu.memory_space<vmem>>, %arg11: memref<32x4xbf16, #tpu.memory_space<vmem>>, %arg12: memref<1x4xf32, #tpu.memory_space<vmem>>, %arg13: memref<2x4xf32, #tpu.memory_space<vmem>>) attributes {dimension_semantics = [], scalar_prefetch = 0 : i64, scratch_operands = 0 : i64, tpu.core_type = #tpu.core_type<tc>} {
    %c0 = arith.constant 0 : index
    %c0_0 = arith.constant 0 : index
    %0 = vector.load %arg0[%c0, %c0_0] : memref<8x800xbf16, #tpu.memory_space<vmem>>, vector<8x800xbf16>
    %c0_1 = arith.constant 0 : index
    %c0_2 = arith.constant 0 : index
    %1 = vector.load %arg1[%c0_1, %c0_2] : memref<800x32xbf16, #tpu.memory_space<vmem>>, vector<800x32xbf16>
    %cst = arith.constant dense<0.000000e+00> : vector<8x32xf32>
    %2 = tpu.matmul %0, %1, %cst {dimension_numbers = #tpu.dot_dimension_numbers<[1], [0], [0], [1], [0, 0, 1, 1], [], []>} : vector<8x800xbf16>, vector<800x32xbf16>, vector<8x32xf32> -> vector<8x32xf32>
    %3 = vector.extract_strided_slice %2 {offsets = [0, 0], sizes = [2, 32], strides = [1, 1]} : vector<8x32xf32> to vector<2x32xf32>
    %4 = vector.extract_strided_slice %2 {offsets = [2, 0], sizes = [2, 32], strides = [1, 1]} : vector<8x32xf32> to vector<2x32xf32>
    %5 = arith.maximumf %3, %4 : vector<2x32xf32>
    %6 = vector.extract_strided_slice %2 {offsets = [4, 0], sizes = [2, 32], strides = [1, 1]} : vector<8x32xf32> to vector<2x32xf32>
    %7 = vector.extract_strided_slice %2 {offsets = [6, 0], sizes = [2, 32], strides = [1, 1]} : vector<8x32xf32> to vector<2x32xf32>
    %8 = arith.maximumf %6, %7 : vector<2x32xf32>
    %9 = arith.maximumf %5, %8 : vector<2x32xf32>
    %c0_3 = arith.constant 0 : index
    %c0_4 = arith.constant 0 : index
    %10 = vector.load %arg2[%c0_3, %c0_4] : memref<1x32xf32, #tpu.memory_space<vmem>>, vector<1x32xf32>
    %11 = vector.broadcast %10 : vector<1x32xf32> to vector<2x32xf32>
    %12 = arith.addf %9, %11 : vector<2x32xf32>
    %cst_5 = arith.constant 0.000000e+00 : f32
    %13 = vector.broadcast %cst_5 : f32 to vector<2x32xf32>
    %14 = arith.cmpf ogt, %12, %13 : vector<2x32xf32>
    %cst_6 = arith.constant 0.000000e+00 : f32
    %15 = vector.broadcast %cst_6 : f32 to vector<2x32xf32>
    %16 = arith.minimumf %12, %15 : vector<2x32xf32>
    %17 = math.exp %16 : vector<2x32xf32>
    %cst_7 = arith.constant 1.000000e+00 : f32
    %18 = vector.broadcast %cst_7 : f32 to vector<2x32xf32>
    %19 = arith.subf %17, %18 : vector<2x32xf32>
    %20 = arith.select %14, %12, %19 : vector<2x32xi1>, vector<2x32xf32>
    %21 = arith.truncf %20 : vector<2x32xf32> to vector<2x32xbf16>
    %c0_8 = arith.constant 0 : index
    %c0_9 = arith.constant 0 : index
    %22 = vector.load %arg3[%c0_8, %c0_9] : memref<32x32xbf16, #tpu.memory_space<vmem>>, vector<32x32xbf16>
    %cst_10 = arith.constant dense<0.000000e+00> : vector<2x32xf32>
    %23 = tpu.matmul %21, %22, %cst_10 {dimension_numbers = #tpu.dot_dimension_numbers<[1], [0], [0], [1], [0, 0, 1, 1], [], []>} : vector<2x32xbf16>, vector<32x32xbf16>, vector<2x32xf32> -> vector<2x32xf32>
    %c0_11 = arith.constant 0 : index
    %c0_12 = arith.constant 0 : index
    %24 = vector.load %arg4[%c0_11, %c0_12] : memref<1x32xf32, #tpu.memory_space<vmem>>, vector<1x32xf32>
    %25 = vector.broadcast %24 : vector<1x32xf32> to vector<2x32xf32>
    %26 = arith.addf %23, %25 : vector<2x32xf32>
    %cst_13 = arith.constant 0.000000e+00 : f32
    %27 = vector.broadcast %cst_13 : f32 to vector<2x32xf32>
    %28 = arith.cmpf ogt, %26, %27 : vector<2x32xf32>
    %cst_14 = arith.constant 0.000000e+00 : f32
    %29 = vector.broadcast %cst_14 : f32 to vector<2x32xf32>
    %30 = arith.minimumf %26, %29 : vector<2x32xf32>
    %31 = math.exp %30 : vector<2x32xf32>
    %cst_15 = arith.constant 1.000000e+00 : f32
    %32 = vector.broadcast %cst_15 : f32 to vector<2x32xf32>
    %33 = arith.subf %31, %32 : vector<2x32xf32>
    %34 = arith.select %28, %26, %33 : vector<2x32xi1>, vector<2x32xf32>
    %35 = arith.truncf %34 : vector<2x32xf32> to vector<2x32xbf16>
    %c0_16 = arith.constant 0 : index
    %c0_17 = arith.constant 0 : index
    %36 = vector.load %arg5[%c0_16, %c0_17] : memref<32x32xbf16, #tpu.memory_space<vmem>>, vector<32x32xbf16>
    %cst_18 = arith.constant dense<0.000000e+00> : vector<2x32xf32>
    %37 = tpu.matmul %35, %36, %cst_18 {dimension_numbers = #tpu.dot_dimension_numbers<[1], [0], [0], [1], [0, 0, 1, 1], [], []>} : vector<2x32xbf16>, vector<32x32xbf16>, vector<2x32xf32> -> vector<2x32xf32>
    %c0_19 = arith.constant 0 : index
    %c0_20 = arith.constant 0 : index
    %38 = vector.load %arg6[%c0_19, %c0_20] : memref<1x32xf32, #tpu.memory_space<vmem>>, vector<1x32xf32>
    %39 = vector.broadcast %38 : vector<1x32xf32> to vector<2x32xf32>
    %40 = arith.addf %37, %39 : vector<2x32xf32>
    %cst_21 = arith.constant 0.000000e+00 : f32
    %41 = vector.broadcast %cst_21 : f32 to vector<2x32xf32>
    %42 = arith.cmpf ogt, %40, %41 : vector<2x32xf32>
    %cst_22 = arith.constant 0.000000e+00 : f32
    %43 = vector.broadcast %cst_22 : f32 to vector<2x32xf32>
    %44 = arith.minimumf %40, %43 : vector<2x32xf32>
    %45 = math.exp %44 : vector<2x32xf32>
    %cst_23 = arith.constant 1.000000e+00 : f32
    %46 = vector.broadcast %cst_23 : f32 to vector<2x32xf32>
    %47 = arith.subf %45, %46 : vector<2x32xf32>
    %48 = arith.select %42, %40, %47 : vector<2x32xi1>, vector<2x32xf32>
    %49 = arith.truncf %48 : vector<2x32xf32> to vector<2x32xbf16>
    %c0_24 = arith.constant 0 : index
    %c0_25 = arith.constant 0 : index
    %50 = vector.load %arg7[%c0_24, %c0_25] : memref<32x1xbf16, #tpu.memory_space<vmem>>, vector<32x1xbf16>
    %cst_26 = arith.constant dense<0.000000e+00> : vector<2x1xf32>
    %51 = tpu.matmul %49, %50, %cst_26 {dimension_numbers = #tpu.dot_dimension_numbers<[1], [0], [0], [1], [0, 0, 1, 1], [], []>} : vector<2x32xbf16>, vector<32x1xbf16>, vector<2x1xf32> -> vector<2x1xf32>
    %c0_27 = arith.constant 0 : index
    %c0_28 = arith.constant 0 : index
    %52 = vector.load %arg8[%c0_27, %c0_28] : memref<1x1xf32, #tpu.memory_space<vmem>>, vector<1x1xf32>
    %53 = vector.broadcast %52 : vector<1x1xf32> to vector<2x1xf32>
    %54 = arith.addf %51, %53 : vector<2x1xf32>
    %c0_29 = arith.constant 0 : index
    %c0_30 = arith.constant 0 : index
    %55 = vector.load %arg9[%c0_29, %c0_30] : memref<32x32xbf16, #tpu.memory_space<vmem>>, vector<32x32xbf16>
    %cst_31 = arith.constant dense<0.000000e+00> : vector<2x32xf32>
    %56 = tpu.matmul %35, %55, %cst_31 {dimension_numbers = #tpu.dot_dimension_numbers<[1], [0], [0], [1], [0, 0, 1, 1], [], []>} : vector<2x32xbf16>, vector<32x32xbf16>, vector<2x32xf32> -> vector<2x32xf32>
    %c0_32 = arith.constant 0 : index
    %c0_33 = arith.constant 0 : index
    %57 = vector.load %arg10[%c0_32, %c0_33] : memref<1x32xf32, #tpu.memory_space<vmem>>, vector<1x32xf32>
    %58 = vector.broadcast %57 : vector<1x32xf32> to vector<2x32xf32>
    %59 = arith.addf %56, %58 : vector<2x32xf32>
    %cst_34 = arith.constant 0.000000e+00 : f32
    %60 = vector.broadcast %cst_34 : f32 to vector<2x32xf32>
    %61 = arith.cmpf ogt, %59, %60 : vector<2x32xf32>
    %cst_35 = arith.constant 0.000000e+00 : f32
    %62 = vector.broadcast %cst_35 : f32 to vector<2x32xf32>
    %63 = arith.minimumf %59, %62 : vector<2x32xf32>
    %64 = math.exp %63 : vector<2x32xf32>
    %cst_36 = arith.constant 1.000000e+00 : f32
    %65 = vector.broadcast %cst_36 : f32 to vector<2x32xf32>
    %66 = arith.subf %64, %65 : vector<2x32xf32>
    %67 = arith.select %61, %59, %66 : vector<2x32xi1>, vector<2x32xf32>
    %68 = arith.truncf %67 : vector<2x32xf32> to vector<2x32xbf16>
    %c0_37 = arith.constant 0 : index
    %c0_38 = arith.constant 0 : index
    %69 = vector.load %arg11[%c0_37, %c0_38] : memref<32x4xbf16, #tpu.memory_space<vmem>>, vector<32x4xbf16>
    %cst_39 = arith.constant dense<0.000000e+00> : vector<2x4xf32>
    %70 = tpu.matmul %68, %69, %cst_39 {dimension_numbers = #tpu.dot_dimension_numbers<[1], [0], [0], [1], [0, 0, 1, 1], [], []>} : vector<2x32xbf16>, vector<32x4xbf16>, vector<2x4xf32> -> vector<2x4xf32>
    %c0_40 = arith.constant 0 : index
    %c0_41 = arith.constant 0 : index
    %71 = vector.load %arg12[%c0_40, %c0_41] : memref<1x4xf32, #tpu.memory_space<vmem>>, vector<1x4xf32>
    %72 = vector.broadcast %71 : vector<1x4xf32> to vector<2x4xf32>
    %73 = arith.addf %70, %72 : vector<2x4xf32>
    %cst_42 = arith.constant dense<0.000000e+00> : vector<2xf32>
    %74 = vector.multi_reduction <add>, %73, %cst_42 [1] : vector<2x4xf32> to vector<2xf32>
    %75 = vector.shape_cast %74 : vector<2xf32> to vector<2x1xf32>
    %cst_43 = arith.constant 4.000000e+00 : f32
    %76 = vector.broadcast %cst_43 : f32 to vector<2x1xf32>
    %77 = arith.divf %75, %76 : vector<2x1xf32>
    %78 = vector.broadcast %77 : vector<2x1xf32> to vector<2x4xf32>
    %79 = arith.divf %73, %78 : vector<2x4xf32>
    %80 = vector.broadcast %54 : vector<2x1xf32> to vector<2x4xf32>
    %81 = arith.addf %80, %79 : vector<2x4xf32>
    %c0_44 = arith.constant 0 : index
    %c0_45 = arith.constant 0 : index
    %82 = vector.load %arg13[%c0_44, %c0_45] : memref<2x4xf32, #tpu.memory_space<vmem>>, vector<2x4xf32>
    tpu.vector_store %arg13[%c0_44, %c0_45], %81 {strides = array<i32>} : memref<2x4xf32, #tpu.memory_space<vmem>>, vector<2x4xf32>,
    return
  }
}

</mosaic_0001>

<bundles_post_ra>
// kernel: banana_pixels_forward.4
= control target key start
LH: loop header
LB: loop body
LE: loop exit
PB: predicated region body
PF: predicated region fallthrough
CT: control target
= control target key end

     0   :  { %s3696_s12 = smov 0   ;;  %s4624_s0 = inlined_call_operand.vmem [shape: bf16[2,80,5632], index: 0, kind: input, shape index: {}]   ;;  %s4625_s1 = inlined_call_operand.vmem [shape: bf16[16,80], index: 1, kind: input, shape index: {}]   ;;  %s4626_s2 = inlined_call_operand.vmem [shape: f32[16,1], index: 2, kind: input, shape index: {}]   ;;  %s4627_s3 = inlined_call_operand.vmem [shape: bf16[2,16,1408], index: 3, kind: output, shape index: {}]  }
   0x1 LB: > { %s2430_s13 = sadd.s32 4294967295, %s3673_s12   ;;  %p2434_p0 = scmp.ge.s32.totalorder %s3673_s12, 1  ;;  %s3673_s12 = sphi %s3696_s12, %s13_s12  }
   0x2   : > { %p137_p1 = scmp.lt.s32.totalorder %s3673_s12, 3 }
   0x4   : > { %p138_p2 = pnand %p2434_p0, %p137_p1 }
   0x6   : > { %141 = sbr.rel (%p138_p2) target bundleno = 404 (0x194), region = 32 }
   0xb   : > { %p161_p3 = scmp.lt.s32.totalorder %s2430_s13, 1  ;;  %vm1499_vm0 = vcmask 654336  }
   0xd   : > { %s4697_s13 = smov (!%p161_p3, %s2430_s13), 1 }
   0xe   : > { %s3610_s14 = smul.u32 1760, %s4697_s13 }
   0xf   : > { %s3611_s26 = smul.u32 88, %s4697_s13 }
  0x10   : > { %s3710_s17 = scalar_lea.vmem %s4624_s0, %s3610_s14 }
  0x11   : > { %v3147_v0 = vld [vmem:[%s3710_s17 + $0x580] sm:$0xf]  ;;  %v3588_v1 = vld [vmem:[%s3710_s17 + $0x62c] sm:$0xf0]  ;;  %v3566_v2 = vld [vmem:[%s3710_s17 + $0x584] sm:$0xf]  ;;  %s4470_s29 = scalar_lea.vmem %s4627_s3, %s3611_s26 }
  0x12   : > { %v3148_v3 = vor.u32 %v3588_v1, %v3147_v0  ;;  %v3149_v4 = vld [vmem:[%s3710_s17 + $0x630] sm:$0xf0]  ;;  %v3155_v5 = vld [vmem:[%s3710_s17 + $0x588] sm:$0xf]  ;;  %v3589_v6 = vld [vmem:[%s3710_s17 + $0x634] sm:$0xf0] }
  0x13   : > { %v3152_v7 = vor.u32 %v3566_v2, %v3149_v4  ;;  %v3156_v8 = vor.u32 %v3589_v6, %v3155_v5  ;;  %v3567_v9 = vld [vmem:[%s3710_s17 + $0x58c] sm:$0xf]  ;;  %v3157_v10 = vld [vmem:[%s3710_s17 + $0x638] sm:$0xf0]  ;;  %v2971_v11 = vld [vmem:[%s3710_s17 + $0x420] sm:$0xf] }
  0x14   : > { %1506 = vmatpush.bf16.msra.mxu0 %v3148_v3  ;;  %v3160_v12 = vor.u32 %v3567_v9, %v3157_v10  ;;  %v3544_v13 = vld [vmem:[%s3710_s17 + $0x4cc] sm:$0xf0]  ;;  %v3522_v14 = vld [vmem:[%s3710_s17 + $0x424] sm:$0xf]  ;;  %v2973_v15 = vld [vmem:[%s3710_s17 + $0x4d0] sm:$0xf0] }
  0x15   : > { %1520 = vmatpush.bf16.msra.mxu1 %v3152_v7  ;;  %1534 = vmatpush.bf16.msra.mxu2 %v3156_v8  ;;  %v2972_v16 = vor.u32 %v3544_v13, %v2971_v11  ;;  %v2976_v17 = vor.u32 %v3522_v14, %v2973_v15  ;;  %v2979_v18 = vld [vmem:[%s3710_s17 + $0x428] sm:$0xf]  ;;  %v3545_v19 = vld [vmem:[%s3710_s17 + $0x4d4] sm:$0xf0]  ;;  %v3523_v20 = vld [vmem:[%s3710_s17 + $0x42c] sm:$0xf] }
  0x16   : > { %1548 = vmatpush.bf16.msra.mxu3 %v3160_v12  ;;  %v2980_v21 = vor.u32 %v3545_v19, %v2979_v18  ;;  %v2981_v22 = vld [vmem:[%s3710_s17 + $0x4d8] sm:$0xf0]  ;;  %v2795_v23 = vld [vmem:[%s3710_s17 + $0x2c0] sm:$0xf]  ;;  %v3500_v24 = vld [vmem:[%s3710_s17 + $0x36c] sm:$0xf0] }
  0x17   : > { %v2984_v25 = vor.u32 %v3523_v20, %v2981_v22  ;;  %v3478_v26 = vld [vmem:[%s3710_s17 + $0x2c4] sm:$0xf]  ;;  %v2797_v27 = vld [vmem:[%s3710_s17 + $0x370] sm:$0xf0]  ;;  %v2803_v28 = vld [vmem:[%s3710_s17 + $0x2c8] sm:$0xf]  ;;  %v2796_v29 = vor.u32 %v3500_v24, %v2795_v23 }
  0x18   : > { %1507 = vmatpush.bf16.msra.mxu0 %v2972_v16  ;;  %v3501_v30 = vld [vmem:[%s3710_s17 + $0x374] sm:$0xf0]  ;;  %v3479_v31 = vld [vmem:[%s3710_s17 + $0x2cc] sm:$0xf]  ;;  %v2805_v32 = vld [vmem:[%s3710_s17 + $0x378] sm:$0xf0]  ;;  %v2800_v33 = vor.u32 %v3478_v26, %v2797_v27 }
  0x19   : > { %1521 = vmatpush.bf16.msra.mxu1 %v2976_v17  ;;  %1535 = vmatpush.bf16.msra.mxu2 %v2980_v21  ;;  %v2804_v34 = vor.u32 %v3501_v30, %v2803_v28  ;;  %v2619_v35 = vld [vmem:[%s3710_s17 + $0x160] sm:$0xf]  ;;  %v3456_v36 = vld [vmem:[%s3710_s17 + $0x20c] sm:$0xf0]  ;;  %v3434_v37 = vld [vmem:[%s3710_s17 + $0x164] sm:$0xf]  ;;  %v2808_v38 = vor.u32 %v3479_v31, %v2805_v32 }
  0x1a   : > { %1549 = vmatpush.bf16.msra.mxu3 %v2984_v25  ;;  %v2621_v39 = vld [vmem:[%s3710_s17 + $0x210] sm:$0xf0]  ;;  %v2627_v40 = vld [vmem:[%s3710_s17 + $0x168] sm:$0xf]  ;;  %v3457_v41 = vld [vmem:[%s3710_s17 + $0x214] sm:$0xf0]  ;;  %v2620_v44 = vor.u32 %v3456_v36, %v2619_v35 }
  0x1b   : > { %v3435_v42 = vld [vmem:[%s3710_s17 + $0x16c] sm:$0xf]  ;;  %v2629_v43 = vld [vmem:[%s3710_s17 + $0x218] sm:$0xf0]  ;;  %v2443_v45 = vld [vmem:[%s3710_s17] sm:$0xf]  ;;  %v2624_v47 = vor.u32 %v3434_v37, %v2621_v39  ;;  %v2628_v48 = vor.u32 %v3457_v41, %v2627_v40 }
  0x1c   : > { %1508 = vmatpush.bf16.msra.mxu0 %v2796_v29  ;;  %v3412_v46 = vld [vmem:[%s3710_s17 + $0xac] sm:$0xf0]  ;;  %v3390_v49 = vld [vmem:[%s3710_s17 + $0x4] sm:$0xf]  ;;  %v2445_v50 = vld [vmem:[%s3710_s17 + $0xb0] sm:$0xf0]  ;;  %v2632_v52 = vor.u32 %v3435_v42, %v2629_v43 }
  0x1d   : > { %1522 = vmatpush.bf16.msra.mxu1 %v2800_v33  ;;  %1536 = vmatpush.bf16.msra.mxu2 %v2804_v34  ;;  %v2451_v51 = vld [vmem:[%s3710_s17 + $0x8] sm:$0xf]  ;;  %v3413_v53 = vld [vmem:[%s3710_s17 + $0xb4] sm:$0xf0]  ;;  %v3391_v54 = vld [vmem:[%s3710_s17 + $0xc] sm:$0xf]  ;;  %v2444_v59 = vor.u32 %v3412_v46, %v2443_v45  ;;  %v2448_v63 = vor.u32 %v3390_v49, %v2445_v50 }
  0x1e   : > { %1550 = vmatpush.bf16.msra.mxu3 %v2808_v38  ;;  %v2453_v55 = vld [vmem:[%s3710_s17 + $0xb8] sm:$0xf0]  ;;  %v3163_v56 = vld [vmem:[%s3710_s17 + $0x590] sm:$0xf]  ;;  %v3590_v57 = vld [vmem:[%s3710_s17 + $0x63c] sm:$0xf0]  ;;  %v2452_v0 = vor.u32 %v3413_v53, %v2451_v51 }
  0x1f   : > { %v3568_v58 = vld [vmem:[%s3710_s17 + $0x594] sm:$0xf]  ;;  %v3165_v60 = vld [vmem:[%s3710_s17 + $0x640] sm:$0xf0]  ;;  %v3171_v61 = vld [vmem:[%s3710_s17 + $0x598] sm:$0xf]  ;;  %v2456_v3 = vor.u32 %v3391_v54, %v2453_v55  ;;  %v3164_v4 = vor.u32 %v3590_v57, %v3163_v56 }
  0x20   : > { %1509 = vmatpush.bf16.msra.mxu0 %v2620_v44  ;;  %v3591_v62 = vld [vmem:[%s3710_s17 + $0x644] sm:$0xf0]  ;;  %v3569_v1 = vld [vmem:[%s3710_s17 + $0x59c] sm:$0xf]  ;;  %v3173_v2 = vld [vmem:[%s3710_s17 + $0x648] sm:$0xf0]  ;;  %v3168_v6 = vor.u32 %v3568_v58, %v3165_v60 }
  0x21   : > { %1523 = vmatpush.bf16.msra.mxu1 %v2624_v47  ;;  %1537 = vmatpush.bf16.msra.mxu2 %v2628_v48  ;;  %v3763_v5 = vld [vmem:[%s4625_s1] sm:$0xff]  ;;  %v3172_v7 = vor.u32 %v3591_v62, %v3171_v61  ;;  %v2987_v8 = vld [vmem:[%s3710_s17 + $0x430] sm:$0xf]  ;;  %v3524_v10 = vld [vmem:[%s3710_s17 + $0x434] sm:$0xf]  ;;  %v3176_v11 = vor.u32 %v3569_v1, %v3173_v2 }
  0x22   : > { %1551 = vmatpush.bf16.msra.mxu3 %v2632_v52  ;;  %v3546_v9 = vld [vmem:[%s3710_s17 + $0x4dc] sm:$0xf0]  ;;  %v2989_v12 = vld [vmem:[%s3710_s17 + $0x4e0] sm:$0xf0]  ;;  %v2995_v13 = vld [vmem:[%s3710_s17 + $0x438] sm:$0xf] }
  0x23   : > { %v3547_v14 = vld [vmem:[%s3710_s17 + $0x4e4] sm:$0xf0]  ;;  %v3525_v15 = vld [vmem:[%s3710_s17 + $0x43c] sm:$0xf]  ;;  %v2997_v16 = vld [vmem:[%s3710_s17 + $0x4e8] sm:$0xf0]  ;;  %v2988_v17 = vor.u32 %v3546_v9, %v2987_v8  ;;  %v2992_v18 = vor.u32 %v3524_v10, %v2989_v12 }
  0x24   : > { %1510 = vmatpush.bf16.msra.mxu0 %v2444_v59  ;;  %v2996_v19 = vor.u32 %v3547_v14, %v2995_v13  ;;  %v2811_v20 = vld [vmem:[%s3710_s17 + $0x2d0] sm:$0xf]  ;;  %v3502_v21 = vld [vmem:[%s3710_s17 + $0x37c] sm:$0xf0]  ;;  %v3480_v22 = vld [vmem:[%s3710_s17 + $0x2d4] sm:$0xf]  ;;  %v3000_v23 = vor.u32 %v3525_v15, %v2997_v16 }
  0x25   : > { %1524 = vmatpush.bf16.msra.mxu1 %v2448_v63  ;;  %1538 = vmatpush.bf16.msra.mxu2 %v2452_v0  ;;  %v2813_v24 = vld [vmem:[%s3710_s17 + $0x380] sm:$0xf0]  ;;  %v2819_v25 = vld [vmem:[%s3710_s17 + $0x2d8] sm:$0xf]  ;;  %v3503_v26 = vld [vmem:[%s3710_s17 + $0x384] sm:$0xf0]  ;;  %v2812_v29 = vor.u32 %v3502_v21, %v2811_v20 }
  0x26   : > { %1552 = vmatpush.bf16.msra.mxu3 %v2456_v3  ;;  %v3481_v27 = vld [vmem:[%s3710_s17 + $0x2dc] sm:$0xf]  ;;  %v2821_v28 = vld [vmem:[%s3710_s17 + $0x388] sm:$0xf0]  ;;  %v2816_v30 = vor.u32 %v3480_v22, %v2813_v24  ;;  %v2820_v31 = vor.u32 %v3503_v26, %v2819_v25  ;;  %v2635_v32 = vld [vmem:[%s3710_s17 + $0x170] sm:$0xf] }
  0x27   : > { %3321 = vmatmul.msk.bf16.vlgmr.msra.gmra.mxu0 %vm1499_vm0, %v3763_v5  ;;  %v3458_v33 = vld [vmem:[%s3710_s17 + $0x21c] sm:$0xf0]  ;;  %v3436_v34 = vld [vmem:[%s3710_s17 + $0x174] sm:$0xf]  ;;  %v2824_v35 = vor.u32 %v3481_v27, %v2821_v28  ;;  %v2637_v36 = vld [vmem:[%s3710_s17 + $0x220] sm:$0xf0] }
  0x28   : > { %1562 = vmatpush.bf16.msrb.mxu0 %v3164_v4  ;;  %3323 = vmatmul.msk.bf16.vlgmr.msra.gmra.mxu2 %vm1499_vm0, %v3763_v5  ;;  %v2643_v37 = vld [vmem:[%s3710_s17 + $0x178] sm:$0xf]  ;;  %v3459_v38 = vld [vmem:[%s3710_s17 + $0x224] sm:$0xf0]  ;;  %v3437_v39 = vld [vmem:[%s3710_s17 + $0x17c] sm:$0xf]  ;;  %v2636_v41 = vor.u32 %v3458_v33, %v2635_v32  ;;  %v2640_v44 = vor.u32 %v3436_v34, %v2637_v36 }
  0x29   : > { %1576 = vmatpush.bf16.msrb.mxu1 %v3168_v6  ;;  %1590 = vmatpush.bf16.msrb.mxu2 %v3172_v7  ;;  %v2645_v40 = vld [vmem:[%s3710_s17 + $0x228] sm:$0xf0]  ;;  %v2459_v42 = vld [vmem:[%s3710_s17 + $0x10] sm:$0xf]  ;;  %v3414_v43 = vld [vmem:[%s3710_s17 + $0xbc] sm:$0xf0]  ;;  %v2644_v45 = vor.u32 %v3459_v38, %v2643_v37 }
  0x2a   : > { %1604 = vmatpush.bf16.msrb.mxu3 %v3176_v11  ;;  %3322 = vmatmul.msk.bf16.vlgmr.msra.gmra.mxu1 %vm1499_vm0, %v3763_v5  ;;  %v3392_v46 = vld [vmem:[%s3710_s17 + $0x14] sm:$0xf]  ;;  %v2461_v47 = vld [vmem:[%s3710_s17 + $0xc0] sm:$0xf0]  ;;  %v2467_v48 = vld [vmem:[%s3710_s17 + $0x18] sm:$0xf]  ;;  %v2648_v49 = vor.u32 %v3437_v39, %v2645_v40  ;;  %v2460_v56 = vor.u32 %v3414_v43, %v2459_v42 }
  0x2b   : > { %3324 = vmatmul.msk.bf16.vlgmr.msra.gmra.mxu3 %vm1499_vm0, %v3763_v5  ;;  %v3415_v50 = vld [vmem:[%s3710_s17 + $0xc4] sm:$0xf0]  ;;  %v3393_v51 = vld [vmem:[%s3710_s17 + $0x1c] sm:$0xf]  ;;  %v2469_v52 = vld [vmem:[%s3710_s17 + $0xc8] sm:$0xf0]  ;;  %v2464_v60 = vor.u32 %v3392_v46, %v2461_v47 }
  0x2c   : > { %1563 = vmatpush.bf16.msrb.mxu0 %v2988_v17  ;;  %v3179_v53 = vld [vmem:[%s3710_s17 + $0x5a0] sm:$0xf]  ;;  %v3592_v54 = vld [vmem:[%s3710_s17 + $0x64c] sm:$0xf0]  ;;  %v3570_v55 = vld [vmem:[%s3710_s17 + $0x5a4] sm:$0xf]  ;;  %v2468_v61 = vor.u32 %v3415_v50, %v2467_v48  ;;  %v2472_v0 = vor.u32 %v3393_v51, %v2469_v52 }
  0x2d   : > { %1577 = vmatpush.bf16.msrb.mxu1 %v2992_v18  ;;  %1591 = vmatpush.bf16.msrb.mxu2 %v2996_v19  ;;  %v3181_v57 = vld [vmem:[%s3710_s17 + $0x650] sm:$0xf0]  ;;  %v3187_v58 = vld [vmem:[%s3710_s17 + $0x5a8] sm:$0xf]  ;;  %v3593_v59 = vld [vmem:[%s3710_s17 + $0x654] sm:$0xf0]  ;;  %v3180_v1 = vor.u32 %v3592_v54, %v3179_v53 }
  0x2e   : > { %1605 = vmatpush.bf16.msrb.mxu3 %v3000_v23  ;;  %v3571_v62 = vld [vmem:[%s3710_s17 + $0x5ac] sm:$0xf]  ;;  %v3189_v63 = vld [vmem:[%s3710_s17 + $0x658] sm:$0xf0]  ;;  %v3184_v2 = vor.u32 %v3570_v55, %v3181_v57  ;;  %v3188_v3 = vor.u32 %v3593_v59, %v3187_v58  ;;  %v3003_v4 = vld [vmem:[%s3710_s17 + $0x440] sm:$0xf] }
  0x2f   : > { %v3548_v6 = vld [vmem:[%s3710_s17 + $0x4ec] sm:$0xf0]  ;;  %v3526_v7 = vld [vmem:[%s3710_s17 + $0x444] sm:$0xf]  ;;  %v3192_v8 = vor.u32 %v3571_v62, %v3189_v63  ;;  %v3005_v9 = vld [vmem:[%s3710_s17 + $0x4f0] sm:$0xf0] }
  0x30   : > { %1564 = vmatpush.bf16.msrb.mxu0 %v2812_v29  ;;  %v3011_v10 = vld [vmem:[%s3710_s17 + $0x448] sm:$0xf]  ;;  %v3549_v11 = vld [vmem:[%s3710_s17 + $0x4f4] sm:$0xf0]  ;;  %v3527_v12 = vld [vmem:[%s3710_s17 + $0x44c] sm:$0xf]  ;;  %v3004_v14 = vor.u32 %v3548_v6, %v3003_v4  ;;  %v3008_v15 = vor.u32 %v3526_v7, %v3005_v9 }
  0x31   : > { %1578 = vmatpush.bf16.msrb.mxu1 %v2816_v30  ;;  %1592 = vmatpush.bf16.msrb.mxu2 %v2820_v31  ;;  %v3013_v13 = vld [vmem:[%s3710_s17 + $0x4f8] sm:$0xf0]  ;;  %v3012_v16 = vor.u32 %v3549_v11, %v3011_v10  ;;  %v2827_v17 = vld [vmem:[%s3710_s17 + $0x2e0] sm:$0xf]  ;;  %v3504_v18 = vld [vmem:[%s3710_s17 + $0x38c] sm:$0xf0] }
  0x32   : > { %1606 = vmatpush.bf16.msrb.mxu3 %v2824_v35  ;;  %v3482_v19 = vld [vmem:[%s3710_s17 + $0x2e4] sm:$0xf]  ;;  %v3016_v20 = vor.u32 %v3527_v12, %v3013_v13  ;;  %v2829_v21 = vld [vmem:[%s3710_s17 + $0x390] sm:$0xf0]  ;;  %v2835_v22 = vld [vmem:[%s3710_s17 + $0x2e8] sm:$0xf]  ;;  %v2828_v26 = vor.u32 %v3504_v18, %v2827_v17 }
  0x33   : > { %v3505_v23 = vld [vmem:[%s3710_s17 + $0x394] sm:$0xf0]  ;;  %v3483_v24 = vld [vmem:[%s3710_s17 + $0x2ec] sm:$0xf]  ;;  %v2837_v25 = vld [vmem:[%s3710_s17 + $0x398] sm:$0xf0]  ;;  %v2832_v27 = vor.u32 %v3482_v19, %v2829_v21 }
  0x34   : > { %1565 = vmatpush.bf16.msrb.mxu0 %v2636_v41  ;;  %v2836_v28 = vor.u32 %v3505_v23, %v2835_v22  ;;  %v2651_v29 = vld [vmem:[%s3710_s17 + $0x180] sm:$0xf]  ;;  %v3460_v30 = vld [vmem:[%s3710_s17 + $0x22c] sm:$0xf0]  ;;  %v3438_v31 = vld [vmem:[%s3710_s17 + $0x184] sm:$0xf]  ;;  %v2840_v32 = vor.u32 %v3483_v24, %v2837_v25 }
  0x35   : > { %1579 = vmatpush.bf16.msrb.mxu1 %v2640_v44  ;;  %1593 = vmatpush.bf16.msrb.mxu2 %v2644_v45  ;;  %v2653_v33 = vld [vmem:[%s3710_s17 + $0x230] sm:$0xf0]  ;;  %v2659_v34 = vld [vmem:[%s3710_s17 + $0x188] sm:$0xf]  ;;  %v3461_v35 = vld [vmem:[%s3710_s17 + $0x234] sm:$0xf0]  ;;  %v2652_v38 = vor.u32 %v3460_v30, %v2651_v29 }
  0x36   : > { %1607 = vmatpush.bf16.msrb.mxu3 %v2648_v49  ;;  %v3439_v36 = vld [vmem:[%s3710_s17 + $0x18c] sm:$0xf]  ;;  %v2661_v37 = vld [vmem:[%s3710_s17 + $0x238] sm:$0xf0]  ;;  %v2475_v39 = vld [vmem:[%s3710_s17 + $0x20] sm:$0xf]  ;;  %v2656_v41 = vor.u32 %v3438_v31, %v2653_v33  ;;  %v2660_v42 = vor.u32 %v3461_v35, %v2659_v34 }
  0x37   : > { %v3416_v40 = vld [vmem:[%s3710_s17 + $0xcc] sm:$0xf0]  ;;  %v3394_v43 = vld [vmem:[%s3710_s17 + $0x24] sm:$0xf]  ;;  %v2477_v44 = vld [vmem:[%s3710_s17 + $0xd0] sm:$0xf0]  ;;  %v2664_v46 = vor.u32 %v3439_v36, %v2661_v37 }
  0x38   : > { %1566 = vmatpush.bf16.msrb.mxu0 %v2460_v56  ;;  %v2483_v45 = vld [vmem:[%s3710_s17 + $0x28] sm:$0xf]  ;;  %v3417_v47 = vld [vmem:[%s3710_s17 + $0xd4] sm:$0xf0]  ;;  %v3395_v48 = vld [vmem:[%s3710_s17 + $0x2c] sm:$0xf]  ;;  %v2476_v53 = vor.u32 %v3416_v40, %v2475_v39  ;;  %v2480_v57 = vor.u32 %v3394_v43, %v2477_v44 }
  0x39   : > { %1580 = vmatpush.bf16.msrb.mxu1 %v2464_v60  ;;  %1594 = vmatpush.bf16.msrb.mxu2 %v2468_v61  ;;  %v2485_v49 = vld [vmem:[%s3710_s17 + $0xd8] sm:$0xf0]  ;;  %v3195_v50 = vld [vmem:[%s3710_s17 + $0x5b0] sm:$0xf]  ;;  %v3594_v51 = vld [vmem:[%s3710_s17 + $0x65c] sm:$0xf0]  ;;  %v2484_v58 = vor.u32 %v3417_v47, %v2483_v45 }
  0x3a   : > { %1608 = vmatpush.bf16.msrb.mxu3 %v2472_v0  ;;  %v3572_v52 = vld [vmem:[%s3710_s17 + $0x5b4] sm:$0xf]  ;;  %v3197_v54 = vld [vmem:[%s3710_s17 + $0x660] sm:$0xf0]  ;;  %v3203_v55 = vld [vmem:[%s3710_s17 + $0x5b8] sm:$0xf]  ;;  %v2488_v61 = vor.u32 %v3395_v48, %v2485_v49  ;;  %v3196_v62 = vor.u32 %v3594_v51, %v3195_v50 }
  0x3b   : > { %3325 = vmatmul.msk.bf16.vlgmr.msrb.gmra.mxu0 %vm1499_vm0, %v3763_v5  ;;  %v3595_v56 = vld [vmem:[%s3710_s17 + $0x664] sm:$0xf0]  ;;  %v3573_v59 = vld [vmem:[%s3710_s17 + $0x5bc] sm:$0xf]  ;;  %v3205_v60 = vld [vmem:[%s3710_s17 + $0x668] sm:$0xf0]  ;;  %v3200_v63 = vor.u32 %v3572_v52, %v3197_v54 }
  0x3c   : > { %1618 = vmatpush.bf16.msra.mxu0 %v3180_v1  ;;  %3327 = vmatmul.msk.bf16.vlgmr.msrb.gmra.mxu2 %vm1499_vm0, %v3763_v5  ;;  %v3204_v0 = vor.u32 %v3595_v56, %v3203_v55  ;;  %v3019_v1 = vld [vmem:[%s3710_s17 + $0x450] sm:$0xf]  ;;  %v3208_v4 = vor.u32 %v3573_v59, %v3205_v60  ;;  %v3021_v6 = vld [vmem:[%s3710_s17 + $0x500] sm:$0xf0]  ;;  %v3027_v7 = vld [vmem:[%s3710_s17 + $0x458] sm:$0xf] }
  0x3d   : > { %1632 = vmatpush.bf16.msra.mxu1 %v3184_v2  ;;  %1646 = vmatpush.bf16.msra.mxu2 %v3188_v3  ;;  %v3550_v2 = vld [vmem:[%s3710_s17 + $0x4fc] sm:$0xf0]  ;;  %v3528_v3 = vld [vmem:[%s3710_s17 + $0x454] sm:$0xf]  ;;  %v3529_v9 = vld [vmem:[%s3710_s17 + $0x45c] sm:$0xf] }
  0x3e   : > { %1660 = vmatpush.bf16.msra.mxu3 %v3192_v8  ;;  %3326 = vmatmul.msk.bf16.vlgmr.msrb.gmra.mxu1 %vm1499_vm0, %v3763_v5  ;;  %v3551_v8 = vld [vmem:[%s3710_s17 + $0x504] sm:$0xf0]  ;;  %v3029_v10 = vld [vmem:[%s3710_s17 + $0x508] sm:$0xf0]  ;;  %v3020_v11 = vor.u32 %v3550_v2, %v3019_v1  ;;  %v3024_v12 = vor.u32 %v3528_v3, %v3021_v6  ;;  %v2845_v18 = vld [vmem:[%s3710_s17 + $0x3a0] sm:$0xf0] }
  0x3f   : > { %3328 = vmatmul.msk.bf16.vlgmr.msrb.gmra.mxu3 %vm1499_vm0, %v3763_v5  ;;  %v3028_v13 = vor.u32 %v3551_v8, %v3027_v7  ;;  %v3032_v17 = vor.u32 %v3529_v9, %v3029_v10  ;;  %v2851_v19 = vld [vmem:[%s3710_s17 + $0x2f8] sm:$0xf]  ;;  %v3485_v21 = vld [vmem:[%s3710_s17 + $0x2fc] sm:$0xf]  ;;  %v2853_v22 = vld [vmem:[%s3710_s17 + $0x3a8] sm:$0xf0] }
  0x40   : > { %1619 = vmatpush.bf16.msra.mxu0 %v3004_v14  ;;  %v2843_v14 = vld [vmem:[%s3710_s17 + $0x2f0] sm:$0xf]  ;;  %v2856_v29 = vor.u32 %v3485_v21, %v2853_v22  ;;  %v2669_v30 = vld [vmem:[%s3710_s17 + $0x240] sm:$0xf0]  ;;  %v2675_v31 = vld [vmem:[%s3710_s17 + $0x198] sm:$0xf] }
  0x41   : > { %1633 = vmatpush.bf16.msra.mxu1 %v3008_v15  ;;  %1647 = vmatpush.bf16.msra.mxu2 %v3012_v16  ;;  %v3506_v15 = vld [vmem:[%s3710_s17 + $0x39c] sm:$0xf0]  ;;  %v3484_v16 = vld [vmem:[%s3710_s17 + $0x2f4] sm:$0xf]  ;;  %v3441_v33 = vld [vmem:[%s3710_s17 + $0x19c] sm:$0xf] }
  0x42   : > { %1661 = vmatpush.bf16.msra.mxu3 %v3016_v20  ;;  %v3507_v20 = vld [vmem:[%s3710_s17 + $0x3a4] sm:$0xf0]  ;;  %v2844_v23 = vor.u32 %v3506_v15, %v2843_v14  ;;  %v2848_v24 = vor.u32 %v3484_v16, %v2845_v18  ;;  %v2677_v34 = vld [vmem:[%s3710_s17 + $0x248] sm:$0xf0]  ;;  %v2491_v36 = vld [vmem:[%s3710_s17 + $0x30] sm:$0xf] }
  0x43   : > { %v2852_v25 = vor.u32 %v3507_v20, %v2851_v19  ;;  %v3418_v37 = vld [vmem:[%s3710_s17 + $0xdc] sm:$0xf0]  ;;  %v3396_v40 = vld [vmem:[%s3710_s17 + $0x34] sm:$0xf]  ;;  %v2680_v43 = vor.u32 %v3441_v33, %v2677_v34  ;;  %v3419_v44 = vld [vmem:[%s3710_s17 + $0xe4] sm:$0xf0] }
  0x44   : > { %1620 = vmatpush.bf16.msra.mxu0 %v2828_v26  ;;  %v2667_v26 = vld [vmem:[%s3710_s17 + $0x190] sm:$0xf]  ;;  %v3397_v45 = vld [vmem:[%s3710_s17 + $0x3c] sm:$0xf]  ;;  %v3211_v47 = vld [vmem:[%s3710_s17 + $0x5c0] sm:$0xf]  ;;  %v2492_v50 = vor.u32 %v3418_v37, %v2491_v36 }
  0x45   : > { %1634 = vmatpush.bf16.msra.mxu1 %v2832_v27  ;;  %1648 = vmatpush.bf16.msra.mxu2 %v2836_v28  ;;  %v3462_v27 = vld [vmem:[%s3710_s17 + $0x23c] sm:$0xf0]  ;;  %v3440_v28 = vld [vmem:[%s3710_s17 + $0x194] sm:$0xf]  ;;  %v3596_v48 = vld [vmem:[%s3710_s17 + $0x66c] sm:$0xf0] }
  0x46   : > { %1662 = vmatpush.bf16.msra.mxu3 %v2840_v32  ;;  %v3463_v32 = vld [vmem:[%s3710_s17 + $0x244] sm:$0xf0]  ;;  %v2668_v35 = vor.u32 %v3462_v27, %v2667_v26  ;;  %v3574_v49 = vld [vmem:[%s3710_s17 + $0x5c4] sm:$0xf]  ;;  %v3213_v51 = vld [vmem:[%s3710_s17 + $0x670] sm:$0xf0]  ;;  %v3212_v59 = vor.u32 %v3596_v48, %v3211_v47 }
  0x47   : > { %v2676_v39 = vor.u32 %v3463_v32, %v2675_v31  ;;  %v3219_v52 = vld [vmem:[%s3710_s17 + $0x5c8] sm:$0xf]  ;;  %v3575_v56 = vld [vmem:[%s3710_s17 + $0x5cc] sm:$0xf]  ;;  %v3216_v60 = vor.u32 %v3574_v49, %v3213_v51  ;;  %v3037_v2 = vld [vmem:[%s3710_s17 + $0x510] sm:$0xf0] }
  0x48   : > { %1621 = vmatpush.bf16.msra.mxu0 %v2652_v38  ;;  %v2672_v38 = vor.u32 %v3440_v28, %v2669_v30  ;;  %v3043_v3 = vld [vmem:[%s3710_s17 + $0x468] sm:$0xf]  ;;  %v3531_v6 = vld [vmem:[%s3710_s17 + $0x46c] sm:$0xf]  ;;  %v3045_v7 = vld [vmem:[%s3710_s17 + $0x518] sm:$0xf0] }
  0x49   : > { %1635 = vmatpush.bf16.msra.mxu1 %v2656_v41  ;;  %1649 = vmatpush.bf16.msra.mxu2 %v2660_v42  ;;  %v2493_v41 = vld [vmem:[%s3710_s17 + $0xe0] sm:$0xf0]  ;;  %v2499_v42 = vld [vmem:[%s3710_s17 + $0x38] sm:$0xf]  ;;  %v3048_v14 = vor.u32 %v3531_v6, %v3045_v7  ;;  %v2861_v15 = vld [vmem:[%s3710_s17 + $0x3b0] sm:$0xf0] }
  0x4a   : > { %1663 = vmatpush.bf16.msra.mxu3 %v2664_v46  ;;  %v2501_v46 = vld [vmem:[%s3710_s17 + $0xe8] sm:$0xf0]  ;;  %v2496_v54 = vor.u32 %v3396_v40, %v2493_v41  ;;  %v2500_v55 = vor.u32 %v3419_v44, %v2499_v42  ;;  %v2867_v16 = vld [vmem:[%s3710_s17 + $0x308] sm:$0xf]  ;;  %v2869_v19 = vld [vmem:[%s3710_s17 + $0x3b8] sm:$0xf0] }
  0x4b   : > { %v3487_v18 = vld [vmem:[%s3710_s17 + $0x30c] sm:$0xf]  ;;  %v2685_v27 = vld [vmem:[%s3710_s17 + $0x250] sm:$0xf0]  ;;  %v2691_v28 = vld [vmem:[%s3710_s17 + $0x1a8] sm:$0xf] }
  0x4c   : > { %1622 = vmatpush.bf16.msra.mxu0 %v2476_v53  ;;  %v3597_v53 = vld [vmem:[%s3710_s17 + $0x674] sm:$0xf0]  ;;  %v2872_v26 = vor.u32 %v3487_v18, %v2869_v19  ;;  %v3443_v30 = vld [vmem:[%s3710_s17 + $0x1ac] sm:$0xf]  ;;  %v2693_v31 = vld [vmem:[%s3710_s17 + $0x258] sm:$0xf0] }
  0x4d   : > { %1636 = vmatpush.bf16.msra.mxu1 %v2480_v57  ;;  %1650 = vmatpush.bf16.msra.mxu2 %v2484_v58  ;;  %v3221_v57 = vld [vmem:[%s3710_s17 + $0x678] sm:$0xf0]  ;;  %v2504_v58 = vor.u32 %v3397_v45, %v2501_v46  ;;  %v2507_v33 = vld [vmem:[%s3710_s17 + $0x40] sm:$0xf]  ;;  %v3420_v34 = vld [vmem:[%s3710_s17 + $0xec] sm:$0xf0]  ;;  %v2696_v40 = vor.u32 %v3443_v30, %v2693_v31 }
  0x4e   : > { %1664 = vmatpush.bf16.msra.mxu3 %v2488_v61  ;;  %v3220_v61 = vor.u32 %v3597_v53, %v3219_v52  ;;  %v3224_v1 = vor.u32 %v3575_v56, %v3221_v57  ;;  %v3398_v37 = vld [vmem:[%s3710_s17 + $0x44] sm:$0xf]  ;;  %v3421_v41 = vld [vmem:[%s3710_s17 + $0xf4] sm:$0xf0]  ;;  %v3399_v42 = vld [vmem:[%s3710_s17 + $0x4c] sm:$0xf]  ;;  %v2508_v47 = vor.u32 %v3420_v34, %v2507_v33 }
  0x4f   : > { %3329 = vmatmul.msk.bf16.vlgmr.msra.gmra.mxu0 %vm1499_vm0, %v3763_v5  ;;  %v3227_v44 = vld [vmem:[%s3710_s17 + $0x5d0] sm:$0xf]  ;;  %v3598_v45 = vld [vmem:[%s3710_s17 + $0x67c] sm:$0xf0]  ;;  %v3576_v46 = vld [vmem:[%s3710_s17 + $0x5d4] sm:$0xf] }
  0x50   : > { %1674 = vmatpush.bf16.msrb.mxu0 %v3196_v62  ;;  %3331 = vmatmul.msk.bf16.vlgmr.msra.gmra.mxu2 %vm1499_vm0, %v3763_v5  ;;  %v3035_v62 = vld [vmem:[%s3710_s17 + $0x460] sm:$0xf]  ;;  %v3229_v48 = vld [vmem:[%s3710_s17 + $0x680] sm:$0xf0]  ;;  %v3235_v49 = vld [vmem:[%s3710_s17 + $0x5d8] sm:$0xf]  ;;  %v3228_v56 = vor.u32 %v3598_v45, %v3227_v44 }
  0x51   : > { %1688 = vmatpush.bf16.msrb.mxu1 %v3200_v63  ;;  %1702 = vmatpush.bf16.msrb.mxu2 %v3204_v0  ;;  %v3552_v63 = vld [vmem:[%s3710_s17 + $0x50c] sm:$0xf0]  ;;  %v3530_v0 = vld [vmem:[%s3710_s17 + $0x464] sm:$0xf]  ;;  %v3577_v53 = vld [vmem:[%s3710_s17 + $0x5dc] sm:$0xf]  ;;  %v3232_v57 = vor.u32 %v3576_v46, %v3229_v48 }
  0x52   : > { %1716 = vmatpush.bf16.msrb.mxu3 %v3208_v4  ;;  %3330 = vmatmul.msk.bf16.vlgmr.msra.gmra.mxu1 %vm1499_vm0, %v3763_v5  ;;  %v3553_v4 = vld [vmem:[%s3710_s17 + $0x514] sm:$0xf0]  ;;  %v3036_v8 = vor.u32 %v3552_v63, %v3035_v62  ;;  %v3040_v9 = vor.u32 %v3530_v0, %v3037_v2  ;;  %v3053_v63 = vld [vmem:[%s3710_s17 + $0x520] sm:$0xf0]  ;;  %v3533_v2 = vld [vmem:[%s3710_s17 + $0x47c] sm:$0xf] }
  0x53   : > { %3332 = vmatmul.msk.bf16.vlgmr.msra.gmra.mxu3 %vm1499_vm0, %v3763_v5  ;;  %v3044_v10 = vor.u32 %v3553_v4, %v3043_v3  ;;  %v3059_v0 = vld [vmem:[%s3710_s17 + $0x478] sm:$0xf]  ;;  %v3061_v3 = vld [vmem:[%s3710_s17 + $0x528] sm:$0xf0]  ;;  %v2523_v30 = vld [vmem:[%s3710_s17 + $0x50] sm:$0xf] }
  0x54   : > { %1675 = vmatpush.bf16.msrb.mxu0 %v3020_v11  ;;  %v2859_v11 = vld [vmem:[%s3710_s17 + $0x300] sm:$0xf]  ;;  %v3400_v34 = vld [vmem:[%s3710_s17 + $0x54] sm:$0xf]  ;;  %v3251_v46 = vld [vmem:[%s3710_s17 + $0x5e8] sm:$0xf] }
  0x55   : > { %1689 = vmatpush.bf16.msrb.mxu1 %v3024_v12  ;;  %1703 = vmatpush.bf16.msrb.mxu2 %v3028_v13  ;;  %v3508_v12 = vld [vmem:[%s3710_s17 + $0x3ac] sm:$0xf0]  ;;  %v3486_v13 = vld [vmem:[%s3710_s17 + $0x304] sm:$0xf]  ;;  %v3422_v31 = vld [vmem:[%s3710_s17 + $0xfc] sm:$0xf0] }
  0x56   : > { %1717 = vmatpush.bf16.msrb.mxu3 %v3032_v17  ;;  %v3509_v17 = vld [vmem:[%s3710_s17 + $0x3b4] sm:$0xf0]  ;;  %v2860_v20 = vor.u32 %v3508_v12, %v2859_v11  ;;  %v2864_v21 = vor.u32 %v3486_v13, %v2861_v15  ;;  %v3064_v11 = vor.u32 %v3533_v2, %v3061_v3  ;;  %v2877_v12 = vld [vmem:[%s3710_s17 + $0x3c0] sm:$0xf0]  ;;  %v3489_v15 = vld [vmem:[%s3710_s17 + $0x31c] sm:$0xf]  ;;  %v2524_v44 = vor.u32 %v3422_v31, %v2523_v30 }
  0x57   : > { %v2868_v22 = vor.u32 %v3509_v17, %v2867_v16  ;;  %v2883_v13 = vld [vmem:[%s3710_s17 + $0x318] sm:$0xf]  ;;  %v2885_v16 = vld [vmem:[%s3710_s17 + $0x3c8] sm:$0xf0]  ;;  %v3245_v45 = vld [vmem:[%s3710_s17 + $0x690] sm:$0xf0] }
  0x58   : > { %1676 = vmatpush.bf16.msrb.mxu0 %v2844_v23  ;;  %v2683_v23 = vld [vmem:[%s3710_s17 + $0x1a0] sm:$0xf]  ;;  %v3402_v30 = vld [vmem:[%s3710_s17 + $0x64] sm:$0xf]  ;;  %v2541_v31 = vld [vmem:[%s3710_s17 + $0x110] sm:$0xf0] }
  0x59   : > { %1690 = vmatpush.bf16.msrb.mxu1 %v2848_v24  ;;  %1704 = vmatpush.bf16.msrb.mxu2 %v2852_v25  ;;  %v3464_v24 = vld [vmem:[%s3710_s17 + $0x24c] sm:$0xf0]  ;;  %v3442_v25 = vld [vmem:[%s3710_s17 + $0x1a4] sm:$0xf] }
  0x5a   : > { %1718 = vmatpush.bf16.msrb.mxu3 %v2856_v29  ;;  %v3465_v29 = vld [vmem:[%s3710_s17 + $0x254] sm:$0xf0]  ;;  %v2684_v32 = vor.u32 %v3464_v24, %v2683_v23  ;;  %v2888_v23 = vor.u32 %v3489_v15, %v2885_v16  ;;  %v2701_v24 = vld [vmem:[%s3710_s17 + $0x260] sm:$0xf0] }
  0x5b   : > { %v2692_v36 = vor.u32 %v3465_v29, %v2691_v28  ;;  %v2709_v28 = vld [vmem:[%s3710_s17 + $0x268] sm:$0xf0] }
  0x5c   : > { %1677 = vmatpush.bf16.msrb.mxu0 %v2668_v35  ;;  %v2688_v35 = vor.u32 %v3442_v25, %v2685_v27  ;;  %v2707_v25 = vld [vmem:[%s3710_s17 + $0x1b8] sm:$0xf]  ;;  %v3445_v27 = vld [vmem:[%s3710_s17 + $0x1bc] sm:$0xf] }
  0x5d   : > { %1691 = vmatpush.bf16.msrb.mxu1 %v2672_v38  ;;  %1705 = vmatpush.bf16.msrb.mxu2 %v2676_v39  ;;  %v2509_v38 = vld [vmem:[%s3710_s17 + $0xf0] sm:$0xf0]  ;;  %v2515_v39 = vld [vmem:[%s3710_s17 + $0x48] sm:$0xf] }
  0x5e   : > { %1719 = vmatpush.bf16.msrb.mxu3 %v2680_v43  ;;  %v2517_v43 = vld [vmem:[%s3710_s17 + $0xf8] sm:$0xf0]  ;;  %v2512_v51 = vor.u32 %v3398_v37, %v2509_v38  ;;  %v2516_v52 = vor.u32 %v3421_v41, %v2515_v39  ;;  %v2712_v37 = vor.u32 %v3445_v27, %v2709_v28  ;;  %v3423_v38 = vld [vmem:[%s3710_s17 + $0x104] sm:$0xf0]  ;;  %v3243_v41 = vld [vmem:[%s3710_s17 + $0x5e0] sm:$0xf] }
  0x5f   : > { %v3401_v39 = vld [vmem:[%s3710_s17 + $0x5c] sm:$0xf]  ;;  %v3424_v27 = vld [vmem:[%s3710_s17 + $0x10c] sm:$0xf0] }
  0x60   : > { %1678 = vmatpush.bf16.msrb.mxu0 %v2492_v50  ;;  %v3599_v50 = vld [vmem:[%s3710_s17 + $0x684] sm:$0xf0] }
  0x61   : > { %1692 = vmatpush.bf16.msrb.mxu1 %v2496_v54  ;;  %1706 = vmatpush.bf16.msrb.mxu2 %v2500_v55  ;;  %v3237_v54 = vld [vmem:[%s3710_s17 + $0x688] sm:$0xf0]  ;;  %v2520_v55 = vor.u32 %v3399_v42, %v2517_v43  ;;  %v3600_v42 = vld [vmem:[%s3710_s17 + $0x68c] sm:$0xf0]  ;;  %v3578_v43 = vld [vmem:[%s3710_s17 + $0x5e4] sm:$0xf] }
  0x62   : > { %1720 = vmatpush.bf16.msrb.mxu3 %v2504_v58  ;;  %v3236_v58 = vor.u32 %v3599_v50, %v3235_v49  ;;  %v3240_v62 = vor.u32 %v3577_v53, %v3237_v54  ;;  %v3579_v50 = vld [vmem:[%s3710_s17 + $0x5ec] sm:$0xf]  ;;  %v3244_v53 = vor.u32 %v3600_v42, %v3243_v41  ;;  %v3248_v54 = vor.u32 %v3578_v43, %v3245_v45  ;;  %v3261_v41 = vld [vmem:[%s3710_s17 + $0x6a0] sm:$0xf0]  ;;  %v3267_v42 = vld [vmem:[%s3710_s17 + $0x5f8] sm:$0xf] }
  0x63   : > { %3333 = vmatmul.msk.bf16.vlgmr.msrb.gmra.mxu0 %vm1499_vm0, %v3763_v5  ;;  %v3603_v43 = vld [vmem:[%s3710_s17 + $0x6a4] sm:$0xf0] }
  0x64   : > { %1730 = vmatpush.bf16.msra.mxu0 %v3212_v59  ;;  %3334 = vmatmul.msk.bf16.vlgmr.msrb.gmra.mxu1 %vm1499_vm0, %v3763_v5  ;;  %v3051_v59 = vld [vmem:[%s3710_s17 + $0x470] sm:$0xf] }
  0x65   : > { %1744 = vmatpush.bf16.msra.mxu1 %v3216_v60  ;;  %1758 = vmatpush.bf16.msra.mxu2 %v3220_v61  ;;  %v3554_v60 = vld [vmem:[%s3710_s17 + $0x51c] sm:$0xf0]  ;;  %v3532_v61 = vld [vmem:[%s3710_s17 + $0x474] sm:$0xf] }
  0x66   : > { %1772 = vmatpush.bf16.msra.mxu3 %v3224_v1  ;;  %3335 = vmatmul.msk.bf16.vlgmr.msrb.gmra.mxu2 %vm1499_vm0, %v3763_v5  ;;  %v3555_v1 = vld [vmem:[%s3710_s17 + $0x524] sm:$0xf0]  ;;  %v3052_v4 = vor.u32 %v3554_v60, %v3051_v59  ;;  %v3056_v6 = vor.u32 %v3532_v61, %v3053_v63  ;;  %v3069_v60 = vld [vmem:[%s3710_s17 + $0x530] sm:$0xf0]  ;;  %v3535_v63 = vld [vmem:[%s3710_s17 + $0x48c] sm:$0xf] }
  0x67   : > { %3336 = vmatmul.msk.bf16.vlgmr.msrb.gmra.mxu3 %vm1499_vm0, %v3763_v5  ;;  %v3060_v7 = vor.u32 %v3555_v1, %v3059_v0  ;;  %v3075_v61 = vld [vmem:[%s3710_s17 + $0x488] sm:$0xf]  ;;  %v3077_v0 = vld [vmem:[%s3710_s17 + $0x538] sm:$0xf0] }
  0x68   : > { %1731 = vmatpush.bf16.msra.mxu0 %v3036_v8  ;;  %v2875_v8 = vld [vmem:[%s3710_s17 + $0x310] sm:$0xf] }
  0x69   : > { %1745 = vmatpush.bf16.msra.mxu1 %v3040_v9  ;;  %1759 = vmatpush.bf16.msra.mxu2 %v3044_v10  ;;  %v3510_v9 = vld [vmem:[%s3710_s17 + $0x3bc] sm:$0xf0]  ;;  %v3488_v10 = vld [vmem:[%s3710_s17 + $0x314] sm:$0xf] }
  0x6a   : > { %1773 = vmatpush.bf16.msra.mxu3 %v3048_v14  ;;  %v3511_v14 = vld [vmem:[%s3710_s17 + $0x3c4] sm:$0xf0]  ;;  %v2876_v17 = vor.u32 %v3510_v9, %v2875_v8  ;;  %v2880_v18 = vor.u32 %v3488_v10, %v2877_v12  ;;  %v3080_v8 = vor.u32 %v3535_v63, %v3077_v0  ;;  %v2893_v9 = vld [vmem:[%s3710_s17 + $0x3d0] sm:$0xf0]  ;;  %v3491_v12 = vld [vmem:[%s3710_s17 + $0x32c] sm:$0xf] }
  0x6b   : > { %v2884_v19 = vor.u32 %v3511_v14, %v2883_v13  ;;  %v2899_v10 = vld [vmem:[%s3710_s17 + $0x328] sm:$0xf]  ;;  %v2901_v13 = vld [vmem:[%s3710_s17 + $0x3d8] sm:$0xf0]  ;;  %v2907_v0 = vld [vmem:[%s3710_s17 + $0x330] sm:$0xf] }
  0x6c   : > { %1732 = vmatpush.bf16.msra.mxu0 %v2860_v20  ;;  %v2699_v20 = vld [vmem:[%s3710_s17 + $0x1b0] sm:$0xf] }
  0x6d   : > { %1746 = vmatpush.bf16.msra.mxu1 %v2864_v21  ;;  %1760 = vmatpush.bf16.msra.mxu2 %v2868_v22  ;;  %v3466_v21 = vld [vmem:[%s3710_s17 + $0x25c] sm:$0xf0]  ;;  %v3444_v22 = vld [vmem:[%s3710_s17 + $0x1b4] sm:$0xf] }
  0x6e   : > { %1774 = vmatpush.bf16.msra.mxu3 %v2872_v26  ;;  %v3467_v26 = vld [vmem:[%s3710_s17 + $0x264] sm:$0xf0]  ;;  %v2700_v29 = vor.u32 %v3466_v21, %v2699_v20  ;;  %v2904_v20 = vor.u32 %v3491_v12, %v2901_v13  ;;  %v2717_v21 = vld [vmem:[%s3710_s17 + $0x270] sm:$0xf0] }
  0x6f   : > { %v2708_v33 = vor.u32 %v3467_v26, %v2707_v25  ;;  %v2539_v26 = vld [vmem:[%s3710_s17 + $0x60] sm:$0xf] }
  0x70   : > { %1733 = vmatpush.bf16.msra.mxu0 %v2684_v32  ;;  %v2704_v32 = vor.u32 %v3444_v22, %v2701_v24  ;;  %v2723_v22 = vld [vmem:[%s3710_s17 + $0x1c8] sm:$0xf]  ;;  %v2725_v24 = vld [vmem:[%s3710_s17 + $0x278] sm:$0xf0] }
  0x71   : > { %1747 = vmatpush.bf16.msra.mxu1 %v2688_v35  ;;  %1761 = vmatpush.bf16.msra.mxu2 %v2692_v36  ;;  %v2525_v35 = vld [vmem:[%s3710_s17 + $0x100] sm:$0xf0]  ;;  %v2531_v36 = vld [vmem:[%s3710_s17 + $0x58] sm:$0xf] }
  0x72   : > { %1775 = vmatpush.bf16.msra.mxu3 %v2696_v40  ;;  %v2533_v40 = vld [vmem:[%s3710_s17 + $0x108] sm:$0xf0]  ;;  %v2528_v48 = vor.u32 %v3400_v34, %v2525_v35  ;;  %v2532_v49 = vor.u32 %v3423_v38, %v2531_v36  ;;  %v3425_v34 = vld [vmem:[%s3710_s17 + $0x114] sm:$0xf0]  ;;  %v2549_v36 = vld [vmem:[%s3710_s17 + $0x118] sm:$0xf0] }
  0x73   : > { %v3403_v35 = vld [vmem:[%s3710_s17 + $0x6c] sm:$0xf]  ;;  %v3602_v38 = vld [vmem:[%s3710_s17 + $0x69c] sm:$0xf0] }
  0x74   : > { %1734 = vmatpush.bf16.msra.mxu0 %v2508_v47  ;;  %v3601_v47 = vld [vmem:[%s3710_s17 + $0x694] sm:$0xf0] }
  0x75   : > { %1748 = vmatpush.bf16.msra.mxu1 %v2512_v51  ;;  %1762 = vmatpush.bf16.msra.mxu2 %v2516_v52  ;;  %v3253_v51 = vld [vmem:[%s3710_s17 + $0x698] sm:$0xf0]  ;;  %v2536_v52 = vor.u32 %v3401_v39, %v2533_v40  ;;  %v3580_v39 = vld [vmem:[%s3710_s17 + $0x5f4] sm:$0xf]  ;;  %v2540_v40 = vor.u32 %v3424_v27, %v2539_v26 }
  0x76   : > { %1776 = vmatpush.bf16.msra.mxu3 %v2520_v55  ;;  %v3252_v55 = vor.u32 %v3601_v47, %v3251_v46  ;;  %v3256_v59 = vor.u32 %v3579_v50, %v3253_v51  ;;  %v3581_v46 = vld [vmem:[%s3710_s17 + $0x5fc] sm:$0xf]  ;;  %v3269_v47 = vld [vmem:[%s3710_s17 + $0x6a8] sm:$0xf0]  ;;  %v3264_v50 = vor.u32 %v3580_v39, %v3261_v41  ;;  %v3268_v51 = vor.u32 %v3603_v43, %v3267_v42  ;;  %v3404_v27 = vld [vmem:[%s3710_s17 + $0x74] sm:$0xf] }
  0x77   : > { %3337 = vmatmul.msk.bf16.vlgmr.msra.gmra.mxu0 %vm1499_vm0, %v3763_v5  ;;  %v3283_v39 = vld [vmem:[%s3710_s17 + $0x608] sm:$0xf]  ;;  %v3583_v43 = vld [vmem:[%s3710_s17 + $0x60c] sm:$0xf] }
  0x78   : > { %1786 = vmatpush.bf16.msrb.mxu0 %v3228_v56  ;;  %3338 = vmatmul.msk.bf16.vlgmr.msra.gmra.mxu1 %vm1499_vm0, %v3763_v5  ;;  %v3067_v56 = vld [vmem:[%s3710_s17 + $0x480] sm:$0xf] }
  0x79   : > { %1800 = vmatpush.bf16.msrb.mxu1 %v3232_v57  ;;  %1814 = vmatpush.bf16.msrb.mxu2 %v3236_v58  ;;  %v3556_v57 = vld [vmem:[%s3710_s17 + $0x52c] sm:$0xf0]  ;;  %v3534_v58 = vld [vmem:[%s3710_s17 + $0x484] sm:$0xf] }
  0x7a   : > { %1828 = vmatpush.bf16.msrb.mxu3 %v3240_v62  ;;  %3339 = vmatmul.msk.bf16.vlgmr.msra.gmra.mxu2 %vm1499_vm0, %v3763_v5  ;;  %v3557_v62 = vld [vmem:[%s3710_s17 + $0x534] sm:$0xf0]  ;;  %v3068_v1 = vor.u32 %v3556_v57, %v3067_v56  ;;  %v3072_v2 = vor.u32 %v3534_v58, %v3069_v60  ;;  %v3085_v56 = vld [vmem:[%s3710_s17 + $0x540] sm:$0xf0]  ;;  %v3559_v58 = vld [vmem:[%s3710_s17 + $0x544] sm:$0xf0] }
  0x7b   : > { %3340 = vmatmul.msk.bf16.vlgmr.msra.gmra.mxu3 %vm1499_vm0, %v3763_v5  ;;  %v3076_v3 = vor.u32 %v3557_v62, %v3075_v61  ;;  %v3091_v57 = vld [vmem:[%s3710_s17 + $0x498] sm:$0xf]  ;;  %v3093_v60 = vld [vmem:[%s3710_s17 + $0x548] sm:$0xf0] }
  0x7c   : > { %1787 = vmatpush.bf16.msrb.mxu0 %v3052_v4  ;;  %v2891_v4 = vld [vmem:[%s3710_s17 + $0x320] sm:$0xf]  ;;  %v3092_v63 = vor.u32 %v3559_v58, %v3091_v57  ;;  %v3109_v57 = vld [vmem:[%s3710_s17 + $0x558] sm:$0xf0] }
  0x7d   : > { %1801 = vmatpush.bf16.msrb.mxu1 %v3056_v6  ;;  %1815 = vmatpush.bf16.msrb.mxu2 %v3060_v7  ;;  %v3512_v6 = vld [vmem:[%s3710_s17 + $0x3cc] sm:$0xf0]  ;;  %v3490_v7 = vld [vmem:[%s3710_s17 + $0x324] sm:$0xf] }
  0x7e   : > { %1829 = vmatpush.bf16.msrb.mxu3 %v3064_v11  ;;  %v3513_v11 = vld [vmem:[%s3710_s17 + $0x3d4] sm:$0xf0]  ;;  %v2892_v14 = vor.u32 %v3512_v6, %v2891_v4  ;;  %v2896_v15 = vor.u32 %v3490_v7, %v2893_v9  ;;  %v2909_v6 = vld [vmem:[%s3710_s17 + $0x3e0] sm:$0xf0]  ;;  %v3493_v9 = vld [vmem:[%s3710_s17 + $0x33c] sm:$0xf] }
  0x7f   : > { %v2900_v16 = vor.u32 %v3513_v11, %v2899_v10  ;;  %v2915_v7 = vld [vmem:[%s3710_s17 + $0x338] sm:$0xf]  ;;  %v2917_v10 = vld [vmem:[%s3710_s17 + $0x3e8] sm:$0xf0] }
  0x80   : > { %1788 = vmatpush.bf16.msrb.mxu0 %v2876_v17  ;;  %v2715_v17 = vld [vmem:[%s3710_s17 + $0x1c0] sm:$0xf] }
  0x81   : > { %1802 = vmatpush.bf16.msrb.mxu1 %v2880_v18  ;;  %1816 = vmatpush.bf16.msrb.mxu2 %v2884_v19  ;;  %v3468_v18 = vld [vmem:[%s3710_s17 + $0x26c] sm:$0xf0]  ;;  %v3446_v19 = vld [vmem:[%s3710_s17 + $0x1c4] sm:$0xf] }
  0x82   : > { %1830 = vmatpush.bf16.msrb.mxu3 %v2888_v23  ;;  %v3447_v23 = vld [vmem:[%s3710_s17 + $0x1cc] sm:$0xf]  ;;  %v2716_v25 = vor.u32 %v3468_v18, %v2715_v17  ;;  %v2720_v28 = vor.u32 %v3446_v19, %v2717_v21  ;;  %v2920_v17 = vor.u32 %v3493_v9, %v2917_v10  ;;  %v2733_v18 = vld [vmem:[%s3710_s17 + $0x280] sm:$0xf0]  ;;  %v2739_v19 = vld [vmem:[%s3710_s17 + $0x1d8] sm:$0xf] }
  0x83   : > { %v3449_v21 = vld [vmem:[%s3710_s17 + $0x1dc] sm:$0xf] }
  0x84   : > { %1789 = vmatpush.bf16.msrb.mxu0 %v2700_v29 }
  0x85   : > { %1803 = vmatpush.bf16.msrb.mxu1 %v2704_v32  ;;  %1817 = vmatpush.bf16.msrb.mxu2 %v2708_v33  ;;  %v2547_v32 = vld [vmem:[%s3710_s17 + $0x68] sm:$0xf]  ;;  %v2728_v33 = vor.u32 %v3447_v23, %v2725_v24  ;;  %v2555_v23 = vld [vmem:[%s3710_s17 + $0x70] sm:$0xf]  ;;  %v3426_v24 = vld [vmem:[%s3710_s17 + $0x11c] sm:$0xf0] }
  0x86   : > { %1831 = vmatpush.bf16.msrb.mxu3 %v2712_v37  ;;  %v3259_v37 = vld [vmem:[%s3710_s17 + $0x5f0] sm:$0xf]  ;;  %v2548_v45 = vor.u32 %v3425_v34, %v2547_v32  ;;  %v3405_v32 = vld [vmem:[%s3710_s17 + $0x7c] sm:$0xf]  ;;  %v3275_v34 = vld [vmem:[%s3710_s17 + $0x600] sm:$0xf] }
  0x88   : > { %1790 = vmatpush.bf16.msrb.mxu0 %v2524_v44  ;;  %v2544_v44 = vor.u32 %v3402_v30, %v2541_v31  ;;  %v3427_v31 = vld [vmem:[%s3710_s17 + $0x124] sm:$0xf0] }
  0x89   : > { %1804 = vmatpush.bf16.msrb.mxu1 %v2528_v48  ;;  %1818 = vmatpush.bf16.msrb.mxu2 %v2532_v49  ;;  %v2552_v48 = vor.u32 %v3403_v35, %v2549_v36  ;;  %v3260_v49 = vor.u32 %v3602_v38, %v3259_v37  ;;  %v3604_v35 = vld [vmem:[%s3710_s17 + $0x6ac] sm:$0xf0]  ;;  %v3582_v36 = vld [vmem:[%s3710_s17 + $0x604] sm:$0xf]  ;;  %v2556_v37 = vor.u32 %v3426_v24, %v2555_v23  ;;  %v3277_v38 = vld [vmem:[%s3710_s17 + $0x6b0] sm:$0xf0] }
  0x8a   : > { %1832 = vmatpush.bf16.msrb.mxu3 %v2536_v52  ;;  %v3083_v52 = vld [vmem:[%s3710_s17 + $0x490] sm:$0xf] }
  0x8b   : > { %3341 = vmatmul.msk.bf16.vlgmr.msrb.gmra.mxu0 %vm1499_vm0, %v3763_v5 }
  0x8c   : > { %1842 = vmatpush.bf16.msra.mxu0 %v3244_v53  ;;  %3342 = vmatmul.msk.bf16.vlgmr.msrb.gmra.mxu1 %vm1499_vm0, %v3763_v5  ;;  %v3558_v53 = vld [vmem:[%s3710_s17 + $0x53c] sm:$0xf0] }
  0x8d   : > { %1856 = vmatpush.bf16.msra.mxu1 %v3248_v54  ;;  %1870 = vmatpush.bf16.msra.mxu2 %v3252_v55  ;;  %v3536_v54 = vld [vmem:[%s3710_s17 + $0x494] sm:$0xf]  ;;  %v3272_v55 = vor.u32 %v3581_v46, %v3269_v47  ;;  %v3084_v61 = vor.u32 %v3558_v53, %v3083_v52  ;;  %v3276_v46 = vor.u32 %v3604_v35, %v3275_v34  ;;  %v3407_v35 = vld [vmem:[%s3710_s17 + $0x8c] sm:$0xf] }
  0x8e   : > { %1884 = vmatpush.bf16.msra.mxu3 %v3256_v59  ;;  %3343 = vmatmul.msk.bf16.vlgmr.msrb.gmra.mxu2 %vm1499_vm0, %v3763_v5  ;;  %v3537_v59 = vld [vmem:[%s3710_s17 + $0x49c] sm:$0xf]  ;;  %v3088_v62 = vor.u32 %v3536_v54, %v3085_v56  ;;  %v3280_v47 = vor.u32 %v3582_v36, %v3277_v38  ;;  %v3101_v53 = vld [vmem:[%s3710_s17 + $0x550] sm:$0xf0]  ;;  %v3107_v54 = vld [vmem:[%s3710_s17 + $0x4a8] sm:$0xf] }
  0x8f   : > { %3344 = vmatmul.msk.bf16.vlgmr.msrb.gmra.mxu3 %vm1499_vm0, %v3763_v5  ;;  %v3469_v5 = vld [vmem:[%s3710_s17 + $0x274] sm:$0xf0]  ;;  %v3096_v4 = vor.u32 %v3537_v59, %v3093_v60  ;;  %v3539_v56 = vld [vmem:[%s3710_s17 + $0x4ac] sm:$0xf]  ;;  %v2581_v36 = vld [vmem:[%s3710_s17 + $0x138] sm:$0xf0] }
  0x90   : > { %1843 = vmatpush.bf16.msra.mxu0 %v3068_v1  ;;  %v2724_v29 = vor.u32 %v3469_v5, %v2723_v22  ;;  %v3514_v1 = vld [vmem:[%s3710_s17 + $0x3dc] sm:$0xf0]  ;;  %v2741_v22 = vld [vmem:[%s3710_s17 + $0x288] sm:$0xf0] }
  0x91   : > { %1857 = vmatpush.bf16.msra.mxu1 %v3072_v2  ;;  %1871 = vmatpush.bf16.msra.mxu2 %v3076_v3  ;;  %v3492_v2 = vld [vmem:[%s3710_s17 + $0x334] sm:$0xf]  ;;  %v4067_v3 = vld [vmem:[%s4625_s1] sm:$0xff]  ;;  %v2908_v11 = vor.u32 %v3514_v1, %v2907_v0  ;;  %v2744_v30 = vor.u32 %v3449_v21, %v2741_v22  ;;  %v3112_v0 = vor.u32 %v3539_v56, %v3109_v57  ;;  %v3675_v21 = vmov 0   ;;  %v3451_v22 = vld [vmem:[%s3710_s17 + $0x1ec] sm:$0xf] }
  0x92   : > { %1885 = vmatpush.bf16.msra.mxu3 %v3080_v8  ;;  %v3515_v8 = vld [vmem:[%s3710_s17 + $0x3e4] sm:$0xf0]  ;;  %v2912_v12 = vor.u32 %v3492_v2, %v2909_v6  ;;  %v2925_v1 = vld [vmem:[%s3710_s17 + $0x3f0] sm:$0xf0]  ;;  %3621 = vset.pattern.permute.xlu0 %v3675_v21  ;;  %v3562_v56 = vld [vmem:[%s3710_s17 + $0x55c] sm:$0xf0] }
  0x93   : > { %v2916_v13 = vor.u32 %v3515_v8, %v2915_v7  ;;  %v2931_v2 = vld [vmem:[%s3710_s17 + $0x348] sm:$0xf]  ;;  %v3495_v7 = vld [vmem:[%s3710_s17 + $0x34c] sm:$0xf]  ;;  %v2933_v8 = vld [vmem:[%s3710_s17 + $0x3f8] sm:$0xf0] }
  0x94   : > { %1844 = vmatpush.bf16.msra.mxu0 %v2892_v14  ;;  %v2731_v14 = vld [vmem:[%s3710_s17 + $0x1d0] sm:$0xf]  ;;  %v3540_v57 = vld [vmem:[%s3710_s17 + $0x4b4] sm:$0xf] }
  0x95   : > { %1858 = vmatpush.bf16.msra.mxu1 %v2896_v15  ;;  %1872 = vmatpush.bf16.msra.mxu2 %v2900_v16  ;;  %v3470_v15 = vld [vmem:[%s3710_s17 + $0x27c] sm:$0xf0]  ;;  %v3448_v16 = vld [vmem:[%s3710_s17 + $0x1d4] sm:$0xf] }
  0x96   : > { %1886 = vmatpush.bf16.msra.mxu3 %v2904_v20  ;;  %v3471_v20 = vld [vmem:[%s3710_s17 + $0x284] sm:$0xf0]  ;;  %v2732_v5 = vor.u32 %v3470_v15, %v2731_v14  ;;  %v2747_v14 = vld [vmem:[%s3710_s17 + $0x1e0] sm:$0xf]  ;;  %v3472_v15 = vld [vmem:[%s3710_s17 + $0x28c] sm:$0xf0] }
  0x97   : > { %v2740_v26 = vor.u32 %v3471_v20, %v2739_v19  ;;  %v2755_v19 = vld [vmem:[%s3710_s17 + $0x1e8] sm:$0xf]  ;;  %v3473_v20 = vld [vmem:[%s3710_s17 + $0x294] sm:$0xf0]  ;;  %v2748_v24 = vor.u32 %v3472_v15, %v2747_v14 }
  0x98   : > { %1845 = vmatpush.bf16.msra.mxu0 %v2716_v25  ;;  %v2736_v25 = vor.u32 %v3448_v16, %v2733_v18  ;;  %v3450_v16 = vld [vmem:[%s3710_s17 + $0x1e4] sm:$0xf]  ;;  %v2749_v18 = vld [vmem:[%s3710_s17 + $0x290] sm:$0xf0]  ;;  %v2947_v14 = vld [vmem:[%s3710_s17 + $0x358] sm:$0xf] }
  0x99   : > { %1859 = vmatpush.bf16.msra.mxu1 %v2720_v28  ;;  %1873 = vmatpush.bf16.msra.mxu2 %v2724_v29  ;;  %v2557_v28 = vld [vmem:[%s3710_s17 + $0x120] sm:$0xf0]  ;;  %v2563_v29 = vld [vmem:[%s3710_s17 + $0x78] sm:$0xf]  ;;  %v3519_v15 = vld [vmem:[%s3710_s17 + $0x404] sm:$0xf0] }
  0x9a   : > { %1887 = vmatpush.bf16.msra.mxu3 %v2728_v33  ;;  %v2565_v33 = vld [vmem:[%s3710_s17 + $0x128] sm:$0xf0]  ;;  %v2560_v41 = vor.u32 %v3404_v27, %v2557_v28  ;;  %v2564_v42 = vor.u32 %v3427_v31, %v2563_v29  ;;  %v3428_v27 = vld [vmem:[%s3710_s17 + $0x12c] sm:$0xf0]  ;;  %v3406_v28 = vld [vmem:[%s3710_s17 + $0x84] sm:$0xf]  ;;  %v2752_v29 = vor.u32 %v3450_v16, %v2749_v18 }
  0x9b   : > { %v2573_v31 = vld [vmem:[%s3710_s17 + $0x130] sm:$0xf0]  ;;  %v2949_v18 = vld [vmem:[%s3710_s17 + $0x408] sm:$0xf0] }
  0x9c   : > { %1846 = vmatpush.bf16.msra.mxu0 %v2540_v40  ;;  %v3605_v40 = vld [vmem:[%s3710_s17 + $0x6b4] sm:$0xf0] }
  0x9d   : > { %1860 = vmatpush.bf16.msra.mxu1 %v2544_v44  ;;  %1874 = vmatpush.bf16.msra.mxu2 %v2548_v45  ;;  %v3285_v44 = vld [vmem:[%s3710_s17 + $0x6b8] sm:$0xf0]  ;;  %v2568_v45 = vor.u32 %v3405_v32, %v2565_v33  ;;  %v2579_v32 = vld [vmem:[%s3710_s17 + $0x88] sm:$0xf]  ;;  %v3429_v33 = vld [vmem:[%s3710_s17 + $0x134] sm:$0xf0] }
  0x9e   : > { %1888 = vmatpush.bf16.msra.mxu3 %v2552_v48  ;;  %v3284_v48 = vor.u32 %v3605_v40, %v3283_v39  ;;  %v3288_v52 = vor.u32 %v3583_v43, %v3285_v44  ;;  %v3606_v39 = vld [vmem:[%s3710_s17 + $0x6bc] sm:$0xf0]  ;;  %v3584_v40 = vld [vmem:[%s3710_s17 + $0x614] sm:$0xf]  ;;  %v3299_v44 = vld [vmem:[%s3710_s17 + $0x618] sm:$0xf] }
  0x9f   : > { %3345 = vmatmul.msk.bf16.vlgmr.msra.gmra.mxu0 %vm1499_vm0, %v4067_v3 }
  0xa0   : > { %1898 = vmatpush.bf16.msrb.mxu0 %v3260_v49  ;;  %3347 = vmatmul.msk.bf16.vlgmr.msra.gmra.mxu2 %vm1499_vm0, %v4067_v3  ;;  %v3099_v49 = vld [vmem:[%s3710_s17 + $0x4a0] sm:$0xf] }
  0xa1   : > { %1912 = vmatpush.bf16.msrb.mxu1 %v3264_v50  ;;  %1926 = vmatpush.bf16.msrb.mxu2 %v3268_v51  ;;  %v3560_v50 = vld [vmem:[%s3710_s17 + $0x54c] sm:$0xf0]  ;;  %v3538_v51 = vld [vmem:[%s3710_s17 + $0x4a4] sm:$0xf] }
  0xa2   : > { %1940 = vmatpush.bf16.msrb.mxu3 %v3272_v55  ;;  %3346 = vmatmul.msk.bf16.vlgmr.msra.gmra.mxu1 %vm1499_vm0, %v4067_v3  ;;  %v3561_v55 = vld [vmem:[%s3710_s17 + $0x554] sm:$0xf0]  ;;  %v3100_v58 = vor.u32 %v3560_v50, %v3099_v49  ;;  %v3104_v59 = vor.u32 %v3538_v51, %v3101_v53  ;;  %v3585_v49 = vld [vmem:[%s3710_s17 + $0x61c] sm:$0xf]  ;;  %v3301_v50 = vld [vmem:[%s3710_s17 + $0x6c8] sm:$0xf0]  ;;  %v2584_v51 = vor.u32 %v3407_v35, %v2581_v36 }
  0xa3   : > { %3348 = vmatmul.msk.bf16.vlgmr.msra.gmra.mxu3 %vm1499_vm0, %v4067_v3  ;;  %v3108_v60 = vor.u32 %v3561_v55, %v3107_v54  ;;  %v3115_v55 = vld [vmem:[%s3710_s17 + $0x4b0] sm:$0xf] }
  0xa4   : > { %1899 = vmatpush.bf16.msrb.mxu0 %v3084_v61  ;;  %v2923_v61 = vld [vmem:[%s3710_s17 + $0x340] sm:$0xf]  ;;  %v4122_v6 = vpop.f32.mrf.mxu0  ;;  %v2587_v36 = vld [vmem:[%s3710_s17 + $0x90] sm:$0xf] }
  0xa5   : > { %1913 = vmatpush.bf16.msrb.mxu1 %v3088_v62  ;;  %1927 = vmatpush.bf16.msrb.mxu2 %v3092_v63  ;;  %v3516_v62 = vld [vmem:[%s3710_s17 + $0x3ec] sm:$0xf0]  ;;  %v3494_v63 = vld [vmem:[%s3710_s17 + $0x344] sm:$0xf] }
  0xa6   : > { %1941 = vmatpush.bf16.msrb.mxu3 %v3096_v4  ;;  %v3517_v4 = vld [vmem:[%s3710_s17 + $0x3f4] sm:$0xf0]  ;;  %v2924_v10 = vor.u32 %v3516_v62, %v2923_v61  ;;  %v3563_v62 = vld [vmem:[%s3710_s17 + $0x564] sm:$0xf0] }
  0xa7   : > { %v4130_v9 = vpop.f32.mrf.mxu1  ;;  %v3123_v61 = vld [vmem:[%s3710_s17 + $0x4b8] sm:$0xf] }
  0xa8   : > { %1900 = vmatpush.bf16.msrb.mxu0 %v2908_v11  ;;  %v2185_v11 = vld [vmem:[%s4626_s2] sm:$0xff] }
  0xa9   : > { %1914 = vmatpush.bf16.msrb.mxu1 %v2912_v12  ;;  %1928 = vmatpush.bf16.msrb.mxu2 %v2916_v13  ;;  %v2928_v12 = vor.u32 %v3494_v63, %v2925_v1  ;;  %v2932_v13 = vor.u32 %v3517_v4, %v2931_v2  ;;  %v3125_v1 = vld [vmem:[%s3710_s17 + $0x568] sm:$0xf0]  ;;  %v3116_v2 = vor.u32 %v3562_v56, %v3115_v55  ;;  %v3309_v55 = vld [vmem:[%s3710_s17 + $0x6d0] sm:$0xf0]  ;;  %v3315_v56 = vld [vmem:[%s3710_s17 + $0x628] sm:$0xf] }
  0xaa   : > { %1942 = vmatpush.bf16.msrb.mxu3 %v2920_v17  ;;  %v2936_v17 = vor.u32 %v3495_v7, %v2933_v8  ;;  %2189 = vperm.xlu0 %3621, %v2185_v11   ;;  %v3124_v7 = vor.u32 %v3563_v62, %v3123_v61  ;;  %v2939_v8 = vld [vmem:[%s3710_s17 + $0x350] sm:$0xf]  ;;  %v3496_v11 = vld [vmem:[%s3710_s17 + $0x354] sm:$0xf]  ;;  %v3587_v61 = vld [vmem:[%s3710_s17 + $0x62c] sm:$0xf] }
  0xab   : > { %v4145_v23 = vpop.f32.mrf.mxu2  ;;  %v3317_v62 = vld [vmem:[%s3710_s17 + $0x6d8] sm:$0xf0] }
  0xac   : > { %1901 = vmatpush.bf16.msrb.mxu0 %v2732_v5  ;;  %v2757_v5 = vld [vmem:[%s3710_s17 + $0x298] sm:$0xf0]  ;;  %v4158_v38 = vpop.f32.mrf.mxu0 }
  0xad   : > { %1915 = vmatpush.bf16.msrb.mxu1 %v2736_v25  ;;  %1929 = vmatpush.bf16.msrb.mxu2 %v2740_v26  ;;  %v2571_v26 = vld [vmem:[%s3710_s17 + $0x80] sm:$0xf]  ;;  %v2760_v34 = vor.u32 %v3451_v22, %v2757_v5  ;;  %v2948_v22 = vor.u32 %v3519_v15, %v2947_v14  ;;  %v2763_v5 = vld [vmem:[%s3710_s17 + $0x1f0] sm:$0xf]  ;;  %v3139_v14 = vld [vmem:[%s3710_s17 + $0x4c8] sm:$0xf] }
  0xae   : > { %1943 = vmatpush.bf16.msrb.mxu3 %v2744_v30  ;;  %v4147_v25 = vpop.f32.mrf.mxu3  ;;  %v2756_v30 = vor.u32 %v3473_v20, %v2755_v19  ;;  %v2572_v43 = vor.u32 %v3428_v27, %v2571_v26  ;;  %v3452_v26 = vld [vmem:[%s3710_s17 + $0x1f4] sm:$0xf]  ;;  %v3565_v15 = vld [vmem:[%s3710_s17 + $0x574] sm:$0xf0] }
  0xb0   : > { %1902 = vmatpush.bf16.msrb.mxu0 %v2556_v37  ;;  %v3291_v37 = vld [vmem:[%s3710_s17 + $0x610] sm:$0xf] }
  0xb1   : > { %1916 = vmatpush.bf16.msrb.mxu1 %v2560_v41  ;;  %1930 = vmatpush.bf16.msrb.mxu2 %v2564_v42  ;;  %v3293_v41 = vld [vmem:[%s3710_s17 + $0x6c0] sm:$0xf0]  ;;  %v4163_v42 = vpop.f32.mrf.mxu1 }
  0xb2   : > { %1944 = vmatpush.bf16.msrb.mxu3 %v2568_v45  ;;  %v3607_v45 = vld [vmem:[%s3710_s17 + $0x6c4] sm:$0xf0]  ;;  %v3296_v53 = vor.u32 %v3584_v40, %v3293_v41  ;;  %v3408_v41 = vld [vmem:[%s3710_s17 + $0x94] sm:$0xf] }
  0xb3   : > { %3349 = vmatmul.msk.bf16.vlgmr.msrb.gmra.mxu0 %vm1499_vm0, %v4067_v3  ;;  %v3300_v54 = vor.u32 %v3607_v45, %v3299_v44  ;;  %v2595_v44 = vld [vmem:[%s3710_s17 + $0x98] sm:$0xf] }
  0xb4   : > { %1954 = vmatpush.bf16.msra.mxu0 %v3276_v46  ;;  %3351 = vmatmul.msk.bf16.vlgmr.msrb.gmra.mxu2 %vm1499_vm0, %v4067_v3  ;;  %v2186_v46 = vld [vmem:[%s4626_s2 + $0x8] sm:$0xff] }
  0xb5   : > { %1968 = vmatpush.bf16.msra.mxu1 %v3280_v47  ;;  %1982 = vmatpush.bf16.msra.mxu2 %v3284_v48  ;;  %v2576_v47 = vor.u32 %v3406_v28, %v2573_v31  ;;  %v2580_v48 = vor.u32 %v3429_v33, %v2579_v32  ;;  %v2765_v28 = vld [vmem:[%s3710_s17 + $0x2a0] sm:$0xf0]  ;;  %v3453_v31 = vld [vmem:[%s3710_s17 + $0x1fc] sm:$0xf]  ;;  %v2773_v32 = vld [vmem:[%s3710_s17 + $0x2a8] sm:$0xf0] }
  0xb6   : > { %1996 = vmatpush.bf16.msra.mxu3 %v3288_v52  ;;  %3350 = vmatmul.msk.bf16.vlgmr.msrb.gmra.mxu1 %vm1499_vm0, %v4067_v3  ;;  %v3292_v52 = vor.u32 %v3606_v39, %v3291_v37  ;;  %v4180_v63 = vpop.f32.mrf.mxu3  ;;  %v3430_v37 = vld [vmem:[%s3710_s17 + $0x13c] sm:$0xf0]  ;;  %v2768_v39 = vor.u32 %v3452_v26, %v2765_v28  ;;  %v2776_v45 = vor.u32 %v3453_v31, %v2773_v32  ;;  %v3520_v26 = vld [vmem:[%s3710_s17 + $0x40c] sm:$0xf0]  ;;  %v3521_v31 = vld [vmem:[%s3710_s17 + $0x414] sm:$0xf0] }
  0xb7   : > { %3352 = vmatmul.msk.bf16.vlgmr.msrb.gmra.mxu3 %vm1499_vm0, %v4067_v3  ;;  %2194 = vperm.xlu0 %3621, %v2186_v46   ;;  %v3431_v46 = vld [vmem:[%s3710_s17 + $0x144] sm:$0xf0] }
  0xb8   : > { %1955 = vmatpush.bf16.msra.mxu0 %v3100_v58  ;;  %v4175_v58 = vpop.f32.mrf.mxu2  ;;  %v4192_v16 = vpop.f32.mrf.mxu0 }
  0xb9   : > { %1969 = vmatpush.bf16.msra.mxu1 %v3104_v59  ;;  %1983 = vmatpush.bf16.msra.mxu2 %v3108_v60  ;;  %v3304_v59 = vor.u32 %v3585_v49, %v3301_v50  ;;  %v3117_v60 = vld [vmem:[%s3710_s17 + $0x560] sm:$0xf0]  ;;  %v3307_v50 = vld [vmem:[%s3710_s17 + $0x620] sm:$0xf] }
  0xba   : > { %1997 = vmatpush.bf16.msra.mxu3 %v3112_v0  ;;  %v3541_v0 = vld [vmem:[%s3710_s17 + $0x4bc] sm:$0xf]  ;;  %v3120_v4 = vor.u32 %v3540_v57, %v3117_v60  ;;  %v3609_v57 = vld [vmem:[%s3710_s17 + $0x6d4] sm:$0xf0]  ;;  %v2596_v60 = vor.u32 %v3431_v46, %v2595_v44  ;;  %v3476_v44 = vld [vmem:[%s3710_s17 + $0x2ac] sm:$0xf0] }
  0xbb   : > { %v4200_v19 = vpop.f32.mrf.mxu1 }
  0xbc   : > { %1956 = vmatpush.bf16.msra.mxu0 %v2924_v10  ;;  %v3518_v10 = vld [vmem:[%s3710_s17 + $0x3fc] sm:$0xf0] }
  0xbd   : > { %1970 = vmatpush.bf16.msra.mxu1 %v2928_v12  ;;  %1984 = vmatpush.bf16.msra.mxu2 %v2932_v13  ;;  %v3128_v12 = vor.u32 %v3541_v0, %v3125_v1  ;;  %v2941_v13 = vld [vmem:[%s3710_s17 + $0x400] sm:$0xf0]  ;;  %v2940_v20 = vor.u32 %v3518_v10, %v2939_v8  ;;  %v3564_v8 = vld [vmem:[%s3710_s17 + $0x56c] sm:$0xf0] }
  0xbe   : > { %1998 = vmatpush.bf16.msra.mxu3 %v2936_v17  ;;  %v3497_v17 = vld [vmem:[%s3710_s17 + $0x35c] sm:$0xf]  ;;  %v2944_v21 = vor.u32 %v3496_v11, %v2941_v13  ;;  %v3542_v10 = vld [vmem:[%s3710_s17 + $0x4c4] sm:$0xf]  ;;  %v3133_v13 = vld [vmem:[%s3710_s17 + $0x570] sm:$0xf0] }
  0xbf   : > { %v2952_v27 = vor.u32 %v3497_v17, %v2949_v18  ;;  %v3543_v18 = vld [vmem:[%s3710_s17 + $0x4cc] sm:$0xf] }
  0xc0   : > { %1957 = vmatpush.bf16.msra.mxu0 %v2748_v24  ;;  %v3474_v24 = vld [vmem:[%s3710_s17 + $0x29c] sm:$0xf0]  ;;  %v4212_v33 = vpop.f32.mrf.mxu2  ;;  %v4224_v49 = vpop.f32.mrf.mxu0 }
  0xc1   : > { %1971 = vmatpush.bf16.msra.mxu1 %v2752_v29  ;;  %1985 = vmatpush.bf16.msra.mxu2 %v2756_v30  ;;  %v2771_v29 = vld [vmem:[%s3710_s17 + $0x1f8] sm:$0xf]  ;;  %v3475_v30 = vld [vmem:[%s3710_s17 + $0x2a4] sm:$0xf0] }
  0xc2   : > { %1999 = vmatpush.bf16.msra.mxu3 %v2760_v34  ;;  %v2764_v34 = vor.u32 %v3474_v24, %v2763_v5  ;;  %v4214_v35 = vpop.f32.mrf.mxu3  ;;  %v2772_v40 = vor.u32 %v3475_v30, %v2771_v29  ;;  %v3140_v5 = vor.u32 %v3565_v15, %v3139_v14  ;;  %v2955_v24 = vld [vmem:[%s3710_s17 + $0x360] sm:$0xf]  ;;  %v2957_v29 = vld [vmem:[%s3710_s17 + $0x410] sm:$0xf0]  ;;  %v2963_v30 = vld [vmem:[%s3710_s17 + $0x368] sm:$0xf] }
  0xc4   : > { %1958 = vmatpush.bf16.msra.mxu0 %v2572_v43  ;;  %v2589_v43 = vld [vmem:[%s3710_s17 + $0x140] sm:$0xf0] }
  0xc5   : > { %1972 = vmatpush.bf16.msra.mxu1 %v2576_v47  ;;  %1986 = vmatpush.bf16.msra.mxu2 %v2580_v48  ;;  %v3409_v47 = vld [vmem:[%s3710_s17 + $0x9c] sm:$0xf]  ;;  %v2597_v48 = vld [vmem:[%s3710_s17 + $0x148] sm:$0xf0] }
  0xc6   : > { %2000 = vmatpush.bf16.msra.mxu3 %v2584_v51  ;;  %v3608_v51 = vld [vmem:[%s3710_s17 + $0x6cc] sm:$0xf0]  ;;  %v2600_v0 = vor.u32 %v3409_v47, %v2597_v48  ;;  %v2781_v47 = vld [vmem:[%s3710_s17 + $0x2b0] sm:$0xf0]  ;;  %v2787_v48 = vld [vmem:[%s3710_s17 + $0x208] sm:$0xf] }
  0xc7   : > { %3353 = vmatmul.msk.bf16.vlgmr.msra.gmra.mxu0 %vm1499_vm0, %v4067_v3  ;;  %v3308_v1 = vor.u32 %v3608_v51, %v3307_v50  ;;  %v3477_v50 = vld [vmem:[%s3710_s17 + $0x2b4] sm:$0xf0]  ;;  %v3455_v51 = vld [vmem:[%s3710_s17 + $0x20c] sm:$0xf] }
  0xc8   : > { %2010 = vmatpush.bf16.msrb.mxu0 %v3292_v52  ;;  %3354 = vmatmul.msk.bf16.vlgmr.msra.gmra.mxu1 %vm1499_vm0, %v4067_v3  ;;  %v3586_v52 = vld [vmem:[%s3710_s17 + $0x624] sm:$0xf]  ;;  %v4239_v11 = vpop.f32.mrf.mxu2 }
  0xc9   : > { %2024 = vmatpush.bf16.msrb.mxu1 %v3296_v53  ;;  %2038 = vmatpush.bf16.msrb.mxu2 %v3300_v54  ;;  %v4229_v53 = vpop.f32.mrf.mxu1  ;;  %v2588_v54 = vor.u32 %v3430_v37, %v2587_v36  ;;  %v2965_v36 = vld [vmem:[%s3710_s17 + $0x418] sm:$0xf0] }
  0xca   : > { %2052 = vmatpush.bf16.msrb.mxu3 %v3304_v59  ;;  %3355 = vmatmul.msk.bf16.vlgmr.msra.gmra.mxu2 %vm1499_vm0, %v4067_v3  ;;  %v2592_v59 = vor.u32 %v3408_v41, %v2589_v43  ;;  %v4244_v17 = vpop.f32.mrf.mxu3  ;;  %v2964_v41 = vor.u32 %v3521_v31, %v2963_v30  ;;  %v2779_v43 = vld [vmem:[%s3710_s17 + $0x200] sm:$0xf] }
  0xcb   : > { %3356 = vmatmul.msk.bf16.vlgmr.msra.gmra.mxu3 %vm1499_vm0, %v4067_v3  ;;  %4640 = vst [vmem:[#allocation2_spill] sm:$0xff] %v4244_v17 }
  0xcc   : > { %2011 = vmatpush.bf16.msrb.mxu0 %v3116_v2  ;;  %v3312_v2 = vor.u32 %v3586_v52, %v3309_v55  ;;  %v4256_v32 = vpop.f32.mrf.mxu0  ;;  %v2789_v52 = vld [vmem:[%s3710_s17 + $0x2b8] sm:$0xf0]  ;;  %v2780_v55 = vor.u32 %v3476_v44, %v2779_v43 }
  0xcd   : > { %2025 = vmatpush.bf16.msrb.mxu1 %v3120_v4  ;;  %2039 = vmatpush.bf16.msrb.mxu2 %v3124_v7  ;;  %v3316_v4 = vor.u32 %v3609_v57, %v3315_v56  ;;  %v3131_v7 = vld [vmem:[%s3710_s17 + $0x4c0] sm:$0xf] }
  0xce   : > { %2053 = vmatpush.bf16.msrb.mxu3 %v3128_v12  ;;  %v3320_v12 = vor.u32 %v3587_v61, %v3317_v62  ;;  %v2603_v61 = vld [vmem:[%s3710_s17 + $0xa0] sm:$0xf]  ;;  %v3432_v62 = vld [vmem:[%s3710_s17 + $0x14c] sm:$0xf0] }
  0xcf   : > { %v2604_v14 = vor.u32 %v3432_v62, %v2603_v61 }
  0xd0   : > { %2012 = vmatpush.bf16.msrb.mxu0 %v2940_v20  ;;  %v3141_v20 = vld [vmem:[%s3710_s17 + $0x578] sm:$0xf0] }
  0xd1   : > { %2026 = vmatpush.bf16.msrb.mxu1 %v2944_v21  ;;  %2040 = vmatpush.bf16.msrb.mxu2 %v2948_v22  ;;  %v3132_v21 = vor.u32 %v3564_v8, %v3131_v7  ;;  %v3136_v22 = vor.u32 %v3542_v10, %v3133_v13  ;;  %v3144_v28 = vor.u32 %v3543_v18, %v3141_v20  ;;  %v4264_v37 = vpop.f32.mrf.mxu1  ;;  %v3433_v7 = vld [vmem:[%s3710_s17 + $0x154] sm:$0xf0]  ;;  %v3411_v10 = vld [vmem:[%s3710_s17 + $0xac] sm:$0xf] }
  0xd2   : > { %2054 = vmatpush.bf16.msrb.mxu3 %v2952_v27  ;;  %v3498_v27 = vld [vmem:[%s3710_s17 + $0x364] sm:$0xf]  ;;  %4641 = vst [vmem:[#allocation3_spill] sm:$0xff] %v4264_v37 }
  0xd4   : > { %2013 = vmatpush.bf16.msrb.mxu0 %v2764_v34  ;;  %v3499_v34 = vld [vmem:[%s3710_s17 + $0x36c] sm:$0xf]  ;;  %v4288_v8 = vpop.f32.mrf.mxu0 }
  0xd5   : > { %2027 = vmatpush.bf16.msrb.mxu1 %v2768_v39  ;;  %2041 = vmatpush.bf16.msrb.mxu2 %v2772_v40  ;;  %v2956_v39 = vor.u32 %v3520_v26, %v2955_v24  ;;  %v2960_v40 = vor.u32 %v3498_v27, %v2957_v29  ;;  %v2968_v46 = vor.u32 %v3499_v34, %v2965_v36 }
  0xd6   : > { %2055 = vmatpush.bf16.msrb.mxu3 %v2776_v45  ;;  %v3454_v45 = vld [vmem:[%s3710_s17 + $0x204] sm:$0xf]  ;;  %v4278_v56 = vpop.f32.mrf.mxu3  ;;  %4643 = vst [vmem:[#allocation5_spill] sm:$0xff] %v4288_v8 }
  0xd7   : > { %v2784_v57 = vor.u32 %v3454_v45, %v2781_v47 }
  0xd8   : > { %2014 = vmatpush.bf16.msrb.mxu0 %v2588_v54  ;;  %v4276_v54 = vpop.f32.mrf.mxu2 }
  0xd9   : > { %2028 = vmatpush.bf16.msrb.mxu1 %v2592_v59  ;;  %2042 = vmatpush.bf16.msrb.mxu2 %v2596_v60  ;;  %4642 = vst [vmem:[#allocation4_spill] sm:$0xff] %v4276_v54  ;;  %v2788_v59 = vor.u32 %v3477_v50, %v2787_v48  ;;  %v4292_v13 = vpop.f32.mrf.mxu1 }
  0xda   : > { %2056 = vmatpush.bf16.msrb.mxu3 %v2600_v0  ;;  %v3410_v0 = vld [vmem:[%s3710_s17 + $0xa4] sm:$0xf]  ;;  %4644 = vst [vmem:[#allocation6_spill] sm:$0xff] %v4292_v13 }
  0xdb   : > { %3357 = vmatmul.msk.bf16.vlgmr.msrb.gmra.mxu0 %vm1499_vm0, %v4067_v3 }
  0xdc   : > { %2066 = vmatpush.bf16.msra.mxu0 %v3308_v1  ;;  %3358 = vmatmul.msk.bf16.vlgmr.msrb.gmra.mxu1 %vm1499_vm0, %v4067_v3  ;;  %v2792_v1 = vor.u32 %v3455_v51, %v2789_v52 }
  0xdd   : > { %2080 = vmatpush.bf16.msra.mxu1 %v3312_v2  ;;  %2094 = vmatpush.bf16.msra.mxu2 %v3316_v4  ;;  %v2605_v2 = vld [vmem:[%s3710_s17 + $0x150] sm:$0xf0]  ;;  %v2611_v4 = vld [vmem:[%s3710_s17 + $0xa8] sm:$0xf] }
  0xde   : > { %2108 = vmatpush.bf16.msra.mxu3 %v3320_v12  ;;  %3359 = vmatmul.msk.bf16.vlgmr.msrb.gmra.mxu2 %vm1499_vm0, %v4067_v3  ;;  %v2613_v12 = vld [vmem:[%s3710_s17 + $0x158] sm:$0xf0]  ;;  %v2608_v15 = vor.u32 %v3410_v0, %v2605_v2  ;;  %v2612_v18 = vor.u32 %v3433_v7, %v2611_v4 }
  0xdf   : > { %3360 = vmatmul.msk.bf16.vlgmr.msrb.gmra.mxu3 %vm1499_vm0, %v4067_v3  ;;  %v2616_v20 = vor.u32 %v3411_v10, %v2613_v12 }
  0xe0   : > { %2067 = vmatpush.bf16.msra.mxu0 %v3132_v21  ;;  %v4294_v21 = vpop.f32.mrf.mxu2  ;;  %v4302_v24 = vpop.f32.mrf.mxu0 }
  0xe1   : > { %2081 = vmatpush.bf16.msra.mxu1 %v3136_v22  ;;  %2095 = vmatpush.bf16.msra.mxu2 %v3140_v5  ;;  %4645 = vst [vmem:[#allocation7_spill] sm:$0xff] %v4294_v21  ;;  %v4296_v22 = vpop.f32.mrf.mxu3  ;;  %v4310_v27 = vpop.f32.mrf.mxu1 }
  0xe2   : > { %2109 = vmatpush.bf16.msra.mxu3 %v3144_v28 }
  0xe4   : > { %2068 = vmatpush.bf16.msra.mxu0 %v2956_v39 }
  0xe5   : > { %2082 = vmatpush.bf16.msra.mxu1 %v2960_v40  ;;  %2096 = vmatpush.bf16.msra.mxu2 %v2964_v41 }
  0xe6   : > { %2110 = vmatpush.bf16.msra.mxu3 %v2968_v46 }
  0xe8   : > { %2069 = vmatpush.bf16.msra.mxu0 %v2780_v55  ;;  %v4322_v34 = vpop.f32.mrf.mxu0 }
  0xe9   : > { %2083 = vmatpush.bf16.msra.mxu1 %v2784_v57  ;;  %2097 = vmatpush.bf16.msra.mxu2 %v2788_v59  ;;  %v4316_v29 = vpop.f32.mrf.mxu2  ;;  %v4328_v40 = vpop.f32.mrf.mxu1 }
  0xea   : > { %2111 = vmatpush.bf16.msra.mxu3 %v2792_v1  ;;  %v4320_v31 = vpop.f32.mrf.mxu3 }
  0xec   : > { %2070 = vmatpush.bf16.msra.mxu0 %v2604_v14 }
  0xed   : > { %2084 = vmatpush.bf16.msra.mxu1 %v2608_v15  ;;  %2098 = vmatpush.bf16.msra.mxu2 %v2612_v18 }
  0xee   : > { %2112 = vmatpush.bf16.msra.mxu3 %v2616_v20 }
  0xef   : > { %3361 = vmatmul.msk.bf16.vlgmr.msra.gmra.mxu0 %vm1499_vm0, %v4067_v3 }
  0xf0   : > { %3362 = vmatmul.msk.bf16.vlgmr.msra.gmra.mxu1 %vm1499_vm0, %v4067_v3  ;;  %3363 = vmatmul.msk.bf16.vlgmr.msra.gmra.mxu2 %vm1499_vm0, %v4067_v3 }
  0xf1   : > { %3364 = vmatmul.msk.bf16.vlgmr.msra.gmra.mxu3 %vm1499_vm0, %v4067_v3  ;;  %v4332_v41 = vpop.f32.mrf.mxu2 }
  0xf2   : > { %v4336_v44 = vpop.f32.mrf.mxu3 }
  0xf4   : > { %v4340_v46 = vpop.f32.mrf.mxu0 }
  0xf5   : > { %v4344_v48 = vpop.f32.mrf.mxu1 }
  0xfc   : > { %v4354_v57 = vpop.f32.mrf.mxu0 }
  0xfd   : > { %v4348_v51 = vpop.f32.mrf.mxu2  ;;  %v4360_v62 = vpop.f32.mrf.mxu1 }
  0xfe   : > { %v4352_v55 = vpop.f32.mrf.mxu3 }
 0x105   : > { %v4364_v1 = vpop.f32.mrf.mxu2 }
 0x106   : > { %4646 = vst [vmem:[#allocation8_spill] sm:$0xff] %v4364_v1  ;;  %v4368_v4 = vpop.f32.mrf.mxu3 }
 0x107   : > { %4647 = vst [vmem:[#allocation9_spill] sm:$0xff] %v4368_v4  ;;  %v4657_v4 = vmax.f32 %v4122_v6, %v4278_v56  ;;  %v4659_v6 = vmax.f32 %v4145_v23, %v4310_v27 }
 0x108   : > { %v4372_v10 = vpop.f32.mrf.mxu0 }
 0x109   : > { %4648 = vst [vmem:[#allocation10_spill] sm:$0xff] %v4372_v10  ;;  %v4376_v14 = vpop.f32.mrf.mxu1 }
 0x10a   : > { %4649 = vst [vmem:[#allocation11_spill] sm:$0xff] %v4376_v14 }
 0x110   : > { %v4380_v59 = vpop.f32.mrf.mxu0 }
 0x111   : > { %v1820_v18 = vpop.f32.mrf.mxu2  ;;  %4650 = vst [vmem:[#allocation12_spill] sm:$0xff] %v4380_v59  ;;  %v4384_v52 = vpop.f32.mrf.mxu1 }
 0x112   : > { %v1834_v20 = vpop.f32.mrf.mxu3  ;;  %4651 = vst [vmem:[#allocation13_spill] sm:$0xff] %v4384_v52 }
 0x119   : > { %v1822_v0 = vpop.f32.mrf.mxu2 }
 0x11a   : > { %v1836_v61 = vpop.f32.mrf.mxu3 }
 0x11c   : > { %v1848_v12 = vpop.f32.mrf.mxu0  ;;  %v4414_v59 = vpop.permute.xlu0 %2189 }
 0x11f   : > { %v1862_v45 = vpop.f32.mrf.mxu1 }
 0x123   : > { %v1876_v43 = vpop.f32.mrf.mxu2 }
 0x124   : > { %v1850_v15 = vpop.f32.mrf.mxu0 }
 0x126   : > { %v4388_v50 = vpop.f32.mrf.mxu3 }
 0x127   : > { %v4390_v47 = vpop.f32.mrf.mxu1 }
 0x12b   : > { %v4392_v36 = vpop.f32.mrf.mxu2 }
 0x12e   : > { %v4394_v30 = vpop.f32.mrf.mxu3 }
 0x130   : > { %v4396_v2 = vpop.f32.mrf.mxu0 }
 0x133   : > { %v4398_v3 = vpop.f32.mrf.mxu1 }
 0x137   : > { %v4400_v39 = vpop.f32.mrf.mxu2 }
 0x138   : > { %v4404_v5 = vpop.f32.mrf.mxu0 }
 0x13a   : > { %v4402_v7 = vpop.f32.mrf.mxu3 }
 0x13b   : > { %4652 = vst [vmem:[#allocation14_spill] sm:$0xff] %v4402_v7  ;;  %v4406_v28 = vpop.f32.mrf.mxu1 }
 0x13c   : > { %4653 = vst [vmem:[#allocation15_spill] sm:$0xff] %v4406_v28 }
 0x13f   : > { %v4408_v26 = vpop.f32.mrf.mxu2 }
 0x140   : > { %4654 = vst [vmem:[#allocation16_spill] sm:$0xff] %v4408_v26 }
 0x142   : > { %v4410_v60 = vpop.f32.mrf.mxu3 }
 0x143   : > { %4655 = vst [vmem:[#allocation17_spill] sm:$0xff] %v4410_v60 }
 0x144   : > { %v4412_v52 = vpop.f32.mrf.mxu0 }
 0x145   : > { %4656 = vst [vmem:[#allocation18_spill] sm:$0xff] %v4412_v52  ;;  %v1974_v21 = vpop.f32.mrf.mxu1  ;;  %v4658_v52 = vmax.f32 %v4130_v9, %v4302_v24 }
 0x146   : > { %v2141_v13 = vmax.f32 %v1820_v18, %v1974_v21 }
 0x148   : > { %v2163_v8 = vmax.f32 %v4657_v4, %v2141_v13  ;;  %v4428_v13 = vpop.permute.xlu0 %2194 }
 0x14a   : > { %v2197_v1 = vadd.f32 %v4414_v59, %v2163_v8  ;;  %v4660_v8 = vmax.f32 %v4158_v38, %v4296_v22  ;;  %v4661_v38 = vmax.f32 %v4163_v42, %v4322_v34  ;;  %v4664_v42 = vmax.f32 %v4192_v16, %v4320_v31 }
 0x14c   : > { %v2241_v54 = vmin.f32 %v2197_v1, 0.0  ;;  %v4420_v10 = vpop.f32.mrf.mxu0  ;;  %vm2219_vm1 = vcmp.gt.f32.partialorder %v2197_v1, 0.0 }
 0x14d   : > { %v1988_v17 = vpop.f32.mrf.mxu2  ;;  %v1976_v60 = vpop.f32.mrf.mxu1 }
 0x14e   : > { %v2142_v14 = vmax.f32 %v1834_v20, %v1988_v17  ;;  %v2002_v28 = vpop.f32.mrf.mxu3  ;;  %v2263_v7 = vmul.f32 1.442695, %v2241_v54  ;;  %v2152_v21 = vmax.f32 %v1822_v0, %v1976_v60 }
 0x14f   : > { %v2143_v26 = vmax.f32 %v1848_v12, %v2002_v28 }
 0x150   : > { %v2164_v37 = vmax.f32 %v4658_v52, %v2142_v14  ;;  %v2174_v4 = vmax.f32 %v4660_v8, %v2152_v21  ;;  %3622 = vpow2.f32 %v2263_v7 }
 0x151   : > { %v2165_v56 = vmax.f32 %v4659_v6, %v2143_v26 }
 0x152   : > { %v2198_v17 = vadd.f32 %v4414_v59, %v2164_v37  ;;  %v4438_v9 = vadd.f32 %v4428_v13, %v2174_v4 }
 0x153   : > { %v4435_v28 = vadd.f32 %v4414_v59, %v2165_v56 }
 0x154   : > { %v2242_v12 = vmin.f32 %v2198_v17, 0.0  ;;  %v2252_v26 = vmin.f32 %v4438_v9, 0.0  ;;  %vm2220_vm2 = vcmp.gt.f32.partialorder %v2198_v17, 0.0  ;;  %vm2230_vm3 = vcmp.gt.f32.partialorder %v4438_v9, 0.0 }
 0x155   : > { %v1990_v54 = vpop.f32.mrf.mxu2  ;;  %v2243_v23 = vmin.f32 %v4435_v28, 0.0  ;;  %vm2221_vm5 = vcmp.gt.f32.partialorder %v4435_v28, 0.0 }
 0x156   : > { %v2265_v60 = vmul.f32 1.442695, %v2242_v12  ;;  %v2153_v24 = vmax.f32 %v1836_v61, %v1990_v54  ;;  %v2004_v37 = vpop.f32.mrf.mxu3  ;;  %v2285_v52 = vmul.f32 1.442695, %v2252_v26  ;;  %v3623_v18 = vpop.eup %3622  ;;  %v4662_v61 = vmax.f32 %v4175_v58, %v4328_v40 }
 0x157   : > { %v2154_v27 = vmax.f32 %v1850_v15, %v2004_v37  ;;  %v2267_v20 = vmul.f32 1.442695, %v2243_v23  ;;  %v4663_v15 = vmax.f32 %v4147_v25, %v4316_v29 }
 0x158   : > { %3624 = vpow2.f32 %v2265_v60  ;;  %v2175_v22 = vmax.f32 %v4661_v38, %v2153_v24  ;;  %v2016_v0 = vpop.f32.mrf.mxu0 }
 0x159   : > { %v2144_v7 = vmax.f32 %v1862_v45, %v2016_v0  ;;  %v2030_v14 = vpop.f32.mrf.mxu1  ;;  %v2176_v6 = vmax.f32 %v4662_v61, %v2154_v27  ;;  %3626 = vpow2.f32 %v2285_v52  ;;  %v3365_v45 = vadd.f32 -1.0, %v3623_v18 }
 0x15a   : > { %v2209_v21 = vadd.f32 %v4428_v13, %v2175_v22  ;;  %v2145_v56 = vmax.f32 %v1876_v43, %v2030_v14  ;;  %3628 = vpow2.f32 %v2267_v20 }
 0x15b   : > { %v2166_v8 = vmax.f32 %v4663_v15, %v2144_v7  ;;  %v4460_v40 = vadd.f32 %v4428_v13, %v2176_v6  ;;  %v2329_v24 = vsel %vm2219_vm1, %v2197_v1, %v3365_v45  ;;  %v4665_v1 = vmax.f32 %v4200_v19, %v4340_v46 }
 0x15c   : > { %v2253_v4 = vmin.f32 %v2209_v21, 0.0  ;;  %v2167_v34 = vmax.f32 %v4664_v42, %v2145_v56  ;;  %v4666_v56 = vmax.f32 %v4212_v33, %v4344_v48  ;;  %v4668_v19 = vmax.f32 %v4224_v49, %v4336_v44 }
 0x15d   : > { %v4457_v12 = vadd.f32 %v4414_v59, %v2166_v8  ;;  %v2254_v52 = vmin.f32 %v4460_v40, 0.0  ;;  %vm2231_vm4 = vcmp.gt.f32.partialorder %v2209_v21, 0.0  ;;  %vm2232_vm7 = vcmp.gt.f32.partialorder %v4460_v40, 0.0 }
 0x15e   : > { %v3625_v54 = vpop.eup %3624  ;;  %v2287_v58 = vmul.f32 1.442695, %v2253_v4  ;;  %v4463_v25 = vadd.f32 %v4414_v59, %v2167_v34 }
 0x15f   : > { %v3366_v29 = vadd.f32 -1.0, %v3625_v54  ;;  %v2244_v43 = vmin.f32 %v4457_v12, 0.0  ;;  %v3627_v38 = vpop.eup %3626  ;;  %v2289_v4 = vmul.f32 1.442695, %v2254_v52  ;;  %vm2222_vm6 = vcmp.gt.f32.partialorder %v4457_v12, 0.0 }
 0x160   : > { %3630 = vpow2.f32 %v2287_v58  ;;  %v2245_v16 = vmin.f32 %v4463_v25, 0.0  ;;  %v2018_v23 = vpop.f32.mrf.mxu0  ;;  %v3629_v20 = vpop.eup %3628  ;;  %v3376_v6 = vadd.f32 -1.0, %v3627_v38  ;;  %vm2223_vm8 = vcmp.gt.f32.partialorder %v4463_v25, 0.0 }
 0x161   : > { %v2044_v60 = vpop.f32.mrf.mxu2  ;;  %v2330_v26 = vsel %vm2220_vm2, %v2198_v17, %v3366_v29  ;;  %v2269_v37 = vmul.f32 1.442695, %v2244_v43  ;;  %v2032_v27 = vpop.f32.mrf.mxu1  ;;  %v2155_v18 = vmax.f32 %v4390_v47, %v2018_v23  ;;  %v3367_v42 = vadd.f32 -1.0, %v3629_v20 }
 0x162   : > { %v2058_v31 = vpop.f32.mrf.mxu3  ;;  %v2351_v22 = vpack.c.bf16 %v2330_v26, %v2329_v24  ;;  %v2146_v0 = vmax.f32 %v4388_v50, %v2044_v60  ;;  %v2271_v7 = vmul.f32 1.442695, %v2245_v16  ;;  %v2156_v61 = vmax.f32 %v4392_v36, %v2032_v27 }
 0x163   : > { %3632 = vpow2.f32 %v2269_v37  ;;  %v2147_v14 = vmax.f32 %v4396_v2, %v2058_v31  ;;  %v4667_v50 = vmax.f32 %v4180_v63, %v4332_v41  ;;  %v2340_v49 = vsel %vm2230_vm3, %v4438_v9, %v3376_v6 }
 0x164   : > { %2363 = vst [vmem:[%s4470_s29] sm:$0xff] %v2351_v22  ;;  %v2168_v17 = vmax.f32 %v4665_v1, %v2146_v0  ;;  %v2178_v46 = vmax.f32 %v4668_v19, %v2156_v61  ;;  %3634 = vpow2.f32 %v2271_v7  ;;  %v2331_v60 = vsel %vm2221_vm5, %v4435_v28, %v3367_v42  ;;  %v4673_v61 = vld [vmem:[#allocation14_spill] sm:$0xff] }
 0x165   : > { %v2169_v15 = vmax.f32 %v4666_v56, %v2147_v14  ;;  %v2177_v8 = vmax.f32 %v4667_v50, %v2155_v18  ;;  %3636 = vpow2.f32 %v2289_v4  ;;  %v4669_v22 = vmax.f32 %v4229_v53, %v4354_v57  ;;  %v4675_v4 = vld [vmem:[#allocation10_spill] sm:$0xff] }
 0x166   : > { %v3631_v2 = vpop.eup %3630  ;;  %v4488_v47 = vadd.f32 %v4414_v59, %v2168_v17  ;;  %v4499_v41 = vadd.f32 %v4428_v13, %v2178_v46  ;;  %v4670_v20 = vmax.f32 %v4239_v11, %v4360_v62  ;;  %v4672_v17 = vmax.f32 %v4256_v32, %v4352_v55  ;;  %v4677_v42 = vld [vmem:[#allocation18_spill] sm:$0xff] }
 0x167   : > { %v3377_v36 = vadd.f32 -1.0, %v3631_v2  ;;  %v4494_v34 = vadd.f32 %v4428_v13, %v2177_v8  ;;  %v4504_v54 = vadd.f32 %v4414_v59, %v2169_v15  ;;  %v4674_v2 = vld [vmem:[#allocation3_spill] sm:$0xff] }
 0x168   : > { %v2246_v63 = vmin.f32 %v4488_v47, 0.0  ;;  %v2256_v9 = vmin.f32 %v4499_v41, 0.0  ;;  %vm2224_vm9 = vcmp.gt.f32.partialorder %v4488_v47, 0.0  ;;  %v4676_v19 = vmax.f32 %v4674_v2, %v4675_v4 }
 0x169   : > { %v2046_v33 = vpop.f32.mrf.mxu2  ;;  %v3633_v45 = vpop.eup %3632  ;;  %v2341_v44 = vsel %vm2231_vm4, %v2209_v21, %v3377_v36  ;;  %v2255_v16 = vmin.f32 %v4494_v34, 0.0  ;;  %v2247_v27 = vmin.f32 %v4504_v54, 0.0  ;;  %vm2233_vm10 = vcmp.gt.f32.partialorder %v4494_v34, 0.0 }
 0x16a   : > { %v2060_v48 = vpop.f32.mrf.mxu3  ;;  %v2357_v58 = vpack.c.bf16 %v2341_v44, %v2340_v49  ;;  %v3368_v29 = vadd.f32 -1.0, %v3633_v45  ;;  %v2273_v43 = vmul.f32 1.442695, %v2246_v63  ;;  %v2157_v21 = vmax.f32 %v4394_v30, %v2046_v33  ;;  %v3635_v26 = vpop.eup %3634 }
 0x16b   : > { %v2291_v28 = vmul.f32 1.442695, %v2255_v16  ;;  %v2293_v38 = vmul.f32 1.442695, %v2256_v9  ;;  %v2158_v0 = vmax.f32 %v4404_v5, %v2060_v48  ;;  %v3637_v7 = vpop.eup %3636  ;;  %v3369_v14 = vadd.f32 -1.0, %v3635_v26  ;;  %v4679_v9 = vld [vmem:[#allocation11_spill] sm:$0xff] }
 0x16c   : > { %v2072_v31 = vpop.f32.mrf.mxu0  ;;  %2369 = vst [vmem:[%s4470_s29 + $0x2c] sm:$0xff] %v2357_v58  ;;  %v2332_v23 = vsel %vm2222_vm6, %v4457_v12, %v3368_v29  ;;  %3638 = vpow2.f32 %v2273_v43  ;;  %v2179_v52 = vmax.f32 %v4669_v22, %v2157_v21  ;;  %v4671_v5 = vmax.f32 %v4214_v35, %v4348_v51  ;;  %v4681_v26 = vld [vmem:[#allocation15_spill] sm:$0xff] }
 0x16d   : > { %v2086_v24 = vpop.f32.mrf.mxu1  ;;  %v2352_v37 = vpack.c.bf16 %v2332_v23, %v2331_v60  ;;  %v2148_v12 = vmax.f32 %v4398_v3, %v2072_v31  ;;  %3640 = vpow2.f32 %v2291_v28  ;;  %v2180_v53 = vmax.f32 %v4670_v20, %v2158_v0  ;;  %v4678_v23 = vld [vmem:[#allocation4_spill] sm:$0xff] }
 0x16e   : > { %v2149_v30 = vmax.f32 %v4400_v39, %v2086_v24  ;;  %v4523_v18 = vadd.f32 %v4428_v13, %v2179_v52  ;;  %v2275_v1 = vmul.f32 1.442695, %v2247_v27  ;;  %3642 = vpow2.f32 %v2293_v38 }
 0x16f   : > { %2364 = vst [vmem:[%s4470_s29 + $0x8] sm:$0xff] %v2352_v37  ;;  %v2170_v57 = vmax.f32 %v4671_v5, %v2148_v12  ;;  %v4538_v62 = vadd.f32 %v4428_v13, %v2180_v53  ;;  %v3378_v51 = vadd.f32 -1.0, %v3637_v7  ;;  %v2333_v63 = vsel %vm2223_vm8, %v4463_v25, %v3369_v14  ;;  %v4683_v7 = vld [vmem:[#allocation8_spill] sm:$0xff] }
 0x170   : > { %v2171_v39 = vmax.f32 %v4672_v17, %v2149_v30  ;;  %v2257_v11 = vmin.f32 %v4523_v18, 0.0  ;;  %3644 = vpow2.f32 %v2275_v1  ;;  %v4680_v21 = vmax.f32 %v4678_v23, %v4679_v9  ;;  %v4682_v30 = vld [vmem:[#allocation2_spill] sm:$0xff]  ;;  %v4685_v53 = vld [vmem:[#allocation16_spill] sm:$0xff] }
 0x171   : > { %v4541_v35 = vadd.f32 %v4414_v59, %v2170_v57  ;;  %v2258_v8 = vmin.f32 %v4538_v62, 0.0  ;;  %v2342_v43 = vsel %vm2232_vm7, %v4460_v40, %v3378_v51  ;;  %vm2234_vm11 = vcmp.gt.f32.partialorder %v4499_v41, 0.0  ;;  %v4686_v57 = vld [vmem:[#allocation17_spill] sm:$0xff] }
 0x172   : > { %v3639_v15 = vpop.eup %3638  ;;  %v4545_v32 = vadd.f32 %v4414_v59, %v2171_v39  ;;  %v2295_v55 = vmul.f32 1.442695, %v2257_v11  ;;  %vm2235_vm12 = vcmp.gt.f32.partialorder %v4523_v18, 0.0  ;;  %v4684_v14 = vmax.f32 %v4682_v30, %v4683_v7 }
 0x173   : > { %v2100_v3 = vpop.f32.mrf.mxu2  ;;  %v3370_v50 = vadd.f32 -1.0, %v3639_v15  ;;  %v3641_v33 = vpop.eup %3640  ;;  %v2248_v45 = vmin.f32 %v4541_v35, 0.0  ;;  %v2297_v60 = vmul.f32 1.442695, %v2258_v8  ;;  %v4688_v15 = vld [vmem:[#allocation9_spill] sm:$0xff]  ;;  %vm2225_vm13 = vcmp.gt.f32.partialorder %v4504_v54, 0.0 }
 0x174   : > { %v2150_v6 = vmax.f32 %v4673_v61, %v2100_v3  ;;  %v2114_v56 = vpop.f32.mrf.mxu3  ;;  %v2074_v49 = vpop.f32.mrf.mxu0  ;;  %v3379_v58 = vadd.f32 -1.0, %v3641_v33  ;;  %3646 = vpow2.f32 %v2295_v55  ;;  %v2249_v25 = vmin.f32 %v4545_v32, 0.0  ;;  %v4691_v55 = vld [vmem:[#allocation12_spill] sm:$0xff]  ;;  %v4693_v33 = vld [vmem:[#allocation7_spill] sm:$0xff] }
 0x175   : > { %v2151_v36 = vmax.f32 %v4677_v42, %v2114_v56  ;;  %v2334_v48 = vsel %vm2224_vm9, %v4488_v47, %v3370_v50  ;;  %v3643_v29 = vpop.eup %3642  ;;  %v2277_v16 = vmul.f32 1.442695, %v2248_v45  ;;  %v2159_v37 = vmax.f32 %v4681_v26, %v2074_v49  ;;  %v2088_v27 = vpop.f32.mrf.mxu1  ;;  %v4687_v56 = vld [vmem:[#allocation5_spill] sm:$0xff]  ;;  %v4690_v50 = vld [vmem:[#allocation6_spill] sm:$0xff] }
 0x176   : > { %v2172_v46 = vmax.f32 %v4676_v19, %v2150_v6  ;;  %v2353_v44 = vpack.c.bf16 %v2334_v48, %v2333_v63  ;;  %v2343_v47 = vsel %vm2233_vm10, %v4494_v34, %v3379_v58  ;;  %v2279_v38 = vmul.f32 1.442695, %v2249_v25  ;;  %v3645_v12 = vpop.eup %3644  ;;  %v4694_v63 = vld [vmem:[#allocation13_spill] sm:$0xff] }
 0x177   : > { %v2173_v24 = vmax.f32 %v4680_v21, %v2151_v36  ;;  %v2358_v40 = vpack.c.bf16 %v2343_v47, %v2342_v43  ;;  %v3380_v34 = vadd.f32 -1.0, %v3643_v29  ;;  %3648 = vpow2.f32 %v2277_v16 }
 0x178   : > { %2365 = vst [vmem:[%s4470_s29 + $0x10] sm:$0xff] %v2353_v44  ;;  %v4563_v31 = vadd.f32 %v4414_v59, %v2172_v46  ;;  %3650 = vpow2.f32 %v2279_v38  ;;  %v2181_v20 = vmax.f32 %v4684_v14, %v2159_v37  ;;  %v2160_v5 = vmax.f32 %v4685_v53, %v2088_v27 }
 0x179   : > { %v4573_v0 = vadd.f32 %v4414_v59, %v2173_v24  ;;  %2370 = vst [vmem:[%s4470_s29 + $0x34] sm:$0xff] %v2358_v40  ;;  %3652 = vpow2.f32 %v2297_v60  ;;  %v4689_v11 = vmax.f32 %v4687_v56, %v4688_v15  ;;  %v4692_v8 = vmax.f32 %v4690_v50, %v4691_v55 }
 0x17a   : > { %v2250_v52 = vmin.f32 %v4563_v31, 0.0  ;;  %v3647_v1 = vpop.eup %3646  ;;  %v2215_v6 = vadd.f32 %v4428_v13, %v2181_v20  ;;  %v3371_v4 = vadd.f32 -1.0, %v3645_v12  ;;  %v2344_v19 = vsel %vm2234_vm11, %v4499_v41, %v3380_v34 }
 0x17b   : > { %v2102_v28 = vpop.f32.mrf.mxu2  ;;  %v2251_v39 = vmin.f32 %v4573_v0, 0.0  ;;  %v3381_v59 = vadd.f32 -1.0, %v3647_v1  ;;  %v2182_v51 = vmax.f32 %v4689_v11, %v2160_v5  ;;  %v4695_v48 = vmax.f32 %v4693_v33, %v4694_v63 }
 0x17c   : > { %v2116_v22 = vpop.f32.mrf.mxu3  ;;  %v2161_v3 = vmax.f32 %v4686_v57, %v2102_v28  ;;  %v2281_v17 = vmul.f32 1.442695, %v2250_v52  ;;  %v2259_v42 = vmin.f32 %v2215_v6, 0.0  ;;  %vm2226_vm14 = vcmp.gt.f32.partialorder %v4541_v35, 0.0 }
 0x17d   : > { %v2162_v61 = vmax.f32 %v4420_v10, %v2116_v22  ;;  %v2283_v46 = vmul.f32 1.442695, %v2251_v39  ;;  %v2345_v10 = vsel %vm2235_vm12, %v4523_v18, %v3381_v59  ;;  %v2216_v36 = vadd.f32 %v4428_v13, %v2182_v51  ;;  %v3649_v49 = vpop.eup %3648 }
 0x17e   : > { %v2183_v2 = vmax.f32 %v4692_v8, %v2161_v3  ;;  %3654 = vpow2.f32 %v2281_v17  ;;  %v2359_v44 = vpack.c.bf16 %v2345_v10, %v2344_v19  ;;  %v3651_v41 = vpop.eup %3650  ;;  %v3372_v29 = vadd.f32 -1.0, %v3649_v49 }
 0x17f   : > { %v2184_v45 = vmax.f32 %v4695_v48, %v2162_v61  ;;  %3656 = vpow2.f32 %v2283_v46  ;;  %v2299_v43 = vmul.f32 1.442695, %v2259_v42  ;;  %v2260_v60 = vmin.f32 %v2216_v36, 0.0  ;;  %v3653_v16 = vpop.eup %3652 }
 0x180   : > { %v2217_v58 = vadd.f32 %v4428_v13, %v2183_v2  ;;  %v2335_v18 = vsel %vm2225_vm13, %v4504_v54, %v3371_v4  ;;  %2371 = vst [vmem:[%s4470_s29 + $0x3c] sm:$0xff] %v2359_v44  ;;  %v3373_v25 = vadd.f32 -1.0, %v3651_v41  ;;  %v2336_v23 = vsel %vm2226_vm14, %v4541_v35, %v3372_v29 }
 0x181   : > { %3658 = vpow2.f32 %v2299_v43  ;;  %v2301_v9 = vmul.f32 1.442695, %v2260_v60  ;;  %v2218_v21 = vadd.f32 %v4428_v13, %v2184_v45  ;;  %v2354_v26 = vpack.c.bf16 %v2336_v23, %v2335_v18 }
 0x182   : > { %v2261_v47 = vmin.f32 %v2217_v58, 0.0  ;;  %vm2227_vm15 = vcmp.gt.f32.partialorder %v4545_v32, 0.0  ;;  %vm2228_vm0 = vcmp.gt.f32.partialorder %v4563_v31, 0.0  ;;  %v3382_v22 = vadd.f32 -1.0, %v3653_v16 }
 0x183   : > { %3660 = vpow2.f32 %v2301_v9  ;;  %v2262_v28 = vmin.f32 %v2218_v21, 0.0  ;;  %2366 = vst [vmem:[%s4470_s29 + $0x18] sm:$0xff] %v2354_v26  ;;  %v2337_v35 = vsel %vm2227_vm15, %v4545_v32, %v3373_v25  ;;  %vm2229_vm1 = vcmp.gt.f32.partialorder %v4573_v0, 0.0 }
 0x184   : > { %v3655_v24 = vpop.eup %3654  ;;  %v2303_v37 = vmul.f32 1.442695, %v2261_v47  ;;  %vm2236_vm2 = vcmp.gt.f32.partialorder %v4538_v62, 0.0  ;;  %vm2237_vm3 = vcmp.gt.f32.partialorder %v2215_v6, 0.0  ;;  %vm2238_vm4 = vcmp.gt.f32.partialorder %v2216_v36, 0.0 }
 0x185   : > { %v3374_v27 = vadd.f32 -1.0, %v3655_v24  ;;  %v3657_v54 = vpop.eup %3656  ;;  %v2305_v13 = vmul.f32 1.442695, %v2262_v28  ;;  %vm2239_vm5 = vcmp.gt.f32.partialorder %v2217_v58, 0.0  ;;  %vm2240_vm6 = vcmp.gt.f32.partialorder %v2218_v21, 0.0 }
 0x186   : > { %3662 = vpow2.f32 %v2303_v37  ;;  %v3375_v38 = vadd.f32 -1.0, %v3657_v54 }
 0x187   : > { %v2338_v40 = vsel %vm2228_vm0, %v4563_v31, %v3374_v27  ;;  %v3659_v52 = vpop.eup %3658  ;;  %3664 = vpow2.f32 %v2305_v13  ;;  %v2346_v31 = vsel %vm2236_vm2, %v4538_v62, %v3382_v22 }
 0x188   : > { %v2355_v34 = vpack.c.bf16 %v2338_v40, %v2337_v35  ;;  %v2339_v12 = vsel %vm2229_vm1, %v4573_v0, %v3375_v38  ;;  %v3383_v7 = vadd.f32 -1.0, %v3659_v52 }
 0x189   : > { %v2356_v30 = vpack.c.bf16 %v2339_v12, %v2339_v12  ;;  %v3661_v14 = vpop.eup %3660 }
 0x18a   : > { %2367 = vst [vmem:[%s4470_s29 + $0x20] sm:$0xff] %v2355_v34  ;;  %v2347_v20 = vsel %vm2237_vm3, %v2215_v6, %v3383_v7  ;;  %v3384_v53 = vadd.f32 -1.0, %v3661_v14 }
 0x18b   : > { %2368 = vst [vmem:[%s4470_s29 + $0x28] sm:$0xf] %v2356_v30  ;;  %v2360_v5 = vpack.c.bf16 %v2347_v20, %v2346_v31 }
 0x18c   : > { %v3663_v32 = vpop.eup %3662  ;;  %v2348_v3 = vsel %vm2238_vm4, %v2216_v36, %v3384_v53 }
 0x18d   : > { %v3385_v57 = vadd.f32 -1.0, %v3663_v32  ;;  %v3665_v0 = vpop.eup %3664  ;;  %2372 = vst [vmem:[%s4470_s29 + $0x44] sm:$0xff] %v2360_v5 }
 0x18e   : > { %v3386_v39 = vadd.f32 -1.0, %v3665_v0 }
 0x18f   : > { %v2349_v1 = vsel %vm2239_vm5, %v2217_v58, %v3385_v57 }
 0x190   : > { %v2361_v17 = vpack.c.bf16 %v2349_v1, %v2348_v3  ;;  %v2350_v61 = vsel %vm2240_vm6, %v2218_v21, %v3386_v39 }
 0x191   : > { %v2362_v59 = vpack.c.bf16 %v2350_v61, %v2350_v61 }
 0x192   : > { %2373 = vst [vmem:[%s4470_s29 + $0x4c] sm:$0xff] %v2361_v17 }
 0x193   : > { %2374 = vst [vmem:[%s4470_s29 + $0x54] sm:$0xf] %v2362_v59 }
 0x194 PF: > { %s13_s12 = sadd.s32 1, %s3673_s12  }
 0x195   : > { %p10_p4 = scmp.ge.s32.totalorder %s13_s12, 4  }
 0x197   :  { %12 = sbr.rel (!%p10_p4) target bundleno = 1 (0x1), region = 62 }

// kernel: banana_pixels_forward.5
= control target key start
LH: loop header
LB: loop body
LE: loop exit
PB: predicated region body
PF: predicated region fallthrough
CT: control target
= control target key end

     0   :  { %s3340_s12 = smov 0   ;;  %s4061_s0 = inlined_call_operand.vmem [shape: bf16[2,400,1024], index: 0, kind: input, shape index: {}]   ;;  %s4062_s1 = inlined_call_operand.vmem [shape: bf16[32,400], index: 1, kind: input, shape index: {}]   ;;  %s4063_s2 = inlined_call_operand.vmem [shape: f32[32,1], index: 2, kind: input, shape index: {}]   ;;  %s4064_s3 = inlined_call_operand.vmem [shape: bf16[2,32,256], index: 3, kind: output, shape index: {}]  }
   0x1 LB: > { %s2200_s13 = sadd.s32 4294967295, %s3317_s12   ;;  %p2204_p0 = scmp.ge.s32.totalorder %s3317_s12, 1  ;;  %s3317_s12 = sphi %s3340_s12, %s13_s12  }
   0x2   : > { %p137_p1 = scmp.lt.s32.totalorder %s3317_s12, 3 }
   0x4   : > { %p138_p2 = pnand %p2204_p0, %p137_p1 }
   0x5   : > { %p161_p3 = scmp.lt.s32.totalorder (!%p138_p2), %s2200_s13, 1 }
   0x6   : > { %141 = sbr.rel (%p138_p2) target bundleno = 477 (0x1dd), region = 32 }
   0xb   : > { %s4066_s13 = smov (!%p161_p3, %s2200_s13), 1  ;;  %v3068_v0 = vld [vmem:[%s4062_s1 + $0xc] sm:$0xf]  ;;  %v2220_v1 = vld [vmem:[%s4062_s1 + $0x18] sm:$0xf0]  ;;  %vm1418_vm0 = vcmask 130048  }
   0xc   : > { %s3283_s14 = smul.u32 1600, %s4066_s13  ;;  %v3374_v18 = vor.u32 %v3068_v0, %v2220_v1  ;;  %v3072_v60 = vld [vmem:[%s4062_s1 + $0x2c] sm:$0xf]  ;;  %v2236_v62 = vld [vmem:[%s4062_s1 + $0x38] sm:$0xf0]  ;;  %s3066_s6 = sshll.u32 %s4066_s13, 5 }
   0xd   : > { %s4044_s13 = scalar_lea.vmem %s4064_s3, %s3066_s6 }
   0xe   : > { %s3354_s17 = scalar_lea.vmem %s4061_s0, %s3283_s14 }
   0xf   : > { %v2466_v2 = vld [vmem:[%s3354_s17 + $0x1c0] sm:$0xf]  ;;  %v3131_v23 = vld [vmem:[%s3354_s17 + $0x1c4] sm:$0xf] }
  0x10   : > { %v3135_v3 = vld [vmem:[%s3354_s17 + $0x1dc] sm:$0xf0]  ;;  %v2468_v25 = vld [vmem:[%s3354_s17 + $0x1e0] sm:$0xf0] }
  0x11   : > { %v2722_v4 = vld [vmem:[%s3354_s17 + $0x3c0] sm:$0xf]  ;;  %v2467_v5 = vor.u32 %v3135_v3, %v2466_v2  ;;  %v2471_v28 = vor.u32 %v3131_v23, %v2468_v25  ;;  %v3123_v34 = vld [vmem:[%s3354_s17 + $0x184] sm:$0xf] }
  0x12   : > { %v3199_v6 = vld [vmem:[%s3354_s17 + $0x3dc] sm:$0xf0]  ;;  %v2436_v35 = vld [vmem:[%s3354_s17 + $0x1a0] sm:$0xf0] }
  0x13   : > { %v2978_v7 = vld [vmem:[%s3354_s17 + $0x5c0] sm:$0xf]  ;;  %v2723_v9 = vor.u32 %v3199_v6, %v2722_v4  ;;  %1425 = vmatpush.bf16.msra.mxu0 %v2467_v5  ;;  %v2439_v40 = vor.u32 %v3123_v34, %v2436_v35  ;;  %v3115_v45 = vld [vmem:[%s3354_s17 + $0x144] sm:$0xf] }
  0x14   : > { %v3263_v8 = vld [vmem:[%s3354_s17 + $0x5dc] sm:$0xf0]  ;;  %v2404_v46 = vld [vmem:[%s3354_s17 + $0x160] sm:$0xf0] }
  0x15   : > { %v2979_v10 = vor.u32 %v3263_v8, %v2978_v7  ;;  %v3010_v11 = vld [vmem:[%s3354_s17 + $0x600] sm:$0xf]  ;;  %1444 = vmatpush.bf16.msra.mxu1 %v2723_v9  ;;  %v2407_v52 = vor.u32 %v3115_v45, %v2404_v46  ;;  %v3107_v57 = vld [vmem:[%s3354_s17 + $0x104] sm:$0xf]  ;;  %v2218_v45 = vld [vmem:[%s4062_s1 + $0x8] sm:$0xf] }
  0x16   : > { %v3271_v12 = vld [vmem:[%s3354_s17 + $0x61c] sm:$0xf0]  ;;  %v2372_v58 = vld [vmem:[%s3354_s17 + $0x120] sm:$0xf0]  ;;  %v3070_v46 = vld [vmem:[%s4062_s1 + $0x14] sm:$0xf0] }
  0x17   : > { %v2434_v13 = vld [vmem:[%s3354_s17 + $0x180] sm:$0xf]  ;;  %v3011_v14 = vor.u32 %v3271_v12, %v3010_v11  ;;  %1463 = vmatpush.bf16.msra.mxu2 %v2979_v10  ;;  %v2375_v2 = vor.u32 %v3107_v57, %v2372_v58  ;;  %v3099_v7 = vld [vmem:[%s3354_s17 + $0xc4] sm:$0xf]  ;;  %v3420_v10 = vor.u32 %v3072_v60, %v2236_v62  ;;  %v3136_v60 = vld [vmem:[%s3354_s17 + $0x1e4] sm:$0xf0] }
  0x18   : > { %v3127_v15 = vld [vmem:[%s3354_s17 + $0x19c] sm:$0xf0]  ;;  %v2340_v8 = vld [vmem:[%s3354_s17 + $0xe0] sm:$0xf0] }
  0x19   : > { %v2690_v16 = vld [vmem:[%s3354_s17 + $0x380] sm:$0xf]  ;;  %v2435_v19 = vor.u32 %v3127_v15, %v2434_v13  ;;  %1489 = vmatpush.bf16.msra.mxu3 %v3011_v14  ;;  %v2343_v15 = vor.u32 %v3099_v7, %v2340_v8  ;;  %v3195_v34 = vld [vmem:[%s3354_s17 + $0x3c4] sm:$0xf]  ;;  %v3128_v7 = vld [vmem:[%s3354_s17 + $0x1a4] sm:$0xf0] }
  0x1a   : > { %v3191_v17 = vld [vmem:[%s3354_s17 + $0x39c] sm:$0xf0]  ;;  %v2724_v35 = vld [vmem:[%s3354_s17 + $0x3e0] sm:$0xf0] }
  0x1b   : > { %v2691_v20 = vor.u32 %v3191_v17, %v2690_v16  ;;  %v2946_v21 = vld [vmem:[%s3354_s17 + $0x580] sm:$0xf]  ;;  %1426 = vmatpush.bf16.msra.mxu0 %v2435_v19  ;;  %v2692_v57 = vld [vmem:[%s3354_s17 + $0x3a0] sm:$0xf0] }
  0x1c   : > { %v3255_v22 = vld [vmem:[%s3354_s17 + $0x59c] sm:$0xf0]  ;;  %3040 = vmatmul.msk.bf16.vlgmr.msra.gmra.mxu3 %vm1418_vm0, %v3374_v18 }
  0x1d   : > { %v2947_v24 = vor.u32 %v3255_v22, %v2946_v21  ;;  %v2402_v26 = vld [vmem:[%s3354_s17 + $0x140] sm:$0xf]  ;;  %1445 = vmatpush.bf16.msra.mxu1 %v2691_v20  ;;  %1501 = vmatpush.bf16.msrb.mxu3 %v2471_v28  ;;  %v3091_v21 = vld [vmem:[%s3354_s17 + $0x84] sm:$0xf] }
  0x1e   : > { %v3119_v27 = vld [vmem:[%s3354_s17 + $0x15c] sm:$0xf0]  ;;  %v2308_v22 = vld [vmem:[%s3354_s17 + $0xa0] sm:$0xf0] }
  0x1f   : > { %v2658_v29 = vld [vmem:[%s3354_s17 + $0x340] sm:$0xf]  ;;  %v2403_v32 = vor.u32 %v3119_v27, %v2402_v26  ;;  %1464 = vmatpush.bf16.msra.mxu2 %v2947_v24 }
  0x20   : > { %v3183_v30 = vld [vmem:[%s3354_s17 + $0x35c] sm:$0xf0] }
  0x21   : > { %v2914_v31 = vld [vmem:[%s3354_s17 + $0x540] sm:$0xf]  ;;  %v2659_v36 = vor.u32 %v3183_v30, %v2658_v29  ;;  %1427 = vmatpush.bf16.msra.mxu0 %v2403_v32  ;;  %1502 = vmatpush.bf16.msrb.mxu3 %v2439_v40  ;;  %v2311_v32 = vor.u32 %v3091_v21, %v2308_v22  ;;  %v3067_v40 = vld [vmem:[%s4062_s1 + $0x4] sm:$0xf] }
  0x22   : > { %v3247_v33 = vld [vmem:[%s3354_s17 + $0x55c] sm:$0xf0]  ;;  %v2884_v22 = vld [vmem:[%s3354_s17 + $0x520] sm:$0xf0] }
  0x23   : > { %v2370_v37 = vld [vmem:[%s3354_s17 + $0x100] sm:$0xf]  ;;  %v2915_v39 = vor.u32 %v3247_v33, %v2914_v31  ;;  %1446 = vmatpush.bf16.msra.mxu1 %v2659_v36  ;;  %v3083_v33 = vld [vmem:[%s3354_s17 + $0x44] sm:$0xf] }
  0x24   : > { %v3111_v38 = vld [vmem:[%s3354_s17 + $0x11c] sm:$0xf0]  ;;  %v2276_v36 = vld [vmem:[%s3354_s17 + $0x60] sm:$0xf0] }
  0x25   : > { %v2626_v41 = vld [vmem:[%s3354_s17 + $0x300] sm:$0xf]  ;;  %v2371_v47 = vor.u32 %v3111_v38, %v2370_v37  ;;  %1465 = vmatpush.bf16.msra.mxu2 %v2915_v39  ;;  %1503 = vmatpush.bf16.msrb.mxu3 %v2407_v52  ;;  %v3069_v38 = vld [vmem:[%s4062_s1 + $0xc] sm:$0xf0]  ;;  %v2980_v52 = vld [vmem:[%s3354_s17 + $0x5e0] sm:$0xf0] }
  0x26   : > { %v3175_v42 = vld [vmem:[%s3354_s17 + $0x31c] sm:$0xf0] }
  0x27   : > { %v2882_v43 = vld [vmem:[%s3354_s17 + $0x500] sm:$0xf]  ;;  %v2627_v48 = vor.u32 %v3175_v42, %v2626_v41  ;;  %1428 = vmatpush.bf16.msra.mxu0 %v2371_v47  ;;  %v3267_v41 = vld [vmem:[%s3354_s17 + $0x604] sm:$0xf]  ;;  %v2727_v47 = vor.u32 %v3195_v34, %v2724_v35  ;;  %v2228_v35 = vld [vmem:[%s4062_s1 + $0x30] sm:$0xf0] }
  0x28   : > { %v3239_v44 = vld [vmem:[%s3354_s17 + $0x51c] sm:$0xf0]  ;;  %v3012_v42 = vld [vmem:[%s3354_s17 + $0x620] sm:$0xf0] }
  0x29   : > { %v2338_v49 = vld [vmem:[%s3354_s17 + $0xc0] sm:$0xf]  ;;  %v2883_v51 = vor.u32 %v3239_v44, %v2882_v43  ;;  %1447 = vmatpush.bf16.msra.mxu1 %v2627_v48  ;;  %1504 = vmatpush.bf16.msrb.mxu3 %v2375_v2  ;;  %v2212_v44 = vld [vmem:[%s4062_s1 + $0x10] sm:$0xf0]  ;;  %v2948_v2 = vld [vmem:[%s3354_s17 + $0x5a0] sm:$0xf0] }
  0x2a   : > { %v3103_v50 = vld [vmem:[%s3354_s17 + $0xdc] sm:$0xf0]  ;;  %v3470_v58 = vor.u32 %v3067_v40, %v2212_v44  ;;  %v3071_v34 = vld [vmem:[%s4062_s1 + $0x24] sm:$0xf] }
  0x2b   : > { %v2594_v53 = vld [vmem:[%s3354_s17 + $0x2c0] sm:$0xf]  ;;  %v2339_v59 = vor.u32 %v3103_v50, %v2338_v49  ;;  %1466 = vmatpush.bf16.msra.mxu2 %v2883_v51  ;;  %v2279_v49 = vor.u32 %v3083_v33, %v2276_v36  ;;  %v3075_v50 = vld [vmem:[%s3354_s17 + $0x4] sm:$0xf]  ;;  %v2234_v36 = vld [vmem:[%s4062_s1 + $0x28] sm:$0xf] }
  0x2c   : > { %v3167_v54 = vld [vmem:[%s3354_s17 + $0x2dc] sm:$0xf0]  ;;  %3041 = vmatmul.msk.bf16.gmra.mxu3 %vm1418_vm0, %v3420_v10  ;;  %v3259_v51 = vld [vmem:[%s3354_s17 + $0x5c4] sm:$0xf] }
  0x2d   : > { %v2850_v55 = vld [vmem:[%s3354_s17 + $0x4c0] sm:$0xf]  ;;  %v2595_v61 = vor.u32 %v3167_v54, %v2594_v53  ;;  %1429 = vmatpush.bf16.msra.mxu0 %v2339_v59  ;;  %1505 = vmatpush.bf16.msrb.mxu3 %v2343_v15  ;;  %v3015_v54 = vor.u32 %v3267_v41, %v3012_v42  ;;  %v2474_v59 = vld [vmem:[%s3354_s17 + $0x1c8] sm:$0xf]  ;;  %v2983_v62 = vor.u32 %v3259_v51, %v2980_v52  ;;  %v2628_v15 = vld [vmem:[%s3354_s17 + $0x320] sm:$0xf0] }
  0x2e   : > { %v3231_v56 = vld [vmem:[%s3354_s17 + $0x4dc] sm:$0xf0]  ;;  %v2852_v40 = vld [vmem:[%s3354_s17 + $0x4e0] sm:$0xf0] }
  0x2f   : > { %v2306_v63 = vld [vmem:[%s3354_s17 + $0x80] sm:$0xf]  ;;  %v2851_v1 = vor.u32 %v3231_v56, %v2850_v55  ;;  %1448 = vmatpush.bf16.msra.mxu1 %v2595_v61  ;;  %v2244_v55 = vld [vmem:[%s3354_s17 + $0x20] sm:$0xf0]  ;;  %v3474_v61 = vor.u32 %v3070_v46, %v2218_v45  ;;  %v3524_v45 = vor.u32 %v3071_v34, %v2228_v35  ;;  %v2346_v46 = vld [vmem:[%s3354_s17 + $0xc8] sm:$0xf] }
  0x30   : > { %v3095_v0 = vld [vmem:[%s3354_s17 + $0x9c] sm:$0xf0]  ;;  %v3187_v56 = vld [vmem:[%s3354_s17 + $0x384] sm:$0xf]  ;;  %v2922_v34 = vld [vmem:[%s3354_s17 + $0x548] sm:$0xf] }
  0x31   : > { %v2562_v3 = vld [vmem:[%s3354_s17 + $0x280] sm:$0xf]  ;;  %v2307_v9 = vor.u32 %v3095_v0, %v2306_v63  ;;  %1467 = vmatpush.bf16.msra.mxu2 %v2851_v1  ;;  %1506 = vmatpush.bf16.msrb.mxu3 %v2311_v32  ;;  %v2247_v63 = vor.u32 %v3075_v50, %v2244_v55  ;;  %v2695_v0 = vor.u32 %v3187_v56, %v2692_v57  ;;  %v3251_v1 = vld [vmem:[%s3354_s17 + $0x584] sm:$0xf]  ;;  %v2314_v57 = vld [vmem:[%s3354_s17 + $0x88] sm:$0xf] }
  0x32   : > { %v3159_v4 = vld [vmem:[%s3354_s17 + $0x29c] sm:$0xf0]  ;;  %v2951_v8 = vor.u32 %v3251_v1, %v2948_v2  ;;  %v2564_v44 = vld [vmem:[%s3354_s17 + $0x2a0] sm:$0xf0]  ;;  %v3248_v35 = vld [vmem:[%s3354_s17 + $0x564] sm:$0xf0] }
  0x33   : > { %v2818_v5 = vld [vmem:[%s3354_s17 + $0x480] sm:$0xf]  ;;  %v2563_v11 = vor.u32 %v3159_v4, %v2562_v3  ;;  %1430 = vmatpush.bf16.msra.mxu0 %v2307_v9  ;;  %v2475_v3 = vor.u32 %v3136_v60, %v2474_v59  ;;  %v3179_v4 = vld [vmem:[%s3354_s17 + $0x344] sm:$0xf]  ;;  %v3096_v59 = vld [vmem:[%s3354_s17 + $0xa4] sm:$0xf0] }
  0x34   : > { %v3223_v6 = vld [vmem:[%s3354_s17 + $0x49c] sm:$0xf0]  ;;  %v3219_v51 = vld [vmem:[%s3354_s17 + $0x484] sm:$0xf]  ;;  %v2315_v1 = vor.u32 %v3096_v59, %v2314_v57 }
  0x35   : > { %v2274_v12 = vld [vmem:[%s3354_s17 + $0x40] sm:$0xf]  ;;  %v2819_v14 = vor.u32 %v3223_v6, %v2818_v5  ;;  %1449 = vmatpush.bf16.msra.mxu1 %v2563_v11  ;;  %1507 = vmatpush.bf16.msrb.mxu3 %v2279_v49  ;;  %v2660_v5 = vld [vmem:[%s3354_s17 + $0x360] sm:$0xf0]  ;;  %v2442_v6 = vld [vmem:[%s3354_s17 + $0x188] sm:$0xf] }
  0x36   : > { %v3087_v13 = vld [vmem:[%s3354_s17 + $0x5c] sm:$0xf0]  ;;  %v2663_v9 = vor.u32 %v3179_v4, %v2660_v5  ;;  %v3243_v11 = vld [vmem:[%s3354_s17 + $0x544] sm:$0xf]  ;;  %v2282_v4 = vld [vmem:[%s3354_s17 + $0x48] sm:$0xf] }
  0x37   : > { %v2530_v16 = vld [vmem:[%s3354_s17 + $0x240] sm:$0xf]  ;;  %v2275_v23 = vor.u32 %v3087_v13, %v2274_v12  ;;  %1468 = vmatpush.bf16.msra.mxu2 %v2819_v14  ;;  %v2916_v12 = vld [vmem:[%s3354_s17 + $0x560] sm:$0xf0]  ;;  %v2443_v13 = vor.u32 %v3128_v7, %v2442_v6  ;;  %v3088_v5 = vld [vmem:[%s3354_s17 + $0x64] sm:$0xf0] }
  0x38   : > { %v3151_v17 = vld [vmem:[%s3354_s17 + $0x25c] sm:$0xf0]  ;;  %v3171_v14 = vld [vmem:[%s3354_s17 + $0x304] sm:$0xf]  ;;  %v2730_v6 = vld [vmem:[%s3354_s17 + $0x3c8] sm:$0xf] }
  0x39   : > { %v2786_v19 = vld [vmem:[%s3354_s17 + $0x440] sm:$0xf]  ;;  %v2531_v27 = vor.u32 %v3151_v17, %v2530_v16  ;;  %1431 = vmatpush.bf16.msra.mxu0 %v2275_v23  ;;  %1508 = vmatpush.bf16.msrb.mxu3 %v2247_v63  ;;  %v2410_v16 = vld [vmem:[%s3354_s17 + $0x148] sm:$0xf]  ;;  %v2631_v21 = vor.u32 %v3171_v14, %v2628_v15  ;;  %v2820_v52 = vld [vmem:[%s3354_s17 + $0x4a0] sm:$0xf0] }
  0x3a   : > { %v3215_v20 = vld [vmem:[%s3354_s17 + $0x45c] sm:$0xf0]  ;;  %v3120_v17 = vld [vmem:[%s3354_s17 + $0x164] sm:$0xf0]  ;;  %v3147_v55 = vld [vmem:[%s3354_s17 + $0x244] sm:$0xf]  ;;  %v2823_v60 = vor.u32 %v3219_v51, %v2820_v52 }
  0x3b   : > { %v2242_v24 = vld [vmem:[%s3354_s17] sm:$0xf]  ;;  %v2787_v31 = vor.u32 %v3215_v20, %v2786_v19  ;;  %1450 = vmatpush.bf16.msra.mxu1 %v2531_v27  ;;  %v2919_v19 = vor.u32 %v3243_v11, %v2916_v12  ;;  %v3235_v20 = vld [vmem:[%s3354_s17 + $0x504] sm:$0xf]  ;;  %v3018_v27 = vld [vmem:[%s3354_s17 + $0x608] sm:$0xf] }
  0x3c   : > { %v3079_v25 = vld [vmem:[%s3354_s17 + $0x1c] sm:$0xf0]  ;;  %v2887_v33 = vor.u32 %v3235_v20, %v2884_v22  ;;  %v2532_v56 = vld [vmem:[%s3354_s17 + $0x260] sm:$0xf0]  ;;  %v3200_v7 = vld [vmem:[%s3354_s17 + $0x3e4] sm:$0xf0] }
  0x3d   : > { %v2498_v26 = vld [vmem:[%s3354_s17 + $0x200] sm:$0xf]  ;;  %v2243_v39 = vor.u32 %v3079_v25, %v2242_v24  ;;  %1469 = vmatpush.bf16.msra.mxu2 %v2787_v31  ;;  %1577 = vmatpush.bf16.msra.mxu3 %v2475_v3  ;;  %v3163_v24 = vld [vmem:[%s3354_s17 + $0x2c4] sm:$0xf]  ;;  %v2411_v25 = vor.u32 %v3120_v17, %v2410_v16  ;;  %v3112_v31 = vld [vmem:[%s3354_s17 + $0x124] sm:$0xf0]  ;;  %v2731_v14 = vor.u32 %v3200_v7, %v2730_v6 }
  0x3e   : > { %v3143_v28 = vld [vmem:[%s3354_s17 + $0x21c] sm:$0xf0]  ;;  %v3211_v63 = vld [vmem:[%s3354_s17 + $0x444] sm:$0xf]  ;;  %v2986_v15 = vld [vmem:[%s3354_s17 + $0x5c8] sm:$0xf] }
  0x3f   : > { %v2754_v29 = vld [vmem:[%s3354_s17 + $0x400] sm:$0xf]  ;;  %v2499_v43 = vor.u32 %v3143_v28, %v2498_v26  ;;  %1432 = vmatpush.bf16.msra.mxu0 %v2243_v39  ;;  %v2596_v26 = vld [vmem:[%s3354_s17 + $0x2e0] sm:$0xf0]  ;;  %v3272_v28 = vld [vmem:[%s3354_s17 + $0x624] sm:$0xf0] }
  0x40   : > { %v3207_v30 = vld [vmem:[%s3354_s17 + $0x41c] sm:$0xf0]  ;;  %v3019_v32 = vor.u32 %v3272_v28, %v3018_v27  ;;  %v3227_v39 = vld [vmem:[%s3354_s17 + $0x4c4] sm:$0xf]  ;;  %v3264_v16 = vld [vmem:[%s3354_s17 + $0x5e4] sm:$0xf0] }
  0x41   : > { %v2210_v37 = vld [vmem:[%s4062_s1] sm:$0xf]  ;;  %v2755_v48 = vor.u32 %v3207_v30, %v2754_v29  ;;  %1451 = vmatpush.bf16.msra.mxu1 %v2499_v43  ;;  %1578 = vmatpush.bf16.msra.mxu3 %v2443_v13  ;;  %v3073_v29 = vld [vmem:[%s4062_s1 + $0x2c] sm:$0xf0]  ;;  %v2378_v30 = vld [vmem:[%s3354_s17 + $0x108] sm:$0xf]  ;;  %v2855_v49 = vor.u32 %v3227_v39, %v2852_v40  ;;  %v2283_v13 = vor.u32 %v3088_v5, %v2282_v4 }
  0x42   : > { %v3465_v53 = vor.u32 %v3069_v38, %v2210_v37  ;;  %v2226_v23 = vld [vmem:[%s4062_s1 + $0x20] sm:$0xf]  ;;  %v3074_v37 = vld [vmem:[%s4062_s1 + $0x34] sm:$0xf0]  ;;  %v2599_v38 = vor.u32 %v3163_v24, %v2596_v26  ;;  %v2379_v42 = vor.u32 %v3112_v31, %v2378_v30  ;;  %v3155_v43 = vld [vmem:[%s3354_s17 + $0x284] sm:$0xf] }
  0x43   : > { %1520 = vmatpush.bf16.msrb.mxu0 %v2727_v47  ;;  %1470 = vmatpush.bf16.msra.mxu2 %v2755_v48  ;;  %v3520_v41 = vor.u32 %v3073_v29, %v2226_v23  ;;  %v3104_v47 = vld [vmem:[%s3354_s17 + $0xe4] sm:$0xf0]  ;;  %v3528_v48 = vor.u32 %v3074_v37, %v2234_v36  ;;  %v2567_v50 = vor.u32 %v3155_v43, %v2564_v44  ;;  %v3139_v2 = vld [vmem:[%s3354_s17 + $0x204] sm:$0xf]  ;;  %v3132_v24 = vld [vmem:[%s3354_s17 + $0x1cc] sm:$0xf] }
  0x44   : > { %1433 = vmatmul.bf16.vlgmr.msra.gmra.mxu0 %v3465_v53  ;;  %1452 = vmatmul.bf16.vlgmr.msra.gmra.mxu1 %v3470_v58  ;;  %v2500_v3 = vld [vmem:[%s3354_s17 + $0x220] sm:$0xf0]  ;;  %v2250_v17 = vld [vmem:[%s3354_s17 + $0x8] sm:$0xf]  ;;  %v2987_v23 = vor.u32 %v3264_v16, %v2986_v15  ;;  %v3124_v36 = vld [vmem:[%s3354_s17 + $0x18c] sm:$0xf]  ;;  %v2923_v44 = vor.u32 %v3248_v35, %v2922_v34 }
  0x45   : > { %1539 = vmatpush.bf16.msrb.mxu1 %v2983_v62  ;;  %1509 = vmatmul.bf16.vlgmr.msrb.gmra.mxu3 %v3465_v53  ;;  %v2535_v62 = vor.u32 %v3147_v55, %v2532_v56  ;;  %v3203_v11 = vld [vmem:[%s3354_s17 + $0x404] sm:$0xf]  ;;  %v3192_v22 = vld [vmem:[%s3354_s17 + $0x3a4] sm:$0xf0]  ;;  %v2444_v37 = vld [vmem:[%s3354_s17 + $0x1a8] sm:$0xf0] }
  0x46   : > { %1471 = vmatmul.bf16.vlgmr.msra.gmra.mxu2 %v3474_v61  ;;  %1579 = vmatpush.bf16.msra.mxu3 %v2411_v25  ;;  %v2756_v12 = vld [vmem:[%s3354_s17 + $0x420] sm:$0xf0]  ;;  %v2476_v25 = vld [vmem:[%s3354_s17 + $0x1e8] sm:$0xf0]  ;;  %v2954_v27 = vld [vmem:[%s3354_s17 + $0x588] sm:$0xf] }
  0x47   : > { %1565 = vmatpush.bf16.msrb.mxu2 %v3015_v54  ;;  %1521 = vmatpush.bf16.msrb.mxu0 %v2695_v0  ;;  %v2347_v54 = vor.u32 %v3104_v47, %v2346_v46  ;;  %v2788_v0 = vld [vmem:[%s3354_s17 + $0x460] sm:$0xf0]  ;;  %v2759_v20 = vor.u32 %v3203_v11, %v2756_v12  ;;  %v3256_v28 = vld [vmem:[%s3354_s17 + $0x5a4] sm:$0xf0]  ;;  %v2479_v30 = vor.u32 %v3132_v24, %v2476_v25  ;;  %v3020_v43 = vld [vmem:[%s3354_s17 + $0x628] sm:$0xf0] }
  0x48   : > { %v2666_v31 = vld [vmem:[%s3354_s17 + $0x348] sm:$0xf]  ;;  %v2447_v46 = vor.u32 %v3124_v36, %v2444_v37  ;;  %v3116_v51 = vld [vmem:[%s3354_s17 + $0x14c] sm:$0xf] }
  0x49   : > { %1540 = vmatpush.bf16.msrb.mxu1 %v2951_v8  ;;  %v2791_v8 = vor.u32 %v3211_v63, %v2788_v0  ;;  %v2634_v39 = vld [vmem:[%s3354_s17 + $0x308] sm:$0xf]  ;;  %v2412_v52 = vld [vmem:[%s3354_s17 + $0x168] sm:$0xf0] }
  0x4a   : > { %1580 = vmatpush.bf16.msra.mxu3 %v2379_v42  ;;  %v3176_v40 = vld [vmem:[%s3354_s17 + $0x324] sm:$0xf0]  ;;  %v3268_v42 = vld [vmem:[%s3354_s17 + $0x60c] sm:$0xf]  ;;  %v2415_v59 = vor.u32 %v3116_v51, %v2412_v52 }
  0x4b   : > { %1522 = vmatpush.bf16.msrb.mxu0 %v2663_v9  ;;  %1641 = vmatpush.bf16.msra.mxu2 %v3019_v32  ;;  %v2503_v9 = vor.u32 %v3139_v2, %v2500_v3  ;;  %v3184_v32 = vld [vmem:[%s3354_s17 + $0x364] sm:$0xf0]  ;;  %v3108_v63 = vld [vmem:[%s3354_s17 + $0x10c] sm:$0xf] }
  0x4c   : > { %v2890_v47 = vld [vmem:[%s3354_s17 + $0x508] sm:$0xf]  ;;  %v2380_v0 = vld [vmem:[%s3354_s17 + $0x128] sm:$0xf0] }
  0x4d   : > { %1541 = vmatpush.bf16.msrb.mxu1 %v2919_v19  ;;  %v3080_v19 = vld [vmem:[%s3354_s17 + $0x24] sm:$0xf0]  ;;  %v2383_v5 = vor.u32 %v3108_v63, %v2380_v0  ;;  %v2988_v34 = vld [vmem:[%s3354_s17 + $0x5e8] sm:$0xf0]  ;;  %v3129_v63 = vld [vmem:[%s3354_s17 + $0x1ac] sm:$0xf0] }
  0x4e   : > { %1581 = vmatpush.bf16.msra.mxu3 %v2347_v54  ;;  %v2251_v26 = vor.u32 %v3080_v19, %v2250_v17  ;;  %v2635_v54 = vor.u32 %v3176_v40, %v2634_v39  ;;  %v2602_v55 = vld [vmem:[%s3354_s17 + $0x2c8] sm:$0xf]  ;;  %v3092_v19 = vld [vmem:[%s3354_s17 + $0x8c] sm:$0xf] }
  0x4f   : > { %1523 = vmatpush.bf16.msrb.mxu0 %v2631_v21  ;;  %v2698_v21 = vld [vmem:[%s3354_s17 + $0x388] sm:$0xf]  ;;  %v2700_v39 = vld [vmem:[%s3354_s17 + $0x3a8] sm:$0xf0] }
  0x50   : > { %v2699_v29 = vor.u32 %v3192_v22, %v2698_v21  ;;  %v3168_v56 = vld [vmem:[%s3354_s17 + $0x2e4] sm:$0xf0]  ;;  %v3076_v40 = vld [vmem:[%s3354_s17 + $0xc] sm:$0xf] }
  0x51   : > { %1542 = vmatpush.bf16.msrb.mxu1 %v2887_v33  ;;  %v2955_v33 = vor.u32 %v3256_v28, %v2954_v27  ;;  %v2570_v2 = vld [vmem:[%s3354_s17 + $0x288] sm:$0xf]  ;;  %v3196_v27 = vld [vmem:[%s3354_s17 + $0x3cc] sm:$0xf] }
  0x52   : > { %1582 = vmatpush.bf16.msra.mxu3 %v2315_v1  ;;  %v2603_v1 = vor.u32 %v3168_v56, %v2602_v55  ;;  %v3160_v3 = vld [vmem:[%s3354_s17 + $0x2a4] sm:$0xf0]  ;;  %v2732_v28 = vld [vmem:[%s3354_s17 + $0x3e8] sm:$0xf0] }
  0x53   : > { %1524 = vmatpush.bf16.msrb.mxu0 %v2599_v38  ;;  %v2667_v38 = vor.u32 %v3184_v32, %v2666_v31  ;;  %v2826_v6 = vld [vmem:[%s3354_s17 + $0x488] sm:$0xf]  ;;  %v2571_v11 = vor.u32 %v3160_v3, %v2570_v2  ;;  %v2284_v31 = vld [vmem:[%s3354_s17 + $0x68] sm:$0xf0]  ;;  %v2735_v35 = vor.u32 %v3196_v27, %v2732_v28 }
  0x54   : > { %1438 = vmatmul.bf16.gmra.mxu0 %v3520_v41  ;;  %1457 = vmatmul.bf16.gmra.mxu1 %v3524_v45  ;;  %v3224_v7 = vld [vmem:[%s3354_s17 + $0x4a4] sm:$0xf0]  ;;  %v3180_v52 = vld [vmem:[%s3354_s17 + $0x34c] sm:$0xf] }
  0x55   : > { %1543 = vmatpush.bf16.msrb.mxu1 %v2855_v49  ;;  %1514 = vmatmul.bf16.gmra.mxu3 %v3520_v41  ;;  %v3023_v49 = vor.u32 %v3268_v42, %v3020_v43  ;;  %v2538_v12 = vld [vmem:[%s3354_s17 + $0x248] sm:$0xf]  ;;  %v2252_v42 = vld [vmem:[%s3354_s17 + $0x28] sm:$0xf0] }
  0x56   : > { %1476 = vmatmul.bf16.gmra.mxu2 %v3528_v48  ;;  %1583 = vmatpush.bf16.msra.mxu3 %v2283_v13  ;;  %v3152_v13 = vld [vmem:[%s3354_s17 + $0x264] sm:$0xf0]  ;;  %v2255_v51 = vor.u32 %v3076_v40, %v2252_v42  ;;  %v3172_v0 = vld [vmem:[%s3354_s17 + $0x30c] sm:$0xf]  ;;  %v3097_v40 = vld [vmem:[%s3354_s17 + $0xac] sm:$0xf0] }
  0x57   : > { %1525 = vmatpush.bf16.msrb.mxu0 %v2567_v50  ;;  %v3240_v50 = vld [vmem:[%s3354_s17 + $0x524] sm:$0xf0]  ;;  %v2539_v21 = vor.u32 %v3152_v13, %v2538_v12  ;;  %v3164_v12 = vld [vmem:[%s3354_s17 + $0x2cc] sm:$0xf] }
  0x58   : > { %v2891_v57 = vor.u32 %v3240_v50, %v2890_v47  ;;  %v2794_v16 = vld [vmem:[%s3354_s17 + $0x448] sm:$0xf]  ;;  %v3137_v50 = vld [vmem:[%s3354_s17 + $0x1ec] sm:$0xf0]  ;;  %v2604_v13 = vld [vmem:[%s3354_s17 + $0x2e8] sm:$0xf0] }
  0x59   : > { %1544 = vmatpush.bf16.msrb.mxu1 %v2823_v60  ;;  %v2858_v60 = vld [vmem:[%s3354_s17 + $0x4c8] sm:$0xf]  ;;  %v3220_v27 = vld [vmem:[%s3354_s17 + $0x48c] sm:$0xf] }
  0x5a   : > { %1584 = vmatpush.bf16.msra.mxu3 %v2251_v26  ;;  %v3216_v17 = vld [vmem:[%s3354_s17 + $0x464] sm:$0xf0]  ;;  %v2828_v28 = vld [vmem:[%s3354_s17 + $0x4a8] sm:$0xf0] }
  0x5b   : > { %1526 = vmatpush.bf16.msrb.mxu0 %v2535_v62  ;;  %v3232_v62 = vld [vmem:[%s3354_s17 + $0x4e4] sm:$0xf0]  ;;  %v2795_v24 = vor.u32 %v3216_v17, %v2794_v16  ;;  %v3228_v17 = vld [vmem:[%s3354_s17 + $0x4cc] sm:$0xf] }
  0x5c   : > { %v2859_v4 = vor.u32 %v3232_v62, %v2858_v60  ;;  %v2506_v22 = vld [vmem:[%s3354_s17 + $0x208] sm:$0xf]  ;;  %v2450_v62 = vld [vmem:[%s3354_s17 + $0x190] sm:$0xf]  ;;  %v3140_v42 = vld [vmem:[%s3354_s17 + $0x20c] sm:$0xf] }
  0x5d   : > { %1545 = vmatpush.bf16.msrb.mxu1 %v2791_v8  ;;  %v3100_v8 = vld [vmem:[%s3354_s17 + $0xcc] sm:$0xf]  ;;  %v2762_v26 = vld [vmem:[%s3354_s17 + $0x408] sm:$0xf]  ;;  %v2451_v3 = vor.u32 %v3129_v63, %v2450_v62  ;;  %v2706_v62 = vld [vmem:[%s3354_s17 + $0x390] sm:$0xf] }
  0x5e   : > { %1653 = vmatpush.bf16.msrb.mxu3 %v2479_v30  ;;  %v3084_v30 = vld [vmem:[%s3354_s17 + $0x4c] sm:$0xf]  ;;  %v3193_v63 = vld [vmem:[%s3354_s17 + $0x3ac] sm:$0xf0] }
  0x5f   : > { %1527 = vmatpush.bf16.msrb.mxu0 %v2503_v9  ;;  %v2348_v9 = vld [vmem:[%s3354_s17 + $0xe8] sm:$0xf0]  ;;  %v2287_v37 = vor.u32 %v3084_v30, %v2284_v31  ;;  %v2354_v30 = vld [vmem:[%s3354_s17 + $0xd0] sm:$0xf] }
  0x60   : > { %v2351_v15 = vor.u32 %v3100_v8, %v2348_v9  ;;  %v3121_v8 = vld [vmem:[%s3354_s17 + $0x16c] sm:$0xf0] }
  0x61   : > { %1546 = vmatpush.bf16.msrb.mxu1 %v2759_v20  ;;  %v2316_v20 = vld [vmem:[%s3354_s17 + $0xa8] sm:$0xf0]  ;;  %v3026_v9 = vld [vmem:[%s3354_s17 + $0x610] sm:$0xf] }
  0x62   : > { %1654 = vmatpush.bf16.msrb.mxu3 %v2447_v46  ;;  %v2319_v25 = vor.u32 %v3092_v19, %v2316_v20  ;;  %v2956_v46 = vld [vmem:[%s3354_s17 + $0x5a8] sm:$0xf0]  ;;  %v2607_v20 = vor.u32 %v3164_v12, %v2604_v13  ;;  %v3105_v31 = vld [vmem:[%s3354_s17 + $0xec] sm:$0xf0] }
  0x63   : > { %1596 = vmatpush.bf16.msra.mxu0 %v2731_v14  ;;  %v2827_v14 = vor.u32 %v3224_v7, %v2826_v6  ;;  %v2418_v6 = vld [vmem:[%s3354_s17 + $0x150] sm:$0xf]  ;;  %v2860_v19 = vld [vmem:[%s3354_s17 + $0x4e8] sm:$0xf0] }
  0x64   : > { %1528 = vmatmul.bf16.vlgmr.msrb.gmra.mxu0 %v3470_v58  ;;  %1547 = vmatmul.bf16.vlgmr.msrb.gmra.mxu1 %v3474_v61  ;;  %v2419_v16 = vor.u32 %v3121_v8, %v2418_v6  ;;  %v2707_v6 = vor.u32 %v3193_v63, %v2706_v62  ;;  %v2484_v8 = vld [vmem:[%s3354_s17 + $0x1f0] sm:$0xf0]  ;;  %v2802_v63 = vld [vmem:[%s3354_s17 + $0x450] sm:$0xf] }
  0x65   : > { %1615 = vmatpush.bf16.msra.mxu1 %v2987_v23  ;;  %1585 = vmatmul.bf16.vlgmr.msra.gmra.mxu3 %v3465_v53  ;;  %v3144_v23 = vld [vmem:[%s3354_s17 + $0x224] sm:$0xf0] }
  0x66   : > { %3042 = vmatmul.msk.bf16.vlgmr.msrb.gmra.mxu2 %vm1418_vm0, %v3374_v18  ;;  %1655 = vmatpush.bf16.msrb.mxu3 %v2415_v59  ;;  %v2507_v32 = vor.u32 %v3144_v23, %v2506_v22  ;;  %v2924_v59 = vld [vmem:[%s3354_s17 + $0x568] sm:$0xf0]  ;;  %v3113_v22 = vld [vmem:[%s3354_s17 + $0x12c] sm:$0xf0] }
  0x67   : > { %1597 = vmatpush.bf16.msra.mxu0 %v2699_v29  ;;  %1717 = vmatpush.bf16.msrb.mxu2 %v3023_v49  ;;  %v3208_v29 = vld [vmem:[%s3354_s17 + $0x424] sm:$0xf0]  ;;  %v2482_v49 = vld [vmem:[%s3354_s17 + $0x1d0] sm:$0xf]  ;;  %v3156_v23 = vld [vmem:[%s3354_s17 + $0x28c] sm:$0xf] }
  0x68   : > { %v2763_v36 = vor.u32 %v3208_v29, %v2762_v26  ;;  %v2483_v56 = vor.u32 %v3137_v50, %v2482_v49  ;;  %v3204_v50 = vld [vmem:[%s3354_s17 + $0x40c] sm:$0xf] }
  0x69   : > { %1616 = vmatpush.bf16.msra.mxu1 %v2955_v33  ;;  %v3260_v33 = vld [vmem:[%s3354_s17 + $0x5cc] sm:$0xf] }
  0x6a   : > { %1656 = vmatpush.bf16.msrb.mxu3 %v2383_v5  ;;  %v2991_v43 = vor.u32 %v3260_v33, %v2988_v34  ;;  %v2892_v5 = vld [vmem:[%s3354_s17 + $0x528] sm:$0xf0]  ;;  %v2831_v34 = vor.u32 %v3220_v27, %v2828_v28  ;;  %v3241_v27 = vld [vmem:[%s3354_s17 + $0x52c] sm:$0xf0]  ;;  %v3117_v28 = vld [vmem:[%s3354_s17 + $0x154] sm:$0xf] }
  0x6b   : > { %1598 = vmatpush.bf16.msra.mxu0 %v2667_v38  ;;  %v3188_v38 = vld [vmem:[%s3354_s17 + $0x38c] sm:$0xf] }
  0x6c   : > { %v2703_v47 = vor.u32 %v3188_v38, %v2700_v39  ;;  %v2540_v33 = vld [vmem:[%s3354_s17 + $0x268] sm:$0xf0]  ;;  %v2322_v39 = vld [vmem:[%s3354_s17 + $0x90] sm:$0xf] }
  0x6d   : > { %1617 = vmatpush.bf16.msra.mxu1 %v2923_v44  ;;  %v3252_v44 = vld [vmem:[%s3354_s17 + $0x58c] sm:$0xf]  ;;  %v2323_v49 = vor.u32 %v3097_v40, %v2322_v39  ;;  %v3109_v39 = vld [vmem:[%s3354_s17 + $0x114] sm:$0xf] }
  0x6e   : > { %1657 = vmatpush.bf16.msrb.mxu3 %v2351_v15  ;;  %v2959_v55 = vor.u32 %v3252_v44, %v2956_v46  ;;  %v2738_v46 = vld [vmem:[%s3354_s17 + $0x3d0] sm:$0xf] }
  0x6f   : > { %1599 = vmatpush.bf16.msra.mxu0 %v2635_v54  ;;  %v2668_v54 = vld [vmem:[%s3354_s17 + $0x368] sm:$0xf0] }
  0x70   : > { %v2671_v60 = vor.u32 %v3180_v52, %v2668_v54  ;;  %v2290_v52 = vld [vmem:[%s3354_s17 + $0x50] sm:$0xf] }
  0x71   : > { %1618 = vmatpush.bf16.msra.mxu1 %v2891_v57  ;;  %v3244_v57 = vld [vmem:[%s3354_s17 + $0x54c] sm:$0xf] }
  0x72   : > { %1658 = vmatpush.bf16.msrb.mxu3 %v2319_v25  ;;  %v2927_v2 = vor.u32 %v3244_v57, %v2924_v59  ;;  %v2863_v25 = vor.u32 %v3228_v17, %v2860_v19  ;;  %v3265_v57 = vld [vmem:[%s3354_s17 + $0x5ec] sm:$0xf0]  ;;  %v3125_v19 = vld [vmem:[%s3354_s17 + $0x194] sm:$0xf] }
  0x73   : > { %1600 = vmatpush.bf16.msra.mxu0 %v2603_v1  ;;  %v2636_v1 = vld [vmem:[%s3354_s17 + $0x328] sm:$0xf0]  ;;  %v3249_v17 = vld [vmem:[%s3354_s17 + $0x56c] sm:$0xf0] }
  0x74   : > { %1533 = vmatmul.bf16.gmra.mxu0 %v3524_v45  ;;  %1552 = vmatmul.bf16.gmra.mxu1 %v3528_v48  ;;  %v2639_v7 = vor.u32 %v3172_v0, %v2636_v1  ;;  %v2258_v1 = vld [vmem:[%s3354_s17 + $0x10] sm:$0xf] }
  0x75   : > { %1619 = vmatpush.bf16.msra.mxu1 %v2859_v4  ;;  %1590 = vmatmul.bf16.gmra.mxu3 %v3520_v41  ;;  %v3236_v4 = vld [vmem:[%s3354_s17 + $0x50c] sm:$0xf] }
  0x76   : > { %3043 = vmatmul.msk.bf16.gmra.mxu2 %vm1418_vm0, %v3420_v10  ;;  %1659 = vmatpush.bf16.msrb.mxu3 %v2287_v37  ;;  %v2895_v15 = vor.u32 %v3236_v4, %v2892_v5  ;;  %v2796_v37 = vld [vmem:[%s3354_s17 + $0x468] sm:$0xf0]  ;;  %v2962_v4 = vld [vmem:[%s3354_s17 + $0x590] sm:$0xf] }
  0x77   : > { %1601 = vmatpush.bf16.msra.mxu0 %v2571_v11  ;;  %v3273_v11 = vld [vmem:[%s3354_s17 + $0x62c] sm:$0xf0] }
  0x78   : > { %v3257_v5 = vld [vmem:[%s3354_s17 + $0x5ac] sm:$0xf0] }
  0x79   : > { %1620 = vmatpush.bf16.msra.mxu1 %v2827_v14  ;;  %v3027_v14 = vor.u32 %v3273_v11, %v3026_v9  ;;  %v2674_v9 = vld [vmem:[%s3354_s17 + $0x350] sm:$0xf]  ;;  %v2963_v13 = vor.u32 %v3257_v5, %v2962_v4  ;;  %v3197_v5 = vld [vmem:[%s3354_s17 + $0x3d4] sm:$0xf] }
  0x7a   : > { %1660 = vmatpush.bf16.msrb.mxu3 %v2255_v51  ;;  %v2764_v51 = vld [vmem:[%s3354_s17 + $0x428] sm:$0xf0]  ;;  %v3185_v11 = vld [vmem:[%s3354_s17 + $0x36c] sm:$0xf0] }
  0x7b   : > { %1602 = vmatpush.bf16.msra.mxu0 %v2539_v21  ;;  %v2386_v21 = vld [vmem:[%s3354_s17 + $0x110] sm:$0xf] }
  0x7c   : > { %v2387_v26 = vor.u32 %v3113_v22, %v2386_v21  ;;  %v2642_v21 = vld [vmem:[%s3354_s17 + $0x310] sm:$0xf] }
  0x7d   : > { %1621 = vmatpush.bf16.msra.mxu1 %v2795_v24  ;;  %v2572_v24 = vld [vmem:[%s3354_s17 + $0x2a8] sm:$0xf0]  ;;  %v3177_v22 = vld [vmem:[%s3354_s17 + $0x32c] sm:$0xf0] }
  0x7e   : > { %1729 = vmatpush.bf16.msra.mxu3 %v2483_v56  ;;  %v2575_v29 = vor.u32 %v3156_v23, %v2572_v24  ;;  %v2994_v56 = vld [vmem:[%s3354_s17 + $0x5d0] sm:$0xf] }
  0x7f   : > { %1603 = vmatpush.bf16.msra.mxu0 %v2507_v32  ;;  %v3148_v32 = vld [vmem:[%s3354_s17 + $0x24c] sm:$0xf]  ;;  %v3145_v4 = vld [vmem:[%s3354_s17 + $0x22c] sm:$0xf0] }
  0x80   : > { %v2543_v38 = vor.u32 %v3148_v32, %v2540_v33  ;;  %v3269_v33 = vld [vmem:[%s3354_s17 + $0x614] sm:$0xf] }
  0x81   : > { %1622 = vmatpush.bf16.msra.mxu1 %v2763_v36  ;;  %v3212_v36 = vld [vmem:[%s3354_s17 + $0x44c] sm:$0xf] }
  0x82   : > { %1730 = vmatpush.bf16.msra.mxu3 %v2451_v3  ;;  %v2799_v44 = vor.u32 %v3212_v36, %v2796_v37  ;;  %v3081_v3 = vld [vmem:[%s3354_s17 + $0x2c] sm:$0xf0] }
  0x83   : > { %1672 = vmatpush.bf16.msrb.mxu0 %v2735_v35  ;;  %v2355_v35 = vor.u32 %v3105_v31, %v2354_v30  ;;  %v2259_v12 = vor.u32 %v3081_v3, %v2258_v1  ;;  %v2610_v30 = vld [vmem:[%s3354_s17 + $0x2d0] sm:$0xf]  ;;  %v3093_v1 = vld [vmem:[%s3354_s17 + $0x94] sm:$0xf] }
  0x84   : > { %1604 = vmatmul.bf16.vlgmr.msra.gmra.mxu0 %v3470_v58  ;;  %1623 = vmatmul.bf16.vlgmr.msra.gmra.mxu1 %v3474_v61  ;;  %v3169_v31 = vld [vmem:[%s3354_s17 + $0x2ec] sm:$0xf0] }
  0x85   : > { %1691 = vmatpush.bf16.msrb.mxu1 %v2991_v43  ;;  %1661 = vmatmul.bf16.vlgmr.msrb.gmra.mxu3 %v3465_v53  ;;  %v2508_v43 = vld [vmem:[%s3354_s17 + $0x228] sm:$0xf0]  ;;  %v2611_v36 = vor.u32 %v3169_v31, %v2610_v30  ;;  %v2866_v37 = vld [vmem:[%s3354_s17 + $0x4d0] sm:$0xf]  ;;  %v2490_v30 = vld [vmem:[%s3354_s17 + $0x1d8] sm:$0xf] }
  0x86   : > { %3044 = vmatmul.msk.bf16.vlgmr.msra.gmra.mxu2 %vm1418_vm0, %v3374_v18  ;;  %1731 = vmatpush.bf16.msra.mxu3 %v2419_v16  ;;  %v2511_v54 = vor.u32 %v3140_v42, %v2508_v43  ;;  %v2930_v16 = vld [vmem:[%s3354_s17 + $0x550] sm:$0xf]  ;;  %v2388_v42 = vld [vmem:[%s3354_s17 + $0x130] sm:$0xf0]  ;;  %v3138_v31 = vld [vmem:[%s3354_s17 + $0x1f4] sm:$0xf0] }
  0x87   : > { %1673 = vmatpush.bf16.msrb.mxu0 %v2703_v47  ;;  %1793 = vmatpush.bf16.msra.mxu2 %v3027_v14  ;;  %v3201_v47 = vld [vmem:[%s3354_s17 + $0x3ec] sm:$0xf0]  ;;  %v2931_v23 = vor.u32 %v3249_v17, %v2930_v16  ;;  %v3261_v16 = vld [vmem:[%s3354_s17 + $0x5d4] sm:$0xf] }
  0x88   : > { %v2739_v59 = vor.u32 %v3201_v47, %v2738_v46  ;;  %v2578_v43 = vld [vmem:[%s3354_s17 + $0x290] sm:$0xf]  ;;  %v2391_v47 = vor.u32 %v3109_v39, %v2388_v42  ;;  %v2996_v17 = vld [vmem:[%s3354_s17 + $0x5f0] sm:$0xf0]  ;;  %v2458_v42 = vld [vmem:[%s3354_s17 + $0x198] sm:$0xf] }
  0x89   : > { %1692 = vmatpush.bf16.msrb.mxu1 %v2959_v55  ;;  %v3089_v55 = vld [vmem:[%s3354_s17 + $0x6c] sm:$0xf0]  ;;  %v2932_v39 = vld [vmem:[%s3354_s17 + $0x570] sm:$0xf0] }
  0x8a   : > { %1732 = vmatpush.bf16.msra.mxu3 %v2387_v26  ;;  %v2291_v0 = vor.u32 %v3089_v55, %v2290_v52  ;;  %v2898_v26 = vld [vmem:[%s3354_s17 + $0x510] sm:$0xf]  ;;  %v3101_v52 = vld [vmem:[%s3354_s17 + $0xd4] sm:$0xf] }
  0x8b   : > { %1674 = vmatpush.bf16.msrb.mxu0 %v2671_v60  ;;  %v2767_v60 = vor.u32 %v3204_v50, %v2764_v51  ;;  %v2899_v32 = vor.u32 %v3241_v27, %v2898_v26  ;;  %v2834_v50 = vld [vmem:[%s3354_s17 + $0x490] sm:$0xf]  ;;  %v2999_v26 = vor.u32 %v3261_v16, %v2996_v17  ;;  %v3221_v16 = vld [vmem:[%s3354_s17 + $0x494] sm:$0xf] }
  0x8c   : > { %v3225_v51 = vld [vmem:[%s3354_s17 + $0x4ac] sm:$0xf0]  ;;  %v2836_v17 = vld [vmem:[%s3354_s17 + $0x4b0] sm:$0xf0] }
  0x8d   : > { %1693 = vmatpush.bf16.msrb.mxu1 %v2927_v2  ;;  %v2995_v2 = vor.u32 %v3265_v57, %v2994_v56  ;;  %v2546_v55 = vld [vmem:[%s3354_s17 + $0x250] sm:$0xf] }
  0x8e   : > { %1733 = vmatpush.bf16.msra.mxu3 %v2355_v35  ;;  %v3153_v56 = vld [vmem:[%s3354_s17 + $0x26c] sm:$0xf0] }
  0x8f   : > { %1675 = vmatpush.bf16.msrb.mxu0 %v2639_v7  ;;  %v3133_v7 = vld [vmem:[%s3354_s17 + $0x1d4] sm:$0xf]  ;;  %v2547_v62 = vor.u32 %v3153_v56, %v2546_v55  ;;  %v2514_v3 = vld [vmem:[%s3354_s17 + $0x210] sm:$0xf]  ;;  %v2426_v55 = vld [vmem:[%s3354_s17 + $0x158] sm:$0xf] }
  0x90   : > { %v2487_v14 = vor.u32 %v3133_v7, %v2484_v8  ;;  %v3122_v56 = vld [vmem:[%s3354_s17 + $0x174] sm:$0xf0] }
  0x91   : > { %1694 = vmatpush.bf16.msrb.mxu1 %v2895_v15  ;;  %v2675_v15 = vor.u32 %v3185_v11, %v2674_v9  ;;  %v2515_v9 = vor.u32 %v3145_v4, %v2514_v3  ;;  %v2770_v11 = vld [vmem:[%s3354_s17 + $0x410] sm:$0xf]  ;;  %v2868_v3 = vld [vmem:[%s3354_s17 + $0x4f0] sm:$0xf0] }
  0x92   : > { %1734 = vmatpush.bf16.msra.mxu3 %v2323_v49 }
  0x93   : > { %1676 = vmatpush.bf16.msrb.mxu0 %v2607_v20  ;;  %v2452_v20 = vld [vmem:[%s3354_s17 + $0x1b0] sm:$0xf0] }
  0x94   : > { %1609 = vmatmul.bf16.gmra.mxu0 %v3524_v45  ;;  %1628 = vmatmul.bf16.gmra.mxu1 %v3528_v48  ;;  %v2455_v24 = vor.u32 %v3125_v19, %v2452_v20  ;;  %v3189_v20 = vld [vmem:[%s3354_s17 + $0x394] sm:$0xf] }
  0x95   : > { %1695 = vmatpush.bf16.msrb.mxu1 %v2863_v25  ;;  %1666 = vmatmul.bf16.gmra.mxu3 %v3520_v41  ;;  %v2643_v25 = vor.u32 %v3177_v22, %v2642_v21  ;;  %v2708_v21 = vld [vmem:[%s3354_s17 + $0x3b0] sm:$0xf0] }
  0x96   : > { %3045 = vmatmul.msk.bf16.gmra.mxu2 %vm1418_vm0, %v3420_v10  ;;  %1735 = vmatpush.bf16.msra.mxu3 %v2291_v0  ;;  %v3217_v0 = vld [vmem:[%s3354_s17 + $0x46c] sm:$0xf0]  ;;  %v2711_v27 = vor.u32 %v3189_v20, %v2708_v21 }
  0x97   : > { %1677 = vmatpush.bf16.msrb.mxu0 %v2575_v29  ;;  %v2420_v29 = vld [vmem:[%s3354_s17 + $0x170] sm:$0xf0]  ;;  %v2803_v7 = vor.u32 %v3217_v0, %v2802_v63 }
  0x98   : > { %v2423_v35 = vor.u32 %v3117_v28, %v2420_v29  ;;  %v3253_v28 = vld [vmem:[%s3354_s17 + $0x594] sm:$0xf] }
  0x99   : > { %1696 = vmatpush.bf16.msrb.mxu1 %v2831_v34  ;;  %v3028_v34 = vld [vmem:[%s3354_s17 + $0x630] sm:$0xf0] }
  0x9a   : > { %1736 = vmatpush.bf16.msra.mxu3 %v2259_v12  ;;  %v3031_v40 = vor.u32 %v3269_v33, %v3028_v34  ;;  %v3209_v12 = vld [vmem:[%s3354_s17 + $0x42c] sm:$0xf0]  ;;  %v2964_v29 = vld [vmem:[%s3354_s17 + $0x5b0] sm:$0xf0] }
  0x9b   : > { %1678 = vmatpush.bf16.msrb.mxu0 %v2543_v38  ;;  %v3233_v38 = vld [vmem:[%s3354_s17 + $0x4ec] sm:$0xf0]  ;;  %v2771_v22 = vor.u32 %v3209_v12, %v2770_v11  ;;  %v2676_v33 = vld [vmem:[%s3354_s17 + $0x370] sm:$0xf0]  ;;  %v3034_v11 = vld [vmem:[%s3354_s17 + $0x618] sm:$0xf] }
  0x9c   : > { %v2867_v46 = vor.u32 %v3233_v38, %v2866_v37  ;;  %v3245_v38 = vld [vmem:[%s3354_s17 + $0x554] sm:$0xf]  ;;  %v3274_v12 = vld [vmem:[%s3354_s17 + $0x634] sm:$0xf0] }
  0x9d   : > { %1697 = vmatpush.bf16.msrb.mxu1 %v2799_v44  ;;  %v3161_v44 = vld [vmem:[%s3354_s17 + $0x2ac] sm:$0xf0] }
  0x9e   : > { %1805 = vmatpush.bf16.msrb.mxu3 %v2487_v14  ;;  %v2579_v49 = vor.u32 %v3161_v44, %v2578_v43  ;;  %v2292_v14 = vld [vmem:[%s3354_s17 + $0x70] sm:$0xf0]  ;;  %v3130_v43 = vld [vmem:[%s3354_s17 + $0x1b4] sm:$0xf0] }
  0x9f   : > { %1679 = vmatpush.bf16.msrb.mxu0 %v2511_v54  ;;  %v2356_v54 = vld [vmem:[%s3354_s17 + $0xf0] sm:$0xf0]  ;;  %v3713_v57 = vpop.f32.mrf.mxu3 }
  0xa0   : > { %v3173_v44 = vld [vmem:[%s3354_s17 + $0x314] sm:$0xf] }
  0xa1   : > { %1698 = vmatpush.bf16.msrb.mxu1 %v2767_v60  ;;  %v2359_v60 = vor.u32 %v3101_v52, %v2356_v54 }
  0xa2   : > { %1806 = vmatpush.bf16.msrb.mxu3 %v2455_v24  ;;  %v3077_v24 = vld [vmem:[%s3354_s17 + $0x14] sm:$0xf] }
  0xa3   : > { %1748 = vmatpush.bf16.msra.mxu0 %v2739_v59  ;;  %v2835_v59 = vor.u32 %v3225_v51, %v2834_v50  ;;  %v3237_v50 = vld [vmem:[%s3354_s17 + $0x514] sm:$0xf] }
  0xa4   : > { %1680 = vmatmul.bf16.vlgmr.msrb.gmra.mxu0 %v3470_v58  ;;  %1699 = vmatmul.bf16.vlgmr.msrb.gmra.mxu1 %v3474_v61  ;;  %v2900_v51 = vld [vmem:[%s3354_s17 + $0x530] sm:$0xf0] }
  0xa5   : > { %1767 = vmatpush.bf16.msra.mxu1 %v2995_v2  ;;  %1737 = vmatmul.bf16.vlgmr.msra.gmra.mxu3 %v3465_v53  ;;  %v2324_v2 = vld [vmem:[%s3354_s17 + $0xb0] sm:$0xf0]  ;;  %v2903_v0 = vor.u32 %v3237_v50, %v2900_v51  ;;  %v2298_v50 = vld [vmem:[%s3354_s17 + $0x58] sm:$0xf] }
  0xa6   : > { %3046 = vmatmul.msk.bf16.vlgmr.msrb.gmra.mxu2 %vm1418_vm0, %v3374_v18  ;;  %1807 = vmatpush.bf16.msrb.mxu3 %v2423_v35  ;;  %v2327_v8 = vor.u32 %v3093_v1, %v2324_v2  ;;  %v2967_v35 = vor.u32 %v3253_v28, %v2964_v29  ;;  %v2427_v1 = vor.u32 %v3122_v56, %v2426_v55  ;;  %v3229_v2 = vld [vmem:[%s3354_s17 + $0x4d4] sm:$0xf]  ;;  %v3090_v55 = vld [vmem:[%s3354_s17 + $0x74] sm:$0xf0] }
  0xa7   : > { %1749 = vmatpush.bf16.msra.mxu0 %v2707_v6  ;;  %1869 = vmatpush.bf16.msrb.mxu2 %v3031_v40  ;;  %v2740_v6 = vld [vmem:[%s3354_s17 + $0x3f0] sm:$0xf0]  ;;  %v3730_v19 = vpop.f32.mrf.mxu3  ;;  %v3002_v56 = vld [vmem:[%s3354_s17 + $0x5d8] sm:$0xf] }
  0xa8   : > { %v2548_v28 = vld [vmem:[%s3354_s17 + $0x270] sm:$0xf0] }
  0xa9   : > { %1768 = vmatpush.bf16.msra.mxu1 %v2963_v13  ;;  %v3085_v13 = vld [vmem:[%s3354_s17 + $0x54] sm:$0xf] }
  0xaa   : > { %1808 = vmatpush.bf16.msrb.mxu3 %v2391_v47  ;;  %v2935_v47 = vor.u32 %v3245_v38, %v2932_v39  ;;  %v3098_v38 = vld [vmem:[%s3354_s17 + $0xb4] sm:$0xf0]  ;;  %v3141_v39 = vld [vmem:[%s3354_s17 + $0x214] sm:$0xf] }
  0xab   : > { %1750 = vmatpush.bf16.msra.mxu0 %v2675_v15  ;;  %v2743_v15 = vor.u32 %v3197_v5, %v2740_v6  ;;  %v2394_v6 = vld [vmem:[%s3354_s17 + $0x118] sm:$0xf] }
  0xad   : > { %1769 = vmatpush.bf16.msra.mxu1 %v2931_v23  ;;  %v2295_v23 = vor.u32 %v3085_v13, %v2292_v14  ;;  %v2871_v13 = vor.u32 %v3229_v2, %v2868_v3  ;;  %v3035_v14 = vor.u32 %v3274_v12, %v3034_v11  ;;  %v2714_v2 = vld [vmem:[%s3354_s17 + $0x398] sm:$0xf] }
  0xae   : > { %1809 = vmatpush.bf16.msrb.mxu3 %v2359_v60  ;;  %v3165_v60 = vld [vmem:[%s3354_s17 + $0x2d4] sm:$0xf]  ;;  %v3194_v3 = vld [vmem:[%s3354_s17 + $0x3b4] sm:$0xf0] }
  0xaf   : > { %1751 = vmatpush.bf16.msra.mxu0 %v2643_v25  ;;  %v2260_v25 = vld [vmem:[%s3354_s17 + $0x30] sm:$0xf0]  ;;  %v3748_v40 = vpop.f32.mrf.mxu3  ;;  %v3082_v11 = vld [vmem:[%s3354_s17 + $0x34] sm:$0xf0] }
  0xb0   : > { %v2263_v34 = vor.u32 %v3077_v24, %v2260_v25  ;;  %v3106_v24 = vld [vmem:[%s3354_s17 + $0xf4] sm:$0xf0] }
  0xb1   : > { %1770 = vmatpush.bf16.msra.mxu1 %v2899_v32  ;;  %v3181_v32 = vld [vmem:[%s3354_s17 + $0x354] sm:$0xf]  ;;  %v2970_v12 = vld [vmem:[%s3354_s17 + $0x598] sm:$0xf] }
  0xb2   : > { %1810 = vmatpush.bf16.msrb.mxu3 %v2327_v8  ;;  %v2679_v37 = vor.u32 %v3181_v32, %v2676_v33  ;;  %v3157_v8 = vld [vmem:[%s3354_s17 + $0x294] sm:$0xf] }
  0xb3   : > { %1752 = vmatpush.bf16.msra.mxu0 %v2611_v36  ;;  %v2491_v36 = vor.u32 %v3138_v31, %v2490_v30  ;;  %v2839_v30 = vor.u32 %v3221_v16, %v2836_v17  ;;  %v3213_v33 = vld [vmem:[%s3354_s17 + $0x454] sm:$0xf]  ;;  %v2682_v16 = vld [vmem:[%s3354_s17 + $0x358] sm:$0xf] }
  0xb4   : > { %1685 = vmatmul.bf16.gmra.mxu0 %v3524_v45  ;;  %1704 = vmatmul.bf16.gmra.mxu1 %v3528_v48  ;;  %v3186_v17 = vld [vmem:[%s3354_s17 + $0x374] sm:$0xf0] }
  0xb5   : > { %1771 = vmatpush.bf16.msra.mxu1 %v2867_v46  ;;  %1742 = vmatmul.bf16.gmra.mxu3 %v3520_v41  ;;  %v2644_v46 = vld [vmem:[%s3354_s17 + $0x330] sm:$0xf0] }
  0xb6   : > { %3047 = vmatmul.msk.bf16.gmra.mxu2 %vm1418_vm0, %v3420_v10  ;;  %1811 = vmatpush.bf16.msrb.mxu3 %v2295_v23  ;;  %v2647_v54 = vor.u32 %v3173_v44, %v2644_v46  ;;  %v2362_v23 = vld [vmem:[%s3354_s17 + $0xd8] sm:$0xf] }
  0xb7   : > { %1753 = vmatpush.bf16.msra.mxu0 %v2579_v49  ;;  %v2459_v49 = vor.u32 %v3130_v43, %v2458_v42  ;;  %v3763_v4 = vpop.f32.mrf.mxu3  ;;  %v2363_v32 = vor.u32 %v3106_v24, %v2362_v23  ;;  %v2516_v42 = vld [vmem:[%s3354_s17 + $0x230] sm:$0xf0]  ;;  %v2746_v43 = vld [vmem:[%s3354_s17 + $0x3d8] sm:$0xf] }
  0xb8   : > { %v3202_v44 = vld [vmem:[%s3354_s17 + $0x3f4] sm:$0xf0] }
  0xb9   : > { %1772 = vmatpush.bf16.msra.mxu1 %v2835_v59 }
  0xba   : > { %1812 = vmatpush.bf16.msrb.mxu3 %v2263_v34  ;;  %v2804_v34 = vld [vmem:[%s3354_s17 + $0x470] sm:$0xf0] }
  0xbb   : > { %1754 = vmatpush.bf16.msra.mxu0 %v2547_v62  ;;  %v2612_v62 = vld [vmem:[%s3354_s17 + $0x2f0] sm:$0xf0] }
  0xbc   : > { %v2615_v5 = vor.u32 %v3165_v60, %v2612_v62 }
  0xbd   : > { %1773 = vmatpush.bf16.msra.mxu1 %v2803_v7  ;;  %v3114_v7 = vld [vmem:[%s3354_s17 + $0x134] sm:$0xf0] }
  0xbe   : > { %1881 = vmatpush.bf16.msra.mxu3 %v2491_v36 }
  0xbf   : > { %1755 = vmatpush.bf16.msra.mxu0 %v2515_v9  ;;  %v2580_v9 = vld [vmem:[%s3354_s17 + $0x2b0] sm:$0xf0] }
  0xc1   : > { %1774 = vmatpush.bf16.msra.mxu1 %v2771_v22  ;;  %v1434_v52 = vpop.f32.mrf.mxu0  ;;  %v1453_v59 = vpop.f32.mrf.mxu1  ;;  %v2583_v22 = vor.u32 %v3157_v8, %v2580_v9 }
  0xc2   : > { %v1454_v63 = vadd.f32 %v1453_v59, %v1434_v52  ;;  %1882 = vmatpush.bf16.msra.mxu3 %v2459_v49  ;;  %v2772_v49 = vld [vmem:[%s3354_s17 + $0x430] sm:$0xf0]  ;;  %v3266_v59 = vld [vmem:[%s3354_s17 + $0x5f4] sm:$0xf0] }
  0xc3   : > { %1824 = vmatpush.bf16.msrb.mxu0 %v2743_v15  ;;  %v2395_v15 = vor.u32 %v3114_v7, %v2394_v6  ;;  %v2299_v6 = vor.u32 %v3090_v55, %v2298_v50  ;;  %v2266_v7 = vld [vmem:[%s3354_s17 + $0x18] sm:$0xf]  ;;  %v3003_v8 = vor.u32 %v3266_v59, %v3002_v56 }
  0xc4   : > { %1756 = vmatmul.bf16.vlgmr.msra.gmra.mxu0 %v3470_v58  ;;  %1775 = vmatmul.bf16.vlgmr.msra.gmra.mxu1 %v3474_v61  ;;  %v2874_v55 = vld [vmem:[%s3354_s17 + $0x4d8] sm:$0xf] }
  0xc5   : > { %1843 = vmatpush.bf16.msrb.mxu1 %v2999_v26  ;;  %1813 = vmatmul.bf16.vlgmr.msrb.gmra.mxu3 %v3465_v53  ;;  %v3234_v56 = vld [vmem:[%s3354_s17 + $0x4f4] sm:$0xf0] }
  0xc6   : > { %3048 = vmatmul.msk.bf16.vlgmr.msra.gmra.mxu2 %vm1418_vm0, %v3374_v18  ;;  %1883 = vmatpush.bf16.msra.mxu3 %v2427_v1 }
  0xc7   : > { %1825 = vmatpush.bf16.msrb.mxu0 %v2711_v27  ;;  %1945 = vmatpush.bf16.msra.mxu2 %v3035_v14  ;;  %v3149_v27 = vld [vmem:[%s3354_s17 + $0x254] sm:$0xf]  ;;  %v3134_v14 = vld [vmem:[%s3354_s17 + $0x1dc] sm:$0xf] }
  0xc8   : > { %v2551_v36 = vor.u32 %v3149_v27, %v2548_v28 }
  0xc9   : > { %1844 = vmatpush.bf16.msrb.mxu1 %v2967_v35  ;;  %v1472_v20 = vpop.f32.mrf.mxu2  ;;  %v1436_v21 = vpop.f32.mrf.mxu0 }
  0xca   : > { %v1473_v25 = vadd.f32 %v1472_v20, %v1454_v63  ;;  %v1455_v26 = vpop.f32.mrf.mxu1  ;;  %1884 = vmatpush.bf16.msra.mxu3 %v2395_v15  ;;  %v3786_v35 = vpop.f32.mrf.mxu3  ;;  %v2747_v63 = vor.u32 %v3202_v44, %v2746_v43  ;;  %v2492_v15 = vld [vmem:[%s3354_s17 + $0x1f8] sm:$0xf0]  ;;  %v2267_v20 = vor.u32 %v3082_v11, %v2266_v7  ;;  %v3242_v43 = vld [vmem:[%s3354_s17 + $0x534] sm:$0xf0] }
  0xcb   : > { %1826 = vmatpush.bf16.msrb.mxu0 %v2679_v37  ;;  %v1456_v29 = vadd.f32 %v1455_v26, %v1436_v21  ;;  %v2330_v37 = vld [vmem:[%s3354_s17 + $0x98] sm:$0xf]  ;;  %v2495_v24 = vor.u32 %v3134_v14, %v2492_v15  ;;  %v2364_v14 = vld [vmem:[%s3354_s17 + $0xf8] sm:$0xf0] }
  0xcc   : > { %v3782_v31 = vadd.f32 %v3713_v57, %v1473_v25  ;;  %v2807_v57 = vor.u32 %v3213_v33, %v2804_v34  ;;  %v2331_v46 = vor.u32 %v3098_v38, %v2330_v37  ;;  %v2938_v25 = vld [vmem:[%s3354_s17 + $0x558] sm:$0xf]  ;;  %v3270_v15 = vld [vmem:[%s3354_s17 + $0x61c] sm:$0xf] }
  0xcd   : > { %1845 = vmatpush.bf16.msrb.mxu1 %v2935_v47  ;;  %v3205_v47 = vld [vmem:[%s3354_s17 + $0x414] sm:$0xf]  ;;  %v3250_v26 = vld [vmem:[%s3354_s17 + $0x574] sm:$0xf0] }
  0xce   : > { %1885 = vmatpush.bf16.msra.mxu3 %v2363_v32  ;;  %v2775_v1 = vor.u32 %v3205_v47, %v2772_v49  ;;  %v2460_v32 = vld [vmem:[%s3354_s17 + $0x1b8] sm:$0xf0]  ;;  %v2650_v34 = vld [vmem:[%s3354_s17 + $0x318] sm:$0xf]  ;;  %v2939_v38 = vor.u32 %v3250_v26, %v2938_v25 }
  0xcf   : > { %1827 = vmatpush.bf16.msrb.mxu0 %v2647_v54  ;;  %v2519_v54 = vor.u32 %v3141_v39, %v2516_v42  ;;  %v2428_v47 = vld [vmem:[%s3354_s17 + $0x178] sm:$0xf0]  ;;  %v2618_v49 = vld [vmem:[%s3354_s17 + $0x2d8] sm:$0xf] }
  0xd0   : > { %v2810_v26 = vld [vmem:[%s3354_s17 + $0x458] sm:$0xf] }
  0xd1   : > { %1846 = vmatpush.bf16.msrb.mxu1 %v2903_v0  ;;  %v1474_v51 = vpop.f32.mrf.mxu2  ;;  %v1439_v52 = vpop.f32.mrf.mxu0 }
  0xd2   : > { %v1475_v60 = vadd.f32 %v1474_v51, %v1456_v29  ;;  %v1458_v62 = vpop.f32.mrf.mxu1  ;;  %1886 = vmatpush.bf16.msra.mxu3 %v2331_v46  ;;  %v3807_v9 = vpop.f32.mrf.mxu3  ;;  %v2683_v29 = vor.u32 %v3186_v17, %v2682_v16  ;;  %v3118_v46 = vld [vmem:[%s3354_s17 + $0x15c] sm:$0xf]  ;;  %v2554_v17 = vld [vmem:[%s3354_s17 + $0x258] sm:$0xf] }
  0xd3   : > { %1828 = vmatpush.bf16.msrb.mxu0 %v2615_v5  ;;  %v1459_v0 = vadd.f32 %v1458_v62, %v1439_v52  ;;  %v3036_v16 = vld [vmem:[%s3354_s17 + $0x638] sm:$0xf0] }
  0xd4   : > { %v3803_v5 = vadd.f32 %v3730_v19, %v1475_v60  ;;  %1761 = vmatmul.bf16.gmra.mxu0 %v3524_v45  ;;  %1780 = vmatmul.bf16.gmra.mxu1 %v3528_v48  ;;  %v2715_v19 = vor.u32 %v3194_v3, %v2714_v2  ;;  %v2586_v2 = vld [vmem:[%s3354_s17 + $0x298] sm:$0xf] }
  0xd5   : > { %1847 = vmatpush.bf16.msrb.mxu1 %v2871_v13  ;;  %v3258_v13 = vld [vmem:[%s3354_s17 + $0x5b4] sm:$0xf0]  ;;  %1818 = vmatmul.bf16.gmra.mxu3 %v3520_v41 }
  0xd6   : > { %3049 = vmatmul.msk.bf16.gmra.mxu2 %vm1418_vm0, %v3420_v10  ;;  %1887 = vmatpush.bf16.msra.mxu3 %v2299_v6  ;;  %v2971_v21 = vor.u32 %v3258_v13, %v2970_v12  ;;  %v3162_v3 = vld [vmem:[%s3354_s17 + $0x2b4] sm:$0xf0] }
  0xd7   : > { %1829 = vmatpush.bf16.msrb.mxu0 %v2583_v22  ;;  %v2842_v12 = vld [vmem:[%s3354_s17 + $0x498] sm:$0xf] }
  0xd8   : > { %v3226_v13 = vld [vmem:[%s3354_s17 + $0x4b4] sm:$0xf0] }
  0xd9   : > { %1848 = vmatpush.bf16.msrb.mxu1 %v2839_v30  ;;  %v1477_v22 = vpop.f32.mrf.mxu2  ;;  %v1441_v23 = vpop.f32.mrf.mxu0  ;;  %v3126_v30 = vld [vmem:[%s3354_s17 + $0x19c] sm:$0xf] }
  0xda   : > { %v1478_v27 = vadd.f32 %v1477_v22, %v1459_v0  ;;  %v1460_v28 = vpop.f32.mrf.mxu1  ;;  %1888 = vmatpush.bf16.msra.mxu3 %v2267_v20  ;;  %v3829_v39 = vpop.f32.mrf.mxu3  ;;  %v2463_v42 = vor.u32 %v3126_v30, %v2460_v32  ;;  %v3110_v0 = vld [vmem:[%s3354_s17 + $0x11c] sm:$0xf]  ;;  %v3154_v20 = vld [vmem:[%s3354_s17 + $0x274] sm:$0xf0]  ;;  %v2843_v22 = vor.u32 %v3226_v13, %v2842_v12 }
  0xdb   : > { %1830 = vmatpush.bf16.msrb.mxu0 %v2551_v36  ;;  %v1461_v33 = vadd.f32 %v1460_v28, %v1441_v23  ;;  %v3178_v36 = vld [vmem:[%s3354_s17 + $0x334] sm:$0xf0]  ;;  %v2555_v32 = vor.u32 %v3154_v20, %v2554_v17  ;;  %v3254_v13 = vld [vmem:[%s3354_s17 + $0x59c] sm:$0xf] }
  0xdc   : > { %v3827_v37 = vadd.f32 %v3748_v40, %v1478_v27  ;;  %v2651_v44 = vor.u32 %v3178_v36, %v2650_v34  ;;  %v3170_v40 = vld [vmem:[%s3354_s17 + $0x2f4] sm:$0xf0]  ;;  %v2332_v34 = vld [vmem:[%s3354_s17 + $0xb8] sm:$0xf0] }
  0xdd   : > { %1849 = vmatpush.bf16.msrb.mxu1 %v2807_v57  ;;  %v2906_v57 = vld [vmem:[%s3354_s17 + $0x518] sm:$0xf] }
  0xde   : > { %1957 = vmatpush.bf16.msrb.mxu3 %v2495_v24  ;;  %v2907_v50 = vor.u32 %v3242_v43, %v2906_v57  ;;  %v3218_v27 = vld [vmem:[%s3354_s17 + $0x474] sm:$0xf0]  ;;  %v3198_v43 = vld [vmem:[%s3354_s17 + $0x3dc] sm:$0xf] }
  0xdf   : > { %1831 = vmatpush.bf16.msrb.mxu0 %v2519_v54  ;;  %v2431_v54 = vor.u32 %v3118_v46, %v2428_v47  ;;  %v2522_v36 = vld [vmem:[%s3354_s17 + $0x218] sm:$0xf]  ;;  %v2811_v57 = vor.u32 %v3218_v27, %v2810_v26 }
  0xe0   : > { %v2778_v47 = vld [vmem:[%s3354_s17 + $0x418] sm:$0xf] }
  0xe1   : > { %1850 = vmatpush.bf16.msrb.mxu1 %v2775_v1  ;;  %v1479_v51 = vpop.f32.mrf.mxu2  ;;  %v1529_v52 = vpop.f32.mrf.mxu0  ;;  %v2396_v1 = vld [vmem:[%s3354_s17 + $0x138] sm:$0xf0] }
  0xe2   : > { %1958 = vmatpush.bf16.msrb.mxu3 %v2463_v42  ;;  %v1480_v59 = vadd.f32 %v1479_v51, %v1461_v33  ;;  %v1530_v60 = vadd.f32 %v1529_v52, %v3786_v35  ;;  %v1548_v62 = vpop.f32.mrf.mxu1  ;;  %v2875_v35 = vor.u32 %v3234_v56, %v2874_v55  ;;  %v2399_v11 = vor.u32 %v3110_v0, %v2396_v1  ;;  %v3094_v33 = vld [vmem:[%s3354_s17 + $0x9c] sm:$0xf] }
  0xe3   : > { %1900 = vmatpush.bf16.msra.mxu0 %v2747_v63  ;;  %v2619_v63 = vor.u32 %v3170_v40, %v2618_v49  ;;  %v2335_v46 = vor.u32 %v3094_v33, %v2332_v34  ;;  %v3210_v49 = vld [vmem:[%s3354_s17 + $0x434] sm:$0xf0]  ;;  %v2300_v51 = vld [vmem:[%s3354_s17 + $0x78] sm:$0xf0] }
  0xe4   : > { %v3845_v6 = vadd.f32 %v3763_v4, %v1480_v59  ;;  %v1549_v7 = vadd.f32 %v1548_v62, %v1530_v60  ;;  %1832 = vmatmul.bf16.vlgmr.msrb.gmra.mxu0 %v3470_v58  ;;  %1851 = vmatmul.bf16.vlgmr.msrb.gmra.mxu1 %v3474_v61  ;;  %v2587_v4 = vor.u32 %v3162_v3, %v2586_v2  ;;  %v3004_v55 = vld [vmem:[%s3354_s17 + $0x5f8] sm:$0xf0] }
  0xe5   : > { %1919 = vmatpush.bf16.msra.mxu1 %v3003_v8  ;;  %v3848_v8 = vpop.f32.mrf.mxu3  ;;  %1889 = vmatmul.bf16.vlgmr.msra.gmra.mxu3 %v3465_v53  ;;  %v2779_v56 = vor.u32 %v3210_v49, %v2778_v47  ;;  %v3190_v59 = vld [vmem:[%s3354_s17 + $0x39c] sm:$0xf] }
  0xe6   : > { %1959 = vmatpush.bf16.msrb.mxu3 %v2431_v54  ;;  %3050 = vmatmul.msk.bf16.vlgmr.msrb.gmra.mxu2 %vm1418_vm0, %v3374_v18  ;;  %v3262_v54 = vld [vmem:[%s3354_s17 + $0x5dc] sm:$0xf] }
  0xe7   : > { %1901 = vmatpush.bf16.msra.mxu0 %v2715_v19  ;;  %v3102_v19 = vld [vmem:[%s3354_s17 + $0xdc] sm:$0xf] }
  0xe8   : > { %v2367_v25 = vor.u32 %v3102_v19, %v2364_v14  ;;  %v2716_v60 = vld [vmem:[%s3354_s17 + $0x3b8] sm:$0xf0] }
  0xe9   : > { %1920 = vmatpush.bf16.msra.mxu1 %v2971_v21  ;;  %v3039_v21 = vor.u32 %v3270_v15, %v3036_v16  ;;  %v1567_v23 = vpop.f32.mrf.mxu2  ;;  %v1531_v24 = vpop.f32.mrf.mxu0  ;;  %v2719_v12 = vor.u32 %v3190_v59, %v2716_v60  ;;  %v2972_v19 = vld [vmem:[%s3354_s17 + $0x5b8] sm:$0xf0] }
  0xea   : > { %1960 = vmatpush.bf16.msrb.mxu3 %v2399_v11  ;;  %v3863_v28 = vadd.f32 %v1567_v23, %v1549_v7  ;;  %v1550_v30 = vpop.f32.mrf.mxu1  ;;  %v3078_v7 = vld [vmem:[%s3354_s17 + $0x1c] sm:$0xf]  ;;  %v3007_v11 = vor.u32 %v3262_v54, %v3004_v55  ;;  %v2975_v17 = vor.u32 %v3254_v13, %v2972_v19 }
  0xeb   : > { %1902 = vmatpush.bf16.msra.mxu0 %v2683_v29  ;;  %2021 = vmatpush.bf16.msrb.mxu2 %v3039_v21  ;;  %v1532_v29 = vadd.f32 %v1531_v24, %v3807_v9  ;;  %v3182_v14 = vld [vmem:[%s3354_s17 + $0x35c] sm:$0xf] }
  0xec   : > { %v2684_v15 = vld [vmem:[%s3354_s17 + $0x378] sm:$0xf0] }
  0xed   : > { %1921 = vmatpush.bf16.msra.mxu1 %v2939_v38  ;;  %v3146_v38 = vld [vmem:[%s3354_s17 + $0x234] sm:$0xf0]  ;;  %v1551_v42 = vadd.f32 %v1550_v30, %v1532_v29  ;;  %v3873_v9 = vpop.f32.mrf.mxu3  ;;  %v2687_v20 = vor.u32 %v3182_v14, %v2684_v15  ;;  %v3246_v21 = vld [vmem:[%s3354_s17 + $0x55c] sm:$0xf] }
  0xee   : > { %1961 = vmatpush.bf16.msrb.mxu3 %v2367_v25  ;;  %v2523_v40 = vor.u32 %v3146_v38, %v2522_v36  ;;  %v3174_v23 = vld [vmem:[%s3354_s17 + $0x31c] sm:$0xf] }
  0xef   : > { %1903 = vmatpush.bf16.msra.mxu0 %v2651_v44  ;;  %v2748_v44 = vld [vmem:[%s3354_s17 + $0x3f8] sm:$0xf0] }
  0xf0   : > { %v2751_v52 = vor.u32 %v3198_v43, %v2748_v44  ;;  %v2652_v24 = vld [vmem:[%s3354_s17 + $0x338] sm:$0xf0]  ;;  %v3319_v43 = vmov 0  }
  0xf1   : > { %1922 = vmatpush.bf16.msra.mxu1 %v2907_v50  ;;  %v3086_v50 = vld [vmem:[%s3354_s17 + $0x5c] sm:$0xf]  ;;  %v1569_v62 = vpop.f32.mrf.mxu2  ;;  %v2655_v33 = vor.u32 %v3174_v23, %v2652_v24  ;;  %3293 = vset.pattern.permute.xlu0 %v3319_v43 }
  0xf2   : > { %1962 = vmatpush.bf16.msrb.mxu3 %v2335_v46  ;;  %v2303_v0 = vor.u32 %v3086_v50, %v2300_v51  ;;  %v3883_v1 = vadd.f32 %v1569_v62, %v1551_v42  ;;  %v1553_v3 = vpop.f32.mrf.mxu1  ;;  %v3238_v34 = vld [vmem:[%s3354_s17 + $0x51c] sm:$0xf]  ;;  %3294 = vset.pattern.permute.xlu1 %v3319_v43 }
  0xf3   : > { %1904 = vmatpush.bf16.msra.mxu0 %v2619_v63  ;;  %v1534_v63 = vpop.f32.mrf.mxu0  ;;  %v2908_v36 = vld [vmem:[%s3354_s17 + $0x538] sm:$0xf0] }
  0xf4   : > { %v1535_v2 = vadd.f32 %v1534_v63, %v3829_v39  ;;  %1837 = vmatmul.bf16.gmra.mxu0 %v3524_v45  ;;  %1856 = vmatmul.bf16.gmra.mxu1 %v3528_v48  ;;  %v3166_v42 = vld [vmem:[%s3354_s17 + $0x2dc] sm:$0xf]  ;;  %v2911_v46 = vor.u32 %v3238_v34, %v2908_v36 }
  0xf5   : > { %1923 = vmatpush.bf16.msra.mxu1 %v2875_v35  ;;  %v2268_v35 = vld [vmem:[%s3354_s17 + $0x38] sm:$0xf0]  ;;  %v3893_v39 = vpop.f32.mrf.mxu3  ;;  %1894 = vmatmul.bf16.gmra.mxu3 %v3520_v41 }
  0xf6   : > { %1963 = vmatpush.bf16.msrb.mxu3 %v2303_v0  ;;  %v2271_v16 = vor.u32 %v3078_v7, %v2268_v35  ;;  %3051 = vmatmul.msk.bf16.gmra.mxu2 %vm1418_vm0, %v3420_v10  ;;  %v3230_v49 = vld [vmem:[%s3354_s17 + $0x4dc] sm:$0xf] }
  0xf7   : > { %1905 = vmatpush.bf16.msra.mxu0 %v2587_v4  ;;  %v1554_v4 = vadd.f32 %v1553_v3, %v1535_v2  ;;  %v3158_v50 = vld [vmem:[%s3354_s17 + $0x29c] sm:$0xf] }
  0xf8   : > { %v2588_v51 = vld [vmem:[%s3354_s17 + $0x2b8] sm:$0xf0] }
  0xf9   : > { %1924 = vmatpush.bf16.msra.mxu1 %v2843_v22  ;;  %v2940_v22 = vld [vmem:[%s3354_s17 + $0x578] sm:$0xf0]  ;;  %v1572_v25 = vpop.f32.mrf.mxu2  ;;  %v2591_v62 = vor.u32 %v3158_v50, %v2588_v51 }
  0xfa   : > { %1964 = vmatpush.bf16.msrb.mxu3 %v2271_v16  ;;  %v3902_v27 = vadd.f32 %v1572_v25, %v1554_v4  ;;  %v1555_v30 = vpop.f32.mrf.mxu1  ;;  %v3222_v63 = vld [vmem:[%s3354_s17 + $0x49c] sm:$0xf] }
  0xfb   : > { %1906 = vmatpush.bf16.msra.mxu0 %v2555_v32  ;;  %v1536_v26 = vpop.f32.mrf.mxu0  ;;  %v2943_v32 = vor.u32 %v3246_v21, %v2940_v22  ;;  %v2844_v0 = vld [vmem:[%s3354_s17 + $0x4b8] sm:$0xf0] }
  0xfc   : > { %v1537_v29 = vadd.f32 %v1536_v26, %v3848_v8  ;;  %v2057_v8 = vld [vmem:[%s4063_s2] sm:$0xff]  ;;  %v3150_v3 = vld [vmem:[%s3354_s17 + $0x25c] sm:$0xf] }
  0xfd   : > { %1925 = vmatpush.bf16.msra.mxu1 %v2811_v57  ;;  %v2620_v57 = vld [vmem:[%s3354_s17 + $0x2f8] sm:$0xf0]  ;;  %v3913_v44 = vpop.f32.mrf.mxu3  ;;  %2063 = vperm.xlu0 %3293, %v2057_v8  }
  0xfe   : > { %3275 = vmatpush.bf16.msra.mxu3 %v2751_v52  ;;  %v1556_v38 = vadd.f32 %v1555_v30, %v1537_v29  ;;  %v2623_v47 = vor.u32 %v3166_v42, %v2620_v57  ;;  %v2556_v7 = vld [vmem:[%s3354_s17 + $0x278] sm:$0xf0]  ;;  %v2059_v30 = vld [vmem:[%s4063_s2 + $0x10] sm:$0xff] }
  0xff   : > { %1907 = vmatpush.bf16.msra.mxu0 %v2523_v40  ;;  %v2876_v40 = vld [vmem:[%s3354_s17 + $0x4f8] sm:$0xf0]  ;;  %2073 = vperm.xlu1 %3294, %v2059_v30  }
 0x100   : > { %v2879_v60 = vor.u32 %v3230_v49, %v2876_v40  ;;  %v3214_v13 = vld [vmem:[%s3354_s17 + $0x45c] sm:$0xf] }
 0x101   : > { %1926 = vmatpush.bf16.msra.mxu1 %v2779_v56  ;;  %v2812_v19 = vld [vmem:[%s3354_s17 + $0x478] sm:$0xf0] }
 0x102   : > { %3276 = vmatpush.bf16.msra.mxu3 %v2719_v12  ;;  %v1624_v59 = vpop.f32.mrf.mxu1  ;;  %v3142_v4 = vld [vmem:[%s3354_s17 + $0x21c] sm:$0xf]  ;;  %v2815_v22 = vor.u32 %v3214_v13, %v2812_v19 }
 0x103   : > { %1976 = vmatpush.bf16.msrb.mxu0 %v2751_v52  ;;  %v1574_v52 = vpop.f32.mrf.mxu2  ;;  %v1605_v54 = vpop.f32.mrf.mxu0  ;;  %v2524_v14 = vld [vmem:[%s3354_s17 + $0x238] sm:$0xf0] }
 0x104   : > { %v3919_v55 = vadd.f32 %v1574_v52, %v1556_v38  ;;  %v1606_v56 = vadd.f32 %v1605_v54, %v3873_v9  ;;  %1908 = vmatmul.bf16.vlgmr.msra.gmra.mxu0 %v3470_v58  ;;  %v2058_v9 = vld [vmem:[%s4063_s2 + $0x8] sm:$0xff]  ;;  %1927 = vmatmul.bf16.vlgmr.msra.gmra.mxu1 %v3474_v61  ;;  %v2527_v23 = vor.u32 %v3142_v4, %v2524_v14  ;;  %v3206_v24 = vld [vmem:[%s3354_s17 + $0x41c] sm:$0xf] }
 0x105   : > { %1995 = vmatpush.bf16.msrb.mxu1 %v3007_v11  ;;  %v1593_v35 = vpop.f32.mrf.mxu3  ;;  %2068 = vperm.xlu0 %3293, %v2058_v9   ;;  %v2847_v11 = vor.u32 %v3222_v63, %v2844_v0  ;;  %v2780_v25 = vld [vmem:[%s3354_s17 + $0x438] sm:$0xf0] }
 0x106   : > { %3277 = vmatpush.bf16.msra.mxu3 %v2687_v20  ;;  %v1625_v2 = vadd.f32 %v1624_v59, %v1606_v56  ;;  %3052 = vmatmul.msk.bf16.vlgmr.msra.gmra.mxu2 %vm1418_vm0, %v3374_v18  ;;  %v2060_v43 = vld [vmem:[%s4063_s2 + $0x18] sm:$0xff] }
 0x107   : > { %1977 = vmatpush.bf16.msrb.mxu0 %v2719_v12  ;;  %v2559_v12 = vor.u32 %v3150_v3, %v2556_v7  ;;  %1965 = vmatmul.bf16.vlgmr.msrb.gmra.mxu3 %v3465_v53  ;;  %v2783_v53 = vor.u32 %v3206_v24, %v2780_v25 }
 0x108   : > { %2078 = vperm.xlu1 %3294, %v2060_v43  }
 0x109   : > { %1996 = vmatpush.bf16.msrb.mxu1 %v2975_v17 }
 0x10a   : > { %3278 = vmatpush.bf16.msra.mxu3 %v2655_v33  ;;  %v1626_v21 = vpop.f32.mrf.mxu1 }
 0x10b   : > { %1978 = vmatpush.bf16.msrb.mxu0 %v2687_v20  ;;  %v1643_v15 = vpop.f32.mrf.mxu2  ;;  %v1607_v16 = vpop.f32.mrf.mxu0 }
 0x10c   : > { %v3937_v17 = vadd.f32 %v1643_v15, %v1625_v2  ;;  %v1608_v20 = vadd.f32 %v1607_v16, %v3893_v39 }
 0x10d   : > { %1997 = vmatpush.bf16.msrb.mxu1 %v2943_v32  ;;  %v1662_v32 = vpop.f32.mrf.mxu3 }
 0x10e   : > { %3279 = vmatpush.bf16.msra.mxu3 %v2623_v47  ;;  %v2033_v26 = vmax.f32 %v3782_v31, %v3937_v17  ;;  %v1627_v29 = vadd.f32 %v1626_v21, %v1608_v20 }
 0x10f   : > { %1979 = vmatpush.bf16.msrb.mxu0 %v2655_v33 }
 0x111   : > { %1998 = vmatpush.bf16.msrb.mxu1 %v2911_v46 }
 0x112   : > { %3280 = vmatpush.bf16.msra.mxu3 %v2591_v62  ;;  %v1629_v38 = vpop.f32.mrf.mxu1 }
 0x113   : > { %1980 = vmatpush.bf16.msrb.mxu0 %v2623_v47  ;;  %v1645_v39 = vpop.f32.mrf.mxu2  ;;  %v1610_v33 = vpop.f32.mrf.mxu0 }
 0x114   : > { %v3948_v34 = vadd.f32 %v1645_v39, %v1627_v29  ;;  %v1611_v36 = vadd.f32 %v1610_v33, %v3913_v44  ;;  %1913 = vmatmul.bf16.gmra.mxu0 %v3524_v45  ;;  %1932 = vmatmul.bf16.gmra.mxu1 %v3528_v48 }
 0x115   : > { %1999 = vmatpush.bf16.msrb.mxu1 %v2879_v60  ;;  %v1664_v8 = vpop.f32.mrf.mxu3 }
 0x116   : > { %3281 = vmatpush.bf16.msra.mxu3 %v2559_v12  ;;  %v2035_v42 = vmax.f32 %v3803_v5, %v3948_v34  ;;  %v1630_v57 = vadd.f32 %v1629_v38, %v1611_v36  ;;  %3053 = vmatmul.msk.bf16.gmra.mxu2 %vm1418_vm0, %v3420_v10 }
 0x117   : > { %1981 = vmatpush.bf16.msrb.mxu0 %v2591_v62  ;;  %1970 = vmatmul.bf16.gmra.mxu3 %v3520_v41 }
 0x119   : > { %2000 = vmatpush.bf16.msrb.mxu1 %v2847_v11 }
 0x11a   : > { %3282 = vmatpush.bf16.msra.mxu3 %v2527_v23  ;;  %v1631_v40 = vpop.f32.mrf.mxu1 }
 0x11b   : > { %1982 = vmatpush.bf16.msrb.mxu0 %v2559_v12  ;;  %v1648_v44 = vpop.f32.mrf.mxu2  ;;  %v1612_v46 = vpop.f32.mrf.mxu0 }
 0x11c   : > { %v3960_v47 = vadd.f32 %v1648_v44, %v1630_v57  ;;  %v1613_v49 = vadd.f32 %v1612_v46, %v1593_v35 }
 0x11d   : > { %2001 = vmatpush.bf16.msrb.mxu1 %v2815_v22  ;;  %v1667_v52 = vpop.f32.mrf.mxu3 }
 0x11e   : > { %v2037_v50 = vmax.f32 %v3827_v37, %v3960_v47  ;;  %v1632_v51 = vadd.f32 %v1631_v40, %v1613_v49 }
 0x11f   : > { %1983 = vmatpush.bf16.msrb.mxu0 %v2527_v23 }
 0x121   : > { %2002 = vmatpush.bf16.msrb.mxu1 %v2783_v53 }
 0x122   : > { %v1700_v62 = vpop.f32.mrf.mxu1 }
 0x123   : > { %v1650_v54 = vpop.f32.mrf.mxu2  ;;  %v1681_v56 = vpop.f32.mrf.mxu0 }
 0x124   : > { %v3965_v59 = vadd.f32 %v1650_v54, %v1632_v51  ;;  %v1682_v60 = vadd.f32 %v1681_v56, %v1662_v32  ;;  %1984 = vmatmul.bf16.vlgmr.msrb.gmra.mxu0 %v3470_v58  ;;  %2003 = vmatmul.bf16.vlgmr.msrb.gmra.mxu1 %v3474_v61 }
 0x125   : > { %v1669_v41 = vpop.f32.mrf.mxu3 }
 0x126   : > { %v2039_v63 = vmax.f32 %v3845_v6, %v3965_v59  ;;  %v1701_v0 = vadd.f32 %v1700_v62, %v1682_v60  ;;  %3054 = vmatmul.msk.bf16.vlgmr.msrb.gmra.mxu2 %vm1418_vm0, %v3374_v18 }
 0x127   : > { %1989 = vmatmul.bf16.vlgmr.msra.gmra.mxu3 %v3524_v45 }
 0x12a   : > { %v1702_v35 = vpop.f32.mrf.mxu1 }
 0x12b   : > { %v1719_v2 = vpop.f32.mrf.mxu2  ;;  %v1683_v3 = vpop.f32.mrf.mxu0 }
 0x12c   : > { %v3973_v7 = vadd.f32 %v1719_v2, %v1701_v0  ;;  %v1684_v9 = vadd.f32 %v1683_v3, %v1664_v8 }
 0x12d   : > { %v1738_v13 = vpop.f32.mrf.mxu3 }
 0x12e   : > { %v2034_v11 = vmax.f32 %v3863_v28, %v3973_v7  ;;  %v1703_v12 = vadd.f32 %v1702_v35, %v1684_v9 }
 0x132   : > { %v1705_v14 = vpop.f32.mrf.mxu1 }
 0x133   : > { %v1721_v58 = vpop.f32.mrf.mxu2  ;;  %v1686_v19 = vpop.f32.mrf.mxu0 }
 0x134   : > { %v3978_v4 = vadd.f32 %v1721_v58, %v1703_v12  ;;  %v1687_v61 = vadd.f32 %v1686_v19, %v1667_v52  ;;  %2008 = vmatmul.bf16.gmra.mxu1 %v3528_v48 }
 0x135   : > { %v1740_v16 = vpop.f32.mrf.mxu3 }
 0x136   : > { %v2036_v18 = vmax.f32 %v3883_v1, %v3978_v4  ;;  %v1706_v15 = vadd.f32 %v1705_v14, %v1687_v61  ;;  %3055 = vmatmul.msk.bf16.gmra.mxu2 %vm1418_vm0, %v3420_v10 }
 0x13a   : > { %v1707_v23 = vpop.f32.mrf.mxu1 }
 0x13b   : > { %v1724_v45 = vpop.f32.mrf.mxu2  ;;  %v1688_v20 = vpop.f32.mrf.mxu0 }
 0x13c   : > { %v3985_v21 = vadd.f32 %v1724_v45, %v1706_v15  ;;  %v1689_v22 = vadd.f32 %v1688_v20, %v1669_v41 }
 0x13d   : > { %v1743_v29 = vpop.f32.mrf.mxu3 }
 0x13e   : > { %v2038_v24 = vmax.f32 %v3902_v27, %v3985_v21  ;;  %v1708_v25 = vadd.f32 %v1707_v23, %v1689_v22 }
 0x142   : > { %v1776_v48 = vpop.f32.mrf.mxu1 }
 0x143   : > { %v1726_v30 = vpop.f32.mrf.mxu2  ;;  %v1757_v32 = vpop.f32.mrf.mxu0 }
 0x144   : > { %v3989_v53 = vadd.f32 %v1726_v30, %v1708_v25  ;;  %v1758_v39 = vadd.f32 %v1757_v32, %v1738_v13 }
 0x145   : > { %v1745_v36 = vpop.f32.mrf.mxu3 }
 0x146   : > { %v2040_v10 = vmax.f32 %v3919_v55, %v3989_v53  ;;  %v1777_v33 = vadd.f32 %v1776_v48, %v1758_v39 }
 0x14a   : > { %v1778_v44 = vpop.f32.mrf.mxu1 }
 0x14b   : > { %v1795_v38 = vpop.f32.mrf.mxu2  ;;  %v1759_v57 = vpop.f32.mrf.mxu0 }
 0x14c   : > { %v1796_v43 = vadd.f32 %v1795_v38, %v1777_v33  ;;  %v1760_v8 = vadd.f32 %v1759_v57, %v1740_v16 }
 0x14d   : > { %v1814_v49 = vpop.f32.mrf.mxu3 }
 0x14e   : > { %v1779_v46 = vadd.f32 %v1778_v44, %v1760_v8 }
 0x152   : > { %v1781_v56 = vpop.f32.mrf.mxu1 }
 0x153   : > { %v1797_v40 = vpop.f32.mrf.mxu2  ;;  %v1762_v51 = vpop.f32.mrf.mxu0 }
 0x154   : > { %v3993_v52 = vadd.f32 %v1797_v40, %v1779_v46  ;;  %v1763_v54 = vadd.f32 %v1762_v51, %v1743_v29 }
 0x155   : > { %v1816_v62 = vpop.f32.mrf.mxu3 }
 0x156   : > { %v1782_v60 = vadd.f32 %v1781_v56, %v1763_v54 }
 0x15a   : > { %v1783_v9 = vpop.f32.mrf.mxu1 }
 0x15b   : > { %v1800_v0 = vpop.f32.mrf.mxu2  ;;  %v1764_v41 = vpop.f32.mrf.mxu0 }
 0x15c   : > { %v3995_v2 = vadd.f32 %v1800_v0, %v1782_v60  ;;  %v1765_v3 = vadd.f32 %v1764_v41, %v1745_v36 }
 0x15d   : > { %v1819_v12 = vpop.f32.mrf.mxu3 }
 0x15e   : > { %v1784_v35 = vadd.f32 %v1783_v9, %v1765_v3 }
 0x162   : > { %v1852_v14 = vpop.f32.mrf.mxu1 }
 0x163   : > { %v1802_v13 = vpop.f32.mrf.mxu2  ;;  %v1833_v58 = vpop.f32.mrf.mxu0 }
 0x164   : > { %v3997_v19 = vadd.f32 %v1802_v13, %v1784_v35  ;;  %v1834_v61 = vadd.f32 %v1833_v58, %v1814_v49 }
 0x165   : > { %v1821_v16 = vpop.f32.mrf.mxu3 }
 0x166   : > { %v1853_v15 = vadd.f32 %v1852_v14, %v1834_v61 }
 0x16a   : > { %v1854_v25 = vpop.f32.mrf.mxu1 }
 0x16b   : > { %v1871_v45 = vpop.f32.mrf.mxu2  ;;  %v1835_v20 = vpop.f32.mrf.mxu0 }
 0x16c   : > { %v3999_v22 = vadd.f32 %v1871_v45, %v1853_v15  ;;  %v1836_v23 = vadd.f32 %v1835_v20, %v1816_v62 }
 0x16d   : > { %v1890_v30 = vpop.f32.mrf.mxu3 }
 0x16e   : > { %v1855_v29 = vadd.f32 %v1854_v25, %v1836_v23 }
 0x171   : > { %v2074_v6 = vpop.permute.xlu1 %2073 }
 0x172   : > { %v1857_v36 = vpop.f32.mrf.mxu1 }
 0x173   : > { %v1873_v32 = vpop.f32.mrf.mxu2  ;;  %v1838_v39 = vpop.f32.mrf.mxu0 }
 0x174   : > { %v4001_v48 = vadd.f32 %v1873_v32, %v1855_v29  ;;  %v1839_v33 = vadd.f32 %v1838_v39, %v1819_v12 }
 0x175   : > { %v1892_v57 = vpop.f32.mrf.mxu3 }
 0x176   : > { %v1858_v38 = vadd.f32 %v1857_v36, %v1839_v33 }
 0x17a   : > { %v1859_v40 = vpop.f32.mrf.mxu1 }
 0x17b   : > { %v1876_v8 = vpop.f32.mrf.mxu2  ;;  %v1840_v44 = vpop.f32.mrf.mxu0 }
 0x17c   : > { %v4003_v46 = vadd.f32 %v1876_v8, %v1858_v38  ;;  %v1841_v49 = vadd.f32 %v1840_v44, %v1821_v16 }
 0x17d   : > { %v1895_v54 = vpop.f32.mrf.mxu3 }
 0x17e   : > { %v1860_v51 = vadd.f32 %v1859_v40, %v1841_v49 }
 0x182   : > { %v1928_v0 = vpop.f32.mrf.mxu1 }
 0x183   : > { %v1878_v56 = vpop.f32.mrf.mxu2  ;;  %v1909_v60 = vpop.f32.mrf.mxu0 }
 0x184   : > { %v4005_v62 = vadd.f32 %v1878_v56, %v1860_v51  ;;  %v1910_v41 = vadd.f32 %v1909_v60, %v1890_v30 }
 0x185   : > { %v1897_v3 = vpop.f32.mrf.mxu3 }
 0x186   : > { %v1929_v9 = vadd.f32 %v1928_v0, %v1910_v41 }
 0x18a   : > { %v1930_v58 = vpop.f32.mrf.mxu1 }
 0x18b   : > { %v1947_v35 = vpop.f32.mrf.mxu2  ;;  %v1911_v12 = vpop.f32.mrf.mxu0 }
 0x18c   : > { %v1948_v13 = vadd.f32 %v1947_v35, %v1929_v9  ;;  %v1912_v14 = vadd.f32 %v1911_v12, %v1892_v57 }
 0x18d   : > { %v1966_v15 = vpop.f32.mrf.mxu3 }
 0x18e   : > { %v2041_v61 = vmax.f32 %v1796_v43, %v1948_v13  ;;  %v1931_v45 = vadd.f32 %v1930_v58, %v1912_v14 }
 0x190   : > { %v2049_v16 = vmax.f32 %v2033_v26, %v2041_v61 }
 0x192   : > { %v1933_v29 = vpop.f32.mrf.mxu1 }
 0x193   : > { %v1949_v20 = vpop.f32.mrf.mxu2  ;;  %v1914_v23 = vpop.f32.mrf.mxu0 }
 0x194   : > { %v1950_v25 = vadd.f32 %v1949_v20, %v1931_v45  ;;  %v1915_v32 = vadd.f32 %v1914_v23, %v1895_v54 }
 0x195   : > { %v1968_v39 = vpop.f32.mrf.mxu3 }
 0x196   : > { %v2043_v30 = vmax.f32 %v3993_v52, %v1950_v25  ;;  %v1934_v43 = vadd.f32 %v1933_v29, %v1915_v32  ;;  %v2064_v52 = vpop.permute.xlu0 %2063 }
 0x197   : > { %v2081_v56 = vadd.f32 %v2064_v52, %v2049_v16 }
 0x198   : > { %v2051_v33 = vmax.f32 %v2035_v42, %v2043_v30 }
 0x199   : > { %v2097_v37 = vmin.f32 %v2081_v56, 0.0  ;;  %vm2089_vm1 = vcmp.gt.f32.partialorder %v2081_v56, 0.0 }
 0x19a   : > { %v1935_v8 = vpop.f32.mrf.mxu1 }
 0x19b   : > { %v1952_v36 = vpop.f32.mrf.mxu2  ;;  %v1916_v38 = vpop.f32.mrf.mxu0  ;;  %v2105_v13 = vmul.f32 1.442695, %v2097_v37 }
 0x19c   : > { %v1953_v57 = vadd.f32 %v1952_v36, %v1934_v43  ;;  %v1917_v17 = vadd.f32 %v1916_v38, %v1897_v3  ;;  %v2079_v43 = vpop.permute.xlu1 %2078 }
 0x19d   : > { %v1971_v26 = vpop.f32.mrf.mxu3  ;;  %3295 = vpow2.f32 %v2105_v13 }
 0x19e   : > { %v2045_v31 = vmax.f32 %v3995_v2, %v1953_v57  ;;  %v1936_v49 = vadd.f32 %v1935_v8, %v1917_v17  ;;  %v2069_v9 = vpop.permute.xlu0 %2068 }
 0x19f   : > { %v4023_v58 = vadd.f32 %v2069_v9, %v2051_v33 }
 0x1a0   : > { %v2053_v44 = vmax.f32 %v2037_v50, %v2045_v31 }
 0x1a1   : > { %vm2091_vm3 = vcmp.gt.f32.partialorder %v4023_v58, 0.0 }
 0x1a2   : > { %v2004_v5 = vpop.f32.mrf.mxu1  ;;  %v4030_v25 = vadd.f32 %v2074_v6, %v2053_v44 }
 0x1a3   : > { %v1954_v40 = vpop.f32.mrf.mxu2  ;;  %v1985_v51 = vpop.f32.mrf.mxu0 }
 0x1a4   : > { %v1955_v54 = vadd.f32 %v1954_v40, %v1936_v49  ;;  %v1986_v42 = vadd.f32 %v1985_v51, %v1966_v15  ;;  %v2099_v15 = vmin.f32 %v4023_v58, 0.0  ;;  %vm2093_vm5 = vcmp.gt.f32.partialorder %v4030_v25, 0.0 }
 0x1a5   : > { %v1973_v60 = vpop.f32.mrf.mxu3 }
 0x1a6   : > { %v2047_v34 = vmax.f32 %v3997_v19, %v1955_v54  ;;  %v2005_v0 = vadd.f32 %v2004_v5, %v1986_v42  ;;  %v2109_v29 = vmul.f32 1.442695, %v2099_v15 }
 0x1a8   : > { %v2055_v2 = vmax.f32 %v2039_v63, %v2047_v34 }
 0x1aa   : > { %v2006_v50 = vpop.f32.mrf.mxu1  ;;  %v2087_v4 = vadd.f32 %v2079_v43, %v2055_v2 }
 0x1ab   : > { %v2023_v41 = vpop.f32.mrf.mxu2  ;;  %v1987_v3 = vpop.f32.mrf.mxu0 }
 0x1ac   : > { %v2024_v47 = vadd.f32 %v2023_v41, %v2005_v0  ;;  %v1988_v12 = vadd.f32 %v1987_v3, %v1968_v39  ;;  %v2101_v39 = vmin.f32 %v4030_v25, 0.0  ;;  %v2103_v42 = vmin.f32 %v2087_v4, 0.0 }
 0x1ad   : > { %v1990_v61 = vpop.f32.mrf.mxu3  ;;  %vm2095_vm7 = vcmp.gt.f32.partialorder %v2087_v4, 0.0 }
 0x1ae   : > { %v2042_v35 = vmax.f32 %v3999_v22, %v2024_v47  ;;  %v2007_v63 = vadd.f32 %v2006_v50, %v1988_v12  ;;  %v1991_v28 = vadd.f32 %v1990_v61, %v1971_v26  ;;  %v2113_v1 = vmul.f32 1.442695, %v2101_v39 }
 0x1af   : > { %v2117_v41 = vmul.f32 1.442695, %v2103_v42 }
 0x1b0   : > { %v2050_v19 = vmax.f32 %v2034_v11, %v2042_v35  ;;  %v3296_v11 = vpop.eup %3295 }
 0x1b1   : > { %v3056_v38 = vadd.f32 -1.0, %v3296_v11 }
 0x1b2   : > { %v2082_v59 = vadd.f32 %v2064_v52, %v2050_v19  ;;  %v2009_v20 = vpop.f32.mrf.mxu1 }
 0x1b3   : > { %v2025_v14 = vpop.f32.mrf.mxu2  ;;  %v2010_v32 = vadd.f32 %v2009_v20, %v1991_v28  ;;  %v2129_v49 = vsel %vm2089_vm1, %v2081_v56, %v3056_v38 }
 0x1b4   : > { %v2098_v16 = vmin.f32 %v2082_v59, 0.0  ;;  %v2026_v45 = vadd.f32 %v2025_v14, %v2007_v63  ;;  %vm2090_vm2 = vcmp.gt.f32.partialorder %v2082_v59, 0.0 }
 0x1b5   : > { %v1992_v57 = vpop.f32.mrf.mxu3 }
 0x1b6   : > { %v2107_v22 = vmul.f32 1.442695, %v2098_v16  ;;  %v2044_v23 = vmax.f32 %v4001_v48, %v2026_v45  ;;  %v1993_v44 = vadd.f32 %v1992_v57, %v1973_v60 }
 0x1b8   : > { %3297 = vpow2.f32 %v2107_v22  ;;  %v2052_v7 = vmax.f32 %v2036_v18, %v2044_v23 }
 0x1b9   : > { %3299 = vpow2.f32 %v2109_v29 }
 0x1ba   : > { %v2084_v30 = vadd.f32 %v2069_v9, %v2052_v7  ;;  %v2011_v26 = vpop.f32.mrf.mxu1 }
 0x1bb   : > { %v2028_v33 = vpop.f32.mrf.mxu2  ;;  %v2012_v5 = vadd.f32 %v2011_v26, %v1993_v44 }
 0x1bc   : > { %v2100_v36 = vmin.f32 %v2084_v30, 0.0  ;;  %v2029_v48 = vadd.f32 %v2028_v33, %v2010_v32  ;;  %vm2092_vm4 = vcmp.gt.f32.partialorder %v2084_v30, 0.0 }
 0x1be   : > { %v3298_v8 = vpop.eup %3297  ;;  %v2111_v31 = vmul.f32 1.442695, %v2100_v36  ;;  %v2046_v17 = vmax.f32 %v4003_v46, %v2029_v48 }
 0x1bf   : > { %v3057_v18 = vadd.f32 -1.0, %v3298_v8  ;;  %v3300_v40 = vpop.eup %3299 }
 0x1c0   : > { %3301 = vpow2.f32 %v2111_v31  ;;  %v2054_v52 = vmax.f32 %v2038_v24, %v2046_v17  ;;  %v3058_v27 = vadd.f32 -1.0, %v3300_v40 }
 0x1c1   : > { %v2130_v46 = vsel %vm2090_vm2, %v2082_v59, %v3057_v18  ;;  %3303 = vpow2.f32 %v2113_v1 }
 0x1c2   : > { %v2137_v51 = vpack.c.bf16 %v2130_v46, %v2129_v49  ;;  %v2086_v54 = vadd.f32 %v2074_v6, %v2054_v52  ;;  %v2131_v37 = vsel %vm2091_vm3, %v4023_v58, %v3058_v27 }
 0x1c3   : > { %v2030_v34 = vpop.f32.mrf.mxu2 }
 0x1c4   : > { %2141 = vst [vmem:[%s4044_s13] sm:$0xff] %v2137_v51  ;;  %v2102_v2 = vmin.f32 %v2086_v54, 0.0  ;;  %v2031_v60 = vadd.f32 %v2030_v34, %v2012_v5  ;;  %vm2094_vm6 = vcmp.gt.f32.partialorder %v2086_v54, 0.0 }
 0x1c6   : > { %v3302_v21 = vpop.eup %3301  ;;  %v2115_v24 = vmul.f32 1.442695, %v2102_v2  ;;  %v2048_v56 = vmax.f32 %v4005_v62, %v2031_v60 }
 0x1c7   : > { %v3059_v0 = vadd.f32 -1.0, %v3302_v21  ;;  %v3304_v50 = vpop.eup %3303 }
 0x1c8   : > { %3305 = vpow2.f32 %v2115_v24  ;;  %v2056_v3 = vmax.f32 %v2040_v10, %v2048_v56  ;;  %v3060_v12 = vadd.f32 -1.0, %v3304_v50 }
 0x1c9   : > { %v2132_v47 = vsel %vm2092_vm4, %v2084_v30, %v3059_v0  ;;  %3307 = vpow2.f32 %v2117_v41 }
 0x1ca   : > { %v2138_v9 = vpack.c.bf16 %v2132_v47, %v2131_v37  ;;  %v2088_v35 = vadd.f32 %v2079_v43, %v2056_v3  ;;  %v2133_v55 = vsel %vm2093_vm5, %v4030_v25, %v3060_v12 }
 0x1cc   : > { %2142 = vst [vmem:[%s4044_s13 + $0x8] sm:$0xff] %v2138_v9  ;;  %v2104_v62 = vmin.f32 %v2088_v35, 0.0  ;;  %vm2096_vm8 = vcmp.gt.f32.partialorder %v2088_v35, 0.0 }
 0x1ce   : > { %v3306_v13 = vpop.eup %3305  ;;  %v2119_v19 = vmul.f32 1.442695, %v2104_v62 }
 0x1cf   : > { %v3061_v6 = vadd.f32 -1.0, %v3306_v13  ;;  %v3308_v10 = vpop.eup %3307 }
 0x1d0   : > { %3309 = vpow2.f32 %v2119_v19  ;;  %v3062_v59 = vadd.f32 -1.0, %v3308_v10 }
 0x1d1   : > { %v2134_v53 = vsel %vm2094_vm6, %v2086_v54, %v3061_v6 }
 0x1d2   : > { %v2139_v58 = vpack.c.bf16 %v2134_v53, %v2133_v55  ;;  %v2135_v14 = vsel %vm2095_vm7, %v2087_v4, %v3062_v59 }
 0x1d4   : > { %2143 = vst [vmem:[%s4044_s13 + $0x10] sm:$0xff] %v2139_v58 }
 0x1d6   : > { %v3310_v63 = vpop.eup %3309 }
 0x1d7   : > { %v3063_v61 = vadd.f32 -1.0, %v3310_v63 }
 0x1d9   : > { %v2136_v15 = vsel %vm2096_vm8, %v2088_v35, %v3063_v61 }
 0x1da   : > { %v2140_v16 = vpack.c.bf16 %v2136_v15, %v2135_v14 }
 0x1dc   : > { %2144 = vst [vmem:[%s4044_s13 + $0x18] sm:$0xff] %v2140_v16 }
 0x1dd PF: > { %s13_s12 = sadd.s32 1, %s3317_s12  }
 0x1de   : > { %p10_p4 = scmp.ge.s32.totalorder %s13_s12, 4  }
 0x1e0   :  { %12 = sbr.rel (!%p10_p4) target bundleno = 1 (0x1), region = 62 }

// kernel: banana_pixels_forward.6
= control target key start
LH: loop header
LB: loop body
LE: loop exit
PB: predicated region body
PF: predicated region fallthrough
CT: control target
= control target key end

     0   :  { %s3277_s12 = smov 0   ;;  %s3954_s0 = inlined_call_operand.vmem [shape: bf16[2,800,512], index: 0, kind: input, shape index: {}]   ;;  %s3955_s1 = inlined_call_operand.vmem [shape: bf16[32,800], index: 1, kind: input, shape index: {}]   ;;  %s3956_s2 = inlined_call_operand.vmem [shape: f32[32,1], index: 2, kind: input, shape index: {}]   ;;  %s3957_s3 = inlined_call_operand.vmem [shape: bf16[2,32,128], index: 3, kind: output, shape index: {}]  }
   0x1 LB: > { %s2124_s13 = sadd.s32 4294967295, %s3254_s12   ;;  %p2128_p0 = scmp.ge.s32.totalorder %s3254_s12, 1  ;;  %s3254_s12 = sphi %s3277_s12, %s13_s12  }
   0x2   : > { %p137_p1 = scmp.lt.s32.totalorder %s3254_s12, 3 }
   0x4   : > { %p138_p2 = pnand %p2128_p0, %p137_p1 }
   0x5   : > { %p161_p3 = scmp.lt.s32.totalorder (!%p138_p2), %s2124_s13, 1 }
   0x6   : > { %141 = sbr.rel (%p138_p2) target bundleno = 428 (0x1ac), region = 32 }
   0xb   : > { %s3959_s13 = smov (!%p161_p3, %s2124_s13), 1  ;;  %vm1458_vm0 = vcmask 261120  }
   0xc   : > { %s3228_s14 = smul.u32 1600, %s3959_s13  ;;  %s3002_s6 = sshll.u32 %s3959_s13, 4 }
   0xd   : > { %s170_s9 = scalar_lea.vmem %s3957_s3, %s3002_s6 }
   0xe   : > { %s3291_s17 = scalar_lea.vmem %s3954_s0, %s3228_s14 }
   0xf   : > { %v2302_v0 = vld [vmem:[%s3291_s17 + $0xe0] sm:$0xf]  ;;  %v3047_v1 = vld [vmem:[%s3291_s17 + $0xec] sm:$0xf0] }
  0x10   : > { %v2430_v2 = vld [vmem:[%s3291_s17 + $0x1e0] sm:$0xf]  ;;  %v2303_v3 = vor.u32 %v3047_v1, %v2302_v0  ;;  %v3079_v4 = vld [vmem:[%s3291_s17 + $0x1ec] sm:$0xf0] }
  0x11   : > { %v2558_v5 = vld [vmem:[%s3291_s17 + $0x2e0] sm:$0xf]  ;;  %v3111_v6 = vld [vmem:[%s3291_s17 + $0x2ec] sm:$0xf0]  ;;  %v2431_v7 = vor.u32 %v3079_v4, %v2430_v2 }
  0x12   : > { %v2559_v8 = vor.u32 %v3111_v6, %v2558_v5  ;;  %v2686_v9 = vld [vmem:[%s3291_s17 + $0x3e0] sm:$0xf]  ;;  %v3143_v10 = vld [vmem:[%s3291_s17 + $0x3ec] sm:$0xf0]  ;;  %1465 = vmatpush.bf16.msra.mxu0 %v2303_v3 }
  0x13   : > { %v2286_v11 = vld [vmem:[%s3291_s17 + $0xc0] sm:$0xf]  ;;  %v2687_v12 = vor.u32 %v3143_v10, %v2686_v9  ;;  %v3043_v13 = vld [vmem:[%s3291_s17 + $0xcc] sm:$0xf0]  ;;  %1484 = vmatpush.bf16.msra.mxu1 %v2431_v7 }
  0x14   : > { %v2414_v14 = vld [vmem:[%s3291_s17 + $0x1c0] sm:$0xf]  ;;  %v3075_v15 = vld [vmem:[%s3291_s17 + $0x1cc] sm:$0xf0]  ;;  %1503 = vmatpush.bf16.msra.mxu2 %v2559_v8  ;;  %v2287_v16 = vor.u32 %v3043_v13, %v2286_v11 }
  0x15   : > { %v2415_v17 = vor.u32 %v3075_v15, %v2414_v14  ;;  %v2542_v18 = vld [vmem:[%s3291_s17 + $0x2c0] sm:$0xf]  ;;  %v3107_v19 = vld [vmem:[%s3291_s17 + $0x2cc] sm:$0xf0]  ;;  %1522 = vmatpush.bf16.msra.mxu3 %v2687_v12 }
  0x16   : > { %v2670_v20 = vld [vmem:[%s3291_s17 + $0x3c0] sm:$0xf]  ;;  %v2543_v21 = vor.u32 %v3107_v19, %v2542_v18  ;;  %v3139_v22 = vld [vmem:[%s3291_s17 + $0x3cc] sm:$0xf0]  ;;  %1466 = vmatpush.bf16.msra.mxu0 %v2287_v16 }
  0x17   : > { %v2270_v23 = vld [vmem:[%s3291_s17 + $0xa0] sm:$0xf]  ;;  %v3039_v24 = vld [vmem:[%s3291_s17 + $0xac] sm:$0xf0]  ;;  %v2671_v25 = vor.u32 %v3139_v22, %v2670_v20  ;;  %1485 = vmatpush.bf16.msra.mxu1 %v2415_v17 }
  0x18   : > { %v2398_v26 = vld [vmem:[%s3291_s17 + $0x1a0] sm:$0xf]  ;;  %v3071_v27 = vld [vmem:[%s3291_s17 + $0x1ac] sm:$0xf0]  ;;  %v2271_v29 = vor.u32 %v3039_v24, %v2270_v23  ;;  %1504 = vmatpush.bf16.msra.mxu2 %v2543_v21 }
  0x19   : > { %v2526_v28 = vld [vmem:[%s3291_s17 + $0x2a0] sm:$0xf]  ;;  %v3103_v30 = vld [vmem:[%s3291_s17 + $0x2ac] sm:$0xf0]  ;;  %v2399_v33 = vor.u32 %v3071_v27, %v2398_v26  ;;  %1523 = vmatpush.bf16.msra.mxu3 %v2671_v25 }
  0x1a   : > { %v2654_v31 = vld [vmem:[%s3291_s17 + $0x3a0] sm:$0xf]  ;;  %v3135_v32 = vld [vmem:[%s3291_s17 + $0x3ac] sm:$0xf0]  ;;  %v2527_v34 = vor.u32 %v3103_v30, %v2526_v28  ;;  %1467 = vmatpush.bf16.msra.mxu0 %v2271_v29  ;;  %v3006_v29 = vld [vmem:[%s3955_s1 + $0x18] sm:$0xf0] }
  0x1b   : > { %v2254_v35 = vld [vmem:[%s3291_s17 + $0x80] sm:$0xf]  ;;  %v3035_v36 = vld [vmem:[%s3291_s17 + $0x8c] sm:$0xf0]  ;;  %v2655_v38 = vor.u32 %v3135_v32, %v2654_v31  ;;  %1486 = vmatpush.bf16.msra.mxu1 %v2399_v33  ;;  %v3003_v30 = vld [vmem:[%s3955_s1 + $0x4] sm:$0xf] }
  0x1c   : > { %v2382_v37 = vld [vmem:[%s3291_s17 + $0x180] sm:$0xf]  ;;  %v3067_v39 = vld [vmem:[%s3291_s17 + $0x18c] sm:$0xf0]  ;;  %v2255_v44 = vor.u32 %v3035_v36, %v2254_v35  ;;  %1505 = vmatpush.bf16.msra.mxu2 %v2527_v34 }
  0x1d   : > { %v2510_v40 = vld [vmem:[%s3291_s17 + $0x280] sm:$0xf]  ;;  %v3099_v41 = vld [vmem:[%s3291_s17 + $0x28c] sm:$0xf0]  ;;  %v2383_v45 = vor.u32 %v3067_v39, %v2382_v37  ;;  %1524 = vmatpush.bf16.msra.mxu3 %v2655_v38  ;;  %v2142_v39 = vld [vmem:[%s3955_s1 + $0x8] sm:$0xf] }
  0x1e   : > { %v2638_v42 = vld [vmem:[%s3291_s17 + $0x380] sm:$0xf]  ;;  %v3131_v43 = vld [vmem:[%s3291_s17 + $0x38c] sm:$0xf0]  ;;  %v2511_v46 = vor.u32 %v3099_v41, %v2510_v40  ;;  %1468 = vmatpush.bf16.msra.mxu0 %v2255_v44  ;;  %v3007_v40 = vld [vmem:[%s3955_s1 + $0x20] sm:$0xf0] }
  0x1f   : > { %v2238_v47 = vld [vmem:[%s3291_s17 + $0x60] sm:$0xf]  ;;  %v3031_v48 = vld [vmem:[%s3291_s17 + $0x6c] sm:$0xf0]  ;;  %v2639_v50 = vor.u32 %v3131_v43, %v2638_v42  ;;  %1487 = vmatpush.bf16.msra.mxu1 %v2383_v45  ;;  %v3004_v41 = vld [vmem:[%s3955_s1 + $0xc] sm:$0xf] }
  0x20   : > { %v2366_v49 = vld [vmem:[%s3291_s17 + $0x160] sm:$0xf]  ;;  %v3063_v51 = vld [vmem:[%s3291_s17 + $0x16c] sm:$0xf0]  ;;  %v2239_v56 = vor.u32 %v3031_v48, %v2238_v47  ;;  %1506 = vmatpush.bf16.msra.mxu2 %v2511_v46  ;;  %v2144_v43 = vld [vmem:[%s3955_s1 + $0x24] sm:$0xf0] }
  0x21   : > { %v2494_v52 = vld [vmem:[%s3291_s17 + $0x260] sm:$0xf]  ;;  %v3095_v53 = vld [vmem:[%s3291_s17 + $0x26c] sm:$0xf0]  ;;  %v2367_v57 = vor.u32 %v3063_v51, %v2366_v49  ;;  %1525 = vmatpush.bf16.msra.mxu3 %v2639_v50  ;;  %v3045_v49 = vld [vmem:[%s3291_s17 + $0xe4] sm:$0xf] }
  0x22   : > { %v2622_v54 = vld [vmem:[%s3291_s17 + $0x360] sm:$0xf]  ;;  %v3127_v55 = vld [vmem:[%s3291_s17 + $0x36c] sm:$0xf0]  ;;  %v2495_v58 = vor.u32 %v3095_v53, %v2494_v52  ;;  %1469 = vmatpush.bf16.msra.mxu0 %v2239_v56  ;;  %v2304_v50 = vld [vmem:[%s3291_s17 + $0xf0] sm:$0xf0]  ;;  %v3393_v52 = vor.u32 %v3007_v40, %v2142_v39 }
  0x23   : > { %v2222_v59 = vld [vmem:[%s3291_s17 + $0x40] sm:$0xf]  ;;  %v3027_v60 = vld [vmem:[%s3291_s17 + $0x4c] sm:$0xf0]  ;;  %v2623_v62 = vor.u32 %v3127_v55, %v2622_v54  ;;  %1488 = vmatpush.bf16.msra.mxu1 %v2367_v57  ;;  %v3397_v55 = vor.u32 %v3004_v41, %v2144_v43  ;;  %v2307_v57 = vor.u32 %v3045_v49, %v2304_v50  ;;  %v2688_v39 = vld [vmem:[%s3291_s17 + $0x3f0] sm:$0xf0] }
  0x24   : > { %v2350_v61 = vld [vmem:[%s3291_s17 + $0x140] sm:$0xf]  ;;  %v3059_v63 = vld [vmem:[%s3291_s17 + $0x14c] sm:$0xf0]  ;;  %v2223_v4 = vor.u32 %v3027_v60, %v2222_v59  ;;  %1507 = vmatpush.bf16.msra.mxu2 %v2495_v58 }
  0x25   : > { %v2478_v0 = vld [vmem:[%s3291_s17 + $0x240] sm:$0xf]  ;;  %v3091_v1 = vld [vmem:[%s3291_s17 + $0x24c] sm:$0xf0]  ;;  %v2351_v5 = vor.u32 %v3059_v63, %v2350_v61  ;;  %1526 = vmatpush.bf16.msra.mxu3 %v2623_v62  ;;  %v3041_v61 = vld [vmem:[%s3291_s17 + $0xc4] sm:$0xf] }
  0x26   : > { %v2606_v2 = vld [vmem:[%s3291_s17 + $0x340] sm:$0xf]  ;;  %v3123_v3 = vld [vmem:[%s3291_s17 + $0x34c] sm:$0xf0]  ;;  %v2479_v6 = vor.u32 %v3091_v1, %v2478_v0  ;;  %1470 = vmatpush.bf16.msra.mxu0 %v2223_v4  ;;  %v2288_v62 = vld [vmem:[%s3291_s17 + $0xd0] sm:$0xf0] }
  0x27   : > { %v2206_v7 = vld [vmem:[%s3291_s17 + $0x20] sm:$0xf]  ;;  %v3023_v8 = vld [vmem:[%s3291_s17 + $0x2c] sm:$0xf0]  ;;  %v2607_v10 = vor.u32 %v3123_v3, %v2606_v2  ;;  %1489 = vmatpush.bf16.msra.mxu1 %v2351_v5  ;;  %v2291_v5 = vor.u32 %v3041_v61, %v2288_v62  ;;  %v3133_v62 = vld [vmem:[%s3291_s17 + $0x3a4] sm:$0xf] }
  0x28   : > { %v2334_v9 = vld [vmem:[%s3291_s17 + $0x120] sm:$0xf]  ;;  %v3055_v11 = vld [vmem:[%s3291_s17 + $0x12c] sm:$0xf0]  ;;  %v2207_v17 = vor.u32 %v3023_v8, %v2206_v7  ;;  %1508 = vmatpush.bf16.msra.mxu2 %v2479_v6 }
  0x29   : > { %v2462_v12 = vld [vmem:[%s3291_s17 + $0x220] sm:$0xf]  ;;  %v3087_v13 = vld [vmem:[%s3291_s17 + $0x22c] sm:$0xf0]  ;;  %v2335_v21 = vor.u32 %v3055_v11, %v2334_v9  ;;  %1527 = vmatpush.bf16.msra.mxu3 %v2607_v10  ;;  %v3037_v9 = vld [vmem:[%s3291_s17 + $0xa4] sm:$0xf] }
  0x2a   : > { %v2590_v14 = vld [vmem:[%s3291_s17 + $0x320] sm:$0xf]  ;;  %v3119_v15 = vld [vmem:[%s3291_s17 + $0x32c] sm:$0xf0]  ;;  %v2463_v22 = vor.u32 %v3087_v13, %v2462_v12  ;;  %1471 = vmatpush.bf16.msra.mxu0 %v2207_v17  ;;  %v2272_v10 = vld [vmem:[%s3291_s17 + $0xb0] sm:$0xf0] }
  0x2b   : > { %v2190_v16 = vld [vmem:[%s3291_s17] sm:$0xf]  ;;  %v3019_v18 = vld [vmem:[%s3291_s17 + $0xc] sm:$0xf0]  ;;  %v2591_v26 = vor.u32 %v3119_v15, %v2590_v14  ;;  %1490 = vmatpush.bf16.msra.mxu1 %v2335_v21  ;;  %v3033_v17 = vld [vmem:[%s3291_s17 + $0x84] sm:$0xf] }
  0x2c   : > { %v2318_v19 = vld [vmem:[%s3291_s17 + $0x100] sm:$0xf]  ;;  %v3051_v20 = vld [vmem:[%s3291_s17 + $0x10c] sm:$0xf0]  ;;  %v2191_v33 = vor.u32 %v3019_v18, %v2190_v16  ;;  %1509 = vmatpush.bf16.msra.mxu2 %v2463_v22  ;;  %v2275_v16 = vor.u32 %v3037_v9, %v2272_v10  ;;  %v2256_v18 = vld [vmem:[%s3291_s17 + $0x90] sm:$0xf0] }
  0x2d   : > { %v2446_v23 = vld [vmem:[%s3291_s17 + $0x200] sm:$0xf]  ;;  %v3083_v24 = vld [vmem:[%s3291_s17 + $0x20c] sm:$0xf0]  ;;  %v2319_v37 = vor.u32 %v3051_v20, %v2318_v19  ;;  %1528 = vmatpush.bf16.msra.mxu3 %v2591_v26  ;;  %v2162_v19 = vld [vmem:[%s3955_s1 + $0x38] sm:$0xf] }
  0x2e   : > { %v2574_v25 = vld [vmem:[%s3291_s17 + $0x300] sm:$0xf]  ;;  %v3115_v27 = vld [vmem:[%s3291_s17 + $0x30c] sm:$0xf0]  ;;  %v2447_v38 = vor.u32 %v3083_v24, %v2446_v23  ;;  %1472 = vmatpush.bf16.msra.mxu0 %v2191_v33  ;;  %v3013_v21 = vld [vmem:[%s3955_s1 + $0x50] sm:$0xf0] }
  0x2f   : > { %v2134_v28 = vld [vmem:[%s3955_s1] sm:$0xf]  ;;  %v3215_v32 = vld [vmem:[%s3291_s17 + $0x62c] sm:$0xf0]  ;;  %v2575_v42 = vor.u32 %v3115_v27, %v2574_v25  ;;  %1491 = vmatpush.bf16.msra.mxu1 %v2319_v37  ;;  %v3010_v22 = vld [vmem:[%s3955_s1 + $0x3c] sm:$0xf] }
  0x30   : > { %v2974_v31 = vld [vmem:[%s3291_s17 + $0x620] sm:$0xf]  ;;  %v3207_v36 = vld [vmem:[%s3291_s17 + $0x5ec] sm:$0xf0]  ;;  %v3387_v47 = vor.u32 %v3006_v29, %v2134_v28  ;;  %1510 = vmatpush.bf16.msra.mxu2 %v2447_v38  ;;  %v2164_v23 = vld [vmem:[%s3955_s1 + $0x54] sm:$0xf0] }
  0x31   : > { %v2136_v34 = vld [vmem:[%s3955_s1 + $0x1c] sm:$0xf0]  ;;  %v2975_v44 = vor.u32 %v3215_v32, %v2974_v31  ;;  %v3175_v46 = vld [vmem:[%s3291_s17 + $0x4ec] sm:$0xf0]  ;;  %1529 = vmatpush.bf16.msra.mxu3 %v2575_v42  ;;  %v3014_v28 = vld [vmem:[%s3955_s1 + $0x58] sm:$0xf0]  ;;  %v2259_v31 = vor.u32 %v3033_v17, %v2256_v18  ;;  %v3455_v40 = vor.u32 %v3010_v22, %v2164_v23 }
  0x32   : > { %v2942_v35 = vld [vmem:[%s3291_s17 + $0x5e0] sm:$0xf]  ;;  %v3391_v51 = vor.u32 %v3003_v30, %v2136_v34  ;;  %v3203_v54 = vld [vmem:[%s3291_s17 + $0x5cc] sm:$0xf0]  ;;  %1473 = vmatmul.bf16.vlgmr.msra.gmra.mxu0 %v3387_v47  ;;  %v3011_v29 = vld [vmem:[%s3955_s1 + $0x44] sm:$0xf] }
  0x33   : > { %v2814_v45 = vld [vmem:[%s3291_s17 + $0x4e0] sm:$0xf]  ;;  %v2943_v48 = vor.u32 %v3207_v36, %v2942_v35  ;;  %v3171_v59 = vld [vmem:[%s3291_s17 + $0x4cc] sm:$0xf0]  ;;  %1511 = vmatmul.bf16.vlgmr.msra.gmra.mxu2 %v3393_v52  ;;  %v3029_v34 = vld [vmem:[%s3291_s17 + $0x64] sm:$0xf]  ;;  %v3450_v35 = vor.u32 %v3013_v21, %v2162_v19 }
  0x34   : > { %v2926_v53 = vld [vmem:[%s3291_s17 + $0x5c0] sm:$0xf]  ;;  %v2815_v56 = vor.u32 %v3175_v46, %v2814_v45  ;;  %1585 = vmatpush.bf16.msrb.mxu2 %v2975_v44  ;;  %1492 = vmatmul.bf16.vlgmr.msra.gmra.mxu1 %v3391_v51  ;;  %v3199_v0 = vld [vmem:[%s3291_s17 + $0x5ac] sm:$0xf0]  ;;  %v2240_v37 = vld [vmem:[%s3291_s17 + $0x70] sm:$0xf0] }
  0x35   : > { %v2798_v58 = vld [vmem:[%s3291_s17 + $0x4c0] sm:$0xf]  ;;  %1560 = vmatpush.bf16.msrb.mxu1 %v2943_v48  ;;  %v2927_v60 = vor.u32 %v3203_v54, %v2926_v53  ;;  %v3211_v2 = vld [vmem:[%s3291_s17 + $0x60c] sm:$0xf0]  ;;  %1530 = vmatmul.bf16.vlgmr.msra.gmra.mxu3 %v3397_v55  ;;  %v3141_v38 = vld [vmem:[%s3291_s17 + $0x3e4] sm:$0xf]  ;;  %v2243_v49 = vor.u32 %v3029_v34, %v2240_v37 }
  0x36   : > { %v2910_v63 = vld [vmem:[%s3291_s17 + $0x5a0] sm:$0xf]  ;;  %1541 = vmatpush.bf16.msrb.mxu0 %v2815_v56  ;;  %v2799_v3 = vor.u32 %v3171_v59, %v2798_v58  ;;  %1598 = vmatpush.bf16.msrb.mxu3 %v2307_v57  ;;  %v3167_v7 = vld [vmem:[%s3291_s17 + $0x4ac] sm:$0xf0]  ;;  %v2691_v44 = vor.u32 %v3141_v38, %v2688_v39  ;;  %v3137_v53 = vld [vmem:[%s3291_s17 + $0x3c4] sm:$0xf] }
  0x37   : > { %v2958_v1 = vld [vmem:[%s3291_s17 + $0x600] sm:$0xf]  ;;  %v2911_v8 = vor.u32 %v3199_v0, %v2910_v63  ;;  %v3195_v12 = vld [vmem:[%s3291_s17 + $0x58c] sm:$0xf0]  ;;  %v2672_v54 = vld [vmem:[%s3291_s17 + $0x3d0] sm:$0xf0] }
  0x38   : > { %v2959_v4 = vor.u32 %v3211_v2, %v2958_v1  ;;  %v2782_v6 = vld [vmem:[%s3291_s17 + $0x4a0] sm:$0xf]  ;;  %v3163_v15 = vld [vmem:[%s3291_s17 + $0x48c] sm:$0xf0]  ;;  %v3025_v57 = vld [vmem:[%s3291_s17 + $0x44] sm:$0xf]  ;;  %v2675_v59 = vor.u32 %v3137_v53, %v2672_v54 }
  0x39   : > { %1561 = vmatpush.bf16.msrb.mxu1 %v2927_v60  ;;  %v2894_v11 = vld [vmem:[%s3291_s17 + $0x580] sm:$0xf]  ;;  %v2783_v13 = vor.u32 %v3167_v7, %v2782_v6  ;;  %v3191_v26 = vld [vmem:[%s3291_s17 + $0x56c] sm:$0xf0]  ;;  %v2224_v58 = vld [vmem:[%s3291_s17 + $0x50] sm:$0xf0] }
  0x3a   : > { %1586 = vmatpush.bf16.msrb.mxu2 %v2959_v4  ;;  %1542 = vmatpush.bf16.msrb.mxu0 %v2799_v3  ;;  %v2766_v14 = vld [vmem:[%s3291_s17 + $0x480] sm:$0xf]  ;;  %v2895_v20 = vor.u32 %v3195_v12, %v2894_v11  ;;  %v3159_v33 = vld [vmem:[%s3291_s17 + $0x46c] sm:$0xf0]  ;;  %v2656_v0 = vld [vmem:[%s3291_s17 + $0x3b0] sm:$0xf0]  ;;  %v2227_v1 = vor.u32 %v3025_v57, %v2224_v58 }
  0x3b   : > { %1599 = vmatpush.bf16.msrb.mxu3 %v2291_v5  ;;  %v2170_v24 = vld [vmem:[%s3955_s1 + $0x40] sm:$0xf]  ;;  %v2767_v27 = vor.u32 %v3163_v15, %v2766_v14  ;;  %v3187_v43 = vld [vmem:[%s3291_s17 + $0x54c] sm:$0xf0]  ;;  %v3021_v4 = vld [vmem:[%s3291_s17 + $0x24] sm:$0xf]  ;;  %v2659_v5 = vor.u32 %v3133_v62, %v2656_v0 }
  0x3c   : > { %v2878_v25 = vld [vmem:[%s3291_s17 + $0x560] sm:$0xf]  ;;  %v3457_v41 = vor.u32 %v3014_v28, %v2170_v24  ;;  %v3155_v50 = vld [vmem:[%s3291_s17 + $0x44c] sm:$0xf0]  ;;  %v2208_v7 = vld [vmem:[%s3291_s17 + $0x30] sm:$0xf0] }
  0x3d   : > { %1562 = vmatpush.bf16.msrb.mxu1 %v2911_v8  ;;  %v2172_v30 = vld [vmem:[%s3955_s1 + $0x5c] sm:$0xf0]  ;;  %v2879_v36 = vor.u32 %v3191_v26, %v2878_v25  ;;  %v3183_v61 = vld [vmem:[%s3291_s17 + $0x52c] sm:$0xf0]  ;;  %v3129_v8 = vld [vmem:[%s3291_s17 + $0x384] sm:$0xf] }
  0x3e   : > { %1543 = vmatpush.bf16.msrb.mxu0 %v2783_v13  ;;  %v2750_v32 = vld [vmem:[%s3291_s17 + $0x460] sm:$0xf]  ;;  %v3461_v45 = vor.u32 %v3011_v29, %v2172_v30  ;;  %1655 = vmatpush.bf16.msra.mxu2 %v2691_v44  ;;  %v3151_v3 = vld [vmem:[%s3291_s17 + $0x42c] sm:$0xf0]  ;;  %v2640_v9 = vld [vmem:[%s3291_s17 + $0x390] sm:$0xf0] }
  0x3f   : > { %1600 = vmatpush.bf16.msrb.mxu3 %v2275_v16  ;;  %v2862_v42 = vld [vmem:[%s3291_s17 + $0x540] sm:$0xf]  ;;  %v2751_v46 = vor.u32 %v3159_v33, %v2750_v32  ;;  %v3179_v11 = vld [vmem:[%s3291_s17 + $0x50c] sm:$0xf0]  ;;  %v3109_v14 = vld [vmem:[%s3291_s17 + $0x2e4] sm:$0xf]  ;;  %v2211_v16 = vor.u32 %v3021_v4, %v2208_v7 }
  0x40   : > { %v2734_v48 = vld [vmem:[%s3291_s17 + $0x440] sm:$0xf]  ;;  %v2863_v56 = vor.u32 %v3187_v43, %v2862_v42  ;;  %v2560_v15 = vld [vmem:[%s3291_s17 + $0x2f0] sm:$0xf0]  ;;  %v3147_v17 = vld [vmem:[%s3291_s17 + $0x40c] sm:$0xf0] }
  0x41   : > { %1563 = vmatpush.bf16.msrb.mxu1 %v2895_v20  ;;  %v2846_v60 = vld [vmem:[%s3291_s17 + $0x520] sm:$0xf]  ;;  %v2735_v63 = vor.u32 %v3155_v50, %v2734_v48  ;;  %v3017_v18 = vld [vmem:[%s3291_s17 + $0x4] sm:$0xf]  ;;  %v2192_v19 = vld [vmem:[%s3291_s17 + $0x10] sm:$0xf0]  ;;  %v2643_v20 = vor.u32 %v3129_v8, %v2640_v9 }
  0x42   : > { %1544 = vmatpush.bf16.msrb.mxu0 %v2767_v27  ;;  %v2718_v2 = vld [vmem:[%s3291_s17 + $0x420] sm:$0xf]  ;;  %1656 = vmatpush.bf16.msra.mxu2 %v2675_v59  ;;  %v2847_v6 = vor.u32 %v3183_v61, %v2846_v60  ;;  %v2150_v22 = vld [vmem:[%s3955_s1 + $0x10] sm:$0xf]  ;;  %v3008_v23 = vld [vmem:[%s3955_s1 + $0x28] sm:$0xf0]  ;;  %v2563_v27 = vor.u32 %v3109_v14, %v2560_v15 }
  0x43   : > { %1601 = vmatpush.bf16.msrb.mxu3 %v2259_v31  ;;  %1478 = vmatmul.bf16.gmra.mxu0 %v3450_v35  ;;  %v2830_v10 = vld [vmem:[%s3291_s17 + $0x500] sm:$0xf]  ;;  %v2719_v12 = vor.u32 %v3151_v3, %v2718_v2  ;;  %v3077_v24 = vld [vmem:[%s3291_s17 + $0x1e4] sm:$0xf]  ;;  %v2432_v25 = vld [vmem:[%s3291_s17 + $0x1f0] sm:$0xf0]  ;;  %v3520_v50 = vor.u32 %v3008_v23, %v2150_v22 }
  0x44   : > { %1497 = vmatmul.bf16.gmra.mxu1 %v3455_v40  ;;  %1516 = vmatmul.bf16.gmra.mxu2 %v3457_v41  ;;  %v2702_v13 = vld [vmem:[%s3291_s17 + $0x400] sm:$0xf]  ;;  %v2831_v21 = vor.u32 %v3179_v11, %v2830_v10  ;;  %v3173_v26 = vld [vmem:[%s3291_s17 + $0x4e4] sm:$0xf]  ;;  %v2816_v28 = vld [vmem:[%s3291_s17 + $0x4f0] sm:$0xf0]  ;;  %v2435_v38 = vor.u32 %v3077_v24, %v2432_v25 }
  0x45   : > { %1564 = vmatpush.bf16.msrb.mxu1 %v2879_v36  ;;  %1535 = vmatmul.bf16.gmra.mxu3 %v3461_v45  ;;  %v3125_v29 = vld [vmem:[%s3291_s17 + $0x364] sm:$0xf]  ;;  %v2624_v30 = vld [vmem:[%s3291_s17 + $0x370] sm:$0xf0]  ;;  %v2703_v31 = vor.u32 %v3147_v17, %v2702_v13  ;;  %v2152_v33 = vld [vmem:[%s3955_s1 + $0x2c] sm:$0xf0]  ;;  %v2195_v36 = vor.u32 %v3017_v18, %v2192_v19  ;;  %v2819_v43 = vor.u32 %v3173_v26, %v2816_v28 }
  0x46   : > { %1545 = vmatpush.bf16.msrb.mxu0 %v2751_v46  ;;  %1657 = vmatpush.bf16.msra.mxu2 %v2659_v5  ;;  %v3005_v32 = vld [vmem:[%s3955_s1 + $0x14] sm:$0xf]  ;;  %v2158_v34 = vld [vmem:[%s3955_s1 + $0x18] sm:$0xf]  ;;  %v3073_v39 = vld [vmem:[%s3291_s17 + $0x1c4] sm:$0xf] }
  0x47   : > { %1602 = vmatpush.bf16.msrb.mxu3 %v2243_v49  ;;  %v3009_v37 = vld [vmem:[%s3955_s1 + $0x30] sm:$0xf0]  ;;  %v3105_v44 = vld [vmem:[%s3291_s17 + $0x2c4] sm:$0xf]  ;;  %v2627_v49 = vor.u32 %v3125_v29, %v2624_v30  ;;  %v3522_v53 = vor.u32 %v3005_v32, %v2152_v33  ;;  %v2310_v19 = vld [vmem:[%s3291_s17 + $0xe8] sm:$0xf] }
  0x48   : > { %v2416_v42 = vld [vmem:[%s3291_s17 + $0x1d0] sm:$0xf0]  ;;  %v3169_v48 = vld [vmem:[%s3291_s17 + $0x4c4] sm:$0xf]  ;;  %v3527_v58 = vor.u32 %v3009_v37, %v2158_v34  ;;  %v2178_v25 = vld [vmem:[%s3955_s1 + $0x48] sm:$0xf] }
  0x49   : > { %1565 = vmatpush.bf16.msrb.mxu1 %v2863_v56  ;;  %v2544_v46 = vld [vmem:[%s3291_s17 + $0x2d0] sm:$0xf0]  ;;  %v3121_v56 = vld [vmem:[%s3291_s17 + $0x344] sm:$0xf]  ;;  %v2419_v59 = vor.u32 %v3073_v39, %v2416_v42  ;;  %v3012_v34 = vld [vmem:[%s3955_s1 + $0x4c] sm:$0xf] }
  0x4a   : > { %1546 = vmatpush.bf16.msrb.mxu0 %v2735_v63  ;;  %1658 = vmatpush.bf16.msra.mxu2 %v2643_v20  ;;  %v2800_v54 = vld [vmem:[%s3291_s17 + $0x4d0] sm:$0xf0]  ;;  %v2547_v60 = vor.u32 %v3105_v44, %v2544_v46  ;;  %v3069_v61 = vld [vmem:[%s3291_s17 + $0x1a4] sm:$0xf]  ;;  %v3048_v20 = vld [vmem:[%s3291_s17 + $0xf4] sm:$0xf0] }
  0x4b   : > { %1603 = vmatpush.bf16.msrb.mxu3 %v2227_v1  ;;  %v2608_v57 = vld [vmem:[%s3291_s17 + $0x350] sm:$0xf0]  ;;  %v2803_v63 = vor.u32 %v3169_v48, %v2800_v54  ;;  %v3101_v0 = vld [vmem:[%s3291_s17 + $0x2a4] sm:$0xf]  ;;  %v2311_v33 = vor.u32 %v3048_v20, %v2310_v19  ;;  %v2186_v37 = vld [vmem:[%s3955_s1 + $0x50] sm:$0xf] }
  0x4c   : > { %v2400_v62 = vld [vmem:[%s3291_s17 + $0x1b0] sm:$0xf0]  ;;  %v3165_v2 = vld [vmem:[%s3291_s17 + $0x4a4] sm:$0xf]  ;;  %v2611_v3 = vor.u32 %v3121_v56, %v2608_v57 }
  0x4d   : > { %1566 = vmatpush.bf16.msrb.mxu1 %v2847_v6  ;;  %v2528_v1 = vld [vmem:[%s3291_s17 + $0x2b0] sm:$0xf0]  ;;  %v3117_v5 = vld [vmem:[%s3291_s17 + $0x324] sm:$0xf]  ;;  %v2403_v7 = vor.u32 %v3069_v61, %v2400_v62  ;;  %v3044_v61 = vld [vmem:[%s3291_s17 + $0xd4] sm:$0xf0] }
  0x4e   : > { %1547 = vmatpush.bf16.msrb.mxu0 %v2719_v12  ;;  %1659 = vmatpush.bf16.msra.mxu2 %v2627_v49  ;;  %v2784_v4 = vld [vmem:[%s3291_s17 + $0x4b0] sm:$0xf0]  ;;  %v2531_v8 = vor.u32 %v3101_v0, %v2528_v1  ;;  %v3065_v9 = vld [vmem:[%s3291_s17 + $0x184] sm:$0xf] }
  0x4f   : > { %1604 = vmatpush.bf16.msrb.mxu3 %v2211_v16  ;;  %v2592_v6 = vld [vmem:[%s3291_s17 + $0x330] sm:$0xf0]  ;;  %v2787_v11 = vor.u32 %v3165_v2, %v2784_v4  ;;  %v3097_v12 = vld [vmem:[%s3291_s17 + $0x284] sm:$0xf] }
  0x50   : > { %v2384_v10 = vld [vmem:[%s3291_s17 + $0x190] sm:$0xf0]  ;;  %v3161_v14 = vld [vmem:[%s3291_s17 + $0x484] sm:$0xf]  ;;  %v2595_v15 = vor.u32 %v3117_v5, %v2592_v6 }
  0x51   : > { %1567 = vmatpush.bf16.msrb.mxu1 %v2831_v21  ;;  %v2512_v13 = vld [vmem:[%s3291_s17 + $0x290] sm:$0xf0]  ;;  %v3113_v17 = vld [vmem:[%s3291_s17 + $0x304] sm:$0xf]  ;;  %v2387_v21 = vor.u32 %v3065_v9, %v2384_v10  ;;  %v2278_v9 = vld [vmem:[%s3291_s17 + $0xa8] sm:$0xf] }
  0x52   : > { %1548 = vmatpush.bf16.msrb.mxu0 %v2703_v31  ;;  %1660 = vmatpush.bf16.msra.mxu2 %v2611_v3  ;;  %v2768_v16 = vld [vmem:[%s3291_s17 + $0x490] sm:$0xf0]  ;;  %v2515_v22 = vor.u32 %v3097_v12, %v2512_v13  ;;  %v3061_v23 = vld [vmem:[%s3291_s17 + $0x164] sm:$0xf]  ;;  %v3040_v10 = vld [vmem:[%s3291_s17 + $0xb4] sm:$0xf0] }
  0x53   : > { %1605 = vmatpush.bf16.msrb.mxu3 %v2195_v36  ;;  %v2576_v18 = vld [vmem:[%s3291_s17 + $0x310] sm:$0xf0]  ;;  %v2771_v24 = vor.u32 %v3161_v14, %v2768_v16  ;;  %v3015_v30 = vld [vmem:[%s3955_s1 + $0x60] sm:$0xf0]  ;;  %v2180_v36 = vld [vmem:[%s3955_s1 + $0x64] sm:$0xf0]  ;;  %v2279_v20 = vor.u32 %v3040_v10, %v2278_v9 }
  0x54   : > { %1568 = vmatmul.bf16.vlgmr.msrb.gmra.mxu1 %v3522_v53  ;;  %2988 = vmatmul.msk.bf16.vlgmr.msrb.gmra.mxu2 %vm1458_vm0, %v3527_v58  ;;  %v2368_v26 = vld [vmem:[%s3291_s17 + $0x170] sm:$0xf0]  ;;  %v2579_v29 = vor.u32 %v3113_v17, %v2576_v18  ;;  %v3157_v31 = vld [vmem:[%s3291_s17 + $0x464] sm:$0xf]  ;;  %v3581_v56 = vor.u32 %v3015_v30, %v2178_v25  ;;  %v3583_v57 = vor.u32 %v3012_v34, %v2180_v36  ;;  %v3036_v30 = vld [vmem:[%s3291_s17 + $0x94] sm:$0xf0] }
  0x55   : > { %1636 = vmatpush.bf16.msra.mxu1 %v2563_v27  ;;  %1549 = vmatmul.bf16.vlgmr.msrb.gmra.mxu0 %v3520_v50  ;;  %v3093_v27 = vld [vmem:[%s3291_s17 + $0x264] sm:$0xf]  ;;  %v2496_v28 = vld [vmem:[%s3291_s17 + $0x270] sm:$0xf0]  ;;  %v2371_v39 = vor.u32 %v3061_v23, %v2368_v26  ;;  %v2438_v23 = vld [vmem:[%s3291_s17 + $0x1e8] sm:$0xf] }
  0x56   : > { %1617 = vmatpush.bf16.msra.mxu0 %v2435_v38  ;;  %1606 = vmatmul.bf16.vlgmr.msrb.gmra.mxu3 %v3387_v47  ;;  %v2752_v32 = vld [vmem:[%s3291_s17 + $0x470] sm:$0xf0]  ;;  %v3016_v38 = vld [vmem:[%s3955_s1 + $0x68] sm:$0xf0]  ;;  %v2499_v42 = vor.u32 %v3093_v27, %v2496_v28  ;;  %v3089_v48 = vld [vmem:[%s3291_s17 + $0x244] sm:$0xf] }
  0x57   : > { %1674 = vmatpush.bf16.msra.mxu3 %v2819_v43  ;;  %1661 = vmatpush.bf16.msra.mxu2 %v2595_v15  ;;  %v3057_v43 = vld [vmem:[%s3291_s17 + $0x144] sm:$0xf]  ;;  %v2352_v44 = vld [vmem:[%s3291_s17 + $0x150] sm:$0xf0]  ;;  %v2755_v46 = vor.u32 %v3157_v31, %v2752_v32  ;;  %v3588_v62 = vor.u32 %v3016_v38, %v2186_v37 }
  0x58   : > { %v2480_v49 = vld [vmem:[%s3291_s17 + $0x250] sm:$0xf0]  ;;  %v3153_v54 = vld [vmem:[%s3291_s17 + $0x444] sm:$0xf] }
  0x59   : > { %1637 = vmatpush.bf16.msra.mxu1 %v2547_v60  ;;  %v2294_v60 = vld [vmem:[%s3291_s17 + $0xc8] sm:$0xf]  ;;  %v2483_v0 = vor.u32 %v3089_v48, %v2480_v49  ;;  %v3053_v1 = vld [vmem:[%s3291_s17 + $0x124] sm:$0xf]  ;;  %v2336_v2 = vld [vmem:[%s3291_s17 + $0x130] sm:$0xf0] }
  0x5a   : > { %1618 = vmatpush.bf16.msra.mxu0 %v2419_v59  ;;  %v2736_v59 = vld [vmem:[%s3291_s17 + $0x450] sm:$0xf0]  ;;  %v3085_v4 = vld [vmem:[%s3291_s17 + $0x224] sm:$0xf]  ;;  %v3032_v48 = vld [vmem:[%s3291_s17 + $0x74] sm:$0xf0] }
  0x5b   : > { %1675 = vmatpush.bf16.msra.mxu3 %v2803_v63  ;;  %1662 = vmatpush.bf16.msra.mxu2 %v2579_v29  ;;  %v2355_v63 = vor.u32 %v3057_v43, %v2352_v44  ;;  %v2739_v3 = vor.u32 %v3153_v54, %v2736_v59  ;;  %v2464_v5 = vld [vmem:[%s3291_s17 + $0x230] sm:$0xf0]  ;;  %v3149_v6 = vld [vmem:[%s3291_s17 + $0x424] sm:$0xf]  ;;  %v2262_v29 = vld [vmem:[%s3291_s17 + $0x88] sm:$0xf] }
  0x5c   : > { %v2467_v12 = vor.u32 %v3085_v4, %v2464_v5  ;;  %v3049_v13 = vld [vmem:[%s3291_s17 + $0x104] sm:$0xf]  ;;  %v2320_v14 = vld [vmem:[%s3291_s17 + $0x110] sm:$0xf0]  ;;  %v2263_v38 = vor.u32 %v3036_v30, %v2262_v29  ;;  %v2230_v4 = vld [vmem:[%s3291_s17 + $0x48] sm:$0xf] }
  0x5d   : > { %1638 = vmatpush.bf16.msra.mxu1 %v2531_v8  ;;  %v2720_v8 = vld [vmem:[%s3291_s17 + $0x430] sm:$0xf0]  ;;  %v3081_v15 = vld [vmem:[%s3291_s17 + $0x204] sm:$0xf]  ;;  %v2323_v27 = vor.u32 %v3049_v13, %v2320_v14  ;;  %v3028_v5 = vld [vmem:[%s3291_s17 + $0x54] sm:$0xf0] }
  0x5e   : > { %1619 = vmatpush.bf16.msra.mxu0 %v2403_v7  ;;  %v2295_v7 = vor.u32 %v3044_v61, %v2294_v60  ;;  %v2723_v16 = vor.u32 %v3149_v6, %v2720_v8  ;;  %v2448_v17 = vld [vmem:[%s3291_s17 + $0x210] sm:$0xf0]  ;;  %v3145_v18 = vld [vmem:[%s3291_s17 + $0x404] sm:$0xf]  ;;  %v2406_v61 = vld [vmem:[%s3291_s17 + $0x1a8] sm:$0xf]  ;;  %v2231_v13 = vor.u32 %v3028_v5, %v2230_v4 }
  0x5f   : > { %1676 = vmatpush.bf16.msra.mxu3 %v2787_v11  ;;  %1731 = vmatpush.bf16.msrb.mxu2 %v2311_v33  ;;  %v2339_v11 = vor.u32 %v3053_v1, %v2336_v2  ;;  %v2704_v19 = vld [vmem:[%s3291_s17 + $0x410] sm:$0xf0]  ;;  %v3213_v25 = vld [vmem:[%s3291_s17 + $0x624] sm:$0xf]  ;;  %v2451_v28 = vor.u32 %v3081_v15, %v2448_v17  ;;  %v3144_v8 = vld [vmem:[%s3291_s17 + $0x3f4] sm:$0xf0] }
  0x60   : > { %v2976_v26 = vld [vmem:[%s3291_s17 + $0x630] sm:$0xf0]  ;;  %v2707_v31 = vor.u32 %v3145_v18, %v2704_v19  ;;  %v3201_v36 = vld [vmem:[%s3291_s17 + $0x5c4] sm:$0xf]  ;;  %v2214_v14 = vld [vmem:[%s3291_s17 + $0x28] sm:$0xf] }
  0x61   : > { %1639 = vmatpush.bf16.msra.mxu1 %v2515_v22  ;;  %v2944_v22 = vld [vmem:[%s3291_s17 + $0x5f0] sm:$0xf0]  ;;  %v2979_v34 = vor.u32 %v3213_v25, %v2976_v26  ;;  %v3197_v44 = vld [vmem:[%s3291_s17 + $0x5a4] sm:$0xf]  ;;  %v2678_v17 = vld [vmem:[%s3291_s17 + $0x3c8] sm:$0xf] }
  0x62   : > { %1620 = vmatpush.bf16.msra.mxu0 %v2387_v21  ;;  %v3205_v21 = vld [vmem:[%s3291_s17 + $0x5e4] sm:$0xf]  ;;  %v2928_v37 = vld [vmem:[%s3291_s17 + $0x5d0] sm:$0xf0]  ;;  %v3140_v18 = vld [vmem:[%s3291_s17 + $0x3d4] sm:$0xf0] }
  0x63   : > { %1677 = vmatpush.bf16.msra.mxu3 %v2771_v24  ;;  %1732 = vmatpush.bf16.msrb.mxu2 %v2295_v7  ;;  %v3080_v24 = vld [vmem:[%s3291_s17 + $0x1f4] sm:$0xf0]  ;;  %v2947_v32 = vor.u32 %v3205_v21, %v2944_v22  ;;  %v2931_v43 = vor.u32 %v3201_v36, %v2928_v37  ;;  %v2912_v49 = vld [vmem:[%s3291_s17 + $0x5b0] sm:$0xf0]  ;;  %v3209_v54 = vld [vmem:[%s3291_s17 + $0x604] sm:$0xf]  ;;  %v2679_v21 = vor.u32 %v3140_v18, %v2678_v17 }
  0x64   : > { %1573 = vmatmul.bf16.gmra.mxu1 %v3583_v57  ;;  %2989 = vmatmul.msk.bf16.gmra.mxu2 %vm1458_vm0, %v3588_v62  ;;  %v2439_v33 = vor.u32 %v3080_v24, %v2438_v23  ;;  %v2960_v59 = vld [vmem:[%s3291_s17 + $0x610] sm:$0xf0]  ;;  %v2915_v1 = vor.u32 %v3197_v44, %v2912_v49  ;;  %v3193_v2 = vld [vmem:[%s3291_s17 + $0x584] sm:$0xf]  ;;  %v2694_v7 = vld [vmem:[%s3291_s17 + $0x3e8] sm:$0xf] }
  0x65   : > { %1640 = vmatpush.bf16.msra.mxu1 %v2499_v42  ;;  %1554 = vmatmul.bf16.gmra.mxu0 %v3581_v56  ;;  %v3076_v42 = vld [vmem:[%s3291_s17 + $0x1d4] sm:$0xf0]  ;;  %v2896_v6 = vld [vmem:[%s3291_s17 + $0x590] sm:$0xf0]  ;;  %v2695_v9 = vor.u32 %v3144_v8, %v2694_v7  ;;  %v3189_v19 = vld [vmem:[%s3291_s17 + $0x564] sm:$0xf] }
  0x66   : > { %1621 = vmatpush.bf16.msra.mxu0 %v2371_v39  ;;  %1611 = vmatmul.bf16.gmra.mxu3 %v3450_v35  ;;  %v2422_v39 = vld [vmem:[%s3291_s17 + $0x1c8] sm:$0xf]  ;;  %v2899_v15 = vor.u32 %v3193_v2, %v2896_v6  ;;  %v3064_v25 = vld [vmem:[%s3291_s17 + $0x174] sm:$0xf0]  ;;  %v3185_v29 = vld [vmem:[%s3291_s17 + $0x544] sm:$0xf] }
  0x67   : > { %1678 = vmatpush.bf16.msra.mxu3 %v2755_v46  ;;  %1733 = vmatpush.bf16.msrb.mxu2 %v2279_v20  ;;  %v2246_v46 = vld [vmem:[%s3291_s17 + $0x68] sm:$0xf]  ;;  %v2423_v60 = vor.u32 %v3076_v42, %v2422_v39  ;;  %v2880_v20 = vld [vmem:[%s3291_s17 + $0x570] sm:$0xf0]  ;;  %v3060_v39 = vld [vmem:[%s3291_s17 + $0x154] sm:$0xf0] }
  0x68   : > { %v2662_v22 = vld [vmem:[%s3291_s17 + $0x3a8] sm:$0xf]  ;;  %v3181_v44 = vld [vmem:[%s3291_s17 + $0x524] sm:$0xf]  ;;  %v3132_v49 = vld [vmem:[%s3291_s17 + $0x394] sm:$0xf0] }
  0x69   : > { %1641 = vmatpush.bf16.msra.mxu1 %v2483_v0  ;;  %v2247_v0 = vor.u32 %v3032_v48, %v2246_v46  ;;  %v2374_v24 = vld [vmem:[%s3291_s17 + $0x168] sm:$0xf]  ;;  %v2832_v4 = vld [vmem:[%s3291_s17 + $0x510] sm:$0xf0]  ;;  %v3168_v7 = vld [vmem:[%s3291_s17 + $0x4b4] sm:$0xf0] }
  0x6a   : > { %1622 = vmatpush.bf16.msra.mxu0 %v2355_v63  ;;  %v3072_v63 = vld [vmem:[%s3291_s17 + $0x1b4] sm:$0xf0]  ;;  %v2198_v30 = vld [vmem:[%s3291_s17 + $0x8] sm:$0xf]  ;;  %v2375_v37 = vor.u32 %v3064_v25, %v2374_v24 }
  0x6b   : > { %1679 = vmatpush.bf16.msra.mxu3 %v2739_v3  ;;  %1734 = vmatpush.bf16.msrb.mxu2 %v2263_v38  ;;  %v2963_v3 = vor.u32 %v3209_v54, %v2960_v59  ;;  %v2407_v10 = vor.u32 %v3072_v63, %v2406_v61  ;;  %v2358_v38 = vld [vmem:[%s3291_s17 + $0x148] sm:$0xf]  ;;  %v2848_v54 = vld [vmem:[%s3291_s17 + $0x530] sm:$0xf0]  ;;  %v3164_v24 = vld [vmem:[%s3291_s17 + $0x494] sm:$0xf0] }
  0x6c   : > { %v2646_v48 = vld [vmem:[%s3291_s17 + $0x388] sm:$0xf]  ;;  %v2359_v61 = vor.u32 %v3060_v39, %v2358_v38  ;;  %v2851_v2 = vor.u32 %v3181_v44, %v2848_v54  ;;  %v3160_v38 = vld [vmem:[%s3291_s17 + $0x474] sm:$0xf0] }
  0x6d   : > { %1642 = vmatpush.bf16.msra.mxu1 %v2467_v12  ;;  %v3068_v12 = vld [vmem:[%s3291_s17 + $0x194] sm:$0xf0]  ;;  %v2806_v59 = vld [vmem:[%s3291_s17 + $0x4c8] sm:$0xf] }
  0x6e   : > { %1623 = vmatpush.bf16.msra.mxu0 %v2339_v11  ;;  %v2390_v11 = vld [vmem:[%s3291_s17 + $0x188] sm:$0xf] }
  0x6f   : > { %1680 = vmatpush.bf16.msra.mxu3 %v2723_v16  ;;  %1735 = vmatpush.bf16.msrb.mxu2 %v2247_v0  ;;  %v3024_v16 = vld [vmem:[%s3291_s17 + $0x34] sm:$0xf0]  ;;  %v2391_v23 = vor.u32 %v3068_v12, %v2390_v11  ;;  %v2342_v63 = vld [vmem:[%s3291_s17 + $0x128] sm:$0xf] }
  0x70   : > { %v2215_v26 = vor.u32 %v3024_v16, %v2214_v14  ;;  %v3056_v0 = vld [vmem:[%s3291_s17 + $0x134] sm:$0xf0]  ;;  %v2790_v6 = vld [vmem:[%s3291_s17 + $0x4a8] sm:$0xf] }
  0x71   : > { %1643 = vmatpush.bf16.msra.mxu1 %v2451_v28  ;;  %v2883_v28 = vor.u32 %v3189_v19, %v2880_v20  ;;  %v2630_v8 = vld [vmem:[%s3291_s17 + $0x368] sm:$0xf]  ;;  %v3112_v11 = vld [vmem:[%s3291_s17 + $0x2f4] sm:$0xf0]  ;;  %v2343_v12 = vor.u32 %v3056_v0, %v2342_v63  ;;  %v2791_v18 = vor.u32 %v3168_v7, %v2790_v6  ;;  %v3046_v7 = vld [vmem:[%s3291_s17 + $0xec] sm:$0xf] }
  0x72   : > { %1624 = vmatpush.bf16.msra.mxu0 %v2323_v27  ;;  %v3136_v27 = vld [vmem:[%s3291_s17 + $0x3b4] sm:$0xf0]  ;;  %v2950_v17 = vld [vmem:[%s3291_s17 + $0x5e8] sm:$0xf] }
  0x73   : > { %1681 = vmatpush.bf16.msra.mxu3 %v2707_v31  ;;  %1736 = vmatpush.bf16.msrb.mxu2 %v2231_v13  ;;  %v3020_v31 = vld [vmem:[%s3291_s17 + $0x14] sm:$0xf0]  ;;  %v2663_v36 = vor.u32 %v3136_v27, %v2662_v22  ;;  %v2326_v13 = vld [vmem:[%s3291_s17 + $0x108] sm:$0xf] }
  0x74   : > { %1644 = vmatmul.bf16.vlgmr.msra.gmra.mxu1 %v3393_v52  ;;  %1663 = vmatmul.bf16.vlgmr.msra.gmra.mxu2 %v3397_v55  ;;  %v2199_v42 = vor.u32 %v3020_v31, %v2198_v30  ;;  %v3052_v14 = vld [vmem:[%s3291_s17 + $0x114] sm:$0xf0]  ;;  %v2614_v19 = vld [vmem:[%s3291_s17 + $0x348] sm:$0xf] }
  0x75   : > { %1718 = vmatpush.bf16.msrb.mxu1 %v2979_v34  ;;  %1625 = vmatmul.bf16.vlgmr.msra.gmra.mxu0 %v3391_v51  ;;  %v3176_v34 = vld [vmem:[%s3291_s17 + $0x4f4] sm:$0xf0]  ;;  %v2550_v25 = vld [vmem:[%s3291_s17 + $0x2c8] sm:$0xf]  ;;  %v2327_v27 = vor.u32 %v3052_v14, %v2326_v13 }
  0x76   : > { %1693 = vmatpush.bf16.msrb.mxu0 %v2947_v32  ;;  %1682 = vmatmul.bf16.vlgmr.msra.gmra.mxu3 %v3520_v50  ;;  %v2864_v32 = vld [vmem:[%s3291_s17 + $0x550] sm:$0xf0]  ;;  %v3124_v20 = vld [vmem:[%s3291_s17 + $0x354] sm:$0xf0]  ;;  %v2934_v30 = vld [vmem:[%s3291_s17 + $0x5c8] sm:$0xf] }
  0x77   : > { %1750 = vmatpush.bf16.msrb.mxu3 %v2439_v33  ;;  %v2822_v33 = vld [vmem:[%s3291_s17 + $0x4e8] sm:$0xf]  ;;  %1737 = vmatpush.bf16.msrb.mxu2 %v2215_v26  ;;  %v3208_v22 = vld [vmem:[%s3291_s17 + $0x5f4] sm:$0xf0] }
  0x78   : > { %v2823_v46 = vor.u32 %v3176_v34, %v2822_v33  ;;  %v3108_v26 = vld [vmem:[%s3291_s17 + $0x2d4] sm:$0xf0]  ;;  %v2534_v39 = vld [vmem:[%s3291_s17 + $0x2a8] sm:$0xf] }
  0x79   : > { %1719 = vmatpush.bf16.msrb.mxu1 %v2963_v3  ;;  %v3177_v3 = vld [vmem:[%s3291_s17 + $0x504] sm:$0xf]  ;;  %v3120_v33 = vld [vmem:[%s3291_s17 + $0x334] sm:$0xf0]  ;;  %v2551_v34 = vor.u32 %v3108_v26, %v2550_v25  ;;  %v2582_v54 = vld [vmem:[%s3291_s17 + $0x308] sm:$0xf] }
  0x7a   : > { %1694 = vmatpush.bf16.msrb.mxu0 %v2931_v43  ;;  %v2867_v43 = vor.u32 %v3185_v29, %v2864_v32  ;;  %v2835_v16 = vor.u32 %v3177_v3, %v2832_v4  ;;  %v2951_v29 = vor.u32 %v3208_v22, %v2950_v17  ;;  %v2598_v32 = vld [vmem:[%s3291_s17 + $0x328] sm:$0xf]  ;;  %v3096_v14 = vld [vmem:[%s3291_s17 + $0x274] sm:$0xf0]  ;;  %v2296_v22 = vld [vmem:[%s3291_s17 + $0xd8] sm:$0xf0] }
  0x7b   : > { %1751 = vmatpush.bf16.msrb.mxu3 %v2423_v60  ;;  %v3172_v60 = vld [vmem:[%s3291_s17 + $0x4d4] sm:$0xf0]  ;;  %1738 = vmatpush.bf16.msrb.mxu2 %v2199_v42  ;;  %v2518_v0 = vld [vmem:[%s3291_s17 + $0x288] sm:$0xf] }
  0x7c   : > { %v2807_v5 = vor.u32 %v3172_v60, %v2806_v59  ;;  %v3104_v42 = vld [vmem:[%s3291_s17 + $0x2b4] sm:$0xf0]  ;;  %v2742_v59 = vld [vmem:[%s3291_s17 + $0x448] sm:$0xf] }
  0x7d   : > { %1788 = vmatpush.bf16.msra.mxu1 %v2695_v9  ;;  %v3128_v9 = vld [vmem:[%s3291_s17 + $0x374] sm:$0xf0]  ;;  %v2535_v63 = vor.u32 %v3104_v42, %v2534_v39  ;;  %v2902_v4 = vld [vmem:[%s3291_s17 + $0x588] sm:$0xf] }
  0x7e   : > { %1695 = vmatpush.bf16.msrb.mxu0 %v2915_v1  ;;  %v2647_v1 = vor.u32 %v3132_v49, %v2646_v48  ;;  %v3200_v48 = vld [vmem:[%s3291_s17 + $0x5b4] sm:$0xf0]  ;;  %v2502_v13 = vld [vmem:[%s3291_s17 + $0x268] sm:$0xf] }
  0x7f   : > { %1752 = vmatpush.bf16.msrb.mxu3 %v2407_v10  ;;  %1807 = vmatpush.bf16.msra.mxu2 %v2823_v46  ;;  %v2566_v10 = vld [vmem:[%s3291_s17 + $0x2e8] sm:$0xf]  ;;  %v3156_v60 = vld [vmem:[%s3291_s17 + $0x454] sm:$0xf0]  ;;  %v2503_v26 = vor.u32 %v3096_v14, %v2502_v13 }
  0x80   : > { %v2918_v46 = vld [vmem:[%s3291_s17 + $0x5a8] sm:$0xf]  ;;  %v2743_v6 = vor.u32 %v3156_v60, %v2742_v59  ;;  %v3192_v17 = vld [vmem:[%s3291_s17 + $0x574] sm:$0xf0]  ;;  %v2264_v59 = vld [vmem:[%s3291_s17 + $0x98] sm:$0xf0] }
  0x81   : > { %1789 = vmatpush.bf16.msra.mxu1 %v2679_v21  ;;  %v2567_v21 = vor.u32 %v3112_v11, %v2566_v10  ;;  %v2919_v3 = vor.u32 %v3200_v48, %v2918_v46  ;;  %v2312_v10 = vld [vmem:[%s3291_s17 + $0xf8] sm:$0xf0]  ;;  %v2470_v39 = vld [vmem:[%s3291_s17 + $0x228] sm:$0xf]  ;;  %v3088_v42 = vld [vmem:[%s3291_s17 + $0x234] sm:$0xf0] }
  0x82   : > { %1696 = vmatpush.bf16.msrb.mxu0 %v2899_v15  ;;  %v2631_v15 = vor.u32 %v3128_v9, %v2630_v8  ;;  %v2726_v8 = vld [vmem:[%s3291_s17 + $0x428] sm:$0xf]  ;;  %v3152_v9 = vld [vmem:[%s3291_s17 + $0x434] sm:$0xf0]  ;;  %v2315_v11 = vor.u32 %v3046_v7, %v2312_v10  ;;  %v3074_v46 = vld [vmem:[%s3291_s17 + $0x1cc] sm:$0xf]  ;;  %v2471_v60 = vor.u32 %v3088_v42, %v2470_v39 }
  0x83   : > { %1753 = vmatpush.bf16.msrb.mxu3 %v2391_v23  ;;  %1808 = vmatpush.bf16.msra.mxu2 %v2807_v5  ;;  %v2774_v23 = vld [vmem:[%s3291_s17 + $0x488] sm:$0xf]  ;;  %v3196_v5 = vld [vmem:[%s3291_s17 + $0x594] sm:$0xf0]  ;;  %v2424_v48 = vld [vmem:[%s3291_s17 + $0x1d8] sm:$0xf0] }
  0x84   : > { %1649 = vmatmul.bf16.gmra.mxu1 %v3457_v41  ;;  %1668 = vmatmul.bf16.gmra.mxu2 %v3461_v45  ;;  %v2775_v31 = vor.u32 %v3164_v24, %v2774_v23  ;;  %v3078_v23 = vld [vmem:[%s3291_s17 + $0x1ec] sm:$0xf]  ;;  %v2440_v24 = vld [vmem:[%s3291_s17 + $0x1f8] sm:$0xf0] }
  0x85   : > { %1790 = vmatpush.bf16.msra.mxu1 %v2663_v36  ;;  %1630 = vmatmul.bf16.gmra.mxu0 %v3455_v40  ;;  %v3204_v36 = vld [vmem:[%s3291_s17 + $0x5d4] sm:$0xf0]  ;;  %v3110_v7 = vld [vmem:[%s3291_s17 + $0x2ec] sm:$0xf]  ;;  %v2568_v10 = vld [vmem:[%s3291_s17 + $0x2f8] sm:$0xf0] }
  0x86   : > { %1697 = vmatpush.bf16.msrb.mxu0 %v2883_v28  ;;  %1687 = vmatmul.bf16.gmra.mxu3 %v3581_v56  ;;  %v2615_v28 = vor.u32 %v3124_v20, %v2614_v19  ;;  %v2935_v44 = vor.u32 %v3204_v36, %v2934_v30  ;;  %v3042_v19 = vld [vmem:[%s3291_s17 + $0xcc] sm:$0xf]  ;;  %v2710_v20 = vld [vmem:[%s3291_s17 + $0x408] sm:$0xf]  ;;  %v3092_v30 = vld [vmem:[%s3291_s17 + $0x254] sm:$0xf0]  ;;  %v2443_v36 = vor.u32 %v3078_v23, %v2440_v24 }
  0x87   : > { %1754 = vmatpush.bf16.msrb.mxu3 %v2375_v37  ;;  %1809 = vmatpush.bf16.msra.mxu2 %v2791_v18  ;;  %v2758_v37 = vld [vmem:[%s3291_s17 + $0x468] sm:$0xf]  ;;  %v2727_v18 = vor.u32 %v3152_v9, %v2726_v8  ;;  %v2299_v25 = vor.u32 %v3042_v19, %v2296_v22  ;;  %v3216_v9 = vld [vmem:[%s3291_s17 + $0x634] sm:$0xf0]  ;;  %v2571_v19 = vor.u32 %v3110_v7, %v2568_v10  ;;  %v2552_v24 = vld [vmem:[%s3291_s17 + $0x2d8] sm:$0xf0] }
  0x88   : > { %v2759_v49 = vor.u32 %v3160_v38, %v2758_v37  ;;  %v2982_v8 = vld [vmem:[%s3291_s17 + $0x628] sm:$0xf]  ;;  %v3212_v23 = vld [vmem:[%s3291_s17 + $0x614] sm:$0xf0]  ;;  %v3022_v42 = vld [vmem:[%s3291_s17 + $0x2c] sm:$0xf] }
  0x89   : > { %1791 = vmatpush.bf16.msra.mxu1 %v2647_v1  ;;  %v3100_v1 = vld [vmem:[%s3291_s17 + $0x294] sm:$0xf0]  ;;  %v2966_v22 = vld [vmem:[%s3291_s17 + $0x608] sm:$0xf] }
  0x8a   : > { %1698 = vmatpush.bf16.msrb.mxu0 %v2867_v43  ;;  %v2599_v43 = vor.u32 %v3120_v33, %v2598_v32  ;;  %v2280_v32 = vld [vmem:[%s3291_s17 + $0xb8] sm:$0xf0]  ;;  %v2870_v33 = vld [vmem:[%s3291_s17 + $0x548] sm:$0xf] }
  0x8b   : > { %1755 = vmatpush.bf16.msrb.mxu3 %v2359_v61  ;;  %1810 = vmatpush.bf16.msra.mxu2 %v2775_v31  ;;  %v3116_v61 = vld [vmem:[%s3291_s17 + $0x314] sm:$0xf0] }
  0x8d   : > { %1792 = vmatpush.bf16.msra.mxu1 %v2631_v15  ;;  %v2903_v15 = vor.u32 %v3196_v5, %v2902_v4  ;;  %v3070_v4 = vld [vmem:[%s3291_s17 + $0x1ac] sm:$0xf]  ;;  %v2408_v5 = vld [vmem:[%s3291_s17 + $0x1b8] sm:$0xf0] }
  0x8e   : > { %1699 = vmatpush.bf16.msrb.mxu0 %v2851_v2  ;;  %v2583_v2 = vor.u32 %v3116_v61, %v2582_v54  ;;  %v3034_v54 = vld [vmem:[%s3291_s17 + $0x8c] sm:$0xf]  ;;  %v2454_v61 = vld [vmem:[%s3291_s17 + $0x208] sm:$0xf]  ;;  %v2411_v14 = vor.u32 %v3070_v4, %v2408_v5 }
  0x8f   : > { %1756 = vmatpush.bf16.msrb.mxu3 %v2343_v12  ;;  %1811 = vmatpush.bf16.msra.mxu2 %v2759_v49  ;;  %v2519_v12 = vor.u32 %v3100_v1, %v2518_v0  ;;  %v3184_v49 = vld [vmem:[%s3291_s17 + $0x534] sm:$0xf0]  ;;  %v2838_v0 = vld [vmem:[%s3291_s17 + $0x508] sm:$0xf]  ;;  %v2427_v1 = vor.u32 %v3074_v46, %v2424_v48  ;;  %v3174_v5 = vld [vmem:[%s3291_s17 + $0x4ec] sm:$0xf] }
  0x91   : > { %1793 = vmatpush.bf16.msra.mxu1 %v2615_v28 }
  0x92   : > { %1700 = vmatpush.bf16.msrb.mxu0 %v2835_v16  ;;  %v2886_v16 = vld [vmem:[%s3291_s17 + $0x568] sm:$0xf] }
  0x93   : > { %1757 = vmatpush.bf16.msrb.mxu3 %v2327_v27  ;;  %1812 = vmatpush.bf16.msra.mxu2 %v2743_v6  ;;  %v3038_v27 = vld [vmem:[%s3291_s17 + $0xac] sm:$0xf]  ;;  %v2887_v28 = vor.u32 %v3192_v17, %v2886_v16  ;;  %v2267_v6 = vor.u32 %v3034_v54, %v2264_v59  ;;  %v2983_v16 = vor.u32 %v3216_v9, %v2982_v8  ;;  %v2520_v54 = vld [vmem:[%s3291_s17 + $0x298] sm:$0xf0] }
  0x94   : > { %2990 = vmatmul.msk.bf16.vlgmr.msrb.gmra.mxu1 %vm1458_vm0, %v3527_v58  ;;  %1739 = vmatmul.bf16.vlgmr.msrb.gmra.mxu2 %v3387_v47  ;;  %v2283_v37 = vor.u32 %v3038_v27, %v2280_v32  ;;  %v3066_v17 = vld [vmem:[%s3291_s17 + $0x18c] sm:$0xf]  ;;  %v2504_v9 = vld [vmem:[%s3291_s17 + $0x278] sm:$0xf0] }
  0x95   : > { %1794 = vmatpush.bf16.msra.mxu1 %v2599_v43  ;;  %1701 = vmatmul.bf16.vlgmr.msrb.gmra.mxu0 %v3522_v53  ;;  %v3094_v8 = vld [vmem:[%s3291_s17 + $0x26c] sm:$0xf] }
  0x96   : > { %1769 = vmatpush.bf16.msra.mxu0 %v2567_v21  ;;  %1758 = vmatmul.bf16.vlgmr.msrb.gmra.mxu3 %v3391_v51  ;;  %v3148_v21 = vld [vmem:[%s3291_s17 + $0x414] sm:$0xf0] }
  0x97   : > { %1826 = vmatpush.bf16.msra.mxu3 %v2951_v29  ;;  %v2486_v29 = vld [vmem:[%s3291_s17 + $0x248] sm:$0xf]  ;;  %1813 = vmatpush.bf16.msra.mxu2 %v2727_v18  ;;  %v2711_v31 = vor.u32 %v3148_v21, %v2710_v20  ;;  %v2392_v18 = vld [vmem:[%s3291_s17 + $0x198] sm:$0xf0]  ;;  %v3106_v20 = vld [vmem:[%s3291_s17 + $0x2cc] sm:$0xf] }
  0x98   : > { %v2487_v38 = vor.u32 %v3092_v30, %v2486_v29  ;;  %v2395_v27 = vor.u32 %v3066_v17, %v2392_v18  ;;  %v2376_v29 = vld [vmem:[%s3291_s17 + $0x178] sm:$0xf0]  ;;  %v2967_v30 = vor.u32 %v3212_v23, %v2966_v22 }
  0x99   : > { %1795 = vmatpush.bf16.msra.mxu1 %v2583_v2  ;;  %v2680_v22 = vld [vmem:[%s3291_s17 + $0x3d8] sm:$0xf0] }
  0x9a   : > { %1770 = vmatpush.bf16.msra.mxu0 %v2551_v34  ;;  %v3188_v34 = vld [vmem:[%s3291_s17 + $0x554] sm:$0xf0] }
  0x9b   : > { %1827 = vmatpush.bf16.msra.mxu3 %v2935_v44  ;;  %v2871_v43 = vor.u32 %v3188_v34, %v2870_v33  ;;  %v2854_v44 = vld [vmem:[%s3291_s17 + $0x528] sm:$0xf]  ;;  %1814 = vmatpush.bf16.msra.mxu2 %v2711_v31  ;;  %v2555_v31 = vor.u32 %v3106_v20, %v2552_v24  ;;  %v3102_v33 = vld [vmem:[%s3291_s17 + $0x2ac] sm:$0xf]  ;;  %v2952_v20 = vld [vmem:[%s3291_s17 + $0x5f8] sm:$0xf0]  ;;  %v2507_v24 = vor.u32 %v3094_v8, %v2504_v9 }
  0x9c   : > { %v2855_v2 = vor.u32 %v3184_v49, %v2854_v44  ;;  %v3098_v49 = vld [vmem:[%s3291_s17 + $0x28c] sm:$0xf] }
  0x9d   : > { %1864 = vmatpush.bf16.msrb.mxu1 %v2315_v11  ;;  %v3030_v11 = vld [vmem:[%s3291_s17 + $0x6c] sm:$0xf]  ;;  %v2523_v7 = vor.u32 %v3098_v49, %v2520_v54 }
  0x9e   : > { %1771 = vmatpush.bf16.msra.mxu0 %v2535_v63  ;;  %v3084_v63 = vld [vmem:[%s3291_s17 + $0x214] sm:$0xf0]  ;;  %v3166_v54 = vld [vmem:[%s3291_s17 + $0x4ac] sm:$0xf] }
  0x9f   : > { %1828 = vmatpush.bf16.msra.mxu3 %v2919_v3  ;;  %1883 = vmatpush.bf16.msrb.mxu2 %v2443_v36  ;;  %v3180_v3 = vld [vmem:[%s3291_s17 + $0x514] sm:$0xf0]  ;;  %v2455_v13 = vor.u32 %v3084_v63, %v2454_v61  ;;  %v2536_v36 = vld [vmem:[%s3291_s17 + $0x2b8] sm:$0xf0] }
  0xa0   : > { %v2539_v48 = vor.u32 %v3102_v33, %v2536_v36  ;;  %v2344_v61 = vld [vmem:[%s3291_s17 + $0x138] sm:$0xf0]  ;;  %v3202_v36 = vld [vmem:[%s3291_s17 + $0x5cc] sm:$0xf] }
  0xa1   : > { %1865 = vmatpush.bf16.msrb.mxu1 %v2299_v25  ;;  %v3026_v25 = vld [vmem:[%s3291_s17 + $0x4c] sm:$0xf] }
  0xa2   : > { %1772 = vmatpush.bf16.msra.mxu0 %v2519_v12  ;;  %v2248_v12 = vld [vmem:[%s3291_s17 + $0x78] sm:$0xf0] }
  0xa3   : > { %1829 = vmatpush.bf16.msra.mxu3 %v2903_v15  ;;  %1884 = vmatpush.bf16.msrb.mxu2 %v2427_v1  ;;  %v2839_v15 = vor.u32 %v3180_v3, %v2838_v0  ;;  %v2251_v21 = vor.u32 %v3030_v11, %v2248_v12  ;;  %v3142_v0 = vld [vmem:[%s3291_s17 + $0x3ec] sm:$0xf]  ;;  %v2696_v3 = vld [vmem:[%s3291_s17 + $0x3f8] sm:$0xf0] }
  0xa4   : > { %2991 = vmatmul.msk.bf16.gmra.mxu1 %vm1458_vm0, %v3588_v62  ;;  %1744 = vmatmul.bf16.gmra.mxu2 %v3450_v35  ;;  %v3018_v1 = vld [vmem:[%s3291_s17 + $0xc] sm:$0xf]  ;;  %v2699_v4 = vor.u32 %v3142_v0, %v2696_v3  ;;  %v2648_v3 = vld [vmem:[%s3291_s17 + $0x398] sm:$0xf0] }
  0xa5   : > { %1866 = vmatpush.bf16.msrb.mxu1 %v2283_v37  ;;  %1706 = vmatmul.bf16.gmra.mxu0 %v3583_v57  ;;  %v3058_v37 = vld [vmem:[%s3291_s17 + $0x14c] sm:$0xf] }
  0xa6   : > { %1773 = vmatpush.bf16.msra.mxu0 %v2503_v26  ;;  %1763 = vmatmul.bf16.gmra.mxu3 %v3455_v40  ;;  %v2232_v26 = vld [vmem:[%s3291_s17 + $0x58] sm:$0xf0]  ;;  %v3050_v12 = vld [vmem:[%s3291_s17 + $0x10c] sm:$0xf] }
  0xa7   : > { %1830 = vmatpush.bf16.msra.mxu3 %v2887_v28  ;;  %1885 = vmatpush.bf16.msrb.mxu2 %v2411_v14  ;;  %v3062_v28 = vld [vmem:[%s3291_s17 + $0x16c] sm:$0xf]  ;;  %v2235_v32 = vor.u32 %v3026_v25, %v2232_v26 }
  0xa8   : > { %v2379_v34 = vor.u32 %v3062_v28, %v2376_v29  ;;  %v3170_v26 = vld [vmem:[%s3291_s17 + $0x4cc] sm:$0xf] }
  0xa9   : > { %1867 = vmatpush.bf16.msrb.mxu1 %v2267_v6  ;;  %v2824_v6 = vld [vmem:[%s3291_s17 + $0x4f8] sm:$0xf0] }
  0xaa   : > { %1774 = vmatpush.bf16.msra.mxu0 %v2487_v38  ;;  %v2360_v38 = vld [vmem:[%s3291_s17 + $0x158] sm:$0xf0] }
  0xab   : > { %1831 = vmatpush.bf16.msra.mxu3 %v2871_v43  ;;  %1886 = vmatpush.bf16.msrb.mxu2 %v2395_v27  ;;  %v2216_v43 = vld [vmem:[%s3291_s17 + $0x38] sm:$0xf0]  ;;  %v2363_v59 = vor.u32 %v3058_v37, %v2360_v38 }
  0xac   : > { %v2219_v63 = vor.u32 %v3022_v42, %v2216_v43  ;;  %v2808_v27 = vld [vmem:[%s3291_s17 + $0x4d8] sm:$0xf0] }
  0xad   : > { %1868 = vmatpush.bf16.msrb.mxu1 %v2251_v21  ;;  %v2827_v21 = vor.u32 %v3174_v5, %v2824_v6  ;;  %v2936_v37 = vld [vmem:[%s3291_s17 + $0x5d8] sm:$0xf0]  ;;  %v2811_v38 = vor.u32 %v3170_v26, %v2808_v27  ;;  %v3082_v5 = vld [vmem:[%s3291_s17 + $0x20c] sm:$0xf] }
  0xae   : > { %1775 = vmatpush.bf16.msra.mxu0 %v2471_v60  ;;  %v3054_v60 = vld [vmem:[%s3291_s17 + $0x12c] sm:$0xf]  ;;  %v2939_v49 = vor.u32 %v3202_v36, %v2936_v37 }
  0xaf   : > { %1832 = vmatpush.bf16.msra.mxu3 %v2855_v2  ;;  %v1474_v39 = vpop.f32.mrf.mxu0  ;;  %1887 = vmatpush.bf16.msrb.mxu2 %v2379_v34  ;;  %v2200_v2 = vld [vmem:[%s3291_s17 + $0x18] sm:$0xf0]  ;;  %v2347_v10 = vor.u32 %v3054_v60, %v2344_v61  ;;  %v3134_v34 = vld [vmem:[%s3291_s17 + $0x3ac] sm:$0xf] }
  0xb0   : > { %v2203_v14 = vor.u32 %v3018_v1, %v2200_v2  ;;  %v3130_v60 = vld [vmem:[%s3291_s17 + $0x38c] sm:$0xf]  ;;  %v2920_v2 = vld [vmem:[%s3291_s17 + $0x5b8] sm:$0xf0] }
  0xb1   : > { %1869 = vmatpush.bf16.msrb.mxu1 %v2235_v32  ;;  %v1493_v44 = vpop.f32.mrf.mxu1  ;;  %v2488_v32 = vld [vmem:[%s3291_s17 + $0x258] sm:$0xf0]  ;;  %v3198_v1 = vld [vmem:[%s3291_s17 + $0x5ac] sm:$0xf]  ;;  %v2651_v6 = vor.u32 %v3130_v60, %v2648_v3 }
  0xb2   : > { %1776 = vmatpush.bf16.msra.mxu0 %v2455_v13  ;;  %v1494_v46 = vadd.f32 %v1493_v44, %v1474_v39  ;;  %v2328_v13 = vld [vmem:[%s3291_s17 + $0x118] sm:$0xf0]  ;;  %v3086_v44 = vld [vmem:[%s3291_s17 + $0x22c] sm:$0xf] }
  0xb3   : > { %1833 = vmatpush.bf16.msra.mxu3 %v2839_v15  ;;  %1888 = vmatpush.bf16.msrb.mxu2 %v2363_v59  ;;  %v3138_v15 = vld [vmem:[%s3291_s17 + $0x3cc] sm:$0xf]  ;;  %v2664_v39 = vld [vmem:[%s3291_s17 + $0x3b8] sm:$0xf0] }
  0xb4   : > { %1796 = vmatmul.bf16.vlgmr.msra.gmra.mxu1 %v3397_v55  ;;  %1815 = vmatmul.bf16.vlgmr.msra.gmra.mxu2 %v3520_v50  ;;  %v2683_v25 = vor.u32 %v3138_v15, %v2680_v22  ;;  %v2667_v42 = vor.u32 %v3134_v34, %v2664_v39  ;;  %v2792_v59 = vld [vmem:[%s3291_s17 + $0x4b8] sm:$0xf0]  ;;  %v3162_v15 = vld [vmem:[%s3291_s17 + $0x48c] sm:$0xf] }
  0xb5   : > { %1777 = vmatmul.bf16.vlgmr.msra.gmra.mxu0 %v3393_v52  ;;  %1870 = vmatpush.bf16.msrb.mxu1 %v2219_v63  ;;  %v3210_v37 = vld [vmem:[%s3291_s17 + $0x60c] sm:$0xf]  ;;  %v2616_v39 = vld [vmem:[%s3291_s17 + $0x358] sm:$0xf0] }
  0xb6   : > { %1851 = vmatpush.bf16.msrb.mxu0 %v2983_v16  ;;  %1834 = vmatmul.bf16.vlgmr.msra.gmra.mxu3 %v3522_v53  ;;  %v1512_v11 = vpop.f32.mrf.mxu2  ;;  %v2744_v60 = vld [vmem:[%s3291_s17 + $0x458] sm:$0xf0] }
  0xb7   : > { %1902 = vmatpush.bf16.msrb.mxu3 %v2571_v19  ;;  %v1513_v16 = vadd.f32 %v1512_v11, %v1494_v46  ;;  %v1476_v18 = vpop.f32.mrf.mxu0  ;;  %v3206_v19 = vld [vmem:[%s3291_s17 + $0x5ec] sm:$0xf]  ;;  %1889 = vmatpush.bf16.msrb.mxu2 %v2347_v10  ;;  %v2472_v46 = vld [vmem:[%s3291_s17 + $0x238] sm:$0xf0] }
  0xb8   : > { %v1531_v17 = vpop.f32.mrf.mxu3  ;;  %v2955_v33 = vor.u32 %v3206_v19, %v2952_v20  ;;  %v2475_v9 = vor.u32 %v3086_v44, %v2472_v46  ;;  %v2456_v10 = vld [vmem:[%s3291_s17 + $0x218] sm:$0xf0]  ;;  %v3214_v11 = vld [vmem:[%s3291_s17 + $0x62c] sm:$0xf] }
  0xb9   : > { %v1495_v23 = vpop.f32.mrf.mxu1  ;;  %v3797_v28 = vadd.f32 %v1531_v17, %v1513_v16  ;;  %1871 = vmatpush.bf16.msrb.mxu1 %v2203_v14  ;;  %v2923_v14 = vor.u32 %v3198_v1, %v2920_v2  ;;  %v2776_v16 = vld [vmem:[%s3291_s17 + $0x498] sm:$0xf0]  ;;  %v3126_v17 = vld [vmem:[%s3291_s17 + $0x36c] sm:$0xf]  ;;  %v2459_v22 = vor.u32 %v3082_v5, %v2456_v10 }
  0xba   : > { %1852 = vmatpush.bf16.msrb.mxu0 %v2967_v30  ;;  %v1496_v29 = vadd.f32 %v1495_v23, %v1476_v18  ;;  %v2331_v30 = vor.u32 %v3050_v12, %v2328_v13  ;;  %v2984_v12 = vld [vmem:[%s3291_s17 + $0x638] sm:$0xf0]  ;;  %v2795_v13 = vor.u32 %v3166_v54, %v2792_v59  ;;  %v3194_v18 = vld [vmem:[%s3291_s17 + $0x58c] sm:$0xf]  ;;  %v2779_v23 = vor.u32 %v3162_v15, %v2776_v16 }
  0xbb   : > { %1903 = vmatpush.bf16.msrb.mxu3 %v2555_v31  ;;  %v3090_v31 = vld [vmem:[%s3291_s17 + $0x24c] sm:$0xf]  ;;  %v2904_v19 = vld [vmem:[%s3291_s17 + $0x598] sm:$0xf0]  ;;  %v2987_v27 = vor.u32 %v3214_v11, %v2984_v12 }
  0xbc   : > { %v2491_v43 = vor.u32 %v3090_v31, %v2488_v32  ;;  %1890 = vmatpush.bf16.msrb.mxu2 %v2331_v30  ;;  %v2632_v20 = vld [vmem:[%s3291_s17 + $0x378] sm:$0xf0]  ;;  %v3158_v30 = vld [vmem:[%s3291_s17 + $0x46c] sm:$0xf] }
  0xbd   : > { %1940 = vmatpush.bf16.msra.mxu1 %v2827_v21  ;;  %v2635_v21 = vor.u32 %v3126_v17, %v2632_v20  ;;  %v2760_v31 = vld [vmem:[%s3291_s17 + $0x478] sm:$0xf0]  ;;  %v3122_v32 = vld [vmem:[%s3291_s17 + $0x34c] sm:$0xf] }
  0xbe   : > { %1921 = vmatpush.bf16.msra.mxu0 %v2699_v4  ;;  %v3154_v59 = vld [vmem:[%s3291_s17 + $0x44c] sm:$0xf]  ;;  %v2600_v1 = vld [vmem:[%s3291_s17 + $0x338] sm:$0xf0] }
  0xbf   : > { %1904 = vmatpush.bf16.msrb.mxu3 %v2539_v48  ;;  %v1514_v48 = vpop.f32.mrf.mxu2  ;;  %v2747_v3 = vor.u32 %v3154_v59, %v2744_v60  ;;  %v3182_v12 = vld [vmem:[%s3291_s17 + $0x52c] sm:$0xf]  ;;  %v3256_v60 = vmov 0  }
  0xc0   : > { %1959 = vmatpush.bf16.msra.mxu2 %v2955_v33  ;;  %v1515_v61 = vadd.f32 %v1514_v48, %v1496_v29  ;;  %v1533_v63 = vpop.f32.mrf.mxu3  ;;  %v1479_v0 = vpop.f32.mrf.mxu0  ;;  %v2907_v29 = vor.u32 %v3194_v18, %v2904_v19  ;;  %v2763_v48 = vor.u32 %v3158_v30, %v2760_v31  ;;  %3238 = vset.pattern.permute.xlu0 %v3256_v60 }
  0xc1   : > { %1941 = vmatpush.bf16.msra.mxu1 %v2811_v38  ;;  %v1498_v4 = vpop.f32.mrf.mxu1  ;;  %v2968_v38 = vld [vmem:[%s3291_s17 + $0x618] sm:$0xf0]  ;;  %3239 = vset.pattern.permute.xlu1 %v3256_v60 }
  0xc2   : > { %1922 = vmatpush.bf16.msra.mxu0 %v2683_v25  ;;  %v1499_v8 = vadd.f32 %v1498_v4, %v1479_v0  ;;  %v2888_v25 = vld [vmem:[%s3291_s17 + $0x578] sm:$0xf0]  ;;  %v2971_v54 = vor.u32 %v3210_v37, %v2968_v38 }
  0xc3   : > { %1905 = vmatpush.bf16.msrb.mxu3 %v2523_v7  ;;  %v3814_v7 = vadd.f32 %v1533_v63, %v1515_v61  ;;  %v3118_v61 = vld [vmem:[%s3291_s17 + $0x32c] sm:$0xf]  ;;  %v2872_v0 = vld [vmem:[%s3291_s17 + $0x558] sm:$0xf0] }
  0xc4   : > { %1960 = vmatpush.bf16.msra.mxu2 %v2939_v49  ;;  %1801 = vmatmul.bf16.gmra.mxu1 %v3461_v45  ;;  %v3186_v63 = vld [vmem:[%s3291_s17 + $0x54c] sm:$0xf]  ;;  %v2603_v2 = vor.u32 %v3118_v61, %v2600_v1 }
  0xc5   : > { %1782 = vmatmul.bf16.gmra.mxu0 %v3457_v41  ;;  %1820 = vmatmul.bf16.gmra.mxu2 %v3581_v56  ;;  %v2875_v5 = vor.u32 %v3186_v63, %v2872_v0 }
  0xc6   : > { %1923 = vmatpush.bf16.msra.mxu0 %v2667_v42  ;;  %1839 = vmatmul.bf16.gmra.mxu3 %v3583_v57 }
  0xc7   : > { %1906 = vmatpush.bf16.msrb.mxu3 %v2507_v24  ;;  %1942 = vmatpush.bf16.msra.mxu1 %v2795_v13  ;;  %v3190_v24 = vld [vmem:[%s3291_s17 + $0x56c] sm:$0xf]  ;;  %v1517_v26 = vpop.f32.mrf.mxu2  ;;  %v2856_v13 = vld [vmem:[%s3291_s17 + $0x538] sm:$0xf0] }
  0xc8   : > { %1961 = vmatpush.bf16.msra.mxu2 %v2923_v14  ;;  %v1518_v33 = vadd.f32 %v1517_v26, %v1499_v8  ;;  %v1536_v34 = vpop.f32.mrf.mxu3  ;;  %v1481_v36 = vpop.f32.mrf.mxu0  ;;  %v2891_v49 = vor.u32 %v3190_v24, %v2888_v25  ;;  %v2728_v8 = vld [vmem:[%s3291_s17 + $0x438] sm:$0xf0]  ;;  %v3178_v25 = vld [vmem:[%s3291_s17 + $0x50c] sm:$0xf] }
  0xc9   : > { %v1500_v42 = vpop.f32.mrf.mxu1  ;;  %v2584_v14 = vld [vmem:[%s3291_s17 + $0x318] sm:$0xf0] }
  0xca   : > { %1924 = vmatpush.bf16.msra.mxu0 %v2651_v6  ;;  %v3837_v44 = vadd.f32 %v1536_v34, %v1518_v33  ;;  %v1501_v46 = vadd.f32 %v1500_v42, %v1481_v36  ;;  %v3150_v6 = vld [vmem:[%s3291_s17 + $0x42c] sm:$0xf]  ;;  %v2840_v26 = vld [vmem:[%s3291_s17 + $0x518] sm:$0xf0] }
  0xcb   : > { %1907 = vmatpush.bf16.msrb.mxu3 %v2491_v43  ;;  %v2619_v43 = vor.u32 %v3122_v32, %v2616_v39  ;;  %1943 = vmatpush.bf16.msra.mxu1 %v2779_v23  ;;  %v2731_v19 = vor.u32 %v3150_v6, %v2728_v8  ;;  %v2712_v23 = vld [vmem:[%s3291_s17 + $0x418] sm:$0xf0] }
  0xcc   : > { %1962 = vmatpush.bf16.msra.mxu2 %v2907_v29 }
  0xce   : > { %1925 = vmatpush.bf16.msra.mxu0 %v2635_v21  ;;  %v2859_v21 = vor.u32 %v3182_v12, %v2856_v13 }
  0xcf   : > { %1908 = vmatpush.bf16.msrb.mxu3 %v2475_v9  ;;  %1944 = vmatpush.bf16.msra.mxu1 %v2763_v48  ;;  %v1519_v4 = vpop.f32.mrf.mxu2  ;;  %v3114_v9 = vld [vmem:[%s3291_s17 + $0x30c] sm:$0xf] }
  0xd0   : > { %1963 = vmatpush.bf16.msra.mxu2 %v2891_v49  ;;  %v1520_v10 = vadd.f32 %v1519_v4, %v1501_v46  ;;  %v1538_v11 = vpop.f32.mrf.mxu3  ;;  %v2587_v20 = vor.u32 %v3114_v9, %v2584_v14 }
  0xd1   : > { %v1569_v16 = vpop.f32.mrf.mxu1 }
  0xd2   : > { %1926 = vmatpush.bf16.msra.mxu0 %v2619_v43  ;;  %v1550_v15 = vpop.f32.mrf.mxu0  ;;  %v1539_v17 = vadd.f32 %v1538_v11, %v1520_v10 }
  0xd3   : > { %1909 = vmatpush.bf16.msrb.mxu3 %v2459_v22  ;;  %v1551_v18 = vadd.f32 %v1550_v15, %v3797_v28  ;;  %1945 = vmatpush.bf16.msra.mxu1 %v2747_v3  ;;  %v3146_v22 = vld [vmem:[%s3291_s17 + $0x40c] sm:$0xf] }
  0xd4   : > { %1964 = vmatpush.bf16.msra.mxu2 %v2875_v5  ;;  %1872 = vmatmul.bf16.vlgmr.msrb.gmra.mxu1 %v3387_v47  ;;  %v2715_v28 = vor.u32 %v3146_v22, %v2712_v23  ;;  %v2010_v3 = vld [vmem:[%s3956_s2 + $0x8] sm:$0xff] }
  0xd5   : > { %v1570_v24 = vadd.f32 %v1569_v16, %v1551_v18  ;;  %2992 = vmatmul.msk.bf16.vlgmr.msrb.gmra.mxu0 %vm1458_vm0, %v3527_v58  ;;  %1891 = vmatmul.bf16.vlgmr.msrb.gmra.mxu2 %v3391_v51 }
  0xd6   : > { %1927 = vmatpush.bf16.msra.mxu0 %v2603_v2  ;;  %1910 = vmatmul.bf16.vlgmr.msrb.gmra.mxu3 %v3393_v52  ;;  %v2011_v2 = vld [vmem:[%s3956_s2 + $0x10] sm:$0xff] }
  0xd7   : > { %1984 = vmatpush.bf16.msra.mxu3 %v2987_v27  ;;  %1946 = vmatpush.bf16.msra.mxu1 %v2731_v19  ;;  %v2843_v27 = vor.u32 %v3178_v25, %v2840_v26  ;;  %v1588_v29 = vpop.f32.mrf.mxu2 }
  0xd8   : > { %1965 = vmatpush.bf16.msra.mxu2 %v2859_v21  ;;  %v3861_v31 = vadd.f32 %v1588_v29, %v1570_v24  ;;  %2025 = vperm.xlu1 %3239, %v2011_v2  }
  0xd9   : > { %v1607_v30 = vpop.f32.mrf.mxu3  ;;  %v1571_v33 = vpop.f32.mrf.mxu1 }
  0xda   : > { %1928 = vmatpush.bf16.msra.mxu0 %v2587_v20  ;;  %v1552_v32 = vpop.f32.mrf.mxu0 }
  0xdb   : > { %1985 = vmatpush.bf16.msra.mxu3 %v2971_v54  ;;  %v1553_v34 = vadd.f32 %v1552_v32, %v3814_v7  ;;  %1947 = vmatpush.bf16.msra.mxu1 %v2715_v28 }
  0xdc   : > { %1966 = vmatpush.bf16.msra.mxu2 %v2843_v27 }
  0xdd   : > { %v1572_v47 = vadd.f32 %v1571_v33, %v1553_v34 }
  0xdf   : > { %v1590_v36 = vpop.f32.mrf.mxu2 }
  0xe0   : > { %v3864_v37 = vadd.f32 %v1590_v36, %v1572_v47 }
  0xe1   : > { %v1609_v51 = vpop.f32.mrf.mxu3  ;;  %v1574_v38 = vpop.f32.mrf.mxu1 }
  0xe2   : > { %v1555_v52 = vpop.f32.mrf.mxu0 }
  0xe3   : > { %v1556_v39 = vadd.f32 %v1555_v52, %v3837_v44  ;;  %v2009_v44 = vld [vmem:[%s3956_s2] sm:$0xff] }
  0xe4   : > { %1877 = vmatmul.bf16.gmra.mxu1 %v3450_v35  ;;  %2015 = vperm.xlu0 %3238, %v2009_v44  }
  0xe5   : > { %v1575_v42 = vadd.f32 %v1574_v38, %v1556_v39  ;;  %2993 = vmatmul.msk.bf16.gmra.mxu0 %vm1458_vm0, %v3588_v62  ;;  %1896 = vmatmul.bf16.gmra.mxu2 %v3455_v40 }
  0xe6   : > { %1915 = vmatmul.bf16.gmra.mxu3 %v3457_v41 }
  0xe7   : > { %v1593_v7 = vpop.f32.mrf.mxu2 }
  0xe8   : > { %v3872_v46 = vadd.f32 %v1593_v7, %v1575_v42 }
  0xe9   : > { %v1612_v43 = vpop.f32.mrf.mxu3  ;;  %v1576_v49 = vpop.f32.mrf.mxu1 }
  0xea   : > { %v1557_v48 = vpop.f32.mrf.mxu0 }
  0xeb   : > { %v1558_v54 = vadd.f32 %v1557_v48, %v1539_v17 }
  0xec   : > { %2020 = vperm.xlu0 %3238, %v2010_v3  }
  0xed   : > { %v1577_v59 = vadd.f32 %v1576_v49, %v1558_v54 }
  0xef   : > { %v1595_v35 = vpop.f32.mrf.mxu2 }
  0xf0   : > { %v3877_v61 = vadd.f32 %v1595_v35, %v1577_v59 }
  0xf1   : > { %v1614_v40 = vpop.f32.mrf.mxu3  ;;  %v1645_v63 = vpop.f32.mrf.mxu1 }
  0xf2   : > { %v1626_v41 = vpop.f32.mrf.mxu0 }
  0xf3   : > { %v1627_v0 = vadd.f32 %v1626_v41, %v1607_v30 }
  0xf4   : > { %1948 = vmatmul.bf16.vlgmr.msra.gmra.mxu1 %v3520_v50 }
  0xf5   : > { %v1646_v1 = vadd.f32 %v1645_v63, %v1627_v0  ;;  %1929 = vmatmul.bf16.vlgmr.msra.gmra.mxu0 %v3397_v55  ;;  %1967 = vmatmul.bf16.vlgmr.msra.gmra.mxu2 %v3522_v53 }
  0xf6   : > { %2994 = vmatmul.msk.bf16.vlgmr.msra.gmra.mxu3 %vm1458_vm0, %v3527_v58  ;;  %v2012_v58 = vld [vmem:[%s3956_s2 + $0x18] sm:$0xff] }
  0xf7   : > { %v1664_v4 = vpop.f32.mrf.mxu2  ;;  %2030 = vperm.xlu1 %3239, %v2012_v58  }
  0xf8   : > { %v1665_v55 = vadd.f32 %v1664_v4, %v1646_v1 }
  0xf9   : > { %v1683_v5 = vpop.f32.mrf.mxu3  ;;  %v1647_v50 = vpop.f32.mrf.mxu1 }
  0xfa   : > { %v1628_v6 = vpop.f32.mrf.mxu0  ;;  %v1684_v53 = vadd.f32 %v1683_v5, %v1665_v55 }
  0xfb   : > { %v1629_v8 = vadd.f32 %v1628_v6, %v1609_v51 }
  0xfd   : > { %v1648_v9 = vadd.f32 %v1647_v50, %v1629_v8 }
  0xff   : > { %v1666_v10 = vpop.f32.mrf.mxu2 }
 0x100   : > { %v1667_v12 = vadd.f32 %v1666_v10, %v1648_v9 }
 0x101   : > { %v1685_v11 = vpop.f32.mrf.mxu3  ;;  %v1650_v14 = vpop.f32.mrf.mxu1 }
 0x102   : > { %v1631_v13 = vpop.f32.mrf.mxu0  ;;  %v1686_v16 = vadd.f32 %v1685_v11, %v1667_v12 }
 0x103   : > { %v1632_v15 = vadd.f32 %v1631_v13, %v1612_v43 }
 0x104   : > { %1953 = vmatmul.bf16.gmra.mxu1 %v3581_v56 }
 0x105   : > { %v1651_v17 = vadd.f32 %v1650_v14, %v1632_v15  ;;  %1934 = vmatmul.bf16.gmra.mxu0 %v3461_v45  ;;  %1972 = vmatmul.bf16.gmra.mxu2 %v3583_v57 }
 0x106   : > { %2995 = vmatmul.msk.bf16.gmra.mxu3 %vm1458_vm0, %v3588_v62 }
 0x107   : > { %v1669_v18 = vpop.f32.mrf.mxu2 }
 0x108   : > { %v1670_v20 = vadd.f32 %v1669_v18, %v1651_v17 }
 0x109   : > { %v1688_v19 = vpop.f32.mrf.mxu3  ;;  %v1652_v22 = vpop.f32.mrf.mxu1 }
 0x10a   : > { %v1633_v21 = vpop.f32.mrf.mxu0  ;;  %v1689_v24 = vadd.f32 %v1688_v19, %v1670_v20 }
 0x10b   : > { %v1634_v23 = vadd.f32 %v1633_v21, %v1614_v40 }
 0x10d   : > { %v1653_v25 = vadd.f32 %v1652_v22, %v1634_v23 }
 0x10f   : > { %v1671_v26 = vpop.f32.mrf.mxu2 }
 0x110   : > { %v1672_v27 = vadd.f32 %v1671_v26, %v1653_v25 }
 0x111   : > { %v1690_v28 = vpop.f32.mrf.mxu3  ;;  %v1721_v45 = vpop.f32.mrf.mxu1 }
 0x112   : > { %v1702_v29 = vpop.f32.mrf.mxu0  ;;  %v1691_v56 = vadd.f32 %v1690_v28, %v1672_v27 }
 0x113   : > { %v1703_v30 = vadd.f32 %v1702_v29, %v1684_v53 }
 0x115   : > { %v3898_v32 = vadd.f32 %v1721_v45, %v1703_v30 }
 0x117   : > { %v1997_v57 = vmax.f32 %v3861_v31, %v3898_v32  ;;  %v1740_v62 = vpop.f32.mrf.mxu2 }
 0x119   : > { %v1759_v33 = vpop.f32.mrf.mxu3  ;;  %v1723_v36 = vpop.f32.mrf.mxu1 }
 0x11a   : > { %v1760_v34 = vadd.f32 %v1759_v33, %v1740_v62  ;;  %v1704_v47 = vpop.f32.mrf.mxu0 }
 0x11b   : > { %v1705_v51 = vadd.f32 %v1704_v47, %v1686_v16 }
 0x11d   : > { %v3902_v52 = vadd.f32 %v1723_v36, %v1705_v51 }
 0x11f   : > { %v1998_v38 = vmax.f32 %v3864_v37, %v3902_v52  ;;  %v1742_v39 = vpop.f32.mrf.mxu2 }
 0x121   : > { %v1761_v42 = vpop.f32.mrf.mxu3  ;;  %v1726_v48 = vpop.f32.mrf.mxu1 }
 0x122   : > { %v3906_v7 = vadd.f32 %v1761_v42, %v1742_v39  ;;  %v1707_v43 = vpop.f32.mrf.mxu0 }
 0x123   : > { %v1708_v49 = vadd.f32 %v1707_v43, %v1689_v24 }
 0x125   : > { %v3908_v54 = vadd.f32 %v1726_v48, %v1708_v49 }
 0x127   : > { %v1999_v59 = vmax.f32 %v3872_v46, %v3908_v54  ;;  %v1745_v44 = vpop.f32.mrf.mxu2 }
 0x129   : > { %v1764_v60 = vpop.f32.mrf.mxu3  ;;  %v1728_v41 = vpop.f32.mrf.mxu1 }
 0x12a   : > { %v1765_v35 = vadd.f32 %v1764_v60, %v1745_v44  ;;  %v1709_v40 = vpop.f32.mrf.mxu0 }
 0x12b   : > { %v1710_v63 = vadd.f32 %v1709_v40, %v1691_v56 }
 0x12d   : > { %v3912_v0 = vadd.f32 %v1728_v41, %v1710_v63 }
 0x12f   : > { %v2000_v1 = vmax.f32 %v3877_v61, %v3912_v0  ;;  %v1747_v2 = vpop.f32.mrf.mxu2 }
 0x131   : > { %v1766_v3 = vpop.f32.mrf.mxu3  ;;  %v1797_v55 = vpop.f32.mrf.mxu1 }
 0x132   : > { %v3916_v4 = vadd.f32 %v1766_v3, %v1747_v2  ;;  %v1778_v5 = vpop.f32.mrf.mxu0 }
 0x133   : > { %v1779_v6 = vadd.f32 %v1778_v5, %v1760_v34 }
 0x135   : > { %v1798_v50 = vadd.f32 %v1797_v55, %v1779_v6 }
 0x137   : > { %v1816_v8 = vpop.f32.mrf.mxu2 }
 0x138   : > { %v1817_v9 = vadd.f32 %v1816_v8, %v1798_v50 }
 0x139   : > { %v1835_v53 = vpop.f32.mrf.mxu3  ;;  %v1799_v10 = vpop.f32.mrf.mxu1 }
 0x13a   : > { %v1780_v58 = vpop.f32.mrf.mxu0  ;;  %v1836_v11 = vadd.f32 %v1835_v53, %v1817_v9 }
 0x13b   : > { %v1781_v41 = vadd.f32 %v1780_v58, %v3906_v7 }
 0x13d   : > { %v1800_v8 = vadd.f32 %v1799_v10, %v1781_v41 }
 0x13f   : > { %v1818_v12 = vpop.f32.mrf.mxu2 }
 0x141   : > { %v1837_v13 = vpop.f32.mrf.mxu3  ;;  %v1802_v15 = vpop.f32.mrf.mxu1 }
 0x142   : > { %v1783_v14 = vpop.f32.mrf.mxu0 }
 0x143   : > { %v1784_v16 = vadd.f32 %v1783_v14, %v1765_v35 }
 0x145   : > { %v1803_v17 = vadd.f32 %v1802_v15, %v1784_v16  ;;  %v1819_v16 = vadd.f32 %v1818_v12, %v1800_v8 }
 0x148   : > { %v1821_v18 = vpop.f32.mrf.mxu2 }
 0x149   : > { %v1840_v19 = vpop.f32.mrf.mxu3  ;;  %v1822_v20 = vadd.f32 %v1821_v18, %v1803_v17  ;;  %v3918_v22 = vpop.f32.mrf.mxu1 }
 0x14a   : > { %v1785_v21 = vpop.f32.mrf.mxu0  ;;  %v2026_v37 = vpop.permute.xlu1 %2025 }
 0x14b   : > { %v3920_v23 = vadd.f32 %v1840_v19, %v1822_v20 }
 0x150   : > { %v3922_v24 = vpop.f32.mrf.mxu2 }
 0x151   : > { %v3924_v25 = vpop.f32.mrf.mxu3  ;;  %v1873_v28 = vpop.f32.mrf.mxu1 }
 0x152   : > { %v1854_v26 = vpop.f32.mrf.mxu0 }
 0x153   : > { %v1855_v53 = vadd.f32 %v1854_v26, %v1836_v11 }
 0x156   : > { %v2016_v15 = vpop.permute.xlu0 %2015 }
 0x158   : > { %v1892_v27 = vpop.f32.mrf.mxu2 }
 0x159   : > { %v1911_v29 = vpop.f32.mrf.mxu3  ;;  %v1875_v30 = vpop.f32.mrf.mxu1  ;;  %v1893_v42 = vadd.f32 %v1892_v27, %v1873_v28  ;;  %v1838_v28 = vadd.f32 %v1837_v13, %v1819_v16 }
 0x15a   : > { %v1856_v45 = vpop.f32.mrf.mxu0 }
 0x15b   : > { %v1912_v49 = vadd.f32 %v1911_v29, %v1893_v42  ;;  %v1857_v10 = vadd.f32 %v1856_v45, %v1838_v28 }
 0x160   : > { %v1894_v56 = vpop.f32.mrf.mxu2 }
 0x161   : > { %v1913_v62 = vpop.f32.mrf.mxu3  ;;  %v1878_v34 = vpop.f32.mrf.mxu1  ;;  %v1895_v40 = vadd.f32 %v1894_v56, %v1875_v30 }
 0x162   : > { %v1859_v33 = vpop.f32.mrf.mxu0 }
 0x163   : > { %v1914_v5 = vadd.f32 %v1913_v62, %v1895_v40 }
 0x168   : > { %v1897_v47 = vpop.f32.mrf.mxu2 }
 0x169   : > { %v1916_v36 = vpop.f32.mrf.mxu3  ;;  %v1880_v39 = vpop.f32.mrf.mxu1  ;;  %v1898_v17 = vadd.f32 %v1897_v47, %v1878_v34  ;;  %v1786_v47 = vadd.f32 %v1785_v21, %v3916_v4 }
 0x16a   : > { %v3926_v51 = vpop.f32.mrf.mxu0 }
 0x16b   : > { %v1917_v27 = vadd.f32 %v1916_v36, %v1898_v17  ;;  %v1805_v40 = vadd.f32 %v3918_v22, %v1786_v47 }
 0x16d   : > { %v1824_v41 = vadd.f32 %v3922_v24, %v1805_v40 }
 0x170   : > { %v1899_v43 = vpop.f32.mrf.mxu2 }
 0x171   : > { %v1918_v48 = vpop.f32.mrf.mxu3  ;;  %v1949_v60 = vpop.f32.mrf.mxu1  ;;  %v1900_v12 = vadd.f32 %v1899_v43, %v1880_v39  ;;  %v1860_v39 = vadd.f32 %v1859_v33, %v3920_v23  ;;  %v1843_v23 = vadd.f32 %v3924_v25, %v1824_v41 }
 0x172   : > { %v1930_v44 = vpop.f32.mrf.mxu0 }
 0x173   : > { %v1931_v35 = vadd.f32 %v1930_v44, %v1912_v49  ;;  %v2021_v49 = vpop.permute.xlu0 %2020  ;;  %v1919_v36 = vadd.f32 %v1918_v48, %v1900_v12  ;;  %v1862_v24 = vadd.f32 %v3926_v51, %v1843_v23  ;;  %v2031_v51 = vpop.permute.xlu1 %2030 }
 0x175   : > { %v1950_v63 = vadd.f32 %v1949_v60, %v1931_v35 }
 0x178   : > { %v1968_v2 = vpop.f32.mrf.mxu2 }
 0x179   : > { %v1987_v3 = vpop.f32.mrf.mxu3  ;;  %v1969_v55 = vadd.f32 %v1968_v2, %v1950_v63  ;;  %v1951_v50 = vpop.f32.mrf.mxu1 }
 0x17a   : > { %v1932_v6 = vpop.f32.mrf.mxu0 }
 0x17b   : > { %v1988_v9 = vadd.f32 %v1987_v3, %v1969_v55  ;;  %v1933_v14 = vadd.f32 %v1932_v6, %v1914_v5 }
 0x17d   : > { %v2001_v18 = vmax.f32 %v1855_v53, %v1988_v9  ;;  %v1952_v19 = vadd.f32 %v1951_v50, %v1933_v14 }
 0x17f   : > { %v2005_v7 = vmax.f32 %v1997_v57, %v2001_v18 }
 0x180   : > { %v1970_v58 = vpop.f32.mrf.mxu2 }
 0x181   : > { %v1989_v20 = vpop.f32.mrf.mxu3  ;;  %v2033_v29 = vadd.f32 %v2016_v15, %v2005_v7  ;;  %v1971_v30 = vadd.f32 %v1970_v58, %v1952_v19  ;;  %v1954_v42 = vpop.f32.mrf.mxu1 }
 0x182   : > { %v1935_v56 = vpop.f32.mrf.mxu0 }
 0x183   : > { %v2041_v11 = vmin.f32 %v2033_v29, 0.0  ;;  %v1990_v26 = vadd.f32 %v1989_v20, %v1971_v30  ;;  %v1936_v62 = vadd.f32 %v1935_v56, %v1917_v27  ;;  %vm2037_vm1 = vcmp.gt.f32.partialorder %v2033_v29, 0.0 }
 0x185   : > { %v2002_v34 = vmax.f32 %v1857_v10, %v1990_v26  ;;  %v2045_v44 = vmul.f32 1.442695, %v2041_v11  ;;  %v1955_v31 = vadd.f32 %v1954_v42, %v1936_v62 }
 0x187   : > { %v2006_v32 = vmax.f32 %v1998_v38, %v2002_v34  ;;  %3240 = vpow2.f32 %v2045_v44 }
 0x188   : > { %v1973_v57 = vpop.f32.mrf.mxu2 }
 0x189   : > { %v1992_v13 = vpop.f32.mrf.mxu3  ;;  %v2034_v60 = vadd.f32 %v2021_v49, %v2006_v32  ;;  %v1974_v45 = vadd.f32 %v1973_v57, %v1955_v31  ;;  %v1956_v52 = vpop.f32.mrf.mxu1 }
 0x18a   : > { %v1937_v35 = vpop.f32.mrf.mxu0 }
 0x18b   : > { %v2042_v43 = vmin.f32 %v2034_v60, 0.0  ;;  %v1993_v4 = vadd.f32 %v1992_v13, %v1974_v45  ;;  %v1938_v21 = vadd.f32 %v1937_v35, %v1919_v36  ;;  %vm2038_vm2 = vcmp.gt.f32.partialorder %v2034_v60, 0.0 }
 0x18d   : > { %v2047_v63 = vmul.f32 1.442695, %v2042_v43  ;;  %v2003_v2 = vmax.f32 %v1860_v39, %v1993_v4  ;;  %v1957_v48 = vadd.f32 %v1956_v52, %v1938_v21  ;;  %v3241_v3 = vpop.eup %3240 }
 0x18e   : > { %v2996_v8 = vadd.f32 -1.0, %v3241_v3 }
 0x18f   : > { %3242 = vpow2.f32 %v2047_v63  ;;  %v2007_v38 = vmax.f32 %v1999_v59, %v2003_v2 }
 0x190   : > { %v1975_v22 = vpop.f32.mrf.mxu2  ;;  %v2057_v59 = vsel %vm2037_vm1, %v2033_v29, %v2996_v8 }
 0x191   : > { %v2035_v33 = vadd.f32 %v2026_v37, %v2007_v38  ;;  %v1976_v5 = vadd.f32 %v1975_v22, %v1957_v48  ;;  %v1994_v55 = vpop.f32.mrf.mxu3 }
 0x193   : > { %v2043_v6 = vmin.f32 %v2035_v33, 0.0  ;;  %v1995_v50 = vadd.f32 %v1994_v55, %v1976_v5  ;;  %vm2039_vm3 = vcmp.gt.f32.partialorder %v2035_v33, 0.0 }
 0x195   : > { %v3243_v53 = vpop.eup %3242  ;;  %v2004_v9 = vmax.f32 %v1862_v24, %v1995_v50  ;;  %v2049_v46 = vmul.f32 1.442695, %v2043_v6 }
 0x196   : > { %v2997_v14 = vadd.f32 -1.0, %v3243_v53 }
 0x197   : > { %v2008_v54 = vmax.f32 %v2000_v1, %v2004_v9  ;;  %3244 = vpow2.f32 %v2049_v46 }
 0x198   : > { %v2058_v25 = vsel %vm2038_vm2, %v2034_v60, %v2997_v14 }
 0x199   : > { %v3220_v15 = vpack.c.bf16 %v2058_v25, %v2057_v59  ;;  %v2036_v16 = vadd.f32 %v2031_v51, %v2008_v54 }
 0x19b   : > { %3221 = vst [vmem:[%s170_s9] sm:$0xff] %v3220_v15   ;;  %v2044_v17 = vmin.f32 %v2036_v16, 0.0  ;;  %vm2040_vm4 = vcmp.gt.f32.partialorder %v2036_v16, 0.0 }
 0x19d   : > { %v2051_v18 = vmul.f32 1.442695, %v2044_v17  ;;  %v3245_v19 = vpop.eup %3244 }
 0x19e   : > { %v2998_v7 = vadd.f32 -1.0, %v3245_v19 }
 0x19f   : > { %3246 = vpow2.f32 %v2051_v18 }
 0x1a0   : > { %v2059_v61 = vsel %vm2039_vm3, %v2035_v33, %v2998_v7 }
 0x1a5   : > { %v3247_v58 = vpop.eup %3246 }
 0x1a6   : > { %v2999_v20 = vadd.f32 -1.0, %v3247_v58 }
 0x1a8   : > { %v2060_v0 = vsel %vm2040_vm4, %v2036_v16, %v2999_v20 }
 0x1a9   : > { %v3225_v1 = vpack.c.bf16 %v2060_v0, %v2059_v61 }
 0x1ab   : > { %3227 = vst [vmem:[%s170_s9 + $0x8] sm:$0xff] %v3225_v1  }
 0x1ac PF: > { %s13_s12 = sadd.s32 1, %s3254_s12  }
 0x1ad   : > { %p10_p4 = scmp.ge.s32.totalorder %s13_s12, 4  }
 0x1af   :  { %12 = sbr.rel (!%p10_p4) target bundleno = 1 (0x1), region = 62 }

// kernel: banana_pixels_forward.7
= control target key start
LH: loop header
LB: loop body
LE: loop exit
PB: predicated region body
PF: predicated region fallthrough
CT: control target
= control target key end

     0   :  { %s1491_s0 = inlined_call_operand.vmem [shape: bf16[8,800], index: 0, kind: input, shape index: {}]   ;;  %s1492_s1 = inlined_call_operand.vmem [shape: bf16[800,32], index: 1, kind: input, shape index: {}]   ;;  %s1493_s2 = inlined_call_operand.vmem [shape: f32[1,32], index: 2, kind: input, shape index: {}]   ;;  %s1494_s3 = inlined_call_operand.vmem [shape: bf16[32,32], index: 3, kind: input, shape index: {}]   ;;  %s1495_s4 = inlined_call_operand.vmem [shape: f32[1,32], index: 4, kind: input, shape index: {}]   ;;  %s1496_s5 = inlined_call_operand.vmem [shape: bf16[32,32], index: 5, kind: input, shape index: {}]   ;;  %s1497_s6 = inlined_call_operand.vmem [shape: f32[1,32], index: 6, kind: input, shape index: {}]   ;;  %s1498_s7 = inlined_call_operand.vmem [shape: bf16[32,1], index: 7, kind: input, shape index: {}]   ;;  %s1499_s8 = inlined_call_operand.<no memory space> [shape: f32[1,1], index: 8, kind: input, shape index: {}]   ;;  %s1500_s9 = inlined_call_operand.vmem [shape: bf16[32,32], index: 9, kind: input, shape index: {}]   ;;  %s1501_s10 = inlined_call_operand.vmem [shape: f32[1,32], index: 10, kind: input, shape index: {}]   ;;  %s1502_s11 = inlined_call_operand.vmem [shape: bf16[32,4], index: 11, kind: input, shape index: {}]   ;;  %s1503_s12 = inlined_call_operand.vmem [shape: f32[1,4], index: 12, kind: input, shape index: {}]   ;;  %s1504_s13 = inlined_call_operand.hbm [shape: f32[2,4], index: 13, kind: output, shape index: {}]  }
   0x1   :  { %v18_v0 = vstv %s1499_s8 }
   0x2   :  { %19 = vst [vmem:[#allocation2] sm:$0x1] %v18_v0 }
   0x3   :  { %v1096_v1 = vld [vmem:[%s1492_s1 + $0x38] sm:$0xff]  ;;  %v1095_v4 = vld [vmem:[%s1492_s1 + $0x30] sm:$0xff]  ;;  %v1094_v9 = vld [vmem:[%s1492_s1 + $0x28] sm:$0xff] }
   0x4   :  { %v1104_v2 = vld [vmem:[%s1492_s1 + $0x78] sm:$0xff]  ;;  %480 = vmatpush.bf16.msra.mxu0 %v1096_v1  ;;  %v1103_v5 = vld [vmem:[%s1492_s1 + $0x70] sm:$0xff]  ;;  %v1102_v10 = vld [vmem:[%s1492_s1 + $0x68] sm:$0xff] }
   0x5   :  { %v1112_v3 = vld [vmem:[%s1492_s1 + $0xb8] sm:$0xff]  ;;  %493 = vmatpush.bf16.msra.mxu1 %v1104_v2  ;;  %v1111_v6 = vld [vmem:[%s1492_s1 + $0xb0] sm:$0xff]  ;;  %v1110_v11 = vld [vmem:[%s1492_s1 + $0xa8] sm:$0xff] }
   0x6   :  { %506 = vmatpush.bf16.msra.mxu2 %v1112_v3  ;;  %v1120_v7 = vld [vmem:[%s1492_s1 + $0xf8] sm:$0xff]  ;;  %v1119_v8 = vld [vmem:[%s1492_s1 + $0xf0] sm:$0xff]  ;;  %v1118_v12 = vld [vmem:[%s1492_s1 + $0xe8] sm:$0xff] }
   0x7   :  { %519 = vmatpush.bf16.msra.mxu3 %v1120_v7  ;;  %v1093_v13 = vld [vmem:[%s1492_s1 + $0x20] sm:$0xff]  ;;  %v1092_v17 = vld [vmem:[%s1492_s1 + $0x18] sm:$0xff]  ;;  %v1091_v20 = vld [vmem:[%s1492_s1 + $0x10] sm:$0xff] }
   0x8   :  { %481 = vmatpush.bf16.msra.mxu0 %v1095_v4  ;;  %v1101_v14 = vld [vmem:[%s1492_s1 + $0x60] sm:$0xff]  ;;  %v1100_v18 = vld [vmem:[%s1492_s1 + $0x58] sm:$0xff]  ;;  %v1099_v22 = vld [vmem:[%s1492_s1 + $0x50] sm:$0xff] }
   0x9   :  { %494 = vmatpush.bf16.msra.mxu1 %v1103_v5  ;;  %v1109_v15 = vld [vmem:[%s1492_s1 + $0xa0] sm:$0xff]  ;;  %v1108_v19 = vld [vmem:[%s1492_s1 + $0x98] sm:$0xff] }
   0xa   :  { %507 = vmatpush.bf16.msra.mxu2 %v1111_v6  ;;  %v1117_v16 = vld [vmem:[%s1492_s1 + $0xe0] sm:$0xff]  ;;  %v1116_v21 = vld [vmem:[%s1492_s1 + $0xd8] sm:$0xff] }
   0xb   :  { %520 = vmatpush.bf16.msra.mxu3 %v1119_v8 }
   0xc   :  { %482 = vmatpush.bf16.msra.mxu0 %v1094_v9 }
   0xd   :  { %495 = vmatpush.bf16.msra.mxu1 %v1102_v10 }
   0xe   :  { %508 = vmatpush.bf16.msra.mxu2 %v1110_v11 }
   0xf   :  { %521 = vmatpush.bf16.msra.mxu3 %v1118_v12 }
  0x10   :  { %483 = vmatpush.bf16.msra.mxu0 %v1093_v13 }
  0x11   :  { %496 = vmatpush.bf16.msra.mxu1 %v1101_v14 }
  0x12   :  { %509 = vmatpush.bf16.msra.mxu2 %v1109_v15 }
  0x13   :  { %522 = vmatpush.bf16.msra.mxu3 %v1117_v16 }
  0x14   :  { %484 = vmatpush.bf16.msra.mxu0 %v1092_v17 }
  0x15   :  { %497 = vmatpush.bf16.msra.mxu1 %v1100_v18 }
  0x16   :  { %20 = vsyncpa [#allocation4], 0  ;;  %510 = vmatpush.bf16.msra.mxu2 %v1108_v19  ;;  %v1107_v23 = vld [vmem:[%s1492_s1 + $0x90] sm:$0xff]  ;;  %v1090_v25 = vld [vmem:[%s1492_s1 + $0x8] sm:$0xff]  ;;  %vm476_vm0 = vcmask 261120   ;;  %vm789_vm5 = vcmask 25600  }
  0x17   :  { %523 = vmatpush.bf16.msra.mxu3 %v1116_v21  ;;  %v1115_v24 = vld [vmem:[%s1492_s1 + $0xd0] sm:$0xff]  ;;  %v1098_v26 = vld [vmem:[%s1492_s1 + $0x48] sm:$0xff]  ;;  %v48_v27 = vld [vmem:[%s1491_s0] sm:$0xff]  ;;  %s830_s29 = sshll.u32 %s1504_s13, 4  ;;  %s831_s29 = int_to_ptr.hbm [resolvable:$true] %s830_s29 }
  0x18   :  { %485 = vmatpush.bf16.msra.mxu0 %v1091_v20  ;;  %v1106_v28 = vld [vmem:[%s1492_s1 + $0x88] sm:$0xff]  ;;  %v156_v31 = vunpack.c.l.b16 %v48_v27  ;;  %v157_v32 = vunpack.c.h.b16 %v48_v27  ;;  %v1089_v33 = vld [vmem:[%s1492_s1] sm:$0xff]  ;;  %v1128_v35 = vld [vmem:[%s1492_s1 + $0x138] sm:$0xff] }
  0x19   :  { %498 = vmatpush.bf16.msra.mxu1 %v1099_v22  ;;  %v49_v29 = vld [vmem:[%s1491_s0 + $0x8] sm:$0xff]  ;;  %v1097_v34 = vld [vmem:[%s1492_s1 + $0x40] sm:$0xff]  ;;  %v1136_v36 = vld [vmem:[%s1492_s1 + $0x178] sm:$0xff] }
  0x1a   :  { %511 = vmatpush.bf16.msra.mxu2 %v1107_v23  ;;  %v1114_v30 = vld [vmem:[%s1492_s1 + $0xc8] sm:$0xff]  ;;  %v1105_v37 = vld [vmem:[%s1492_s1 + $0x80] sm:$0xff]  ;;  %v158_v38 = vunpack.c.l.b16 %v49_v29  ;;  %v163_v39 = vpack.c.b16 %v156_v31, %v156_v31  ;;  %v164_v40 = vpack.c.b16 %v157_v32, %v157_v32  ;;  %v159_v41 = vunpack.c.h.b16 %v49_v29  ;;  %v1127_v44 = vld [vmem:[%s1492_s1 + $0x130] sm:$0xff] }
  0x1b   :  { %524 = vmatpush.bf16.msra.mxu3 %v1115_v24  ;;  %v1113_v42 = vld [vmem:[%s1492_s1 + $0xc0] sm:$0xff]  ;;  %v1138_v43 = vld [vmem:[%s1492_s1 + $0x188] sm:$0xff]  ;;  %v1135_v45 = vld [vmem:[%s1492_s1 + $0x170] sm:$0xff] }
  0x1c   :  { %486 = vmatpush.bf16.msra.mxu0 %v1090_v25  ;;  %v165_v46 = vpack.c.b16 %v158_v38, %v158_v38  ;;  %v166_v47 = vpack.c.b16 %v159_v41, %v159_v41  ;;  %v1137_v48 = vld [vmem:[%s1492_s1 + $0x180] sm:$0xff]  ;;  %v1126_v49 = vld [vmem:[%s1492_s1 + $0x128] sm:$0xff]  ;;  %v51_v53 = vld [vmem:[%s1491_s0 + $0x18] sm:$0xf] }
  0x1d   :  { %499 = vmatpush.bf16.msra.mxu1 %v1098_v26  ;;  %v1134_v50 = vld [vmem:[%s1492_s1 + $0x168] sm:$0xff]  ;;  %v1125_v51 = vld [vmem:[%s1492_s1 + $0x120] sm:$0xff]  ;;  %v1124_v54 = vld [vmem:[%s1492_s1 + $0x118] sm:$0xff]  ;;  %v162_v56 = vunpack.c.l.b16 %v51_v53 }
  0x1e   :  { %512 = vmatpush.bf16.msra.mxu2 %v1106_v28  ;;  %v1133_v52 = vld [vmem:[%s1492_s1 + $0x160] sm:$0xff]  ;;  %v1132_v55 = vld [vmem:[%s1492_s1 + $0x158] sm:$0xff]  ;;  %v1123_v57 = vld [vmem:[%s1492_s1 + $0x110] sm:$0xff] }
  0x1f   :  { %525 = vmatpush.bf16.msra.mxu3 %v1114_v30  ;;  %v1131_v58 = vld [vmem:[%s1492_s1 + $0x150] sm:$0xff]  ;;  %v169_v59 = vpack.c.b16 %v162_v56, %v162_v56  ;;  %v1122_v60 = vld [vmem:[%s1492_s1 + $0x108] sm:$0xff]  ;;  %v1121_v1 = vld [vmem:[%s1492_s1 + $0x100] sm:$0xff] }
  0x20   :  { %487 = vmatpush.bf16.msra.mxu0 %v1089_v33  ;;  %v1130_v61 = vld [vmem:[%s1492_s1 + $0x148] sm:$0xff]  ;;  %v50_v62 = vld [vmem:[%s1491_s0 + $0x10] sm:$0xff]  ;;  %v1129_v2 = vld [vmem:[%s1492_s1 + $0x140] sm:$0xff] }
  0x21   :  { %500 = vmatpush.bf16.msra.mxu1 %v1097_v34  ;;  %v160_v63 = vunpack.c.l.b16 %v50_v62  ;;  %v161_v0 = vunpack.c.h.b16 %v50_v62  ;;  %v1140_v11 = vld [vmem:[%s1494_s3 + $0x8] sm:$0xff]  ;;  %v1139_v14 = vld [vmem:[%s1494_s3] sm:$0xff] }
  0x22   :  { %513 = vmatpush.bf16.msra.mxu2 %v1105_v37  ;;  %v1153_v30 = vld [vmem:[%s1493_s2] ss:$0 sm:$0xff]  ;;  %v1148_v53 = vld [vmem:[%s1502_s11 + $0x8] sm:$0xff] }
  0x23   :  { %488 = vmatmul.bf16.vlgmr.msra.gmra.mxu0 %v163_v39  ;;  %526 = vmatpush.bf16.msra.mxu3 %v1113_v42  ;;  %v167_v3 = vpack.c.b16 %v160_v63, %v160_v63  ;;  %v168_v4 = vpack.c.b16 %v161_v0, %v161_v0  ;;  %v1146_v39 = vld [vmem:[%s1500_s9 + $0x8] sm:$0xff]  ;;  %v1145_v41 = vld [vmem:[%s1500_s9] sm:$0xff] }
  0x24   :  { %532 = vmatpush.bf16.msrb.mxu0 %v1128_v35  ;;  %501 = vmatmul.bf16.vlgmr.msra.gmra.mxu1 %v164_v40  ;;  %v1142_v40 = vld [vmem:[%s1496_s5 + $0x8] sm:$0xff]  ;;  %v1141_v42 = vld [vmem:[%s1496_s5] sm:$0xff] }
  0x25   :  { %545 = vmatpush.bf16.msrb.mxu1 %v1136_v36  ;;  %514 = vmatmul.bf16.vlgmr.msra.gmra.mxu2 %v165_v46  ;;  %v1143_v56 = vld [vmem:[%s1498_s7] sm:$0xff] }
  0x26   :  { %564 = vmatpush.bf16.msrb.mxu2 %v1138_v43  ;;  %527 = vmatmul.bf16.vlgmr.msra.gmra.mxu3 %v166_v47  ;;  %v1154_v43 = vld [vmem:[%s1495_s4] ss:$0 sm:$0xff] }
  0x27   :  { %620 = vmatpush.bf16.msrb.mxu3 %v1140_v11 }
  0x28   :  { %533 = vmatpush.bf16.msrb.mxu0 %v1127_v44 }
  0x29   :  { %546 = vmatpush.bf16.msrb.mxu1 %v1135_v45 }
  0x2a   :  { %565 = vmatpush.bf16.msrb.mxu2 %v1137_v48 }
  0x2b   :  { %621 = vmatpush.bf16.msrb.mxu3 %v1139_v14  ;;  %v1157_v14 = vld [vmem:[%s1503_s12] ss:$0 sm:$0xff] }
  0x2c   :  { %534 = vmatpush.bf16.msrb.mxu0 %v1126_v49 }
  0x2d   :  { %547 = vmatpush.bf16.msrb.mxu1 %v1134_v50 }
  0x2e   :  { %663 = vmatpush.bf16.msra.mxu2 %v1142_v40 }
  0x30   :  { %535 = vmatpush.bf16.msrb.mxu0 %v1125_v51 }
  0x31   :  { %548 = vmatpush.bf16.msrb.mxu1 %v1133_v52 }
  0x32   :  { %664 = vmatpush.bf16.msra.mxu2 %v1141_v42 }
  0x34   :  { %536 = vmatpush.bf16.msrb.mxu0 %v1124_v54  ;;  %v1147_v54 = vld [vmem:[%s1502_s11] sm:$0xff] }
  0x35   :  { %549 = vmatpush.bf16.msrb.mxu1 %v1132_v55  ;;  %1039 = vmatmul.msk.bf16.vlgmr.msrb.gmra.mxu2 %vm476_vm0, %v169_v59  ;;  %v1144_v55 = vld [vmem:[%s1498_s7 + $0x8] sm:$0xff] }
  0x36   :  { %706 = vmatpush.bf16.msra.mxu3 %v1144_v55 }
  0x38   :  { %537 = vmatpush.bf16.msrb.mxu0 %v1123_v57  ;;  %v1155_v57 = vld [vmem:[%s1501_s10] ss:$0 sm:$0xff]  ;;  %s1199_s10 = smov [#allocation3]  }
  0x39   :  { %550 = vmatpush.bf16.msrb.mxu1 %v1131_v58  ;;  %s828_s12 = sshll.u32 %s1199_s10, 4  ;;  %s829_s12 = int_to_ptr.vmem [resolvable:$true] %s828_s12 }
  0x3a   :  { %707 = vmatpush.bf16.msra.mxu3 %v1143_v56 }
  0x3c   :  { %538 = vmatpush.bf16.msrb.mxu0 %v1122_v60 }
  0x3d   :  { %551 = vmatpush.bf16.msrb.mxu1 %v1130_v61  ;;  %v1156_v61 = vld [vmem:[%s1497_s6] ss:$0 sm:$0xff] }
  0x40   :  { %539 = vmatpush.bf16.msrb.mxu0 %v1121_v1 }
  0x41   :  { %552 = vmatpush.bf16.msrb.mxu1 %v1129_v2 }
  0x43   :  { %540 = vmatmul.bf16.vlgmr.msrb.gmra.mxu0 %v167_v3 }
  0x44   :  { %553 = vmatmul.bf16.vlgmr.msrb.gmra.mxu1 %v168_v4  ;;  %739 = vmatpush.bf16.msra.mxu0 %v1146_v39 }
  0x45   :  { %782 = vmatpush.bf16.msra.mxu1 %v1148_v53 }
  0x48   :  { %740 = vmatpush.bf16.msra.mxu0 %v1145_v41 }
  0x49   :  { %783 = vmatpush.bf16.msra.mxu1 %v1147_v54 }
  0xa0   :  { %v489_v5 = vpop.f32.mrf.mxu0 }
  0xa1   :  { %v502_v6 = vpop.f32.mrf.mxu1 }
  0xa2   :  { %v503_v15 = vadd.f32 %v502_v6, %v489_v5 }
  0xa8   :  { %v491_v7 = vpop.f32.mrf.mxu0  ;;  %v515_v9 = vpop.f32.mrf.mxu2 }
  0xa9   :  { %v504_v8 = vpop.f32.mrf.mxu1  ;;  %v528_v10 = vpop.f32.mrf.mxu3  ;;  %v516_v16 = vadd.f32 %v515_v9, %v503_v15 }
  0xab   :  { %v529_v18 = vadd.f32 %v528_v10, %v516_v16 }
  0xb0   :  { %v517_v12 = vpop.f32.mrf.mxu2 }
  0xb1   :  { %v530_v13 = vpop.f32.mrf.mxu3 }
  0xb2   :  { %v1197_v13 = vmov 0  }
  0xb3   :  { %1152 = vset.pattern.permute.xlu0 %v1197_v13 }
  0xb8   :  { %v567_v17 = vpop.f32.mrf.mxu2 }
  0xc0   :  { %v541_v19 = vpop.f32.mrf.mxu0  ;;  %v569_v23 = vpop.f32.mrf.mxu2 }
  0xc1   :  { %v554_v20 = vpop.f32.mrf.mxu1  ;;  %v542_v21 = vadd.f32 %v541_v19, %v529_v18  ;;  %v1198_v23 = vmov 4.0  }
  0xc3   :  { %v555_v22 = vadd.f32 %v554_v20, %v542_v21  ;;  %v1158_v20 = vld [vmem:[#allocation2] ss:$0 sm:$0xff] }
  0xc5   :  { %v568_v24 = vadd.f32 %v567_v17, %v555_v22 }
  0xc7   :  { %v572_v25 = vrot.slane %v568_v24, 2 }
  0xc8   :  { %v543_v26 = vpop.f32.mrf.mxu0 }
  0xc9   :  { %v556_v27 = vpop.f32.mrf.mxu1  ;;  %v574_v28 = vmax.f32 %v568_v24, %v572_v25 }
  0xcb   :  { %v576_v29 = vrot.slane %v574_v28, 4 }
  0xcd   :  { %v578_v31 = vmax.f32 %v574_v28, %v576_v29 }
  0xcf   :  { %v583_v32 = vadd.f32 %v1153_v30, %v578_v31 }
  0xd1   :  { %v585_v33 = vmin.f32 %v583_v32, 0.0  ;;  %vm584_vm1 = vcmp.gt.f32.partialorder %v583_v32, 0.0 }
  0xd3   :  { %v586_v34 = vmul.f32 1.442695, %v585_v33 }
  0xd5   :  { %1159 = vpow2.f32 %v586_v34 }
  0xdb   :  { %v1160_v35 = vpop.eup %1159 }
  0xdc   :  { %v1040_v36 = vadd.f32 -1.0, %v1160_v35 }
  0xde   :  { %v589_v37 = vsel %vm584_vm1, %v583_v32, %v1040_v36 }
  0xdf   :  { %v590_v38 = vpack.c.bf16 %v589_v37, %v589_v37 }
  0xe1   :  { %1049 = vmatmul.msk.bf16.vlgmr.msrb.gmra.mxu3 %vm476_vm0, %v590_v38 }
 0x164   :  { %v623_v44 = vpop.f32.mrf.mxu3 }
 0x165   :  { %v624_v45 = vadd.f32 %v1154_v43, %v623_v44 }
 0x167   :  { %v628_v46 = vmin.f32 %v624_v45, 0.0  ;;  %vm627_vm2 = vcmp.gt.f32.partialorder %v624_v45, 0.0 }
 0x169   :  { %v629_v47 = vmul.f32 1.442695, %v628_v46 }
 0x16b   :  { %1161 = vpow2.f32 %v629_v47 }
 0x16c   :  { %v625_v48 = vpop.f32.mrf.mxu3 }
 0x171   :  { %v1162_v49 = vpop.eup %1161 }
 0x172   :  { %v1050_v50 = vadd.f32 -1.0, %v1162_v49 }
 0x174   :  { %v632_v51 = vsel %vm627_vm2, %v624_v45, %v1050_v50 }
 0x175   :  { %v633_v52 = vpack.c.bf16 %v632_v51, %v632_v51 }
 0x177   :  { %1059 = vmatmul.msk.bf16.vlgmr.msra.gmra.mxu2 %vm476_vm0, %v633_v52  ;;  %1078 = vmatmul.msk.bf16.vlgmr.msra.gmra.mxu0 %vm476_vm0, %v633_v52 }
 0x1f4   :  { %v742_v58 = vpop.f32.mrf.mxu0 }
 0x1f5   :  { %v743_v59 = vadd.f32 %v1155_v57, %v742_v58 }
 0x1f7   :  { %v747_v60 = vmin.f32 %v743_v59, 0.0  ;;  %vm746_vm3 = vcmp.gt.f32.partialorder %v743_v59, 0.0 }
 0x1f9   :  { %v748_v62 = vmul.f32 1.442695, %v747_v60 }
 0x1fa   :  { %v666_v63 = vpop.f32.mrf.mxu2 }
 0x1fb   :  { %1163 = vpow2.f32 %v748_v62  ;;  %v667_v0 = vadd.f32 %v1156_v61, %v666_v63 }
 0x1fc   :  { %v744_v1 = vpop.f32.mrf.mxu0 }
 0x1fd   :  { %v671_v2 = vmin.f32 %v667_v0, 0.0  ;;  %vm670_vm4 = vcmp.gt.f32.partialorder %v667_v0, 0.0 }
 0x1ff   :  { %v672_v3 = vmul.f32 1.442695, %v671_v2 }
 0x201   :  { %v1164_v4 = vpop.eup %1163  ;;  %1165 = vpow2.f32 %v672_v3 }
 0x202   :  { %v1079_v5 = vadd.f32 -1.0, %v1164_v4  ;;  %v668_v6 = vpop.f32.mrf.mxu2  ;;  %1167 = vrcp.f32 %v1198_v23 }
 0x204   :  { %v751_v7 = vsel %vm746_vm3, %v743_v59, %v1079_v5 }
 0x205   :  { %v752_v8 = vpack.c.bf16 %v751_v7, %v751_v7 }
 0x207   :  { %v1166_v9 = vpop.eup %1165  ;;  %1088 = vmatmul.msk.bf16.vlgmr.msra.gmra.mxu1 %vm476_vm0, %v752_v8 }
 0x208   :  { %v1060_v10 = vadd.f32 -1.0, %v1166_v9  ;;  %v1168_v24 = vpop.eup %1167 }
 0x209   :  { %v794_v25 = vmul.f32 4.0, %v1168_v24  ;;  %vm798_vm6 = vweird.f32 %v1168_v24 }
 0x20a   :  { %v675_v11 = vsel %vm670_vm4, %v667_v0, %v1060_v10 }
 0x20b   :  { %v676_v12 = vpack.c.bf16 %v675_v11, %v675_v11  ;;  %v795_v26 = vsub.f32 1.0, %v794_v25 }
 0x20d   :  { %1069 = vmatmul.msk.bf16.vlgmr.msra.gmra.mxu3 %vm476_vm0, %v676_v12  ;;  %v796_v27 = vmul.f32 %v1168_v24, %v795_v26 }
 0x20f   :  { %v797_v28 = vadd.f32 %v1168_v24, %v796_v27 }
 0x211   :  { %v799_v29 = vsel %vm798_vm6, %v1168_v24, %v797_v28 }
 0x284   :  { %v785_v15 = vpop.f32.mrf.mxu1 }
 0x285   :  { %v786_v16 = vadd.f32 %v1157_v14, %v785_v15 }
 0x287   :  { %v790_v17 = vsel %vm789_vm5, %v786_v16, 0.0 }
 0x288   :  { %791 = vadd.xlane.f32.xlu0 %v790_v17 }
 0x28c   :  { %v787_v18 = vpop.f32.mrf.mxu1 }
 0x290   :  { %v709_v19 = vpop.f32.mrf.mxu3 }
 0x291   :  { %v710_v22 = vadd.f32 %v1158_v20, %v709_v19 }
 0x298   :  { %v711_v21 = vpop.f32.mrf.mxu3 }
 0x29c   :  { %818 = vperm.xlu0 %1152, %v710_v22  }
 0x2fb   :  { %v792_v30 = vpop.xlane.xlu0 %791 }
 0x2fc   :  { %v800_v31 = vmul.f32 %v799_v29, %v792_v30 }
 0x2fe   :  { %1169 = vrcp.f32 %v800_v31  ;;  %v812_v35 = vand.u32 2147483648, %v800_v31  ;;  %v810_v37 = vand.u32 2147483647, %v800_v31  ;;  %vm806_vm8 = vweird.f32 %v800_v31 }
 0x300   :  { %v813_v39 = vor.u32 1.1754944e-38, %v812_v35  ;;  %vm811_vm10 = vcmp.eq.f32.partialorder %v810_v37, 8.507059e+37 }
 0x304   :  { %v1170_v32 = vpop.eup %1169 }
 0x305   :  { %v802_v33 = vmul.f32 %v1170_v32, %v800_v31  ;;  %vm807_vm7 = vweird.f32 %v1170_v32 }
 0x306   :  { %vm808_vm9 = vmor %vm806_vm8, %vm807_vm7 }
 0x307   :  { %v803_v34 = vsub.f32 1.0, %v802_v33 }
 0x309   :  { %v804_v36 = vmul.f32 %v1170_v32, %v803_v34 }
 0x30b   :  { %v805_v38 = vadd.f32 %v1170_v32, %v804_v36 }
 0x30d   :  { %v809_v40 = vsel %vm808_vm9, %v1170_v32, %v805_v38 }
 0x30e   :  { %v814_v41 = vsel %vm811_vm10, %v813_v39, %v809_v40  ;;  %v819_v43 = vpop.permute.xlu0 %818 }
 0x30f   :  { %v815_v42 = vmul.f32 %v814_v41, %v786_v16 }
 0x311   :  { %v821_v44 = vadd.f32 %v819_v43, %v815_v42 }
 0x313   :  { %822 = vst.msk [vmem:[#allocation3] sm:$0x3] %vm789_vm5, %v821_v44 }
 0x314   :  { %833 = dma.vmem_to_hbm [thread:$0]  %s829_s12, 32, %s831_s29, [#allocation4]  }
 0x315   :  { %1195 = dma.done.wait [#allocation4], 32  }
 0x316   :  { %1196 = vsyncadd [#allocation4], 4294967264 }
 0x317   :  { %838 = vsyncpa [#allocation4], 1 }

</bundles_post_ra>
